<compile_context>
chip_gen: v7x
topology: tpu7x:2x2x1
jax: 0.10.0
libtpu: 0.0.40
codegen_flags: <defaults>
</compile_context>

<pallas_src>
import functools

import jax
import jax.numpy as jnp
from jax import lax
from jax.experimental import pallas as pl
from jax.experimental.pallas import tpu as pltpu

LN_EPS = 1e-5


# ----------------------------------------------------------------------------
# Pallas kernel: one (batch, window-row) block = nW windows per grid step.
# ----------------------------------------------------------------------------
def _attn_kernel(x_ref, wqkv_ref, bqkv_ref, wout_ref, bout_ref, bias_ref, o_ref,
                 *, attn_type, wsz, n_win, heads, dim_head):
    t = wsz * wsz                      # tokens per window
    s = n_win * t                      # tokens per grid step
    d = x_ref.shape[-1]
    inner = heads * dim_head

    x = x_ref[...].astype(jnp.float32)

    # ---- window rearrange (VMEM only; lane dim D never moves) ---------------
    if attn_type == 'short':
        # (s1, nW, s2, D) -> (nW, s1, s2, D) -> (nW, T, D)
        xw = jnp.swapaxes(x, 0, 1).reshape(n_win, t, d)
    else:
        # (s1, s2, nW, D) -> (T, nW, D) -> (nW, T, D)
        xw = jnp.swapaxes(x.reshape(t, n_win, d), 0, 1)
    x_tok = xw.reshape(s, d)                            # token order = (win, tok)

    # ---- channel LayerNorm (unbiased var); gamma/beta folded into W/bias ----
    mean = jnp.mean(x_tok, axis=-1, keepdims=True)
    var = jnp.mean(jnp.square(x_tok - mean), axis=-1, keepdims=True)
    x_hat = (x_tok - mean) * lax.rsqrt(var + LN_EPS)

    # ---- fused QKV projection: ONE (S, D) @ (D, 3*inner) MXU matmul ---------
    qkv = jnp.dot(x_hat.astype(jnp.bfloat16), wqkv_ref[...],
                  preferred_element_type=jnp.float32)
    qkv = qkv + bqkv_ref[...].astype(jnp.float32)       # (S, 3*inner), f32

    # ---- head split: (S, 3*heads, dh) -> (3*heads, S, dh), then slices ------
    qkv_h = jnp.swapaxes(qkv.reshape(s, 3 * heads, dim_head), 0, 1)

    def _take(i):                                       # -> (heads*nW, T, dh) bf16
        blk = qkv_h[i * heads:(i + 1) * heads]          # (heads, S, dh)
        return blk.astype(jnp.bfloat16).reshape(heads * n_win, t, dim_head)

    q, k, v = _take(0), _take(1), _take(2)

    # ---- attention, batched over (head, window) ------------------------------
    bias = bias_ref[...].astype(jnp.float32)            # (T, T) rel-pos bias
    sim = jnp.einsum('bid,bjd->bij', q, k,
                     preferred_element_type=jnp.float32)
    sim = sim + bias                                     # broadcast over batch

    m = jnp.max(sim, axis=-1, keepdims=True)
    p = jnp.exp(sim - m)                                 # unnormalized probs, f32
    l = jnp.sum(p, axis=-1, keepdims=True)
    # TODO(synk): nn.Dropout on attn omitted (dropout=0.0 -> identity).

    ov = jnp.einsum('bij,bjd->bid', p.astype(jnp.bfloat16), v,
                    preferred_element_type=jnp.float32)  # (heads*nW, T, dh)
    ov = ov * pl.reciprocal(l, approx=True)              # fold softmax denom

    # ---- merge heads back into lanes: (heads, S, dh) -> (S, inner) ----------
    ov = jnp.swapaxes(ov.reshape(heads, s, dim_head), 0, 1).reshape(s, inner)

    # ---- fused output projection: ONE (S, inner) @ (inner, D) matmul --------
    out = jnp.dot(ov.astype(jnp.bfloat16), wout_ref[...],
                  preferred_element_type=jnp.float32)
    out = out + bout_ref[...].astype(jnp.float32)        # (S, D)

    # ---- windows -> block layout and store -----------------------------------
    ow = out.reshape(n_win, t, d)
    if attn_type == 'short':
        o_blk = jnp.swapaxes(ow.reshape(n_win, wsz, wsz, d), 0, 1)
    else:
        o_blk = jnp.swapaxes(ow, 0, 1).reshape(wsz, wsz, n_win, d)
    o_ref[...] = o_blk.astype(o_ref.dtype)


# ----------------------------------------------------------------------------
# DynamicPositionBias MLP (plain JAX glue: tiny, input-independent precompute)
# ----------------------------------------------------------------------------
def _std_layernorm(x, w, b, eps=1e-5):
    mean = jnp.mean(x, axis=-1, keepdims=True)
    var = jnp.mean(jnp.square(x - mean), axis=-1, keepdims=True)
    return (x - mean) / jnp.sqrt(var + eps) * w + b


def _dpb_forward(rel, p):
    h = rel @ p['w1'].T + p['b1']
    h = jax.nn.relu(_std_layernorm(h, p['ln1w'], p['ln1b']))
    h = h @ p['w2'].T + p['b2']
    h = jax.nn.relu(_std_layernorm(h, p['ln2w'], p['ln2b']))
    h = h @ p['w3'].T + p['b3']
    h = jax.nn.relu(_std_layernorm(h, p['ln3w'], p['ln3b']))
    h = h @ p['w4'].T + p['b4']
    return h[..., 0]


def _rel_pos_bias_table(params, wsz):
    # biases over relative offsets in [-wsz, wsz]
    pos2 = jnp.arange(-wsz, wsz + 1)
    ri, rj = jnp.meshgrid(pos2, pos2, indexing='ij')
    rel_pos = jnp.stack([ri, rj], axis=-1).reshape(-1, 2).astype(jnp.float32)
    biases = _dpb_forward(rel_pos, params['dpb'])            # ((2*wsz+1)^2,)

    # rel_pos_indices buffer (same construction as the PyTorch __init__)
    pos = jnp.arange(wsz)
    gi, gj = jnp.meshgrid(pos, pos, indexing='ij')
    grid = jnp.stack([gi, gj], axis=-1).reshape(-1, 2)       # (T, 2)
    rel = grid[:, None] - grid[None, :] + (wsz - 1)
    idx = rel[..., 0] * (2 * wsz - 1) + rel[..., 1]          # (T, T)
    return biases[idx]                                        # (T, T)


# ----------------------------------------------------------------------------
# Wrapper: full Attention.forward
# ----------------------------------------------------------------------------
def crossformer_attention(x, params, *, attn_type, window_size, dim_head):
    assert attn_type in ('short', 'long')
    B, D, H, W = x.shape
    wsz = window_size
    heads = D // dim_head
    inner = heads * dim_head
    scale = dim_head ** -0.5
    T = wsz * wsz
    nH, nW = H // wsz, W // wsz

    bias_table = _rel_pos_bias_table(params, wsz).astype(jnp.float32)  # (T, T)

    # Fold LayerNorm gamma/beta and the q-scale into the fused QKV weight/bias.
    w_qkv = params['wqkv'].T.astype(jnp.float32)                  # (D, 3*inner)
    col_scale = jnp.concatenate([jnp.full((inner,), scale, jnp.float32),
                                 jnp.ones((2 * inner,), jnp.float32)])
    w_qkv_f = (params['ln_g'][:, None] * w_qkv * col_scale[None, :])
    b_qkv_f = ((params['ln_b'] @ w_qkv) * col_scale).reshape(1, 3 * inner)

    w_qkv_f = w_qkv_f.astype(jnp.bfloat16)                        # MXU operands
    w_out = params['wout'].T.astype(jnp.bfloat16)                 # (inner, D)
    b_out = params['bout'].reshape(1, D).astype(jnp.float32)

    # Single layout transpose NCHW -> NHWC; windowing itself happens via the
    # BlockSpec index_map on a FREE 6-D reshape of the NHWC view.
    x_nhwc = jnp.transpose(x, (0, 2, 3, 1))
    if attn_type == 'short':
        x6 = x_nhwc.reshape(B, nH, wsz, nW, wsz, D)
        blk = (None, None, wsz, nW, wsz, D)
        imap = lambda b, i: (b, i, 0, 0, 0, 0)
    else:
        x6 = x_nhwc.reshape(B, wsz, nH, wsz, nW, D)
        blk = (None, wsz, None, wsz, nW, D)
        imap = lambda b, i: (b, 0, i, 0, 0, 0)

    kernel = functools.partial(_attn_kernel, attn_type=attn_type, wsz=wsz,
                               n_win=nW, heads=heads, dim_head=dim_head)

    # Rough per-step VMEM need (double-buffered in/out blocks + f32 temps) so
    # the scoped-VMEM limit is explicit and safe on v5e/v6e/v7x.
    blk_bytes = nW * T * D * 4
    tmp_bytes = 3 * heads * nW * T * T * 4 + 8 * nW * T * max(3 * inner, D) * 4
    vmem_limit = int(min(64 * 2 ** 20,
                         max(32 * 2 ** 20, 4 * (4 * blk_bytes + tmp_bytes))))

    out6 = pl.pallas_call(
        kernel,
        out_shape=jax.ShapeDtypeStruct(x6.shape, x.dtype),
        grid=(B, nH),
        in_specs=[
            pl.BlockSpec(blk, imap),                               # x window-row
            pl.BlockSpec((D, 3 * inner), lambda b, i: (0, 0)),     # fused Wqkv
            pl.BlockSpec((1, 3 * inner), lambda b, i: (0, 0)),     # fused qkv bias
            pl.BlockSpec((inner, D), lambda b, i: (0, 0)),         # Wout
            pl.BlockSpec((1, D), lambda b, i: (0, 0)),             # out bias
            pl.BlockSpec((T, T), lambda b, i: (0, 0)),             # rel-pos bias
        ],
        out_specs=pl.BlockSpec(blk, imap),
        compiler_params=pltpu.CompilerParams(
            dimension_semantics=("parallel", "parallel"),
            vmem_limit_bytes=vmem_limit),
    )(x6, w_qkv_f, b_qkv_f, w_out, b_out, bias_table)

    # Single layout transpose back NHWC -> NCHW (reshape is free).
    return jnp.transpose(out6.reshape(B, H, W, D), (0, 3, 1, 2))


# ----------------------------------------------------------------------------
# Pure-JAX reference (mirrors the PyTorch forward) for verification
# ----------------------------------------------------------------------------
def _window(x, wsz, attn_type):
    B, D, H, W = x.shape
    nH, nW = H // wsz, W // wsz
    if attn_type == 'short':
        xw = x.reshape(B, D, nH, wsz, nW, wsz).transpose(0, 2, 4, 1, 3, 5)
    else:
        xw = x.reshape(B, D, wsz, nH, wsz, nW).transpose(0, 3, 5, 1, 2, 4)
    return xw.reshape(B * nH * nW, D, wsz, wsz), (B, nH, nW)


def _unwindow(out_w, dims, wsz, attn_type):
    B, nH, nW = dims
    D = out_w.shape[1]
    o = out_w.reshape(B, nH, nW, D, wsz, wsz)
    if attn_type == 'short':
        o = o.transpose(0, 3, 1, 4, 2, 5)
    else:
        o = o.transpose(0, 3, 4, 1, 5, 2)
    return o.reshape(B, D, nH * wsz, nW * wsz)


def reference_forward(x, params, *, attn_type, window_size, dim_head):
    B, D, H, W = x.shape
    wsz = window_size
    heads = D // dim_head
    inner = heads * dim_head
    scale = dim_head ** -0.5
    T = wsz * wsz
    hp = jax.lax.Precision.HIGHEST

    mean = x.mean(axis=1, keepdims=True)
    var = ((x - mean) ** 2).mean(axis=1, keepdims=True)
    xn = ((x - mean) / jnp.sqrt(var + LN_EPS)
          * params['ln_g'][None, :, None, None] + params['ln_b'][None, :, None, None])

    xw, dims = _window(xn, wsz, attn_type)                    # (N, D, wsz, wsz)
    N = xw.shape[0]
    qkv = jnp.einsum('ncxy,oc->noxy', xw, params['wqkv'], precision=hp)
    q, k, v = jnp.split(qkv, 3, axis=1)

    def to_heads(t):
        return t.reshape(N, heads, dim_head, T).transpose(0, 1, 3, 2)  # (N,h,T,d)

    q, k, v = to_heads(q) * scale, to_heads(k), to_heads(v)
    sim = jnp.einsum('nhid,nhjd->nhij', q, k, precision=hp)
    sim = sim + _rel_pos_bias_table(params, wsz)[None, None]
    attn = jax.nn.softmax(sim, axis=-1)
    out = jnp.einsum('nhij,nhjd->nhid', attn, v, precision=hp)
    out = out.transpose(0, 1, 3, 2).reshape(N, inner, wsz, wsz)
    out = (jnp.einsum('ncxy,oc->noxy', out, params['wout'], precision=hp)
           + params['bout'][None, :, None, None])
    return _unwindow(out, dims, wsz, attn_type)


# ----------------------------------------------------------------------------
# Deterministic parameter init (shapes from the module's __init__)
# ----------------------------------------------------------------------------
def init_params(key, dim, dim_head):
    heads = dim // dim_head
    inner = heads * dim_head
    dpb_dim = dim // 4
    ks = jax.random.split(key, 16)

    def nrm(k, shape, s):
        return jax.random.normal(k, shape, jnp.float32) * s

    return {
        'ln_g': jnp.ones((dim,), jnp.float32) + nrm(ks[0], (dim,), 0.05),
        'ln_b': nrm(ks[1], (dim,), 0.05),
        'wqkv': nrm(ks[2], (3 * inner, dim), 0.1),
        'wout': nrm(ks[3], (dim, inner), 0.1),
        'bout': nrm(ks[4], (dim,), 0.05),
        'dpb': {
            'w1': nrm(ks[5], (dpb_dim, 2), 0.5), 'b1': nrm(ks[6], (dpb_dim,), 0.1),
            'ln1w': jnp.ones((dpb_dim,), jnp.float32), 'ln1b': jnp.zeros((dpb_dim,), jnp.float32),
            'w2': nrm(ks[7], (dpb_dim, dpb_dim), 0.3), 'b2': nrm(ks[8], (dpb_dim,), 0.1),
            'ln2w': jnp.ones((dpb_dim,), jnp.float32), 'ln2b': jnp.zeros((dpb_dim,), jnp.float32),
            'w3': nrm(ks[9], (dpb_dim, dpb_dim), 0.3), 'b3': nrm(ks[10], (dpb_dim,), 0.1),
            'ln3w': jnp.ones((dpb_dim,), jnp.float32), 'ln3b': jnp.zeros((dpb_dim,), jnp.float32),
            'w4': nrm(ks[11], (1, dpb_dim), 0.3), 'b4': nrm(ks[12], (1,), 0.1),
        },
    }


if __name__ == "__main__":
    key = jax.random.PRNGKey(0)
    kp, kx = jax.random.split(key)

    B, dim, H, W = 2, 32, 16, 16            # NCHW input, like the PyTorch module
    dim_head = 8
    window_size = 8

    params = init_params(kp, dim, dim_head)
    x = jax.random.normal(kx, (B, dim, H, W), jnp.float32)

    for attn_type in ('short', 'long'):
        out = crossformer_attention(x, params, attn_type=attn_type,
                                    window_size=window_size, dim_head=dim_head)
        out = jax.block_until_ready(out)
        ref = reference_forward(x, params, attn_type=attn_type,
                                window_size=window_size, dim_head=dim_head)
        assert out.shape == x.shape and out.dtype == x.dtype
        # bf16 MXU operands + approx reciprocal in the kernel vs f32 HIGHEST ref.
        assert bool(jnp.allclose(out, ref, atol=3e-2, rtol=3e-2)), attn_type

    print("KERNEL_OK")
</pallas_src>

<mosaic_0001>
module attributes {stable_mosaic.version = 11 : i64} {
  func.func @_attn_kernel(%arg0: i32, %arg1: i32, %arg2: memref<1x1x8x2x8x32xf32, #tpu.memory_space<vmem>>, %arg3: memref<32x96xbf16, #tpu.memory_space<vmem>>, %arg4: memref<1x96xf32, #tpu.memory_space<vmem>>, %arg5: memref<32x32xbf16, #tpu.memory_space<vmem>>, %arg6: memref<1x32xf32, #tpu.memory_space<vmem>>, %arg7: memref<64x64xf32, #tpu.memory_space<vmem>>, %arg8: memref<1x1x8x2x8x32xf32, #tpu.memory_space<vmem>>) attributes {dimension_semantics = [#tpu.dimension_semantics<parallel>, #tpu.dimension_semantics<parallel>], iteration_bounds = array<i64: 2, 2>, scalar_prefetch = 0 : i64, scratch_operands = 0 : i64, tpu.core_type = #tpu.core_type<tc>, window_params = [{transform_indices = @transform_0, window_bounds = array<i64: 1, 1, 8, 2, 8, 32>}, {pipeline_mode = #tpu.pipeline_mode<synchronous>, transform_indices = @transform_1, window_bounds = array<i64: 32, 96>}, {pipeline_mode = #tpu.pipeline_mode<synchronous>, transform_indices = @transform_2, window_bounds = array<i64: 1, 96>}, {pipeline_mode = #tpu.pipeline_mode<synchronous>, transform_indices = @transform_3, window_bounds = array<i64: 32, 32>}, {pipeline_mode = #tpu.pipeline_mode<synchronous>, transform_indices = @transform_4, window_bounds = array<i64: 1, 32>}, {pipeline_mode = #tpu.pipeline_mode<synchronous>, transform_indices = @transform_5, window_bounds = array<i64: 64, 64>}, {transform_indices = @transform_6, window_bounds = array<i64: 1, 1, 8, 2, 8, 32>}]} {
    %c0 = arith.constant 0 : index
    %c0_0 = arith.constant 0 : index
    %c0_1 = arith.constant 0 : index
    %c0_2 = arith.constant 0 : index
    %c0_3 = arith.constant 0 : index
    %c0_4 = arith.constant 0 : index
    %0 = vector.load %arg2[%c0, %c0_0, %c0_1, %c0_2, %c0_3, %c0_4] : memref<1x1x8x2x8x32xf32, #tpu.memory_space<vmem>>, vector<1x1x8x2x8x32xf32>
    %1 = vector.shape_cast %0 : vector<1x1x8x2x8x32xf32> to vector<8x2x8x32xf32>
    %2 = tpu.transpose %1, [1, 0, 2, 3] : vector<8x2x8x32xf32> -> vector<2x8x8x32xf32>
    %3 = vector.shape_cast %2 : vector<2x8x8x32xf32> to vector<2x64x32xf32>
    %4 = vector.shape_cast %3 : vector<2x64x32xf32> to vector<128x32xf32>
    %cst = arith.constant dense<0.000000e+00> : vector<128xf32>
    %5 = vector.multi_reduction <add>, %4, %cst [1] : vector<128x32xf32> to vector<128xf32>
    %6 = vector.shape_cast %5 : vector<128xf32> to vector<128x1xf32>
    %cst_5 = arith.constant 3.200000e+01 : f32
    %7 = vector.broadcast %cst_5 : f32 to vector<128x1xf32>
    %8 = arith.divf %6, %7 : vector<128x1xf32>
    %9 = vector.broadcast %8 : vector<128x1xf32> to vector<128x32xf32>
    %10 = arith.subf %4, %9 : vector<128x32xf32>
    %11 = arith.mulf %10, %10 : vector<128x32xf32>
    %cst_6 = arith.constant dense<0.000000e+00> : vector<128xf32>
    %12 = vector.multi_reduction <add>, %11, %cst_6 [1] : vector<128x32xf32> to vector<128xf32>
    %13 = vector.shape_cast %12 : vector<128xf32> to vector<128x1xf32>
    %cst_7 = arith.constant 3.200000e+01 : f32
    %14 = vector.broadcast %cst_7 : f32 to vector<128x1xf32>
    %15 = arith.divf %13, %14 : vector<128x1xf32>
    %16 = vector.broadcast %8 : vector<128x1xf32> to vector<128x32xf32>
    %17 = arith.subf %4, %16 : vector<128x32xf32>
    %cst_8 = arith.constant 9.99999974E-6 : f32
    %18 = vector.broadcast %cst_8 : f32 to vector<128x1xf32>
    %19 = arith.addf %15, %18 : vector<128x1xf32>
    %20 = math.rsqrt %19 : vector<128x1xf32>
    %21 = vector.broadcast %20 : vector<128x1xf32> to vector<128x32xf32>
    %22 = arith.mulf %17, %21 : vector<128x32xf32>
    %23 = arith.truncf %22 : vector<128x32xf32> to vector<128x32xbf16>
    %c0_9 = arith.constant 0 : index
    %c0_10 = arith.constant 0 : index
    %24 = vector.load %arg3[%c0_9, %c0_10] : memref<32x96xbf16, #tpu.memory_space<vmem>>, vector<32x96xbf16>
    %cst_11 = arith.constant dense<0.000000e+00> : vector<128x96xf32>
    %25 = tpu.matmul %23, %24, %cst_11 {dimension_numbers = #tpu.dot_dimension_numbers<[1], [0], [0], [1], [0, 0, 1, 1], [], []>} : vector<128x32xbf16>, vector<32x96xbf16>, vector<128x96xf32> -> vector<128x96xf32>
    %c0_12 = arith.constant 0 : index
    %c0_13 = arith.constant 0 : index
    %26 = vector.load %arg4[%c0_12, %c0_13] : memref<1x96xf32, #tpu.memory_space<vmem>>, vector<1x96xf32>
    %27 = vector.broadcast %26 : vector<1x96xf32> to vector<128x96xf32>
    %28 = arith.addf %25, %27 : vector<128x96xf32>
    %29 = vector.shape_cast %28 : vector<128x96xf32> to vector<128x12x8xf32>
    %30 = tpu.transpose %29, [1, 0, 2] : vector<128x12x8xf32> -> vector<12x128x8xf32>
    %31 = vector.extract_strided_slice %30 {offsets = [0, 0, 0], sizes = [4, 128, 8], strides = [1, 1, 1]} : vector<12x128x8xf32> to vector<4x128x8xf32>
    %32 = arith.truncf %31 : vector<4x128x8xf32> to vector<4x128x8xbf16>
    %33 = vector.shape_cast %32 : vector<4x128x8xbf16> to vector<8x64x8xbf16>
    %34 = vector.extract_strided_slice %30 {offsets = [4, 0, 0], sizes = [4, 128, 8], strides = [1, 1, 1]} : vector<12x128x8xf32> to vector<4x128x8xf32>
    %35 = arith.truncf %34 : vector<4x128x8xf32> to vector<4x128x8xbf16>
    %36 = vector.shape_cast %35 : vector<4x128x8xbf16> to vector<8x64x8xbf16>
    %37 = vector.extract_strided_slice %30 {offsets = [8, 0, 0], sizes = [4, 128, 8], strides = [1, 1, 1]} : vector<12x128x8xf32> to vector<4x128x8xf32>
    %38 = arith.truncf %37 : vector<4x128x8xf32> to vector<4x128x8xbf16>
    %39 = vector.shape_cast %38 : vector<4x128x8xbf16> to vector<8x64x8xbf16>
    %c0_14 = arith.constant 0 : index
    %c0_15 = arith.constant 0 : index
    %40 = vector.load %arg7[%c0_14, %c0_15] : memref<64x64xf32, #tpu.memory_space<vmem>>, vector<64x64xf32>
    "tpu.trace_start"() <{level = 10 : i32, message = "bid,bjd->bij"}> : () -> ()
    %cst_16 = arith.constant dense<0.000000e+00> : vector<8x64x64xf32>
    %41 = tpu.matmul %33, %36, %cst_16 {dimension_numbers = #tpu.dot_dimension_numbers<[2], [2], [1], [1], [0, 0, 0, 1, 1, 1], [0], [0]>} : vector<8x64x8xbf16>, vector<8x64x8xbf16>, vector<8x64x64xf32> -> vector<8x64x64xf32>
    "tpu.trace_stop"() : () -> ()
    %42 = vector.shape_cast %40 : vector<64x64xf32> to vector<1x64x64xf32>
    %43 = vector.broadcast %42 : vector<1x64x64xf32> to vector<8x64x64xf32>
    %44 = arith.addf %41, %43 : vector<8x64x64xf32>
    %cst_17 = arith.constant dense<0xFF800000> : vector<8x64xf32>
    %45 = vector.multi_reduction <maximumf>, %44, %cst_17 [2] : vector<8x64x64xf32> to vector<8x64xf32>
    %46 = vector.shape_cast %45 : vector<8x64xf32> to vector<8x64x1xf32>
    %47 = vector.broadcast %46 : vector<8x64x1xf32> to vector<8x64x64xf32>
    %48 = arith.subf %44, %47 : vector<8x64x64xf32>
    %49 = math.exp %48 : vector<8x64x64xf32>
    %cst_18 = arith.constant dense<0.000000e+00> : vector<8x64xf32>
    %50 = vector.multi_reduction <add>, %49, %cst_18 [2] : vector<8x64x64xf32> to vector<8x64xf32>
    %51 = vector.shape_cast %50 : vector<8x64xf32> to vector<8x64x1xf32>
    %52 = arith.truncf %49 : vector<8x64x64xf32> to vector<8x64x64xbf16>
    "tpu.trace_start"() <{level = 10 : i32, message = "bij,bjd->bid"}> : () -> ()
    %cst_19 = arith.constant dense<0.000000e+00> : vector<8x64x8xf32>
    %53 = tpu.matmul %52, %39, %cst_19 {dimension_numbers = #tpu.dot_dimension_numbers<[2], [1], [1], [2], [0, 0, 0, 1, 1, 2], [0], [0]>} : vector<8x64x64xbf16>, vector<8x64x8xbf16>, vector<8x64x8xf32> -> vector<8x64x8xf32>
    "tpu.trace_stop"() : () -> ()
    %54 = tpu.reciprocal %51 {approx = true} : vector<8x64x1xf32> -> vector<8x64x1xf32>
    %55 = vector.broadcast %54 : vector<8x64x1xf32> to vector<8x64x8xf32>
    %56 = arith.mulf %53, %55 : vector<8x64x8xf32>
    %57 = vector.shape_cast %56 : vector<8x64x8xf32> to vector<4x128x8xf32>
    %58 = tpu.transpose %57, [1, 0, 2] : vector<4x128x8xf32> -> vector<128x4x8xf32>
    %59 = vector.shape_cast %58 : vector<128x4x8xf32> to vector<128x32xf32>
    %60 = arith.truncf %59 : vector<128x32xf32> to vector<128x32xbf16>
    %c0_20 = arith.constant 0 : index
    %c0_21 = arith.constant 0 : index
    %61 = vector.load %arg5[%c0_20, %c0_21] : memref<32x32xbf16, #tpu.memory_space<vmem>>, vector<32x32xbf16>
    %cst_22 = arith.constant dense<0.000000e+00> : vector<128x32xf32>
    %62 = tpu.matmul %60, %61, %cst_22 {dimension_numbers = #tpu.dot_dimension_numbers<[1], [0], [0], [1], [0, 0, 1, 1], [], []>} : vector<128x32xbf16>, vector<32x32xbf16>, vector<128x32xf32> -> vector<128x32xf32>
    %c0_23 = arith.constant 0 : index
    %c0_24 = arith.constant 0 : index
    %63 = vector.load %arg6[%c0_23, %c0_24] : memref<1x32xf32, #tpu.memory_space<vmem>>, vector<1x32xf32>
    %64 = vector.broadcast %63 : vector<1x32xf32> to vector<128x32xf32>
    %65 = arith.addf %62, %64 : vector<128x32xf32>
    %66 = vector.shape_cast %65 : vector<128x32xf32> to vector<2x64x32xf32>
    %67 = vector.shape_cast %66 : vector<2x64x32xf32> to vector<2x8x8x32xf32>
    %68 = tpu.transpose %67, [1, 0, 2, 3] : vector<2x8x8x32xf32> -> vector<8x2x8x32xf32>
    %c0_25 = arith.constant 0 : index
    %c0_26 = arith.constant 0 : index
    %c0_27 = arith.constant 0 : index
    %c0_28 = arith.constant 0 : index
    %c0_29 = arith.constant 0 : index
    %c0_30 = arith.constant 0 : index
    %69 = vector.load %arg8[%c0_25, %c0_26, %c0_27, %c0_28, %c0_29, %c0_30] : memref<1x1x8x2x8x32xf32, #tpu.memory_space<vmem>>, vector<1x1x8x2x8x32xf32>
    %70 = vector.shape_cast %69 : vector<1x1x8x2x8x32xf32> to vector<8x2x8x32xf32>
    %71 = vector.shape_cast %68 : vector<8x2x8x32xf32> to vector<1x1x8x2x8x32xf32>
    tpu.vector_store %arg8[%c0_25, %c0_26, %c0_27, %c0_28, %c0_29, %c0_30], %71 {strides = array<i32>} : memref<1x1x8x2x8x32xf32, #tpu.memory_space<vmem>>, vector<1x1x8x2x8x32xf32>,
    return
  }
  func.func @transform_0(%arg0: i32, %arg1: i32) -> (i32, i32, i32, i32, i32, i32) {
    %c0_i32 = arith.constant 0 : i32
    %c0_i32_0 = arith.constant 0 : i32
    %c0_i32_1 = arith.constant 0 : i32
    %c0_i32_2 = arith.constant 0 : i32
    %c0_i32_3 = arith.constant 0 : i32
    return %arg0, %arg1, %c0_i32, %c0_i32_0, %c0_i32_1, %c0_i32_2 : i32, i32, i32, i32, i32, i32
  }
  func.func @transform_1(%arg0: i32, %arg1: i32) -> (i32, i32) {
    %c0_i32 = arith.constant 0 : i32
    %c0_i32_0 = arith.constant 0 : i32
    %c0_i32_1 = arith.constant 0 : i32
    return %c0_i32, %c0_i32_0 : i32, i32
  }
  func.func @transform_2(%arg0: i32, %arg1: i32) -> (i32, i32) {
    %c0_i32 = arith.constant 0 : i32
    %c0_i32_0 = arith.constant 0 : i32
    %c0_i32_1 = arith.constant 0 : i32
    return %c0_i32, %c0_i32_0 : i32, i32
  }
  func.func @transform_3(%arg0: i32, %arg1: i32) -> (i32, i32) {
    %c0_i32 = arith.constant 0 : i32
    %c0_i32_0 = arith.constant 0 : i32
    %c0_i32_1 = arith.constant 0 : i32
    return %c0_i32, %c0_i32_0 : i32, i32
  }
  func.func @transform_4(%arg0: i32, %arg1: i32) -> (i32, i32) {
    %c0_i32 = arith.constant 0 : i32
    %c0_i32_0 = arith.constant 0 : i32
    %c0_i32_1 = arith.constant 0 : i32
    return %c0_i32, %c0_i32_0 : i32, i32
  }
  func.func @transform_5(%arg0: i32, %arg1: i32) -> (i32, i32) {
    %c0_i32 = arith.constant 0 : i32
    %c0_i32_0 = arith.constant 0 : i32
    %c0_i32_1 = arith.constant 0 : i32
    return %c0_i32, %c0_i32_0 : i32, i32
  }
  func.func @transform_6(%arg0: i32, %arg1: i32) -> (i32, i32, i32, i32, i32, i32) {
    %c0_i32 = arith.constant 0 : i32
    %c0_i32_0 = arith.constant 0 : i32
    %c0_i32_1 = arith.constant 0 : i32
    %c0_i32_2 = arith.constant 0 : i32
    %c0_i32_3 = arith.constant 0 : i32
    return %arg0, %arg1, %c0_i32, %c0_i32_0, %c0_i32_1, %c0_i32_2 : i32, i32, i32, i32, i32, i32
  }
}

</mosaic_0001>

<bundles_post_ra>
// kernel: tpu_custom_call.1
= control target key start
LH: loop header
LB: loop body
LE: loop exit
PB: predicated region body
PF: predicated region fallthrough
CT: control target
= control target key end

     0   :  { %s20534_s0 = inlined_call_operand.hbm [shape: f32[2,2,8,2,8,32], index: 0, kind: input, shape index: {}]   ;;  %s20535_s1 = inlined_call_operand.hbm [shape: bf16[32,96], index: 1, kind: input, shape index: {}]   ;;  %s20536_s2 = inlined_call_operand.vmem [shape: f32[1,96], index: 2, kind: input, shape index: {}]   ;;  %s20537_s3 = inlined_call_operand.hbm [shape: bf16[32,32], index: 3, kind: input, shape index: {}]   ;;  %s20538_s4 = inlined_call_operand.vmem [shape: f32[1,32], index: 4, kind: input, shape index: {}]   ;;  %s20539_s5 = inlined_call_operand.hbm [shape: f32[64,64], index: 5, kind: input, shape index: {}]   ;;  %s20540_s6 = inlined_call_operand.hbm [shape: f32[2,2,8,2,8,32], index: 6, kind: output, shape index: {}]  }
   0x1   :  { %20870 = sst [smem:[#allocation126_spill]] %s20535_s1 }
   0x2   :  { %20871 = sst [smem:[#allocation127_spill]] %s20537_s3 }
   0x3   :  { %20872 = sst [smem:[#allocation128_spill]] %s20539_s5 }
   0x4   :  { %20873 = sst [smem:[#allocation129_spill]] %s20540_s6 }
   0x5   :  { %11 = vsyncpa [#allocation3], 0 }
   0x6   :  { %13 = vsyncpa [#allocation3 + $0x1], 0 }
   0x7   :  { %14 = vsyncpa [#allocation6], 0 }
   0x8   :  { %15 = vsyncpa [#allocation9], 0 }
   0x9   :  { %16 = vsyncpa [#allocation4], 0 }
   0xa   :  { %18 = vsyncpa [#allocation4 + $0x1], 0  ;;  %s14278_s21 = smov 0   ;;  %s14280_s22 = smov 0  }
   0xb   :  { %s14282_s23 = smov 0   ;;  %s14284_s24 = smov 0  }
   0xc   :  { %s14286_s25 = smov 0   ;;  %s14288_s26 = smov 0  }
   0xd   :  { %s14290_s27 = smov 0   ;;  %s14292_s28 = smov 0  }
   0xe LB: > { %20874 = sst [smem:[#allocation15_spill]] %s14187_s21  ;;  %s12674_s29 = sadd.s32 4294967295, %s14215_s28   ;;  %s14215_s28 = sphi %s14292_s28, %s24_s28   ;;  %s14211_s27 = sphi %s14290_s27, %s21604_s27   ;;  %s14207_s26 = sphi %s14288_s26, %s21603_s26   ;;  %s14203_s25 = sphi %s14286_s25, %s21602_s25   ;;  %s14199_s24 = sphi %s14284_s24, %s21601_s24   ;;  %s14195_s23 = sphi %s14282_s23, %s21600_s23   ;;  %s14191_s22 = sphi %s14280_s22, %s21599_s22   ;;  %s14187_s21 = sphi %s14278_s21, %s21598_s21  }
   0xf   : > { %20875 = sst [smem:[#allocation16_spill]] %s14199_s24  ;;  %s12675_s30 = sadd.s32 4294967294, %s14215_s28  }
  0x10   : > { %20876 = sst [smem:[#allocation17_spill]] %s14203_s25  ;;  %p58_p0 = scmp.ne.s32.totalorder %s14191_s22, %s14187_s21 }
  0x11   : > { %p14322_p1 = scmp.eq.s32.totalorder %s12674_s29, 0  ;;  %p14326_p2 = scmp.eq.s32.totalorder %s12674_s29, 3 }
  0x12   : > { %p195_p3 = scmp.eq.s32.totalorder %s12675_s30, 3  ;;  %p12676_p5 = scmp.ge.s32.totalorder %s14215_s28, 1 }
  0x13   : > { %s20877_s7 = scalar_select %p14322_p1, 1, 0 }
  0x14   : > { %s20878_s8 = scalar_select %p14326_p2, 1, 0 }
  0x15   : > { %p14332_p4 = por %p14322_p1, %p58_p0  ;;  %p14337_p6 = por %p195_p3, %p58_p0 }
  0x16   : > { %p202_p7 = scmp.lt.s32.totalorder %s14215_s28, 5  ;;  %s14217_s12 = smov [#allocation5]  }
  0x17   : > { %s20879_s9 = scalar_select %p14332_p4, 1, 0 }
  0x18   : > { %s20880_s10 = scalar_select %p14337_p6, 1, 0 }
  0x19   : > { %p14342_p8 = pnand %p12676_p5, %p202_p7  ;;  %s214_s13 = sshll.u32 %s14217_s12, 4  ;;  %s14346_s13 = int_to_ptr.vmem [resolvable:$true] %s214_s13 }
  0x1a   : > { %20881 = sst [smem:[#allocation18_spill]] %s20880_s10  ;;  %s14218_s15 = smov [#allocation7]  }
  0x1b   : > { %s20882_s11 = scalar_select %p14342_p8, 1, 0 }
  0x1c   : > { %p13467_p9 = pneg %p14342_p8  ;;  %s230_s16 = sshll.u32 %s14218_s15, 4  ;;  %s14356_s16 = int_to_ptr.vmem [resolvable:$true] %s230_s16 }
  0x1d   : > { %s14219_s17 = smov [#allocation8]   ;;  %s20884_s1 = sld [smem:[#allocation126_spill]] }
  0x1e   : > { %p14352_p10 = pnand %p13467_p9, %p14322_p1  ;;  %s14358_s18 = sshll.u32 %s14219_s17, 4  ;;  %s247_s18 = int_to_ptr.vmem [resolvable:$true] %s14358_s18 }
  0x20   : > { %p14368_p12 = pneg %p14352_p10 }
  0x23   : > { %s13995_s29 = scalar_lea.hbm %s20884_s1, 256 }
  0x24   : > { %p13996_p11 = scmp.ne.s32.totalorder %s20884_s1, %s13995_s29  ;;  %p14002_p3 = scmp.lt.u32.totalorder %s13995_s29, %s20884_s1 }
  0x26   : > { %p13998_p13 = pnand %p14368_p12, %p13996_p11 }
  0x28   : > { %p13999_p0 = pneg %p13998_p13 }
  0x2a   : > { %p14004_p5 = pnand %p14002_p3, %p13999_p0 }
  0x2c   : > { %14007 = shalt.err (!%p14004_p5)
}
  0x2d   : > { %s14008_s19 = scalar_lea.vmem %s14346_s13, 256  ;;  %p14016_p1 = scmp.lt.s32.totalorder %s14346_s13, %s14346_s13 }
  0x2e   : > { %p14009_p7 = scmp.ne.s32.totalorder %s14346_s13, %s14008_s19  ;;  %p14017_p4 = scmp.lt.s32.totalorder %s14008_s19, %s14008_s19 }
  0x30   : > { %p14011_p9 = pnand %p14009_p7, %p14368_p12  ;;  %p14018_p11 = por %p14017_p4, %p14016_p1 }
  0x32   : > { %p14012_p6 = pneg %p14011_p9 }
  0x34   : > { %p14019_p13 = pnand %p14018_p11, %p14012_p6 }
  0x36   : > { %14022 = shalt.err (!%p14019_p13)
}
  0x37   : > { %s14220_s20 = smov 64   ;;  %s14221_s29 = smov 4  }
  0x38   : > { %13470 = dma.hbm_to_vmem [thread:$0]  (!%p14352_p10), %s20884_s1, 256, %s14346_s13, [#allocation6], %s14220_s20, %s14220_s20, %s14221_s29  }
  0x39   : > { %s20886_s3 = sld [smem:[#allocation127_spill]] }
  0x3f   : > { %s14023_s21 = scalar_lea.hbm %s20886_s3, 256 }
  0x40   : > { %p14024_p1 = scmp.ne.s32.totalorder %s20886_s3, %s14023_s21  ;;  %p14030_p0 = scmp.lt.u32.totalorder %s14023_s21, %s20886_s3 }
  0x42   : > { %p14026_p4 = pnand %p14024_p1, %p14368_p12 }
  0x44   : > { %p14027_p6 = pneg %p14026_p4 }
  0x46   : > { %p14032_p3 = pnand %p14030_p0, %p14027_p6 }
  0x48   : > { %14035 = shalt.err (!%p14032_p3)
}
  0x49   : > { %s14036_s13 = scalar_lea.vmem %s14356_s16, 256  ;;  %p14044_p11 = scmp.lt.s32.totalorder %s14356_s16, %s14356_s16 }
  0x4a   : > { %p14037_p5 = scmp.ne.s32.totalorder %s14356_s16, %s14036_s13  ;;  %p14045_p13 = scmp.lt.s32.totalorder %s14036_s13, %s14036_s13 }
  0x4c   : > { %p14039_p7 = pnand %p14037_p5, %p14368_p12  ;;  %p14046_p1 = por %p14045_p13, %p14044_p11 }
  0x4e   : > { %p14040_p9 = pneg %p14039_p7 }
  0x50   : > { %p14047_p4 = pnand %p14046_p1, %p14040_p9 }
  0x52   : > { %14050 = shalt.err (!%p14047_p4)
}
  0x53   : > { %13473 = dma.hbm_to_vmem [thread:$0]  (!%p14352_p10), %s20886_s3, 256, %s14356_s16, [#allocation6], %s14220_s20, %s14220_s20, %s14221_s29  }
  0x54   : > { %s20887_s5 = sld [smem:[#allocation128_spill]] }
  0x5a   : > { %s14051_s30 = scalar_lea.hbm %s20887_s5, 1024 }
  0x5b   : > { %p14052_p6 = scmp.ne.s32.totalorder %s20887_s5, %s14051_s30  ;;  %p14058_p5 = scmp.lt.u32.totalorder %s14051_s30, %s20887_s5 }
  0x5d   : > { %p14054_p0 = pnand %p14052_p6, %p14368_p12 }
  0x5f   : > { %p14055_p3 = pneg %p14054_p0 }
  0x61   : > { %p14060_p7 = pnand %p14058_p5, %p14055_p3 }
  0x63   : > { %14063 = shalt.err (!%p14060_p7)
}
  0x64   : > { %s14064_s13 = scalar_lea.vmem %s247_s18, 1024  ;;  %p14072_p1 = scmp.lt.s32.totalorder %s247_s18, %s247_s18 }
  0x65   : > { %p14065_p9 = scmp.ne.s32.totalorder %s247_s18, %s14064_s13  ;;  %p14073_p4 = scmp.lt.s32.totalorder %s14064_s13, %s14064_s13 }
  0x67   : > { %p14067_p11 = pnand %p14065_p9, %p14368_p12  ;;  %p14074_p8 = por %p14073_p4, %p14072_p1 }
  0x69   : > { %p14068_p13 = pneg %p14067_p11 }
  0x6b   : > { %p14075_p2 = pnand %p14074_p8, %p14068_p13 }
  0x6d   : > { %14078 = shalt.err (!%p14075_p2)
}
  0x6e   : > { %s20548_s16 = smov 128   ;;  %s20549_s10 = smov 8  }
  0x6f   : > { %13476 = dma.hbm_to_vmem [thread:$0]  (!%p14352_p10), %s20887_s5, 1024, %s247_s18, [#allocation9], %s20548_s16, %s20548_s16, %s20549_s10  }
  0x70   : > { %s33_s6 = sadd.s32 1, %s14207_s26  ;;  %s36_s21 = sadd.s32 1, %s14211_s27 }
  0x71   : > { %p34_p2 = scmp.ge.s32.totalorder %s33_s6, 2  ;;  %s45_s24 = sadd.s32 1, %s14195_s23 }
  0x72   : > { %p52_p8 = scmp.ne.s32.totalorder %s14195_s23, %s14191_s22  ;;  %p53_p12 = scmp.eq.s32.totalorder %s14215_s28, 0 }
  0x73   : > { %s21606_s6 = smov (%p34_p2, %s33_s6), 0  ;;  %s21608_s21 = smov (!%p34_p2, %s36_s21), %s14211_s27 }
  0x74   : > { %s41_s14 = ssub.s32 %s14207_s26, %s21606_s6  ;;  %p38_p6 = scmp.ge.s32.totalorder %s21608_s21, 2 }
  0x75   : > { %p20888_p0 = scmp.ne.s32.totalorder %s20878_s8, 0  ;;  %p14451_p10 = por %p53_p12, %p52_p8 }
  0x76   : > { %p13488_p5 = scmp.lt.s32.totalorder %s14215_s28, 4  ;;  %s21610_s21 = smov (%p38_p6, %s21608_s21), 0 }
  0x77   : > { %p14447_p3 = por %p20888_p0, %p52_p8  ;;  %s260_s30 = sand.u32 1, %s14195_s23  }
  0x78   : > { %s12682_s12 = sshll.u32 %s14207_s26, 4  ;;  %s40_s15 = ssub.s32 %s14211_s27, %s21610_s21 }
  0x79   : > { %s42_s17 = sor.u32 %s41_s14, %s40_s15  ;;  %s12681_s19 = sshll.u32 %s260_s30, 7 }
  0x7a   : > { %p43_p7 = scmp.eq.s32.totalorder %s42_s17, 0  ;;  %s12683_s8 = sshll.u32 %s14211_s27, 5 }
  0x7b   : > { %s264_s13 = scalar_lea.vmem [#allocation2], %s12681_s19  ;;  %s270_s16 = sadd.s32 %s12683_s8, %s12682_s12 }
  0x7c   : > { %s273_s20 = sshll.u32 %s264_s13, 4  ;;  %s12684_s10 = sshll.u32 %s270_s16, 7  ;;  %s14466_s20 = int_to_ptr.vmem [resolvable:$true] %s273_s20 }
  0x7d   : > { %s14464_s29 = scalar_select %p43_p7, %s14195_s23, %s45_s24  }
  0x7e   : > { %p14472_p9 = pnand %p13488_p5, %p14451_p10  ;;  %s14479_s14 = scalar_lea.hbm %s20534_s0, %s12684_s10 }
  0x7f   : > { %s14481_s24 = scalar_lea.sflag [#allocation3], %s260_s30  ;;  %s14079_s16 = scalar_lea.hbm %s14479_s14, 2048 }
  0x80   : > { %p14080_p11 = scmp.ne.s32.totalorder %s14479_s14, %s14079_s16  ;;  %p14081_p13 = pneg %p14472_p9 }
  0x81   : > { %s14084_s5 = scalar_lea.hbm %s20534_s0, 8192  ;;  %p14085_p2 = scmp.lt.u32.totalorder %s14479_s14, %s20534_s0 }
  0x82   : > { %p14082_p1 = pnand %p14081_p13, %p14080_p11  ;;  %p14086_p8 = scmp.lt.u32.totalorder %s14084_s5, %s14079_s16 }
  0x83   : > { %p14088_p6 = scmp.lt.u32.totalorder %s14079_s16, %s14479_s14 }
  0x84   : > { %p14083_p4 = pneg %p14082_p1  ;;  %p14087_p12 = por %p14086_p8, %p14085_p2 }
  0x86   : > { %p14089_p0 = por %p14088_p6, %p14087_p12 }
  0x88   : > { %p14090_p10 = pnand %p14089_p0, %p14083_p4 }
  0x8a   : > { %14093 = shalt.err (!%p14090_p10)
}
  0x8b   : > { %s14094_s30 = scalar_lea.vmem %s14466_s20, 2048  ;;  %s14224_s15 = smov [#allocation2]  }
  0x8c   : > { %p14095_p5 = scmp.ne.s32.totalorder %s14466_s20, %s14094_s30  ;;  %s14099_s17 = sshll.u32 %s14224_s15, 4  ;;  %s14100_s17 = int_to_ptr.vmem [resolvable:$false] %s14099_s17 }
  0x8d   : > { %s14101_s19 = scalar_lea.vmem %s14100_s17, 4096  ;;  %p14102_p1 = scmp.lt.s32.totalorder %s14466_s20, %s14100_s17 }
  0x8e   : > { %p14097_p7 = pnand %p14095_p5, %p14081_p13  ;;  %p14103_p2 = scmp.lt.s32.totalorder %s14101_s19, %s14094_s30 }
  0x90   : > { %p14098_p11 = pneg %p14097_p7  ;;  %p14104_p8 = por %p14103_p2, %p14102_p1 }
  0x92   : > { %p14105_p12 = pnand %p14104_p8, %p14098_p11 }
  0x94   : > { %14108 = shalt.err (!%p14105_p12)
}
  0x95   : > { %s20892_s8 = smov 8   ;;  %s20893_s13 = smov 128  }
  0x96   : > { %13480 = dma.hbm_to_vmem [thread:$0]  (!%p14472_p9), %s14479_s14, 2048, %s14466_s20, %s14481_s24, %s20893_s13, %s20893_s13, %s20892_s8  }
  0x97   : > { %p20894_p13 = scmp.ne.s32.totalorder %s20882_s11, 0 }
  0x99   : > { %285 = sbr.rel (%p20894_p13) target bundleno = 2301 (0x8fd), region = 44 }
  0xa0   : > { %s14515_s16 = sand.u32 1, %s14191_s22   ;;  %p20895_p4 = scmp.ne.s32.totalorder %s20879_s9, 0 }
  0xa1   : > { %s12686_s18 = sshll.u32 %s14515_s16, 7  ;;  %s288_s3 = scalar_lea.sflag [#allocation3], %s14515_s16 }
  0xa2   : > { %s14521_s1 = scalar_lea.vmem [#allocation2], %s12686_s18 }
  0xa3   : > { %14170 = dma.done.wait (%p20895_p4), %s288_s3, 2048  }
  0xa4   : > { %14172 = vsyncadd (%p20895_p4), %s288_s3, 4294965248  ;;  %p20896_p9 = scmp.ne.s32.totalorder %s20877_s7, 0 }
  0xa6   : > { %14174 = dma.done.wait (%p20896_p9), [#allocation6], 512  }
  0xa7   : > { %14176 = vsyncadd (%p20896_p9), [#allocation6], 4294966784 }
  0xa8   : > { %14178 = dma.done.wait (%p20896_p9), [#allocation9], 1024  }
  0xa9   : > { %14180 = vsyncadd (%p20896_p9), [#allocation9], 4294966272  ;;  %vm349_vm0 = vcmask 261120   ;;  %v333_v0 = vld [vmem:[%s14521_s1] sm:$0xff]  ;;  %v335_v2 = vld [vmem:[%s14521_s1 + $0x10] sm:$0xff]  ;;  %s14225_s11 = smov 96  }
  0xaa   : > { %v337_v1 = vld [vmem:[%s14521_s1 + $0x20] sm:$0xff]  ;;  %v350_v3 = vsel %vm349_vm0, %v333_v0, 0.0  ;;  %v339_v5 = vld [vmem:[%s14521_s1 + $0x30] sm:$0xff]  ;;  %v353_v7 = vsel %vm349_vm0, %v335_v2, 0.0  ;;  %v14561_v16 = vld [vmem:[%s14521_s1 + $0x8] sm:$0xff]  ;;  %s14226_s20 = smov 88  }
  0xab   : > { %v356_v4 = vsel %vm349_vm0, %v337_v1, 0.0  ;;  %351 = vadd.xlane.f32.xlu0 %v350_v3  ;;  %v14542_v6 = vld [vmem:[%s14521_s1 + $0x40] sm:$0xff]  ;;  %v359_v8 = vsel %vm349_vm0, %v339_v5, 0.0  ;;  %v343_v9 = vld [vmem:[%s14521_s1 + $0x50] sm:$0xff]  ;;  %v14564_v17 = vld [vmem:[%s14521_s1 + $0x18] sm:$0xff]  ;;  %v374_v18 = vsel %vm349_vm0, %v14561_v16, 0.0 }
  0xac   : > { %357 = vadd.xlane.f32.xlu1 %v356_v4  ;;  %v362_v10 = vsel %vm349_vm0, %v14542_v6, 0.0  ;;  %v365_v11 = vsel %vm349_vm0, %v343_v9, 0.0  ;;  %v14551_v12 = vld [vmem:[%s14521_s1 + $0x60] sm:$0xff]  ;;  %v14554_v13 = vld [vmem:[%s14521_s1 + $0x70] sm:$0xff]  ;;  %v377_v19 = vsel %vm349_vm0, %v14564_v17, 0.0  ;;  %v14571_v20 = vld [vmem:[%s14521_s1 + $0x28] sm:$0xff] }
  0xad   : > { %v368_v14 = vsel %vm349_vm0, %v14551_v12, 0.0  ;;  %v371_v15 = vsel %vm349_vm0, %v14554_v13, 0.0  ;;  %v14574_v21 = vld [vmem:[%s14521_s1 + $0x38] sm:$0xff]  ;;  %v380_v22 = vsel %vm349_vm0, %v14571_v20, 0.0  ;;  %v14581_v24 = vld [vmem:[%s14521_s1 + $0x48] sm:$0xff]  ;;  %s14227_s14 = smov 80  }
  0xae   : > { %v383_v23 = vsel %vm349_vm0, %v14574_v21, 0.0  ;;  %v14584_v25 = vld [vmem:[%s14521_s1 + $0x58] sm:$0xff]  ;;  %v386_v26 = vsel %vm349_vm0, %v14581_v24, 0.0  ;;  %v14591_v28 = vld [vmem:[%s14521_s1 + $0x68] sm:$0xff]  ;;  %s14228_s24 = smov 72   ;;  %s14229_s5 = smov 120  }
  0xaf   : > { %354 = vadd.xlane.f32.xlu0 %v353_v7  ;;  %v389_v27 = vsel %vm349_vm0, %v14584_v25, 0.0  ;;  %v14594_v29 = vld [vmem:[%s14521_s1 + $0x78] sm:$0xff]  ;;  %v392_v30 = vsel %vm349_vm0, %v14591_v28, 0.0  ;;  %s14230_s10 = smov 112   ;;  %s14231_s12 = smov 104   ;;  %vm7887_vm1 = vcmask 64512  }
  0xb0   : > { %360 = vadd.xlane.f32.xlu1 %v359_v8  ;;  %v395_v31 = vsel %vm349_vm0, %v14594_v29, 0.0  ;;  %s14234_s30 = smov 64   ;;  %s14235_s15 = smov 56   ;;  %vm8600_vm2 = vcmask 523264   ;;  %vm12337_vm3 = vcmask 130048   ;;  %vm12354_vm4 = vcmask 195584  }
  0xb1   : > { %s14236_s17 = smov 48   ;;  %s14237_s19 = smov 40  }
  0xb2   : > { %s14238_s8 = smov 8   ;;  %s14239_s13 = smov 16  }
  0xb3   : > { %363 = vadd.xlane.f32.xlu0 %v362_v10  ;;  %s14240_s3 = smov 24   ;;  %s20437_s9 = scalar_lea.vmem [#allocation10], %s12686_s18 }
  0xb4   : > { %366 = vadd.xlane.f32.xlu1 %v365_v11  ;;  %s21591_s18 = sld [smem:[#allocation16_spill]] }
  0xb7   : > { %369 = vadd.xlane.f32.xlu0 %v368_v14 }
  0xb8   : > { %372 = vadd.xlane.f32.xlu1 %v371_v15 }
  0xbb   : > { %375 = vadd.xlane.f32.xlu0 %v374_v18 }
  0xbc   : > { %378 = vadd.xlane.f32.xlu1 %v377_v19 }
  0xbf   : > { %381 = vadd.xlane.f32.xlu0 %v380_v22 }
  0xc0   : > { %384 = vadd.xlane.f32.xlu1 %v383_v23 }
  0xc3   : > { %387 = vadd.xlane.f32.xlu0 %v386_v26 }
  0xc4   : > { %390 = vadd.xlane.f32.xlu1 %v389_v27 }
  0xc7   : > { %393 = vadd.xlane.f32.xlu0 %v392_v30 }
  0xc8   : > { %396 = vadd.xlane.f32.xlu1 %v395_v31 }
 0x138   : > { %v352_v32 = vpop.xlane.xlu0 %351 }
 0x139   : > { %v358_v33 = vpop.xlane.xlu1 %357  ;;  %v399_v34 = vmul.f32 0.03125, %v352_v32 }
 0x13a   : > { %v401_v35 = vmul.f32 0.03125, %v358_v33 }
 0x13b   : > { %v14600_v36 = vsub.f32 %v333_v0, %v399_v34 }
 0x13c   : > { %v14602_v37 = vsub.f32 %v337_v1, %v401_v35  ;;  %v355_v38 = vpop.xlane.xlu0 %354 }
 0x13d   : > { %v361_v39 = vpop.xlane.xlu1 %360  ;;  %v400_v40 = vmul.f32 0.03125, %v355_v38  ;;  %v431_v42 = vmul.f32 %v14600_v36, %v14600_v36 }
 0x13e   : > { %v402_v41 = vmul.f32 0.03125, %v361_v39  ;;  %v433_v43 = vmul.f32 %v14602_v37, %v14602_v37 }
 0x13f   : > { %v14608_v44 = vsub.f32 %v335_v2, %v400_v40  ;;  %v447_v46 = vsel %vm349_vm0, %v431_v42, 0.0 }
 0x140   : > { %v14610_v45 = vsub.f32 %v339_v5, %v402_v41  ;;  %448 = vadd.xlane.f32.xlu0 %v447_v46  ;;  %v364_v47 = vpop.xlane.xlu0 %363  ;;  %v453_v49 = vsel %vm349_vm0, %v433_v43, 0.0 }
 0x141   : > { %v367_v48 = vpop.xlane.xlu1 %366  ;;  %v403_v50 = vmul.f32 0.03125, %v364_v47  ;;  %v432_v52 = vmul.f32 %v14608_v44, %v14608_v44 }
 0x142   : > { %v404_v51 = vmul.f32 0.03125, %v367_v48  ;;  %v434_v53 = vmul.f32 %v14610_v45, %v14610_v45 }
 0x143   : > { %v14619_v54 = vsub.f32 %v14542_v6, %v403_v50  ;;  %v450_v56 = vsel %vm349_vm0, %v432_v52, 0.0 }
 0x144   : > { %v14621_v55 = vsub.f32 %v343_v9, %v404_v51  ;;  %454 = vadd.xlane.f32.xlu0 %v453_v49  ;;  %451 = vadd.xlane.f32.xlu1 %v450_v56  ;;  %v370_v57 = vpop.xlane.xlu0 %369  ;;  %v456_v59 = vsel %vm349_vm0, %v434_v53, 0.0  ;;  %v13702_v53 = vld [vmem:[#allocation5 + $0x8] sm:$0xff]  }
 0x145   : > { %v373_v58 = vpop.xlane.xlu1 %372  ;;  %v405_v60 = vmul.f32 0.03125, %v370_v57  ;;  %v435_v62 = vmul.f32 %v14619_v54, %v14619_v54 }
 0x146   : > { %v406_v61 = vmul.f32 0.03125, %v373_v58  ;;  %v436_v63 = vmul.f32 %v14621_v55, %v14621_v55 }
 0x147   : > { %v14630_v0 = vsub.f32 %v14551_v12, %v405_v60  ;;  %v459_v2 = vsel %vm349_vm0, %v435_v62, 0.0 }
 0x148   : > { %v14633_v1 = vsub.f32 %v14554_v13, %v406_v61  ;;  %457 = vadd.xlane.f32.xlu1 %v456_v59  ;;  %460 = vadd.xlane.f32.xlu0 %v459_v2  ;;  %v376_v3 = vpop.xlane.xlu0 %375  ;;  %v462_v5 = vsel %vm349_vm0, %v436_v63, 0.0 }
 0x149   : > { %v379_v4 = vpop.xlane.xlu1 %378  ;;  %v407_v6 = vmul.f32 0.03125, %v376_v3  ;;  %v437_v8 = vmul.f32 %v14630_v0, %v14630_v0 }
 0x14a   : > { %v408_v7 = vmul.f32 0.03125, %v379_v4  ;;  %v438_v9 = vmul.f32 %v14633_v1, %v14633_v1 }
 0x14b   : > { %v14642_v10 = vsub.f32 %v14561_v16, %v407_v6  ;;  %v465_v12 = vsel %vm349_vm0, %v437_v8, 0.0 }
 0x14c   : > { %v14645_v11 = vsub.f32 %v14564_v17, %v408_v7  ;;  %463 = vadd.xlane.f32.xlu1 %v462_v5  ;;  %466 = vadd.xlane.f32.xlu0 %v465_v12  ;;  %v382_v13 = vpop.xlane.xlu0 %381  ;;  %v468_v15 = vsel %vm349_vm0, %v438_v9, 0.0 }
 0x14d   : > { %v385_v14 = vpop.xlane.xlu1 %384  ;;  %v409_v18 = vmul.f32 0.03125, %v382_v13  ;;  %v439_v22 = vmul.f32 %v14642_v10, %v14642_v10 }
 0x14e   : > { %v410_v19 = vmul.f32 0.03125, %v385_v14  ;;  %v440_v16 = vmul.f32 %v14645_v11, %v14645_v11 }
 0x14f   : > { %v14654_v23 = vsub.f32 %v14571_v20, %v409_v18  ;;  %v471_v26 = vsel %vm349_vm0, %v439_v22, 0.0 }
 0x150   : > { %v14657_v17 = vsub.f32 %v14574_v21, %v410_v19  ;;  %469 = vadd.xlane.f32.xlu1 %v468_v15  ;;  %472 = vadd.xlane.f32.xlu0 %v471_v26  ;;  %v388_v27 = vpop.xlane.xlu0 %387  ;;  %v474_v31 = vsel %vm349_vm0, %v440_v16, 0.0 }
 0x151   : > { %v391_v30 = vpop.xlane.xlu1 %390  ;;  %v411_v32 = vmul.f32 0.03125, %v388_v27  ;;  %v441_v34 = vmul.f32 %v14654_v23, %v14654_v23 }
 0x152   : > { %v412_v33 = vmul.f32 0.03125, %v391_v30  ;;  %v442_v20 = vmul.f32 %v14657_v17, %v14657_v17 }
 0x153   : > { %v14666_v35 = vsub.f32 %v14581_v24, %v411_v32  ;;  %v477_v38 = vsel %vm349_vm0, %v441_v34, 0.0 }
 0x154   : > { %v14669_v21 = vsub.f32 %v14584_v25, %v412_v33  ;;  %475 = vadd.xlane.f32.xlu1 %v474_v31  ;;  %478 = vadd.xlane.f32.xlu0 %v477_v38  ;;  %v394_v39 = vpop.xlane.xlu0 %393  ;;  %v480_v41 = vsel %vm349_vm0, %v442_v20, 0.0 }
 0x155   : > { %v397_v40 = vpop.xlane.xlu1 %396  ;;  %v413_v42 = vmul.f32 0.03125, %v394_v39  ;;  %v443_v46 = vmul.f32 %v14666_v35, %v14666_v35 }
 0x156   : > { %v414_v43 = vmul.f32 0.03125, %v397_v40  ;;  %v444_v24 = vmul.f32 %v14669_v21, %v14669_v21 }
 0x157   : > { %v14678_v47 = vsub.f32 %v14591_v28, %v413_v42  ;;  %v483_v48 = vsel %vm349_vm0, %v443_v46, 0.0 }
 0x158   : > { %v14681_v25 = vsub.f32 %v14594_v29, %v414_v43  ;;  %481 = vadd.xlane.f32.xlu1 %v480_v41  ;;  %484 = vadd.xlane.f32.xlu0 %v483_v48  ;;  %v486_v49 = vsel %vm349_vm0, %v444_v24, 0.0  ;;  %v13701_v29 = vld [vmem:[#allocation5] sm:$0xff]  }
 0x159   : > { %v445_v50 = vmul.f32 %v14678_v47, %v14678_v47  ;;  %13123 = vmatprep.subr.bf16.mxu0 %v13701_v29 }
 0x15a   : > { %v446_v51 = vmul.f32 %v14681_v25, %v14681_v25  ;;  %13124 = vmatpush3.bf16.msra.mxu0 %v13701_v29 }
 0x15b   : > { %v489_v52 = vsel %vm349_vm0, %v445_v50, 0.0  ;;  %13125 = vmatprep.subr.bf16.mxu0 %v13702_v53 }
 0x15c   : > { %487 = vadd.xlane.f32.xlu1 %v486_v49  ;;  %490 = vadd.xlane.f32.xlu0 %v489_v52  ;;  %v492_v28 = vsel %vm349_vm0, %v446_v51, 0.0 }
 0x15e   : > { %13126 = vmatpush3.bf16.msra.mxu0 %v13702_v53 }
 0x160   : > { %493 = vadd.xlane.f32.xlu1 %v492_v28 }
 0x1cd   : > { %v449_v56 = vpop.xlane.xlu0 %448 }
 0x1ce   : > { %v495_v57 = vmul.f32 0.03125, %v449_v56 }
 0x1d0   : > { %v511_v58 = vadd.f32 1e-05, %v495_v57 }
 0x1d1   : > { %v452_v59 = vpop.xlane.xlu1 %451  ;;  %v455_v60 = vpop.xlane.xlu0 %454 }
 0x1d2   : > { %v496_v61 = vmul.f32 0.03125, %v452_v59  ;;  %v497_v62 = vmul.f32 0.03125, %v455_v60  ;;  %13705 = vrsqrt.f32 %v511_v58 }
 0x1d4   : > { %v512_v63 = vadd.f32 1e-05, %v496_v61  ;;  %v513_v2 = vadd.f32 1e-05, %v497_v62 }
 0x1d5   : > { %v458_v3 = vpop.xlane.xlu1 %457  ;;  %v461_v4 = vpop.xlane.xlu0 %460 }
 0x1d6   : > { %13707 = vrsqrt.f32 %v512_v63  ;;  %v498_v5 = vmul.f32 0.03125, %v458_v3  ;;  %v499_v6 = vmul.f32 0.03125, %v461_v4 }
 0x1d7   : > { %13709 = vrsqrt.f32 %v513_v2 }
 0x1d8   : > { %v514_v7 = vadd.f32 1e-05, %v498_v5  ;;  %v515_v8 = vadd.f32 1e-05, %v499_v6 }
 0x1d9   : > { %v464_v9 = vpop.xlane.xlu1 %463  ;;  %v467_v12 = vpop.xlane.xlu0 %466 }
 0x1da   : > { %13711 = vrsqrt.f32 %v514_v7  ;;  %v500_v13 = vmul.f32 0.03125, %v464_v9  ;;  %v501_v14 = vmul.f32 0.03125, %v467_v12 }
 0x1db   : > { %13713 = vrsqrt.f32 %v515_v8 }
 0x1dc   : > { %v516_v15 = vadd.f32 1e-05, %v500_v13  ;;  %v517_v18 = vadd.f32 1e-05, %v501_v14  ;;  %v13706_v16 = vpop.eup %13705 }
 0x1dd   : > { %v470_v19 = vpop.xlane.xlu1 %469  ;;  %v473_v22 = vpop.xlane.xlu0 %472  ;;  %v543_v20 = vmul.f32 %v13706_v16, %v14600_v36 }
 0x1de   : > { %13715 = vrsqrt.f32 %v516_v15  ;;  %v502_v26 = vmul.f32 0.03125, %v470_v19  ;;  %v503_v27 = vmul.f32 0.03125, %v473_v22 }
 0x1df   : > { %13717 = vrsqrt.f32 %v517_v18 }
 0x1e0   : > { %v13708_v30 = vpop.eup %13707  ;;  %v518_v31 = vadd.f32 1e-05, %v502_v26  ;;  %v519_v32 = vadd.f32 1e-05, %v503_v27 }
 0x1e1   : > { %v476_v33 = vpop.xlane.xlu1 %475  ;;  %v479_v34 = vpop.xlane.xlu0 %478  ;;  %v544_v38 = vmul.f32 %v13708_v30, %v14608_v44 }
 0x1e2   : > { %v13710_v39 = vpop.eup %13709  ;;  %13719 = vrsqrt.f32 %v518_v31  ;;  %v504_v40 = vmul.f32 0.03125, %v476_v33  ;;  %v505_v41 = vmul.f32 0.03125, %v479_v34 }
 0x1e3   : > { %v559_v42 = vpack.c.bf16 %v544_v38, %v543_v20  ;;  %13721 = vrsqrt.f32 %v519_v32  ;;  %v545_v50 = vmul.f32 %v13710_v39, %v14602_v37 }
 0x1e4   : > { %v13712_v43 = vpop.eup %13711  ;;  %v520_v46 = vadd.f32 1e-05, %v504_v40  ;;  %v521_v24 = vadd.f32 1e-05, %v505_v41 }
 0x1e5   : > { %v482_v48 = vpop.xlane.xlu1 %481  ;;  %13127 = vmatprep.mubr.msk.bf16.mxu0 %vm349_vm0, %v559_v42  ;;  %v485_v49 = vpop.xlane.xlu0 %484  ;;  %v546_v51 = vmul.f32 %v13712_v43, %v14610_v45 }
 0x1e6   : > { %v13714_v36 = vpop.eup %13713  ;;  %13723 = vrsqrt.f32 %v520_v46  ;;  %v506_v44 = vmul.f32 0.03125, %v482_v48  ;;  %v507_v52 = vmul.f32 0.03125, %v485_v49 }
 0x1e7   : > { %v560_v28 = vpack.c.bf16 %v546_v51, %v545_v50  ;;  %13725 = vrsqrt.f32 %v521_v24  ;;  %v547_v59 = vmul.f32 %v13714_v36, %v14619_v54 }
 0x1e8   : > { %v13716_v29 = vpop.eup %13715  ;;  %v522_v53 = vadd.f32 1e-05, %v506_v44  ;;  %v523_v56 = vadd.f32 1e-05, %v507_v52 }
 0x1e9   : > { %v488_v57 = vpop.xlane.xlu1 %487  ;;  %13128 = vmatmul.mubr.msk.bf16.vlgmr.msra.gmra.mrb[0].mxu0 %vm349_vm0, %v560_v28  ;;  %v491_v58 = vpop.xlane.xlu0 %490  ;;  %v548_v60 = vmul.f32 %v13716_v29, %v14621_v55 }
 0x1ea   : > { %v13718_v37 = vpop.eup %13717  ;;  %13727 = vrsqrt.f32 %v522_v53  ;;  %v508_v45 = vmul.f32 0.03125, %v488_v57  ;;  %v509_v61 = vmul.f32 0.03125, %v491_v58 }
 0x1eb   : > { %v561_v62 = vpack.c.bf16 %v548_v60, %v547_v59  ;;  %13729 = vrsqrt.f32 %v523_v56  ;;  %v549_v5 = vmul.f32 %v13718_v37, %v14630_v0 }
 0x1ec   : > { %v13720_v63 = vpop.eup %13719  ;;  %v524_v2 = vadd.f32 1e-05, %v508_v45  ;;  %v525_v3 = vadd.f32 1e-05, %v509_v61 }
 0x1ed   : > { %v494_v4 = vpop.xlane.xlu1 %493  ;;  %13131 = vmatprep.mubr.msk.bf16.mxu0 %vm349_vm0, %v561_v62  ;;  %v550_v6 = vmul.f32 %v13720_v63, %v14633_v1  ;;  %v13722_v7 = vpop.eup %13721 }
 0x1ee   : > { %13731 = vrsqrt.f32 %v524_v2  ;;  %v510_v54 = vmul.f32 0.03125, %v494_v4  ;;  %v551_v12 = vmul.f32 %v13722_v7, %v14642_v10  ;;  %v14232_v4 = vmov 1983009808  }
 0x1ef   : > { %v562_v55 = vpack.c.bf16 %v550_v6, %v549_v5  ;;  %13733 = vrsqrt.f32 %v525_v3  ;;  %v1258_v5 = vunpack.c.l.s4 %v14232_v4  ;;  %v1260_v6 = vlaneseq }
 0x1f0   : > { %v13724_v8 = vpop.eup %13723  ;;  %v526_v9 = vadd.f32 1e-05, %v510_v54 }
 0x1f1   : > { %13132 = vmatmul.mubr.msk.bf16.gmra.mrb[4].mxu0 %vm349_vm0, %v562_v55  ;;  %v552_v13 = vmul.f32 %v13724_v8, %v14645_v11  ;;  %v13726_v14 = vpop.eup %13725  ;;  %v1259_v55 = vunpack.c.0.s8 %v1258_v5  ;;  %v1261_v8 = vshrl.u32 %v1260_v6, 7 }
 0x1f2   : > { %13735 = vrsqrt.f32 %v526_v9  ;;  %v553_v0 = vmul.f32 %v13726_v14, %v14654_v23 }
 0x1f3   : > { %v563_v15 = vpack.c.bf16 %v552_v13, %v551_v12  ;;  %v14233_v12 = vmov 1934713408  }
 0x1f4   : > { %v13728_v18 = vpop.eup %13727  ;;  %v1322_v13 = vunpack.c.l.s4 %v14233_v12 }
 0x1f5   : > { %13135 = vmatprep.mubr.msk.bf16.mxu0 %vm349_vm0, %v563_v15  ;;  %v554_v1 = vmul.f32 %v13728_v18, %v14657_v17  ;;  %v13730_v19 = vpop.eup %13729  ;;  %v14718_v17 = vld [vmem:[%s20536_s2] ss:$0 sm:$0xff]  ;;  %v14902_v18 = vsub.s32 %v1259_v55, %v1261_v8 }
 0x1f6   : > { %v555_v26 = vmul.f32 %v13730_v19, %v14666_v35 }
 0x1f7   : > { %v564_v22 = vpack.c.bf16 %v554_v1, %v553_v0  ;;  %20906 = vst [vmem:[#allocation28_spill] sm:$0xff] %v14902_v18 }
 0x1f8   : > { %v13732_v16 = vpop.eup %13731 }
 0x1f9   : > { %13136 = vmatmul.mubr.msk.bf16.gmra.mrb[8].mxu0 %vm349_vm0, %v564_v22  ;;  %v556_v10 = vmul.f32 %v13732_v16, %v14669_v21  ;;  %v13734_v11 = vpop.eup %13733  ;;  %v1323_v22 = vunpack.c.0.s8 %v1322_v13 }
 0x1fa   : > { %v557_v31 = vmul.f32 %v13734_v11, %v14678_v47 }
 0x1fb   : > { %v565_v27 = vpack.c.bf16 %v556_v10, %v555_v26 }
 0x1fc   : > { %v13736_v30 = vpop.eup %13735 }
 0x1fd   : > { %13139 = vmatprep.mubr.msk.bf16.mxu0 %vm349_vm0, %v565_v27  ;;  %v558_v23 = vmul.f32 %v13736_v30, %v14681_v25 }
 0x1ff   : > { %v566_v32 = vpack.c.bf16 %v558_v23, %v557_v31 }
 0x201   : > { %13140 = vmatmul.mubr.msk.bf16.gmra.mrb[12].mxu0 %vm349_vm0, %v566_v32 }
 0x2bc   : > { %v13129_v35 = vpop.f32.mrb[0].mxu0 }
 0x2bd   : > { %v14721_v21 = vadd.f32 %v13129_v35, %v14718_v17  ;;  %v648_v33 = vpop.f32.mrb[1].mxu0  ;;  %v14913_v35 = vsub.s32 %v1323_v22, %v1261_v8 }
 0x2be   : > { %v14724_v34 = vadd.f32 %v14718_v17, %v648_v33  ;;  %v13130_v20 = vpop.f32.mrb[2].mxu0 }
 0x2bf   : > { %875 = vrot.lane.b32.xlu0 %v14721_v21, %s14225_s11  ;;  %v651_v47 = vpop.f32.mrb[3].mxu0  ;;  %v14731_v25 = vadd.f32 %v13130_v20, %v14718_v17 }
 0x2c0   : > { %919 = vrot.lane.b32.xlu1 %v14724_v34, %s14226_s20  ;;  %v14792_v60 = vadd.f32 %v14718_v17, %v651_v47 }
 0x2c3   : > { %923 = vrot.lane.b32.xlu0 %v14721_v21, %s14226_s20 }
 0x2c4   : > { %877 = vrot.lane.b32.xlu1 %v14731_v25, %s14225_s11  ;;  %v13133_v38 = vpop.f32.mrb[4].mxu0 }
 0x2c5   : > { %v664_v39 = vpop.f32.mrb[5].mxu0  ;;  %v14815_v37 = vadd.f32 %v13133_v38, %v14718_v17 }
 0x2c6   : > { %v14738_v40 = vadd.f32 %v14718_v17, %v664_v39  ;;  %v13134_v41 = vpop.f32.mrb[6].mxu0 }
 0x2c7   : > { %971 = vrot.lane.b32.xlu0 %v14721_v21, %s14227_s14  ;;  %v667_v42 = vpop.f32.mrb[7].mxu0  ;;  %20904 = vst [vmem:[#allocation26_spill] sm:$0xff] %v14815_v37  ;;  %v14826_v45 = vadd.f32 %v13134_v41, %v14718_v17 }
 0x2c8   : > { %20897 = vst [vmem:[#allocation19_spill] sm:$0xff] %v14738_v40  ;;  %v14743_v43 = vadd.f32 %v14718_v17, %v667_v42  ;;  %925 = vrot.lane.b32.xlu1 %v14731_v25, %s14226_s20 }
 0x2c9   : > { %20905 = vst [vmem:[#allocation27_spill] sm:$0xff] %v14826_v45 }
 0x2cb   : > { %1019 = vrot.lane.b32.xlu0 %v14721_v21, %s14228_s24 }
 0x2cc   : > { %973 = vrot.lane.b32.xlu1 %v14731_v25, %s14227_s14  ;;  %v13137_v46 = vpop.f32.mrb[8].mxu0 }
 0x2cd   : > { %v14752_v24 = vadd.f32 %v13137_v46, %v14718_v17  ;;  %v680_v48 = vpop.f32.mrb[9].mxu0 }
 0x2ce   : > { %v14755_v49 = vadd.f32 %v14718_v17, %v680_v48  ;;  %v13138_v50 = vpop.f32.mrb[10].mxu0 }
 0x2cf   : > { %v14758_v51 = vadd.f32 %v13138_v50, %v14718_v17  ;;  %731 = vrot.lane.b32.xlu0 %v14721_v21, %s14229_s5  ;;  %v683_v36 = vpop.f32.mrb[11].mxu0 }
 0x2d0   : > { %20898 = vst [vmem:[#allocation20_spill] sm:$0xff] %v14755_v49  ;;  %v14763_v44 = vadd.f32 %v14718_v17, %v683_v36  ;;  %1021 = vrot.lane.b32.xlu1 %v14731_v25, %s14228_s24 }
 0x2d1   : > { %20899 = vst [vmem:[#allocation21_spill] sm:$0xff] %v14758_v51 }
 0x2d2   : > { %20900 = vst [vmem:[#allocation22_spill] sm:$0xff] %v14763_v44 }
 0x2d3   : > { %779 = vrot.lane.b32.xlu0 %v14721_v21, %s14230_s10 }
 0x2d4   : > { %733 = vrot.lane.b32.xlu1 %v14731_v25, %s14229_s5  ;;  %v13141_v52 = vpop.f32.mrb[12].mxu0 }
 0x2d5   : > { %v14772_v28 = vadd.f32 %v13141_v52, %v14718_v17  ;;  %v696_v29 = vpop.f32.mrb[13].mxu0 }
 0x2d6   : > { %v14775_v53 = vadd.f32 %v14718_v17, %v696_v29  ;;  %v13142_v56 = vpop.f32.mrb[14].mxu0 }
 0x2d7   : > { %20901 = vst [vmem:[#allocation23_spill] sm:$0xff] %v14772_v28  ;;  %v14778_v57 = vadd.f32 %v13142_v56, %v14718_v17  ;;  %827 = vrot.lane.b32.xlu0 %v14721_v21, %s14231_s12  ;;  %v699_v58 = vpop.f32.mrb[15].mxu0 }
 0x2d8   : > { %v14783_v59 = vadd.f32 %v14718_v17, %v699_v58  ;;  %781 = vrot.lane.b32.xlu1 %v14731_v25, %s14230_s10 }
 0x2d9   : > { %20902 = vst [vmem:[#allocation24_spill] sm:$0xff] %v14778_v57 }
 0x2da   : > { %20903 = vst [vmem:[#allocation25_spill] sm:$0xff] %v14783_v59 }
 0x2db   : > { %871 = vrot.lane.b32.xlu0 %v14724_v34, %s14225_s11 }
 0x2dc   : > { %829 = vrot.lane.b32.xlu1 %v14731_v25, %s14231_s12 }
 0x2df   : > { %967 = vrot.lane.b32.xlu0 %v14724_v34, %s14227_s14 }
 0x2e0   : > { %873 = vrot.lane.b32.xlu1 %v14792_v60, %s14225_s11 }
 0x2e3   : > { %1015 = vrot.lane.b32.xlu0 %v14724_v34, %s14228_s24 }
 0x2e4   : > { %921 = vrot.lane.b32.xlu1 %v14792_v60, %s14226_s20 }
 0x2e7   : > { %727 = vrot.lane.b32.xlu0 %v14724_v34, %s14229_s5 }
 0x2e8   : > { %969 = vrot.lane.b32.xlu1 %v14792_v60, %s14227_s14 }
 0x2eb   : > { %775 = vrot.lane.b32.xlu0 %v14724_v34, %s14230_s10 }
 0x2ec   : > { %1017 = vrot.lane.b32.xlu1 %v14792_v60, %s14228_s24 }
 0x2ef   : > { %823 = vrot.lane.b32.xlu0 %v14724_v34, %s14231_s12 }
 0x2f0   : > { %729 = vrot.lane.b32.xlu1 %v14792_v60, %s14229_s5 }
 0x2f3   : > { %883 = vrot.lane.b32.xlu0 %v14815_v37, %s14225_s11 }
 0x2f4   : > { %777 = vrot.lane.b32.xlu1 %v14792_v60, %s14230_s10 }
 0x2f7   : > { %931 = vrot.lane.b32.xlu0 %v14815_v37, %s14226_s20 }
 0x2f8   : > { %825 = vrot.lane.b32.xlu1 %v14792_v60, %s14231_s12 }
 0x2fb   : > { %979 = vrot.lane.b32.xlu0 %v14815_v37, %s14227_s14 }
 0x2fc   : > { %885 = vrot.lane.b32.xlu1 %v14826_v45, %s14225_s11 }
 0x2ff   : > { %1027 = vrot.lane.b32.xlu0 %v14815_v37, %s14228_s24 }
 0x300   : > { %933 = vrot.lane.b32.xlu1 %v14826_v45, %s14226_s20 }
 0x303   : > { %879 = vrot.lane.b32.xlu0 %v14738_v40, %s14225_s11 }
 0x304   : > { %981 = vrot.lane.b32.xlu1 %v14826_v45, %s14227_s14 }
 0x307   : > { %927 = vrot.lane.b32.xlu0 %v14738_v40, %s14226_s20 }
 0x308   : > { %1029 = vrot.lane.b32.xlu1 %v14826_v45, %s14228_s24 }
 0x30b   : > { %975 = vrot.lane.b32.xlu0 %v14738_v40, %s14227_s14 }
 0x30c   : > { %881 = vrot.lane.b32.xlu1 %v14743_v43, %s14225_s11 }
 0x30f   : > { %1023 = vrot.lane.b32.xlu0 %v14738_v40, %s14228_s24 }
 0x310   : > { %929 = vrot.lane.b32.xlu1 %v14743_v43, %s14226_s20 }
 0x313   : > { %735 = vrot.lane.b32.xlu0 %v14738_v40, %s14229_s5 }
 0x314   : > { %977 = vrot.lane.b32.xlu1 %v14743_v43, %s14227_s14 }
 0x317   : > { %891 = vrot.lane.b32.xlu0 %v14752_v24, %s14225_s11 }
 0x318   : > { %1025 = vrot.lane.b32.xlu1 %v14743_v43, %s14228_s24 }
 0x31b   : > { %939 = vrot.lane.b32.xlu0 %v14752_v24, %s14226_s20 }
 0x31c   : > { %737 = vrot.lane.b32.xlu1 %v14743_v43, %s14229_s5 }
 0x31f   : > { %987 = vrot.lane.b32.xlu0 %v14752_v24, %s14227_s14 }
 0x320   : > { %893 = vrot.lane.b32.xlu1 %v14758_v51, %s14225_s11 }
 0x323   : > { %1035 = vrot.lane.b32.xlu0 %v14752_v24, %s14228_s24 }
 0x324   : > { %941 = vrot.lane.b32.xlu1 %v14758_v51, %s14226_s20 }
 0x327   : > { %747 = vrot.lane.b32.xlu0 %v14752_v24, %s14229_s5 }
 0x328   : > { %989 = vrot.lane.b32.xlu1 %v14758_v51, %s14227_s14 }
 0x32b   : > { %795 = vrot.lane.b32.xlu0 %v14752_v24, %s14230_s10 }
 0x32c   : > { %1037 = vrot.lane.b32.xlu1 %v14758_v51, %s14228_s24 }
 0x32f   : > { %843 = vrot.lane.b32.xlu0 %v14752_v24, %s14231_s12 }
 0x330   : > { %749 = vrot.lane.b32.xlu1 %v14758_v51, %s14229_s5 }
 0x331   : > { %v876_v61 = vpop.permute.xlu0 %875 }
 0x332   : > { %v14884_v62 = vpop.permute.xlu1 %919 }
 0x333   : > { %887 = vrot.lane.b32.xlu0 %v14755_v49, %s14225_s11 }
 0x334   : > { %797 = vrot.lane.b32.xlu1 %v14758_v51, %s14230_s10 }
 0x335   : > { %v924_v63 = vpop.permute.xlu0 %923 }
 0x336   : > { %v878_v2 = vpop.permute.xlu1 %877 }
 0x337   : > { %935 = vrot.lane.b32.xlu0 %v14755_v49, %s14226_s20 }
 0x338   : > { %845 = vrot.lane.b32.xlu1 %v14758_v51, %s14231_s12 }
 0x339   : > { %v972_v3 = vpop.permute.xlu0 %971 }
 0x33a   : > { %v926_v7 = vpop.permute.xlu1 %925  ;;  %v1695_v0 = vcombine.low %v876_v61, %v972_v3  ;;  %v1696_v26 = vcombine.high %v876_v61, %v972_v3 }
 0x33b   : > { %983 = vrot.lane.b32.xlu0 %v14755_v49, %s14227_s14 }
 0x33c   : > { %889 = vrot.lane.b32.xlu1 %v14763_v44, %s14225_s11  ;;  %v1703_v31 = vrot.slane %v1695_v0, %v14902_v18  ;;  %v1710_v20 = vrot.slane %v1696_v26, %v14902_v18 }
 0x33d   : > { %v1020_v54 = vpop.permute.xlu0 %1019 }
 0x33e   : > { %v974_v9 = vpop.permute.xlu1 %973  ;;  %v1711_v14 = vcombine.low %v924_v63, %v1020_v54  ;;  %v1712_v1 = vcombine.high %v924_v63, %v1020_v54 }
 0x33f   : > { %1031 = vrot.lane.b32.xlu0 %v14755_v49, %s14228_s24  ;;  %v1899_v27 = vcombine.low %v878_v2, %v974_v9  ;;  %v1900_v32 = vcombine.high %v878_v2, %v974_v9 }
 0x340   : > { %937 = vrot.lane.b32.xlu1 %v14763_v44, %s14226_s20  ;;  %v1719_v10 = vrot.slane %v1711_v14, %v14902_v18  ;;  %v1726_v23 = vrot.slane %v1712_v1, %v14902_v18 }
 0x341   : > { %v732_v15 = vpop.permute.xlu0 %731  ;;  %v1907_v41 = vrot.slane %v1899_v27, %v14902_v18  ;;  %v1914_v50 = vrot.slane %v1900_v32, %v14902_v18 }
 0x342   : > { %v1022_v19 = vpop.permute.xlu1 %1021  ;;  %v1759_v47 = vcombine.low %v1703_v31, %v1719_v10  ;;  %v1760_v38 = vcombine.high %v1703_v31, %v1719_v10  ;;  %v1775_v46 = vcombine.low %v1710_v20, %v1726_v23  ;;  %v1776_v48 = vcombine.high %v1710_v20, %v1726_v23 }
 0x343   : > { %v1915_v16 = vcombine.low %v926_v7, %v1022_v19  ;;  %743 = vrot.lane.b32.xlu0 %v14755_v49, %s14229_s5  ;;  %v1916_v11 = vcombine.high %v926_v7, %v1022_v19 }
 0x344   : > { %985 = vrot.lane.b32.xlu1 %v14763_v44, %s14227_s14  ;;  %v1767_v63 = vrot.slane %v1759_v47, %v14913_v35  ;;  %v1774_v2 = vrot.slane %v1760_v38, %v14913_v35  ;;  %v1783_v54 = vrot.slane %v1775_v46, %v14913_v35  ;;  %v1790_v55 = vrot.slane %v1776_v48, %v14913_v35 }
 0x345   : > { %v780_v30 = vpop.permute.xlu0 %779  ;;  %v1923_v33 = vrot.slane %v1915_v16, %v14902_v18  ;;  %v1930_v39 = vrot.slane %v1916_v11, %v14902_v18 }
 0x346   : > { %v14911_v17 = vpop.permute.xlu1 %733  ;;  %v1663_v58 = vcombine.low %v14721_v21, %v780_v30  ;;  %v1664_v5 = vcombine.high %v14721_v21, %v780_v30  ;;  %v12721_v10 = vcombine.high %v1767_v63, %v1774_v2  ;;  %v12723_v11 = vcombine.low %v1783_v54, %v1790_v55 }
 0x347   : > { %791 = vrot.lane.b32.xlu0 %v14755_v49, %s14230_s10  ;;  %v1963_v29 = vcombine.low %v1907_v41, %v1923_v33  ;;  %v1964_v56 = vcombine.high %v1907_v41, %v1923_v33  ;;  %v1979_v3 = vcombine.low %v1914_v50, %v1930_v39  ;;  %v1980_v4 = vcombine.high %v1914_v50, %v1930_v39 }
 0x348   : > { %1033 = vrot.lane.b32.xlu1 %v14763_v44, %s14228_s24  ;;  %v1671_v13 = vrot.slane %v1663_v58, %v14902_v18  ;;  %v1678_v19 = vrot.slane %v1664_v5, %v14902_v18  ;;  %v12725_v27 = vcombine.high %v1783_v54, %v1790_v55 }
 0x349   : > { %v828_v42 = vpop.permute.xlu0 %827  ;;  %v1971_v9 = vrot.slane %v1963_v29, %v14913_v35  ;;  %v1978_v12 = vrot.slane %v1964_v56, %v14913_v35  ;;  %v1987_v0 = vrot.slane %v1979_v3, %v14913_v35  ;;  %v1994_v1 = vrot.slane %v1980_v4, %v14913_v35 }
 0x34a   : > { %v1679_v36 = vcombine.low %v732_v15, %v828_v42  ;;  %v14924_v52 = vpop.permute.xlu1 %781  ;;  %v1680_v61 = vcombine.high %v732_v15, %v828_v42  ;;  %v12719_v15 = vcombine.low %v1767_v63, %v1774_v2  ;;  %v14969_v29 = vrot.slane %v12723_v11, %v14902_v18 }
 0x34b   : > { %839 = vrot.lane.b32.xlu0 %v14755_v49, %s14231_s12  ;;  %v12727_v31 = vcombine.low %v1971_v9, %v1978_v12  ;;  %v12729_v47 = vcombine.high %v1971_v9, %v1978_v12  ;;  %v12731_v38 = vcombine.low %v1987_v0, %v1994_v1  ;;  %v12733_v41 = vcombine.high %v1987_v0, %v1994_v1 }
 0x34c   : > { %745 = vrot.lane.b32.xlu1 %v14763_v44, %s14229_s5  ;;  %v1687_v6 = vrot.slane %v1679_v36, %v14902_v18  ;;  %v1694_v14 = vrot.slane %v1680_v61, %v14902_v18  ;;  %v14956_v20 = vrot.slane %v12719_v15, %v14902_v18  ;;  %v1867_v48 = vcombine.low %v14731_v25, %v14924_v52 }
 0x34d   : > { %v14935_v7 = vpop.permute.xlu0 %871  ;;  %v14966_v36 = vrot.slane %v12721_v10, %v14902_v18  ;;  %20909 = vst [vmem:[#allocation31_spill] sm:$0xff] %v14969_v29  ;;  %v1868_v56 = vcombine.high %v14731_v25, %v14924_v52  ;;  %v14977_v61 = vrot.slane %v12727_v31, %v14902_v18  ;;  %v14989_v4 = vrot.slane %v12729_v47, %v14902_v18 }
 0x34e   : > { %v830_v8 = vpop.permute.xlu1 %829  ;;  %v1727_v22 = vcombine.low %v1671_v13, %v1687_v6  ;;  %v1728_v16 = vcombine.high %v1671_v13, %v1687_v6  ;;  %v1743_v23 = vcombine.low %v1678_v19, %v1694_v14  ;;  %v1744_v32 = vcombine.high %v1678_v19, %v1694_v14  ;;  %20907 = vst [vmem:[#allocation29_spill] sm:$0xff] %v14956_v20 }
 0x34f   : > { %899 = vrot.lane.b32.xlu0 %v14772_v28, %s14225_s11  ;;  %v1883_v33 = vcombine.low %v14911_v17, %v830_v8  ;;  %v1884_v39 = vcombine.high %v14911_v17, %v830_v8  ;;  %20908 = vst [vmem:[#allocation30_spill] sm:$0xff] %v14966_v36  ;;  %v14972_v17 = vrot.slane %v12725_v27, %v14902_v18  ;;  %20911 = vst [vmem:[#allocation33_spill] sm:$0xff] %v14977_v61 }
 0x350   : > { %793 = vrot.lane.b32.xlu1 %v14763_v44, %s14230_s10  ;;  %v1735_v42 = vrot.slane %v1727_v22, %v14913_v35  ;;  %v1742_v46 = vrot.slane %v1728_v16, %v14913_v35  ;;  %v14980_v63 = vrot.slane %v1743_v23, %v14913_v35  ;;  %v14983_v2 = vrot.slane %v1744_v32, %v14913_v35 }
 0x351   : > { %v968_v26 = vpop.permute.xlu0 %967  ;;  %20910 = vst [vmem:[#allocation32_spill] sm:$0xff] %v14972_v17  ;;  %v1891_v3 = vrot.slane %v1883_v33, %v14902_v18  ;;  %20912 = vst [vmem:[#allocation34_spill] sm:$0xff] %v14989_v4  ;;  %v14992_v52 = vrot.slane %v12731_v38, %v14902_v18  ;;  %v1898_v5 = vrot.slane %v1884_v39, %v14902_v18 }
 0x352   : > { %v14950_v30 = vpop.permute.xlu1 %873  ;;  %v1287_v6 = vcombine.low %v14935_v7, %v968_v26  ;;  %v14999_v54 = vrot.slane %v12733_v41, %v14902_v18  ;;  %v12718_v55 = vcombine.low %v1735_v42, %v1742_v46  ;;  %v1875_v8 = vrot.slane %v1867_v48, %v14902_v18 }
 0x353   : > { %947 = vrot.lane.b32.xlu0 %v14772_v28, %s14226_s20  ;;  %20913 = vst [vmem:[#allocation35_spill] sm:$0xff] %v14992_v52  ;;  %v1288_v9 = vcombine.high %v14935_v7, %v968_v26  ;;  %v12720_v13 = vcombine.high %v1735_v42, %v1742_v46  ;;  %v1882_v14 = vrot.slane %v1868_v56, %v14902_v18 }
 0x354   : > { %841 = vrot.lane.b32.xlu1 %v14763_v44, %s14231_s12  ;;  %20914 = vst [vmem:[#allocation36_spill] sm:$0xff] %v14999_v54  ;;  %v12722_v19 = vcombine.low %v14980_v63, %v14983_v2  ;;  %v12724_v22 = vcombine.high %v14980_v63, %v14983_v2  ;;  %v1931_v16 = vcombine.low %v1875_v8, %v1891_v3 }
 0x355   : > { %v1016_v50 = vpop.permute.xlu0 %1015  ;;  %v1932_v10 = vcombine.high %v1875_v8, %v1891_v3  ;;  %v1947_v7 = vcombine.low %v1882_v14, %v1898_v5  ;;  %v1295_v26 = vrot.slane %v1287_v6, %v14902_v18  ;;  %v1948_v31 = vcombine.high %v1882_v14, %v1898_v5 }
 0x356   : > { %v922_v58 = vpop.permute.xlu1 %921  ;;  %v1303_v15 = vcombine.low %v14884_v62, %v1016_v50  ;;  %v1304_v0 = vcombine.high %v14884_v62, %v1016_v50  ;;  %v15020_v62 = vrot.slane %v12718_v55, %v14902_v18  ;;  %v1302_v23 = vrot.slane %v1288_v9, %v14902_v18 }
 0x357   : > { %995 = vrot.lane.b32.xlu0 %v14772_v28, %s14227_s14  ;;  %v15027_v47 = vrot.slane %v12720_v13, %v14902_v18  ;;  %v1939_v63 = vrot.slane %v1931_v16, %v14913_v35  ;;  %v1946_v2 = vrot.slane %v1932_v10, %v14913_v35  ;;  %v15045_v9 = vrot.slane %v1948_v31, %v14913_v35 }
 0x358   : > { %901 = vrot.lane.b32.xlu1 %v14778_v57, %s14225_s11  ;;  %v1311_v11 = vrot.slane %v1303_v15, %v14902_v18  ;;  %v1318_v27 = vrot.slane %v1304_v0, %v14902_v18 }
 0x359   : > { %v15003_v12 = vpop.permute.xlu0 %727 }
 0x35a   : > { %v970_v1 = vpop.permute.xlu1 %969  ;;  %v1351_v38 = vcombine.low %v1295_v26, %v1311_v11  ;;  %v1352_v39 = vcombine.high %v1295_v26, %v1311_v11  ;;  %v1367_v46 = vcombine.low %v1302_v23, %v1318_v27  ;;  %v1368_v48 = vcombine.high %v1302_v23, %v1318_v27 }
 0x35b   : > { %1043 = vrot.lane.b32.xlu0 %v14772_v28, %s14228_s24  ;;  %v1491_v32 = vcombine.low %v14950_v30, %v970_v1  ;;  %v1492_v41 = vcombine.high %v14950_v30, %v970_v1  ;;  %v15039_v30 = vrot.slane %v1947_v7, %v14913_v35  ;;  %v15055_v26 = vrot.slane %v12722_v19, %v14902_v18 }
 0x35c   : > { %949 = vrot.lane.b32.xlu1 %v14778_v57, %s14226_s20  ;;  %v1359_v3 = vrot.slane %v1351_v38, %v14913_v35  ;;  %v1366_v5 = vrot.slane %v1352_v39, %v14913_v35  ;;  %v1375_v1 = vrot.slane %v1367_v46, %v14913_v35  ;;  %v1382_v16 = vrot.slane %v1368_v48, %v14913_v35 }
 0x35d   : > { %v15024_v33 = vpop.permute.xlu0 %775  ;;  %v1499_v6 = vrot.slane %v1491_v32, %v14902_v18  ;;  %v1506_v13 = vrot.slane %v1492_v41, %v14902_v18  ;;  %v15058_v11 = vrot.slane %v12724_v22, %v14902_v18  ;;  %v12726_v32 = vcombine.low %v1939_v63, %v1946_v2 }
 0x35e   : > { %v1018_v42 = vpop.permute.xlu1 %1017  ;;  %v12703_v15 = vcombine.low %v1359_v3, %v1366_v5  ;;  %v12705_v0 = vcombine.high %v1359_v3, %v1366_v5  ;;  %v12728_v38 = vcombine.high %v1939_v63, %v1946_v2  ;;  %v12707_v63 = vcombine.low %v1375_v1, %v1382_v16 }
 0x35f   : > { %v1507_v50 = vcombine.low %v922_v58, %v1018_v42  ;;  %v1508_v56 = vcombine.high %v922_v58, %v1018_v42  ;;  %895 = vrot.lane.b32.xlu0 %v14775_v53, %s14225_s11  ;;  %v12709_v2 = vcombine.high %v1375_v1, %v1382_v16  ;;  %v1255_v3 = vcombine.low %v14724_v34, %v15024_v33 }
 0x360   : > { %997 = vrot.lane.b32.xlu1 %v14778_v57, %s14227_s14  ;;  %v15072_v46 = vrot.slane %v12703_v15, %v14902_v18  ;;  %v15075_v48 = vrot.slane %v12705_v0, %v14902_v18  ;;  %v4903_v15 = vcombine.low %v14969_v29, %v14972_v17 }
 0x361   : > { %v1515_v58 = vrot.slane %v1507_v50, %v14902_v18  ;;  %v1522_v55 = vrot.slane %v1508_v56, %v14902_v18  ;;  %v824_v8 = vpop.permute.xlu0 %823  ;;  %v12730_v50 = vcombine.low %v15039_v30, %v15045_v9 }
 0x362   : > { %v15048_v14 = vpop.permute.xlu1 %729  ;;  %v1271_v39 = vcombine.low %v15003_v12, %v824_v8  ;;  %20915 = vst [vmem:[#allocation37_spill] sm:$0xff] %v15072_v46  ;;  %20916 = vst [vmem:[#allocation38_spill] sm:$0xff] %v15075_v48  ;;  %v1272_v56 = vcombine.high %v15003_v12, %v824_v8  ;;  %v1256_v12 = vcombine.high %v14724_v34, %v15024_v33 }
 0x363   : > { %v1555_v10 = vcombine.low %v1499_v6, %v1515_v58  ;;  %v1556_v7 = vcombine.high %v1499_v6, %v1515_v58  ;;  %943 = vrot.lane.b32.xlu0 %v14775_v53, %s14226_s20  ;;  %v1571_v27 = vcombine.low %v1506_v13, %v1522_v55  ;;  %v1572_v31 = vcombine.high %v1506_v13, %v1522_v55 }
 0x364   : > { %1045 = vrot.lane.b32.xlu1 %v14778_v57, %s14228_s24  ;;  %v4871_v58 = vcombine.low %v14956_v20, %v14966_v36  ;;  %v15093_v8 = vrot.slane %v12707_v63, %v14902_v18  ;;  %v15096_v13 = vrot.slane %v12709_v2, %v14902_v18  ;;  %v15101_v0 = vrot.slane %v1271_v39, %v14902_v18 }
 0x365   : > { %v15065_v41 = vpop.permute.xlu0 %883  ;;  %v1563_v19 = vrot.slane %v1555_v10, %v14913_v35  ;;  %v1570_v42 = vrot.slane %v1556_v7, %v14913_v35  ;;  %v1579_v5 = vrot.slane %v1571_v27, %v14913_v35  ;;  %v1586_v6 = vrot.slane %v1572_v31, %v14913_v35 }
 0x366   : > { %v15069_v22 = vpop.permute.xlu1 %777  ;;  %20917 = vst [vmem:[#allocation39_spill] sm:$0xff] %v15093_v8  ;;  %20918 = vst [vmem:[#allocation40_spill] sm:$0xff] %v15096_v13  ;;  %v15108_v7 = vrot.slane %v12726_v32, %v14902_v18  ;;  %v15113_v31 = vrot.slane %v1272_v56, %v14902_v18  ;;  %v15120_v63 = vrot.slane %v12728_v38, %v14902_v18 }
 0x367   : > { %991 = vrot.lane.b32.xlu0 %v14775_v53, %s14227_s14  ;;  %v12711_v10 = vcombine.low %v1563_v19, %v1570_v42  ;;  %v12713_v33 = vcombine.high %v1563_v19, %v1570_v42  ;;  %v15123_v19 = vrot.slane %v12730_v50, %v14902_v18  ;;  %v1263_v32 = vrot.slane %v1255_v3, %v14902_v18 }
 0x368   : > { %897 = vrot.lane.b32.xlu1 %v14783_v59, %s14225_s11  ;;  %v12715_v42 = vcombine.low %v1579_v5, %v1586_v6  ;;  %v15129_v56 = vrot.slane %v1256_v12, %v14902_v18  ;;  %v4599_v16 = vcombine.low %v15072_v46, %v15075_v48  ;;  %v12717_v23 = vcombine.high %v1579_v5, %v1586_v6  ;;  %s21592_s11 = sld [smem:[#allocation17_spill]] }
 0x369   : > { %v932_v55 = vpop.permute.xlu0 %931  ;;  %v15134_v39 = vrot.slane %v12711_v10, %v14902_v18  ;;  %v15137_v38 = vrot.slane %v12713_v33, %v14902_v18  ;;  %v1319_v50 = vcombine.low %v1263_v32, %v15101_v0  ;;  %v15143_v27 = vrot.slane %v4871_v58, %v14913_v35 }
 0x36a   : > { %v15103_v1 = vpop.permute.xlu1 %825  ;;  %v15146_v12 = vrot.slane %v4903_v15, %v14913_v35  ;;  %v1320_v29 = vcombine.high %v1263_v32, %v15101_v0  ;;  %v1335_v10 = vcombine.low %v15129_v56, %v15113_v31  ;;  %v4631_v5 = vcombine.low %v15093_v8, %v15096_v13 }
 0x36b   : > { %1039 = vrot.lane.b32.xlu0 %v14775_v53, %s14228_s24  ;;  %20919 = vst [vmem:[#allocation41_spill] sm:$0xff] %v15134_v39  ;;  %20920 = vst [vmem:[#allocation42_spill] sm:$0xff] %v15137_v38  ;;  %v1459_v6 = vcombine.low %v14792_v60, %v15069_v22  ;;  %v1460_v58 = vcombine.high %v14792_v60, %v15069_v22  ;;  %v15165_v0 = vrot.slane %v12715_v42, %v14902_v18 }
 0x36c   : > { %945 = vrot.lane.b32.xlu1 %v14783_v59, %s14226_s20  ;;  %v1475_v32 = vcombine.low %v15048_v14, %v15103_v1  ;;  %v1476_v33 = vcombine.high %v15048_v14, %v15103_v1  ;;  %v15172_v20 = vrot.slane %v4599_v16, %v14913_v35  ;;  %v4735_v22 = vcombine.low %v15134_v39, %v15137_v38  ;;  %s12970_s20 = sshll.u32 %s21591_s18, 4 }
 0x36d   : > { %v980_v2 = vpop.permute.xlu0 %979  ;;  %20921 = vst [vmem:[#allocation43_spill] sm:$0xff] %v15165_v0  ;;  %v15179_v42 = vrot.slane %v12717_v23, %v14902_v18  ;;  %v15187_v14 = vrot.slane %v4631_v5, %v14913_v35  ;;  %v5007_v1 = vcombine.low %v14977_v61, %v14989_v4 }
 0x36e   : > { %v15140_v3 = vpop.permute.xlu1 %885  ;;  %v2511_v15 = vcombine.low %v15065_v41, %v980_v2  ;;  %v2512_v46 = vcombine.high %v15065_v41, %v980_v2  ;;  %v15203_v5 = vrot.slane %v4735_v22, %v14913_v35  ;;  %v1334_v41 = vrot.slane %v1320_v29, %v14913_v35 }
 0x36f   : > { %783 = vrot.lane.b32.xlu0 %v14738_v40, %s14230_s10  ;;  %20922 = vst [vmem:[#allocation44_spill] sm:$0xff] %v15179_v42  ;;  %v4767_v16 = vcombine.low %v15165_v0, %v15179_v42  ;;  %v15206_v48 = vrot.slane %v5007_v1, %v14913_v35  ;;  %v1474_v29 = vrot.slane %v1460_v58, %v14902_v18 }
 0x370   : > { %993 = vrot.lane.b32.xlu1 %v14783_v59, %s14227_s14  ;;  %v2519_v23 = vrot.slane %v2511_v15, %v14902_v18  ;;  %v2526_v22 = vrot.slane %v2512_v46, %v14902_v18  ;;  %s12971_s14 = sshll.u32 %s21592_s11, 5 }
 0x371   : > { %v1028_v17 = vpop.permute.xlu0 %1027 }
 0x372   : > { %v2527_v36 = vcombine.low %v932_v55, %v1028_v17  ;;  %v2528_v13 = vcombine.high %v932_v55, %v1028_v17  ;;  %v15176_v8 = vpop.permute.xlu1 %933  ;;  %v5039_v17 = vcombine.low %v14992_v52, %v14999_v54  ;;  %v1327_v52 = vrot.slane %v1319_v50, %v14913_v35 }
 0x373   : > { %831 = vrot.lane.b32.xlu0 %v14738_v40, %s14231_s12  ;;  %v15216_v54 = vrot.slane %v1335_v10, %v14913_v35  ;;  %v1467_v50 = vrot.slane %v1459_v6, %v14902_v18  ;;  %v1490_v10 = vrot.slane %v1476_v33, %v14902_v18 }
 0x374   : > { %v2535_v55 = vrot.slane %v2527_v36, %v14902_v18  ;;  %1041 = vrot.lane.b32.xlu1 %v14783_v59, %s14228_s24  ;;  %v2542_v2 = vrot.slane %v2528_v13, %v14902_v18  ;;  %v15209_v36 = vrot.slane %v5039_v17, %v14913_v35  ;;  %v1483_v13 = vrot.slane %v1475_v32, %v14902_v18  ;;  %s12552_s24 = sadd.s32 %s12971_s14, %s12970_s20 }
 0x375   : > { %v15211_v15 = vpop.permute.xlu0 %879  ;;  %v15223_v17 = vrot.slane %v4767_v16, %v14913_v35  ;;  %v4651_v32 = vcombine.low %v15172_v20, %v15187_v14  ;;  %v12702_v33 = vcombine.low %v1327_v52, %v1334_v41  ;;  %v12704_v38 = vcombine.high %v1327_v52, %v1334_v41 }
 0x376   : > { %v15219_v61 = vpop.permute.xlu1 %981  ;;  %v2575_v1 = vcombine.low %v2519_v23, %v2535_v55  ;;  %v2576_v4 = vcombine.high %v2519_v23, %v2535_v55  ;;  %v2591_v46 = vcombine.low %v2526_v22, %v2542_v2  ;;  %v2592_v23 = vcombine.high %v2526_v22, %v2542_v2 }
 0x377   : > { %739 = vrot.lane.b32.xlu0 %v14815_v37, %s14229_s5  ;;  %v4787_v55 = vcombine.low %v15203_v5, %v15223_v17  ;;  %v5059_v16 = vcombine.low %v15206_v48, %v15209_v36  ;;  %v1523_v6 = vcombine.low %v1467_v50, %v1483_v13  ;;  %v1524_v58 = vcombine.high %v1467_v50, %v1483_v13 }
 0x378   : > { %785 = vrot.lane.b32.xlu1 %v14743_v43, %s14230_s10  ;;  %v2583_v39 = vrot.slane %v2575_v1, %v14913_v35  ;;  %v2590_v44 = vrot.slane %v2576_v4, %v14913_v35  ;;  %v4923_v2 = vcombine.low %v15143_v27, %v15146_v12  ;;  %v20923_v22 = vcombine.high %v15129_v56, %v15113_v31 }
 0x379   : > { %v15238_v42 = vpop.permute.xlu0 %927  ;;  %v7815_v49 = vpack.c.bf16 %v4787_v55, %v4651_v32  ;;  %v1539_v50 = vcombine.low %v1474_v29, %v1490_v10  ;;  %v1540_v40 = vcombine.high %v1474_v29, %v1490_v10  ;;  %v2715_v52 = vcombine.low %v15140_v3, %v15219_v61 }
 0x37a   : > { %v15240_v0 = vpop.permute.xlu1 %1029  ;;  %v1350_v13 = vrot.slane %v20923_v22, %v14913_v35  ;;  %v15257_v4 = vrot.slane %v2591_v46, %v14913_v35  ;;  %v15260_v41 = vrot.slane %v2592_v23, %v14913_v35  ;;  %v7816_v31 = vpack.c.bf16 %v5059_v16, %v4923_v2 }
 0x37b   : > { %787 = vrot.lane.b32.xlu0 %v14815_v37, %s14230_s10  ;;  %13419 = vmatprep.subr.msk.bf16.mxu1 %vm7887_vm1, %v7815_v49  ;;  %v7901_v1 = vsel %vm7887_vm1, %v7815_v49, 0  ;;  %v20924_v29 = vcombine.high %v15039_v30, %v15045_v9  ;;  %v1531_v32 = vrot.slane %v1523_v6, %v14913_v35  ;;  %v15276_v23 = vrot.slane %v12702_v33, %v14902_v18 }
 0x37c   : > { %833 = vrot.lane.b32.xlu1 %v14743_v43, %s14231_s12  ;;  %13144 = vmatpush3.bf16.xpose.msra.mxu1 %v7901_v1  ;;  %v15279_v55 = vrot.slane %v12704_v38, %v14902_v18  ;;  %v1538_v49 = vrot.slane %v1524_v58, %v14913_v35  ;;  %v12751_v16 = vcombine.low %v2583_v39, %v2590_v44 }
 0x37d   : > { %v15264_v56 = vpop.permute.xlu0 %975  ;;  %v15270_v10 = vrot.slane %v20924_v29, %v14902_v18  ;;  %20925 = vst [vmem:[#allocation45_spill] sm:$0xff] %v15276_v23  ;;  %13420 = vmatprep.subr.msk.bf16.mxu1 %vm7887_vm1, %v7816_v31  ;;  %v2716_v30 = vcombine.high %v15140_v3, %v15219_v61  ;;  %v2731_v9 = vcombine.low %v15176_v8, %v15240_v0 }
 0x37e   : > { %v15273_v46 = vpop.permute.xlu1 %881  ;;  %20926 = vst [vmem:[#allocation46_spill] sm:$0xff] %v15279_v55  ;;  %v1547_v6 = vrot.slane %v1539_v50, %v14913_v35  ;;  %v1554_v2 = vrot.slane %v1540_v40, %v14913_v35  ;;  %v12706_v38 = vcombine.low %v15216_v54, %v1350_v13  ;;  %v12708_v58 = vcombine.high %v15216_v54, %v1350_v13 }
 0x37f   : > { %835 = vrot.lane.b32.xlu0 %v14815_v37, %s14231_s12  ;;  %v12753_v33 = vcombine.high %v2583_v39, %v2590_v44  ;;  %v15298_v3 = vrot.slane %v2715_v52, %v14902_v18  ;;  %v4583_v44 = vcombine.low %v15276_v23, %v15279_v55  ;;  %v15315_v13 = vrot.slane %v12751_v16, %v14902_v18 }
 0x380   : > { %741 = vrot.lane.b32.xlu1 %v14826_v45, %s14229_s5  ;;  %v15303_v50 = vrot.slane %v12706_v38, %v14902_v18  ;;  %v15306_v1 = vrot.slane %v12708_v58, %v14902_v18  ;;  %v15318_v52 = vrot.slane %v2716_v30, %v14902_v18  ;;  %v2732_v29 = vcombine.high %v15176_v8, %v15240_v0 }
 0x381   : > { %v1024_v40 = vpop.permute.xlu0 %1023  ;;  %20929 = vst [vmem:[#allocation49_spill] sm:$0xff] %v15315_v13  ;;  %v15323_v38 = vrot.slane %v2731_v9, %v14902_v18  ;;  %v15326_v58 = vrot.slane %v4583_v44, %v14913_v35  ;;  %v12710_v16 = vcombine.low %v1531_v32, %v1538_v49  ;;  %v15335_v30 = vrot.slane %v12753_v33, %v14902_v18 }
 0x382   : > { %20927 = vst [vmem:[#allocation47_spill] sm:$0xff] %v15303_v50  ;;  %20928 = vst [vmem:[#allocation48_spill] sm:$0xff] %v15306_v1  ;;  %v15312_v39 = vpop.permute.xlu1 %929  ;;  %v4615_v54 = vcombine.low %v15303_v50, %v15306_v1  ;;  %v7904_v8 = vsel %vm7887_vm1, %v7816_v31, 0  ;;  %v2103_v0 = vcombine.low %v15211_v15, %v15264_v56  ;;  %v2104_v9 = vcombine.high %v15211_v15, %v15264_v56 }
 0x383   : > { %20930 = vst [vmem:[#allocation50_spill] sm:$0xff] %v15326_v58  ;;  %751 = vrot.lane.b32.xlu0 %v14775_v53, %s14229_s5  ;;  %20931 = vst [vmem:[#allocation51_spill] sm:$0xff] %v15335_v30  ;;  %v15350_v33 = vrot.slane %v12710_v16, %v14902_v18  ;;  %v12712_v22 = vcombine.high %v1531_v32, %v1538_v49  ;;  %v12714_v31 = vcombine.low %v1547_v6, %v1554_v2 }
 0x384   : > { %789 = vrot.lane.b32.xlu1 %v14826_v45, %s14230_s10  ;;  %13146 = vmatpush3.bf16.xpose.msra.mxu1 %v7904_v8  ;;  %v15347_v61 = vrot.slane %v4615_v54, %v14913_v35  ;;  %v15353_v50 = vrot.slane %v2732_v29, %v14902_v18  ;;  %v12716_v55 = vcombine.high %v1547_v6, %v1554_v2 }
 0x385   : > { %v15344_v44 = vpop.permute.xlu0 %735  ;;  %20934 = vst [vmem:[#allocation54_spill] sm:$0xff] %v15350_v33  ;;  %v2119_v15 = vcombine.low %v15238_v42, %v1024_v40  ;;  %v2120_v56 = vcombine.high %v15238_v42, %v1024_v40  ;;  %v2779_v8 = vcombine.low %v15298_v3, %v15323_v38  ;;  %v15362_v16 = vrot.slane %v12712_v22, %v14902_v18 }
 0x386   : > { %20932 = vst [vmem:[#allocation52_spill] sm:$0xff] %v15344_v44  ;;  %20933 = vst [vmem:[#allocation53_spill] sm:$0xff] %v15347_v61  ;;  %v978_v1 = vpop.permute.xlu1 %977  ;;  %v15365_v32 = vrot.slane %v12714_v31, %v14902_v18  ;;  %v2111_v49 = vrot.slane %v2103_v0, %v14902_v18  ;;  %v15371_v6 = vrot.slane %v12716_v55, %v14902_v18 }
 0x387   : > { %20935 = vst [vmem:[#allocation55_spill] sm:$0xff] %v15362_v16  ;;  %799 = vrot.lane.b32.xlu0 %v14775_v53, %s14230_s10  ;;  %v2127_v42 = vrot.slane %v2119_v15, %v14902_v18  ;;  %v2134_v2 = vrot.slane %v2120_v56, %v14902_v18  ;;  %v2118_v40 = vrot.slane %v2104_v9, %v14902_v18 }
 0x388   : > { %20936 = vst [vmem:[#allocation56_spill] sm:$0xff] %v15365_v32  ;;  %20937 = vst [vmem:[#allocation57_spill] sm:$0xff] %v15371_v6  ;;  %837 = vrot.lane.b32.xlu1 %v14826_v45, %s14231_s12  ;;  %v4719_v29 = vcombine.low %v15350_v33, %v15362_v16  ;;  %v2307_v55 = vcombine.low %v15273_v46, %v978_v1  ;;  %v4751_v15 = vcombine.low %v15365_v32, %v15371_v6 }
 0x389   : > { %v15377_v22 = vpop.permute.xlu0 %891  ;;  %v2167_v54 = vcombine.low %v2111_v49, %v2127_v42  ;;  %v2168_v23 = vcombine.high %v2111_v49, %v2127_v42  ;;  %v2183_v9 = vcombine.low %v2118_v40, %v2134_v2  ;;  %v2184_v45 = vcombine.high %v2118_v40, %v2134_v2 }
 0x38a   : > { %v1026_v31 = vpop.permute.xlu1 %1025  ;;  %v15390_v44 = vrot.slane %v4719_v29, %v14913_v35  ;;  %v2308_v37 = vcombine.high %v15273_v46, %v978_v1  ;;  %v15396_v0 = vrot.slane %v4751_v15, %v14913_v35  ;;  %v2780_v46 = vcombine.high %v15298_v3, %v15323_v38 }
 0x38b   : > { %847 = vrot.lane.b32.xlu0 %v14775_v53, %s14231_s12  ;;  %v2175_v16 = vrot.slane %v2167_v54, %v14913_v35  ;;  %v2182_v33 = vrot.slane %v2168_v23, %v14913_v35  ;;  %v2323_v56 = vcombine.low %v15312_v39, %v1026_v31  ;;  %v2191_v1 = vrot.slane %v2183_v9, %v14913_v35 }
 0x38c   : > { %20938 = vst [vmem:[#allocation58_spill] sm:$0xff] %v15390_v44  ;;  %20939 = vst [vmem:[#allocation59_spill] sm:$0xff] %v15396_v0  ;;  %757 = vrot.lane.b32.xlu1 %v14778_v57, %s14229_s5  ;;  %v2198_v42 = vrot.slane %v2184_v45, %v14913_v35  ;;  %v2324_v2 = vcombine.high %v15312_v39, %v1026_v31  ;;  %v2795_v23 = vcombine.low %v15318_v52, %v15353_v50 }
 0x38d   : > { %v15403_v49 = vpop.permute.xlu0 %939  ;;  %v4647_v54 = vcombine.low %v15326_v58, %v15347_v61  ;;  %v4783_v29 = vcombine.low %v15390_v44, %v15396_v0  ;;  %v2796_v38 = vcombine.high %v15318_v52, %v15353_v50  ;;  %v2315_v45 = vrot.slane %v2307_v55, %v14902_v18 }
 0x38e   : > { %v15410_v40 = vpop.permute.xlu1 %737  ;;  %v2331_v39 = vrot.slane %v2323_v56, %v14902_v18  ;;  %v2338_v31 = vrot.slane %v2324_v2, %v14902_v18  ;;  %v12735_v9 = vcombine.low %v2175_v16, %v2182_v33  ;;  %v12737_v6 = vcombine.high %v2175_v16, %v2182_v33 }
 0x38f   : > { %20940 = vst [vmem:[#allocation60_spill] sm:$0xff] %v15410_v40  ;;  %755 = vrot.lane.b32.xlu0 %v14772_v28, %s14229_s5  ;;  %v7783_v15 = vpack.c.bf16 %v4783_v29, %v4647_v54  ;;  %v2322_v32 = vrot.slane %v2308_v37, %v14902_v18  ;;  %v12739_v50 = vcombine.low %v2191_v1, %v2198_v42 }
 0x390   : > { %805 = vrot.lane.b32.xlu1 %v14778_v57, %s14230_s10  ;;  %v12741_v52 = vcombine.high %v2191_v1, %v2198_v42  ;;  %v2371_v55 = vcombine.low %v2315_v45, %v2331_v39  ;;  %v2372_v0 = vcombine.high %v2315_v45, %v2331_v39  ;;  %v2787_v2 = vrot.slane %v2779_v8, %v14913_v35 }
 0x391   : > { %v15430_v3 = vpop.permute.xlu0 %987  ;;  %v2794_v44 = vrot.slane %v2780_v46, %v14913_v35  ;;  %13151 = vmatprep.mubr.msk.bf16.mxu1 %vm7887_vm1, %v7783_v15  ;;  %v2387_v33 = vcombine.low %v2322_v32, %v2338_v31  ;;  %v2388_v16 = vcombine.high %v2322_v32, %v2338_v31  ;;  %v2803_v37 = vrot.slane %v2795_v23, %v14913_v35 }
 0x392   : > { %v15432_v56 = vpop.permute.xlu1 %893  ;;  %v2810_v54 = vrot.slane %v2796_v38, %v14913_v35  ;;  %v2379_v29 = vrot.slane %v2371_v55, %v14913_v35  ;;  %v2386_v1 = vrot.slane %v2372_v0, %v14913_v35  ;;  %v15444_v42 = vrot.slane %v12735_v9, %v14902_v18 }
 0x393   : > { %803 = vrot.lane.b32.xlu0 %v14772_v28, %s14230_s10  ;;  %v15447_v8 = vrot.slane %v12737_v6, %v14902_v18  ;;  %v2395_v46 = vrot.slane %v2387_v33, %v14913_v35  ;;  %v2402_v32 = vrot.slane %v2388_v16, %v14913_v35  ;;  %v15454_v38 = vrot.slane %v12739_v50, %v14902_v18 }
 0x394   : > { %20941 = vst [vmem:[#allocation61_spill] sm:$0xff] %v15444_v42  ;;  %753 = vrot.lane.b32.xlu1 %v14783_v59, %s14229_s5  ;;  %v15457_v0 = vrot.slane %v12741_v52, %v14902_v18  ;;  %v12743_v45 = vcombine.low %v2379_v29, %v2386_v1  ;;  %v12745_v39 = vcombine.high %v2379_v29, %v2386_v1  ;;  %s12555_s5 = sshll.u32 %s20437_s9, 4  ;;  %s20468_s5 = int_to_ptr.vmem [resolvable:$true] %s12555_s5 }
 0x395   : > { %20942 = vst [vmem:[#allocation62_spill] sm:$0xff] %v15447_v8  ;;  %v1036_v23 = vpop.permute.xlu0 %1035  ;;  %20943 = vst [vmem:[#allocation63_spill] sm:$0xff] %v15454_v38  ;;  %v20945_v6 = vcombine.low %v15257_v4, %v15260_v41  ;;  %v12759_v9 = vcombine.low %v2787_v2, %v2794_v44  ;;  %v12747_v55 = vcombine.low %v2395_v46, %v2402_v32 }
 0x396   : > { %20944 = vst [vmem:[#allocation64_spill] sm:$0xff] %v15457_v0  ;;  %v15459_v31 = vpop.permute.xlu1 %941  ;;  %v12749_v33 = vcombine.high %v2395_v46, %v2402_v32  ;;  %v12761_v16 = vcombine.high %v2787_v2, %v2794_v44  ;;  %v12763_v61 = vcombine.low %v2803_v37, %v2810_v54  ;;  %v15468_v50 = vrot.slane %v12743_v45, %v14902_v18 }
 0x397   : > { %v15465_v15 = vrot.slane %v20945_v6, %v14902_v18  ;;  %v15471_v52 = vrot.slane %v12745_v39, %v14902_v18  ;;  %851 = vrot.lane.b32.xlu0 %v14772_v28, %s14231_s12  ;;  %v20949_v29 = vcombine.high %v15257_v4, %v15260_v41  ;;  %v12765_v6 = vcombine.high %v2803_v37, %v2810_v54 }
 0x398   : > { %20947 = vst [vmem:[#allocation66_spill] sm:$0xff] %v15468_v50  ;;  %v15482_v46 = vrot.slane %v12747_v55, %v14902_v18  ;;  %v15485_v44 = vrot.slane %v12749_v33, %v14902_v18  ;;  %801 = vrot.lane.b32.xlu1 %v14783_v59, %s14230_s10  ;;  %v4888_v32 = vcombine.high %v15055_v26, %v15058_v11  ;;  %s12972_s10 = sshll.u32 %s12552_s24, 7 }
 0x399   : > { %20946 = vst [vmem:[#allocation65_spill] sm:$0xff] %v15465_v15  ;;  %20948 = vst [vmem:[#allocation67_spill] sm:$0xff] %v15471_v52  ;;  %v15479_v1 = vrot.slane %v20949_v29, %v14902_v18  ;;  %v15489_v2 = vpop.permute.xlu0 %747  ;;  %v4992_v4 = vcombine.high %v15108_v7, %v15120_v63  ;;  %v5143_v37 = vcombine.low %v15444_v42, %v15447_v8 }
 0x39a   : > { %20951 = vst [vmem:[#allocation69_spill] sm:$0xff] %v15482_v46  ;;  %20952 = vst [vmem:[#allocation70_spill] sm:$0xff] %v15485_v44  ;;  %v15495_v41 = vpop.permute.xlu1 %989  ;;  %v5175_v54 = vcombine.low %v15454_v38, %v15457_v0  ;;  %v5024_v45 = vcombine.high %v15123_v19, %v15270_v10  ;;  %v3343_v39 = vcombine.low %v15403_v49, %v1036_v23 }
 0x39b   : > { %20950 = vst [vmem:[#allocation68_spill] sm:$0xff] %v15479_v1  ;;  %v5279_v55 = vcombine.low %v15468_v50, %v15471_v52  ;;  %v5311_v33 = vcombine.low %v15482_v46, %v15485_v44  ;;  %v15509_v29 = vrot.slane %v12759_v9, %v14902_v18  ;;  %v15512_v58 = vrot.slane %v12761_v16, %v14902_v18 }
 0x39c   : > { %v15515_v42 = vrot.slane %v12763_v61, %v14902_v18  ;;  %1063 = vrot.lane.b32.xlu0 %v14724_v34, %s14234_s30  ;;  %v5415_v38 = vcombine.low %v15315_v13, %v15335_v30  ;;  %v15522_v50 = vrot.slane %v12765_v6, %v14902_v18  ;;  %v3327_v9 = vcombine.low %v15377_v22, %v15430_v3 }
 0x39d   : > { %20953 = vst [vmem:[#allocation71_spill] sm:$0xff] %v15509_v29  ;;  %20954 = vst [vmem:[#allocation72_spill] sm:$0xff] %v15512_v58  ;;  %v3344_v46 = vcombine.high %v15403_v49, %v1036_v23  ;;  %849 = vrot.lane.b32.xlu1 %v14783_v59, %s14231_s12  ;;  %v796_v61 = vpop.permute.xlu0 %795  ;;  %v5447_v16 = vcombine.low %v15465_v15, %v15479_v1  ;;  %v15534_v52 = vrot.slane %v5143_v37, %v14913_v35 }
 0x39e   : > { %20955 = vst [vmem:[#allocation73_spill] sm:$0xff] %v15515_v42  ;;  %20956 = vst [vmem:[#allocation74_spill] sm:$0xff] %v15522_v50  ;;  %v15531_v44 = vpop.permute.xlu1 %1037  ;;  %v15537_v6 = vrot.slane %v5175_v54, %v14913_v35  ;;  %v15540_v13 = vrot.slane %v5279_v55, %v14913_v35  ;;  %v15543_v49 = vrot.slane %v5311_v33, %v14913_v35 }
 0x39f   : > { %v20957_v23 = vcombine.high %v15020_v62, %v15027_v47  ;;  %v3328_v15 = vcombine.high %v15377_v22, %v15430_v3  ;;  %v3351_v37 = vrot.slane %v3343_v39, %v14902_v18  ;;  %v15555_v54 = vrot.slane %v4888_v32, %v14913_v35 }
 0x3a0   : > { %v15558_v55 = vrot.slane %v4992_v4, %v14913_v35  ;;  %v15561_v33 = vrot.slane %v5024_v45, %v14913_v35  ;;  %1111 = vrot.lane.b32.xlu0 %v14724_v34, %s14235_s15  ;;  %v3335_v22 = vrot.slane %v3327_v9, %v14902_v18  ;;  %v15570_v3 = vrot.slane %v3344_v46, %v14902_v18 }
 0x3a1   : > { %v15549_v30 = vrot.slane %v20957_v23, %v14913_v35  ;;  %20959 = vst [vmem:[#allocation76_spill] sm:$0xff] %v15555_v54  ;;  %v15566_v23 = vrot.slane %v5415_v38, %v14913_v35  ;;  %v3295_v32 = vcombine.low %v14752_v24, %v796_v61  ;;  %853 = vrot.lane.b32.xlu1 %v14778_v57, %s14231_s12  ;;  %v844_v45 = vpop.permute.xlu0 %843 }
 0x3a2   : > { %20960 = vst [vmem:[#allocation77_spill] sm:$0xff] %v15558_v55  ;;  %20961 = vst [vmem:[#allocation78_spill] sm:$0xff] %v15561_v33  ;;  %v15576_v4 = vrot.slane %v5447_v16, %v14913_v35  ;;  %v5195_v39 = vcombine.low %v15534_v52, %v15537_v6  ;;  %v5331_v38 = vcombine.low %v15540_v13, %v15543_v49  ;;  %v15586_v55 = vpop.permute.xlu1 %749 }
 0x3a3   : > { %20958 = vst [vmem:[#allocation75_spill] sm:$0xff] %v15549_v30  ;;  %v5551_v9 = vcombine.low %v15509_v29, %v15512_v58  ;;  %v5583_v46 = vcombine.low %v15515_v42, %v15522_v50  ;;  %v4652_v33 = vcombine.high %v15172_v20, %v15187_v14  ;;  %v15591_v16 = vrot.slane %v3328_v15, %v14902_v18 }
 0x3a4   : > { %v3391_v30 = vcombine.low %v3335_v22, %v3351_v37  ;;  %v3296_v54 = vcombine.high %v14752_v24, %v796_v61  ;;  %v7817_v1 = vpack.c.bf16 %v5331_v38, %v5195_v39  ;;  %v3311_v42 = vcombine.low %v15489_v2, %v844_v45  ;;  %1159 = vrot.lane.b32.xlu0 %v14724_v34, %s14236_s17 }
 0x3a5   : > { %v15595_v0 = vrot.slane %v5551_v9, %v14913_v35  ;;  %v15598_v29 = vrot.slane %v5583_v46, %v14913_v35  ;;  %v3392_v20 = vcombine.high %v3335_v22, %v3351_v37  ;;  %v3407_v14 = vcombine.low %v15591_v16, %v15570_v3  ;;  %1065 = vrot.lane.b32.xlu1 %v14792_v60, %s14234_s30  ;;  %v15610_v39 = vpop.permute.xlu0 %887 }
 0x3a6   : > { %v3303_v15 = vrot.slane %v3295_v32, %v14902_v18  ;;  %v5467_v61 = vcombine.low %v15566_v23, %v15576_v4  ;;  %13421 = vmatprep.subr.msk.bf16.mxu1 %vm7887_vm1, %v7817_v1  ;;  %v7907_v38 = vsel %vm7887_vm1, %v7817_v1, 0  ;;  %v3312_v22 = vcombine.high %v15489_v2, %v844_v45  ;;  %v798_v32 = vpop.permute.xlu1 %797 }
 0x3a7   : > { %v5603_v37 = vcombine.low %v15595_v0, %v15598_v29  ;;  %v3319_v9 = vrot.slane %v3311_v42, %v14902_v18  ;;  %v4788_v46 = vcombine.high %v15203_v5, %v15223_v17  ;;  %v3408_v50 = vcombine.high %v15591_v16, %v15570_v3  ;;  %13148 = vmatpush3.bf16.xpose.msra.mxu1 %v7907_v38 }
 0x3a8   : > { %v3531_v58 = vcombine.low %v15432_v56, %v15495_v41  ;;  %v3310_v8 = vrot.slane %v3296_v54, %v14902_v18  ;;  %v3326_v59 = vrot.slane %v3312_v22, %v14902_v18  ;;  %1207 = vrot.lane.b32.xlu0 %v14724_v34, %s14237_s19  ;;  %v15629_v5 = vrot.slane %v3391_v30, %v14913_v35 }
 0x3a9   : > { %v7818_v1 = vpack.c.bf16 %v5603_v37, %v5467_v61  ;;  %v3359_v57 = vcombine.low %v3303_v15, %v3319_v9  ;;  %v3360_v2 = vcombine.high %v3303_v15, %v3319_v9  ;;  %v15632_v17 = vrot.slane %v3392_v20, %v14913_v35  ;;  %1113 = vrot.lane.b32.xlu1 %v14792_v60, %s14235_s15  ;;  %v15641_v3 = vpop.permute.xlu0 %935 }
 0x3aa   : > { %v15635_v42 = vrot.slane %v3407_v14, %v14913_v35  ;;  %v3532_v54 = vcombine.high %v15432_v56, %v15495_v41  ;;  %v3375_v45 = vcombine.low %v3310_v8, %v3326_v59  ;;  %v3376_v16 = vcombine.high %v3310_v8, %v3326_v59  ;;  %v846_v20 = vpop.permute.xlu1 %845 }
 0x3ab   : > { %13422 = vmatprep.subr.msk.bf16.mxu1 %vm7887_vm1, %v7818_v1  ;;  %v3367_v34 = vrot.slane %v3359_v57, %v14913_v35  ;;  %v3374_v30 = vrot.slane %v3360_v2, %v14913_v35  ;;  %v3547_v14 = vcombine.low %v15459_v31, %v15531_v44  ;;  %v3548_v56 = vcombine.high %v15459_v31, %v15531_v44 }
 0x3ac   : > { %v3499_v41 = vcombine.low %v14758_v51, %v798_v32  ;;  %v3500_v15 = vcombine.high %v14758_v51, %v798_v32  ;;  %v3383_v61 = vrot.slane %v3375_v45, %v14913_v35  ;;  %v3390_v38 = vrot.slane %v3376_v16, %v14913_v35  ;;  %1067 = vrot.lane.b32.xlu0 %v14721_v21, %s14234_s30 }
 0x3ad   : > { %v12782_v57 = vcombine.low %v3367_v34, %v3374_v30  ;;  %v12784_v37 = vcombine.high %v3367_v34, %v3374_v30  ;;  %v7910_v59 = vsel %vm7887_vm1, %v7818_v1, 0  ;;  %v15657_v8 = vpack.c.bf16 %v4788_v46, %v4652_v33  ;;  %1161 = vrot.lane.b32.xlu1 %v14792_v60, %s14236_s17  ;;  %v15663_v44 = vpop.permute.xlu0 %983 }
 0x3ae   : > { %v3515_v22 = vcombine.low %v15586_v55, %v846_v20  ;;  %v3516_v31 = vcombine.high %v15586_v55, %v846_v20  ;;  %v12786_v2 = vcombine.low %v3383_v61, %v3390_v38  ;;  %v12788_v34 = vcombine.high %v3383_v61, %v3390_v38  ;;  %v15671_v1 = vpop.permute.xlu1 %889 }
 0x3af   : > { %v15666_v9 = vrot.slane %v12782_v57, %v14902_v18  ;;  %v15669_v32 = vrot.slane %v12784_v37, %v14902_v18  ;;  %v3507_v33 = vrot.slane %v3499_v41, %v14902_v18  ;;  %v3514_v46 = vrot.slane %v3500_v15, %v14902_v18  ;;  %13150 = vmatpush3.bf16.xpose.msra.mxu1 %v7910_v59 }
 0x3b0   : > { %v3523_v55 = vrot.slane %v3515_v22, %v14902_v18  ;;  %v3530_v30 = vrot.slane %v3516_v31, %v14902_v18  ;;  %v3555_v45 = vrot.slane %v3547_v14, %v14902_v18  ;;  %v15679_v16 = vrot.slane %v12786_v2, %v14902_v18  ;;  %13427 = vmatprep.subr.msk.bf16.mxu1 %vm7887_vm1, %v15657_v8 }
 0x3b1   : > { %20962 = vst [vmem:[#allocation79_spill] sm:$0xff] %v15666_v9  ;;  %20963 = vst [vmem:[#allocation80_spill] sm:$0xff] %v15669_v32  ;;  %v15682_v20 = vrot.slane %v12788_v34, %v14902_v18  ;;  %1115 = vrot.lane.b32.xlu0 %v14721_v21, %s14235_s15  ;;  %v15690_v14 = vpop.permute.xlu0 %1031  ;;  %v15693_v37 = vrot.slane %v3408_v50, %v14913_v35  ;;  %v3539_v59 = vrot.slane %v3531_v58, %v14902_v18 }
 0x3b2   : > { %20964 = vst [vmem:[#allocation81_spill] sm:$0xff] %v15679_v16  ;;  %v3563_v41 = vcombine.low %v3507_v33, %v3523_v55  ;;  %v3564_v15 = vcombine.high %v3507_v33, %v3523_v55  ;;  %v3579_v38 = vcombine.low %v3514_v46, %v3530_v30  ;;  %v3580_v57 = vcombine.high %v3514_v46, %v3530_v30  ;;  %v15703_v2 = vpop.permute.xlu1 %937 }
 0x3b3   : > { %20965 = vst [vmem:[#allocation82_spill] sm:$0xff] %v15682_v20  ;;  %v15697_v22 = vrot.slane %v3532_v54, %v14902_v18  ;;  %1209 = vrot.lane.b32.xlu1 %v14792_v60, %s14237_s19  ;;  %v12783_v58 = vcombine.low %v15629_v5, %v15632_v17  ;;  %v15712_v54 = vrot.slane %v3548_v56, %v14902_v18 }
 0x3b4   : > { %v3571_v34 = vrot.slane %v3563_v41, %v14913_v35  ;;  %v3578_v33 = vrot.slane %v3564_v15, %v14913_v35  ;;  %v3587_v50 = vrot.slane %v3579_v38, %v14913_v35  ;;  %v3594_v46 = vrot.slane %v3580_v57, %v14913_v35 }
 0x3b5   : > { %v3595_v55 = vcombine.low %v3539_v59, %v3555_v45  ;;  %v3596_v30 = vcombine.high %v3539_v59, %v3555_v45  ;;  %1163 = vrot.lane.b32.xlu0 %v14721_v21, %s14236_s17  ;;  %v15716_v41 = vpop.permute.xlu0 %743  ;;  %v4855_v15 = vcombine.low %v15020_v62, %v15027_v47  ;;  %v4887_v38 = vcombine.low %v15055_v26, %v15058_v11 }
 0x3b6   : > { %v12790_v31 = vcombine.low %v3571_v34, %v3578_v33  ;;  %v12792_v60 = vcombine.high %v3571_v34, %v3578_v33  ;;  %v12794_v61 = vcombine.low %v3587_v50, %v3594_v46  ;;  %v12796_v28 = vcombine.high %v3587_v50, %v3594_v46  ;;  %v15728_v57 = vpop.permute.xlu1 %985 }
 0x3b7   : > { %v4991_v56 = vcombine.low %v15108_v7, %v15120_v63  ;;  %v5023_v45 = vcombine.low %v15123_v19, %v15270_v10  ;;  %1069 = vrot.lane.b32.xlu1 %v14731_v25, %s14234_s30  ;;  %v4863_v26 = vrot.slane %v4855_v15, %v14913_v35  ;;  %v4895_v11 = vrot.slane %v4887_v38, %v14913_v35 }
 0x3b8   : > { %v15731_v59 = vrot.slane %v12790_v31, %v14902_v18  ;;  %v15734_v34 = vrot.slane %v12792_v60, %v14902_v18  ;;  %v15737_v62 = vrot.slane %v12794_v61, %v14902_v18  ;;  %v15740_v47 = vrot.slane %v12796_v28, %v14902_v18  ;;  %v20986_v28 = vld [vmem:[#allocation22_spill] sm:$0xff] }
 0x3b9   : > { %v4999_v7 = vrot.slane %v4991_v56, %v14913_v35  ;;  %v5031_v63 = vrot.slane %v5023_v45, %v14913_v35  ;;  %v12785_v19 = vcombine.high %v15629_v5, %v15632_v17  ;;  %v12787_v10 = vcombine.low %v15635_v42, %v15693_v37  ;;  %1211 = vrot.lane.b32.xlu0 %v14721_v21, %s14237_s19  ;;  %v15756_v31 = vpop.permute.xlu0 %791 }
 0x3ba   : > { %20966 = vst [vmem:[#allocation83_spill] sm:$0xff] %v15731_v59  ;;  %20967 = vst [vmem:[#allocation84_spill] sm:$0xff] %v15734_v34  ;;  %v4919_v33 = vcombine.low %v4863_v26, %v4895_v11  ;;  %v4920_v50 = vcombine.high %v4863_v26, %v4895_v11  ;;  %v1034_v5 = vpop.permute.xlu1 %1033  ;;  %v15761_v17 = vrot.slane %v3595_v55, %v14913_v35 }
 0x3bb   : > { %20968 = vst [vmem:[#allocation85_spill] sm:$0xff] %v15737_v62  ;;  %20969 = vst [vmem:[#allocation86_spill] sm:$0xff] %v15740_v47  ;;  %v5055_v46 = vcombine.low %v4999_v7, %v5031_v63  ;;  %v5056_v60 = vcombine.high %v4999_v7, %v5031_v63  ;;  %1117 = vrot.lane.b32.xlu1 %v14731_v25, %s14235_s15  ;;  %v3611_v15 = vcombine.low %v15697_v22, %v15712_v54 }
 0x3bc   : > { %v3612_v38 = vcombine.high %v15697_v22, %v15712_v54  ;;  %v2919_v21 = vcombine.low %v15610_v39, %v15663_v44  ;;  %v15770_v56 = vrot.slane %v3596_v30, %v14913_v35  ;;  %v2920_v45 = vcombine.high %v15610_v39, %v15663_v44  ;;  %v20971_v30 = vld [vmem:[#allocation19_spill] sm:$0xff] }
 0x3bd   : > { %v7784_v26 = vpack.c.bf16 %v5055_v46, %v4919_v33  ;;  %v15774_v11 = vpack.c.bf16 %v5056_v60, %v4920_v50  ;;  %v4924_v55 = vcombine.high %v15143_v27, %v15146_v12  ;;  %v5060_v7 = vcombine.high %v15206_v48, %v15209_v36  ;;  %1071 = vrot.lane.b32.xlu0 %v20971_v30, %s14234_s30  ;;  %v15786_v63 = vpop.permute.xlu0 %839 }
 0x3be   : > { %v2935_v22 = vcombine.low %v15641_v3, %v15690_v14  ;;  %v2936_v54 = vcombine.high %v15641_v3, %v15690_v14  ;;  %v15789_v39 = vrot.slane %v12783_v58, %v14902_v18  ;;  %v15792_v44 = vrot.slane %v12785_v19, %v14902_v18  ;;  %v15799_v12 = vpop.permute.xlu1 %745 }
 0x3bf   : > { %20970 = vst [vmem:[#allocation87_spill] sm:$0xff] %v15774_v11  ;;  %v12789_v48 = vcombine.high %v15635_v42, %v15693_v37  ;;  %13152 = vmatmul.mubr.msk.bf16.vlgmr.msra.gmra.mrb[0].mxu1 %vm7887_vm1, %v7784_v26  ;;  %v8079_v27 = vsel %vm7887_vm1, %v15657_v8, 0  ;;  %v2927_v36 = vrot.slane %v2919_v21, %v14902_v18  ;;  %v7824_v3 = vpack.c.bf16 %v5060_v7, %v4924_v55 }
 0x3c0   : > { %20972 = vst [vmem:[#allocation19_spill] sm:$0xff] %v15789_v39  ;;  %20973 = vst [vmem:[#allocation88_spill] sm:$0xff] %v15792_v44  ;;  %13176 = vmatpush3.bf16.xpose.msra.mxu1 %v8079_v27  ;;  %v2943_v14 = vrot.slane %v2935_v22, %v14902_v18  ;;  %v2950_v58 = vrot.slane %v2936_v54, %v14902_v18  ;;  %v15805_v19 = vrot.slane %v12787_v10, %v14902_v18 }
 0x3c1   : > { %v3619_v42 = vrot.slane %v3611_v15, %v14913_v35  ;;  %v3626_v37 = vrot.slane %v3612_v38, %v14913_v35  ;;  %v12791_v8 = vcombine.low %v15761_v17, %v15770_v56  ;;  %1165 = vrot.lane.b32.xlu1 %v14731_v25, %s14236_s17  ;;  %v2934_v33 = vrot.slane %v2920_v45, %v14902_v18  ;;  %v15817_v60 = vpop.permute.xlu0 %899 }
 0x3c2   : > { %20974 = vst [vmem:[#allocation89_spill] sm:$0xff] %v15805_v19  ;;  %13428 = vmatprep.subr.msk.bf16.mxu1 %vm7887_vm1, %v7824_v3  ;;  %v2983_v50 = vcombine.low %v2927_v36, %v2943_v14  ;;  %v2984_v46 = vcombine.high %v2927_v36, %v2943_v14  ;;  %v3123_v10 = vcombine.low %v15671_v1, %v15728_v57  ;;  %v15827_v45 = vpop.permute.xlu1 %793 }
 0x3c3   : > { %v3124_v15 = vcombine.high %v15671_v1, %v15728_v57  ;;  %v5332_v38 = vcombine.high %v15540_v13, %v15543_v49  ;;  %v3139_v21 = vcombine.low %v15703_v2, %v1034_v5  ;;  %v3140_v26 = vcombine.high %v15703_v2, %v1034_v5  ;;  %1167 = vrot.lane.b32.xlu0 %v20971_v30, %s14236_s17 }
 0x3c4   : > { %v15830_v55 = vrot.slane %v12789_v48, %v14902_v18  ;;  %v12793_v7 = vcombine.high %v15761_v17, %v15770_v56  ;;  %v2999_v22 = vcombine.low %v2934_v33, %v2950_v58  ;;  %v3000_v1 = vcombine.high %v2934_v33, %v2950_v58 }
 0x3c5   : > { %v12795_v57 = vcombine.low %v3619_v42, %v3626_v37  ;;  %v12797_v54 = vcombine.high %v3619_v42, %v3626_v37  ;;  %v5196_v13 = vcombine.high %v15534_v52, %v15537_v6  ;;  %v3147_v49 = vrot.slane %v3139_v21, %v14902_v18  ;;  %1213 = vrot.lane.b32.xlu1 %v14731_v25, %s14237_s19  ;;  %v15843_v56 = vpop.permute.xlu0 %947 }
 0x3c6   : > { %20975 = vst [vmem:[#allocation90_spill] sm:$0xff] %v15830_v55  ;;  %v2991_v2 = vrot.slane %v2983_v50, %v14913_v35  ;;  %v2998_v5 = vrot.slane %v2984_v46, %v14913_v35  ;;  %v3131_v48 = vrot.slane %v3123_v10, %v14902_v18  ;;  %v3154_v17 = vrot.slane %v3140_v26, %v14902_v18  ;;  %v15852_v25 = vpop.permute.xlu1 %841 }
 0x3c7   : > { %v15846_v27 = vrot.slane %v12791_v8, %v14902_v18  ;;  %v3138_v52 = vrot.slane %v3124_v15, %v14902_v18  ;;  %v8082_v6 = vsel %vm7887_vm1, %v7824_v3, 0  ;;  %v7825_v36 = vpack.c.bf16 %v5332_v38, %v5196_v13  ;;  %1215 = vrot.lane.b32.xlu0 %v20971_v30, %s14237_s19  ;;  %v20977_v3 = vld [vmem:[#allocation20_spill] sm:$0xff] }
 0x3c8   : > { %v3007_v14 = vrot.slane %v2999_v22, %v14913_v35  ;;  %v3014_v58 = vrot.slane %v3000_v1, %v14913_v35  ;;  %13178 = vmatpush3.bf16.xpose.msra.mxu1 %v8082_v6  ;;  %v3187_v42 = vcombine.low %v3131_v48, %v3147_v49  ;;  %v3188_v37 = vcombine.high %v3131_v48, %v3147_v49  ;;  %v20981_v49 = vld [vmem:[#allocation26_spill] sm:$0xff] }
 0x3c9   : > { %20976 = vst [vmem:[#allocation91_spill] sm:$0xff] %v15846_v27  ;;  %v5943_v8 = vcombine.low %v15666_v9, %v15669_v32  ;;  %13429 = vmatprep.subr.msk.bf16.mxu1 %vm7887_vm1, %v7825_v36  ;;  %v2887_v33 = vcombine.low %v20977_v3, %v15756_v31  ;;  %v2888_v50 = vcombine.high %v20977_v3, %v15756_v31  ;;  %v15869_v26 = vpop.permute.xlu0 %995  ;;  %v20996_v9 = vld [vmem:[#allocation42_spill] sm:$0xff] }
 0x3ca   : > { %v2903_v46 = vcombine.low %v15716_v41, %v15786_v63  ;;  %v12767_v10 = vcombine.low %v2991_v2, %v2998_v5  ;;  %v3203_v15 = vcombine.low %v3138_v52, %v3154_v17  ;;  %v3204_v38 = vcombine.high %v3138_v52, %v3154_v17  ;;  %1073 = vrot.lane.b32.xlu1 %v14743_v43, %s14234_s30  ;;  %v15882_v48 = vpop.permute.xlu1 %901 }
 0x3cb   : > { %v2904_v21 = vcombine.high %v15716_v41, %v15786_v63  ;;  %v15872_v22 = vrot.slane %v12793_v7, %v14902_v18  ;;  %v15875_v1 = vrot.slane %v12795_v57, %v14902_v18  ;;  %v15878_v31 = vrot.slane %v12797_v54, %v14902_v18  ;;  %1075 = vrot.lane.b32.xlu0 %v20981_v49, %s14234_s30 }
 0x3cc   : > { %v12769_v13 = vcombine.high %v2991_v2, %v2998_v5  ;;  %v12771_v41 = vcombine.low %v3007_v14, %v3014_v58  ;;  %v12773_v63 = vcombine.high %v3007_v14, %v3014_v58  ;;  %v3195_v17 = vrot.slane %v3187_v42, %v14913_v35 }
 0x3cd   : > { %20978 = vst [vmem:[#allocation20_spill] sm:$0xff] %v15872_v22  ;;  %20979 = vst [vmem:[#allocation92_spill] sm:$0xff] %v15875_v1  ;;  %v3202_v52 = vrot.slane %v3188_v37, %v14913_v35  ;;  %v15887_v7 = vrot.slane %v5943_v8, %v14913_v35  ;;  %v2895_v57 = vrot.slane %v2887_v33, %v14902_v18  ;;  %v15900_v42 = vpop.permute.xlu0 %1043  ;;  %v8085_v8 = vsel %vm7887_vm1, %v7825_v36, 0 }
 0x3ce   : > { %20980 = vst [vmem:[#allocation93_spill] sm:$0xff] %v15878_v31  ;;  %v2902_v54 = vrot.slane %v2888_v50, %v14902_v18  ;;  %v2911_v2 = vrot.slane %v2903_v46, %v14902_v18  ;;  %v15893_v5 = vrot.slane %v12767_v10, %v14902_v18  ;;  %v3211_v6 = vrot.slane %v3203_v15, %v14913_v35  ;;  %v15912_v46 = vpop.permute.xlu1 %949 }
 0x3cf   : > { %20982 = vst [vmem:[#allocation26_spill] sm:$0xff] %v15887_v7  ;;  %v3218_v14 = vrot.slane %v3204_v38, %v14913_v35  ;;  %v2918_v58 = vrot.slane %v2904_v21, %v14902_v18  ;;  %1119 = vrot.lane.b32.xlu1 %v20971_v30, %s14235_s15  ;;  %v15903_v37 = vrot.slane %v12769_v13, %v14902_v18 }
 0x3d0   : > { %20983 = vst [vmem:[#allocation94_spill] sm:$0xff] %v15893_v5  ;;  %v5468_v33 = vcombine.high %v15566_v23, %v15576_v4  ;;  %v5604_v50 = vcombine.high %v15595_v0, %v15598_v29  ;;  %1123 = vrot.lane.b32.xlu0 %v20981_v49, %s14235_s15  ;;  %v15915_v10 = vrot.slane %v12771_v41, %v14902_v18 }
 0x3d1   : > { %v15918_v15 = vrot.slane %v12773_v63, %v14902_v18  ;;  %v12775_v38 = vcombine.low %v3195_v17, %v3202_v52  ;;  %13180 = vmatpush3.bf16.xpose.msra.mxu1 %v8085_v8  ;;  %v3107_v36 = vcombine.low %v15799_v12, %v15852_v25  ;;  %v12777_v23 = vcombine.high %v3195_v17, %v3202_v52  ;;  %v15928_v63 = vpop.permute.xlu0 %895  ;;  %v20987_v52 = vld [vmem:[#allocation37_spill] sm:$0xff] }
 0x3d2   : > { %20984 = vst [vmem:[#allocation95_spill] sm:$0xff] %v15915_v10  ;;  %v2951_v4 = vcombine.low %v2895_v57, %v2911_v2  ;;  %v2952_v21 = vcombine.high %v2895_v57, %v2911_v2  ;;  %v7826_v0 = vpack.c.bf16 %v5604_v50, %v5468_v33  ;;  %v12779_v29 = vcombine.low %v3211_v6, %v3218_v14  ;;  %v20988_v57 = vld [vmem:[#allocation38_spill] sm:$0xff] }
 0x3d3   : > { %20985 = vst [vmem:[#allocation96_spill] sm:$0xff] %v15918_v15  ;;  %v2967_v13 = vcombine.low %v2902_v54, %v2918_v58  ;;  %v3091_v61 = vcombine.low %v20986_v28, %v15827_v45  ;;  %v3108_v41 = vcombine.high %v15799_v12, %v15852_v25  ;;  %1121 = vrot.lane.b32.xlu1 %v14743_v43, %s14235_s15  ;;  %v15941_v12 = vpop.permute.xlu1 %997 }
 0x3d4   : > { %v2968_v8 = vcombine.high %v2902_v54, %v2918_v58  ;;  %13430 = vmatprep.subr.msk.bf16.mxu1 %vm7887_vm1, %v7826_v0  ;;  %v3092_v17 = vcombine.high %v20986_v28, %v15827_v45  ;;  %v20989_v2 = vcombine.high %v20987_v52, %v20988_v57  ;;  %1171 = vrot.lane.b32.xlu0 %v20981_v49, %s14236_s17  ;;  %v20991_v54 = vld [vmem:[#allocation39_spill] sm:$0xff]  ;;  %v20992_v58 = vld [vmem:[#allocation40_spill] sm:$0xff]  ;;  %v20995_v45 = vld [vmem:[#allocation41_spill] sm:$0xff] }
 0x3d5   : > { %v3115_v25 = vrot.slane %v3107_v36, %v14902_v18  ;;  %v20993_v50 = vcombine.high %v20991_v54, %v20992_v58  ;;  %v20997_v11 = vcombine.high %v20995_v45, %v20996_v9  ;;  %v20999_v57 = vld [vmem:[#allocation43_spill] sm:$0xff]  ;;  %v15963_v36 = vrot.slane %v12775_v38, %v14902_v18 }
 0x3d6   : > { %v15937_v33 = vrot.slane %v20989_v2, %v14913_v35  ;;  %v21000_v2 = vld [vmem:[#allocation44_spill] sm:$0xff]  ;;  %v12781_v40 = vcombine.high %v3211_v6, %v3218_v14  ;;  %v2959_v54 = vrot.slane %v2951_v4, %v14913_v35  ;;  %v2966_v58 = vrot.slane %v2952_v21, %v14913_v35 }
 0x3d7   : > { %v15948_v32 = vrot.slane %v20993_v50, %v14913_v35  ;;  %v15954_v52 = vrot.slane %v20997_v11, %v14913_v35  ;;  %v21001_v7 = vcombine.high %v20999_v57, %v21000_v2  ;;  %21003 = vst [vmem:[#allocation40_spill] sm:$0xff] %v15963_v36  ;;  %v3099_v50 = vrot.slane %v3091_v61, %v14902_v18  ;;  %v15989_v4 = vpop.permute.xlu1 %1045 }
 0x3d8   : > { %20990 = vst [vmem:[#allocation22_spill] sm:$0xff] %v15937_v33  ;;  %v3122_v9 = vrot.slane %v3108_v41, %v14902_v18  ;;  %1169 = vrot.lane.b32.xlu1 %v14743_v43, %s14236_s17  ;;  %v15978_v6 = vrot.slane %v12777_v23, %v14902_v18  ;;  %v15981_v14 = vrot.slane %v2967_v13, %v14913_v35  ;;  %v8088_v38 = vsel %vm7887_vm1, %v7826_v0, 0 }
 0x3d9   : > { %20994 = vst [vmem:[#allocation37_spill] sm:$0xff] %v15948_v32  ;;  %20998 = vst [vmem:[#allocation38_spill] sm:$0xff] %v15954_v52  ;;  %v15960_v51 = vrot.slane %v21001_v7, %v14913_v35  ;;  %v4653_v11 = vcombine.low %v15937_v33, %v15948_v32  ;;  %v15975_v7 = vpop.permute.xlu0 %943  ;;  %v15984_v61 = vrot.slane %v2968_v8, %v14913_v35  ;;  %1219 = vrot.lane.b32.xlu0 %v20981_v49, %s14237_s19 }
 0x3da   : > { %21004 = vst [vmem:[#allocation41_spill] sm:$0xff] %v15978_v6  ;;  %v3106_v21 = vrot.slane %v3092_v17, %v14902_v18  ;;  %v3155_v41 = vcombine.low %v3099_v50, %v3115_v25  ;;  %v3156_v57 = vcombine.high %v3099_v50, %v3115_v25  ;;  %13182 = vmatpush3.bf16.xpose.msra.mxu1 %v8088_v38 }
 0x3db   : > { %21002 = vst [vmem:[#allocation39_spill] sm:$0xff] %v15960_v51  ;;  %v4789_v45 = vcombine.low %v15954_v52, %v15960_v51  ;;  %v15995_v13 = vrot.slane %v12779_v29, %v14902_v18  ;;  %v15998_v8 = vrot.slane %v12781_v40, %v14902_v18  ;;  %v12766_v2 = vcombine.low %v2959_v54, %v2966_v58 }
 0x3dc   : > { %v12768_v0 = vcombine.high %v2959_v54, %v2966_v58  ;;  %v3171_v52 = vcombine.low %v3106_v21, %v3122_v9  ;;  %v3172_v51 = vcombine.high %v3106_v21, %v3122_v9  ;;  %v5687_v17 = vcombine.low %v15893_v5, %v15903_v37  ;;  %1217 = vrot.lane.b32.xlu1 %v14743_v43, %s14237_s19 }
 0x3dd   : > { %v15992_v23 = vpack.c.bf16 %v4789_v45, %v4653_v11  ;;  %21005 = vst [vmem:[#allocation42_spill] sm:$0xff] %v15995_v13  ;;  %21006 = vst [vmem:[#allocation43_spill] sm:$0xff] %v15998_v8  ;;  %v5719_v25 = vcombine.low %v15915_v10, %v15918_v15  ;;  %v16006_v50 = vpop.permute.xlu0 %991  ;;  %v12770_v29 = vcombine.low %v15981_v14, %v15984_v61  ;;  %1079 = vrot.lane.b32.xlu0 %v20977_v3, %s14234_s30 }
 0x3de   : > { %v12772_v40 = vcombine.high %v15981_v14, %v15984_v61  ;;  %v4143_v54 = vcombine.low %v15817_v60, %v15869_v26  ;;  %v4144_v58 = vcombine.high %v15817_v60, %v15869_v26  ;;  %v3163_v9 = vrot.slane %v3155_v41, %v14913_v35  ;;  %v16026_v14 = vpop.permute.xlu1 %897 }
 0x3df   : > { %13435 = vmatprep.subr.msk.bf16.mxu1 %vm7887_vm1, %v15992_v23  ;;  %v3170_v11 = vrot.slane %v3156_v57, %v14913_v35  ;;  %v4159_v45 = vcombine.low %v15843_v56, %v15900_v42  ;;  %v4160_v38 = vcombine.high %v15843_v56, %v15900_v42  ;;  %v16029_v60 = vrot.slane %v5687_v17, %v14913_v35 }
 0x3e0   : > { %v16032_v26 = vrot.slane %v5719_v25, %v14913_v35  ;;  %v5823_v61 = vcombine.low %v15963_v36, %v15978_v6  ;;  %v5855_v21 = vcombine.low %v15995_v13, %v15998_v8  ;;  %v16039_v41 = vrot.slane %v12766_v2, %v14902_v18  ;;  %v21009_v2 = vld [vmem:[#allocation27_spill] sm:$0xff] }
 0x3e1   : > { %v16042_v56 = vrot.slane %v12768_v0, %v14902_v18  ;;  %v3179_v42 = vrot.slane %v3171_v52, %v14913_v35  ;;  %v3186_v57 = vrot.slane %v3172_v51, %v14913_v35  ;;  %v4151_v17 = vrot.slane %v4143_v54, %v14902_v18  ;;  %1077 = vrot.lane.b32.xlu1 %v21009_v2, %s14234_s30  ;;  %v16057_v0 = vpop.permute.xlu0 %1039 }
 0x3e2   : > { %21007 = vst [vmem:[#allocation44_spill] sm:$0xff] %v16039_v41  ;;  %v16048_v25 = vrot.slane %v5823_v61, %v14913_v35  ;;  %v16051_v33 = vrot.slane %v5855_v21, %v14913_v35  ;;  %v5959_v32 = vcombine.low %v15789_v39, %v15792_v44  ;;  %v12774_v13 = vcombine.low %v3163_v9, %v3170_v11  ;;  %v16075_v36 = vpop.permute.xlu1 %945 }
 0x3e3   : > { %21008 = vst [vmem:[#allocation97_spill] sm:$0xff] %v16042_v56  ;;  %v4158_v52 = vrot.slane %v4144_v58, %v14902_v18  ;;  %v4167_v51 = vrot.slane %v4159_v45, %v14902_v18  ;;  %v4174_v54 = vrot.slane %v4160_v38, %v14902_v18  ;;  %1175 = vrot.lane.b32.xlu0 %v20977_v3, %s14236_s17 }
 0x3e4   : > { %v5739_v61 = vcombine.low %v16029_v60, %v16032_v26  ;;  %v5875_v21 = vcombine.low %v16048_v25, %v16051_v33  ;;  %v5991_v39 = vcombine.low %v15805_v19, %v15830_v55  ;;  %v6095_v44 = vcombine.low %v15846_v27, %v15872_v22  ;;  %v21020_v55 = vld [vmem:[#allocation52_spill] sm:$0xff] }
 0x3e5   : > { %v12776_v58 = vcombine.high %v3163_v9, %v3170_v11  ;;  %v12778_v8 = vcombine.low %v3179_v42, %v3186_v57  ;;  %v12780_v45 = vcombine.high %v3179_v42, %v3186_v57  ;;  %v16073_v38 = vrot.slane %v5959_v32, %v14913_v35  ;;  %1125 = vrot.lane.b32.xlu1 %v21009_v2, %s14235_s15 }
 0x3e6   : > { %v7819_v6 = vpack.c.bf16 %v5875_v21, %v5739_v61  ;;  %v16078_v10 = vrot.slane %v5991_v39, %v14913_v35  ;;  %v16081_v15 = vrot.slane %v6095_v44, %v14913_v35  ;;  %v6127_v19 = vcombine.low %v15875_v1, %v15878_v31  ;;  %v16102_v21 = vpop.permute.xlu0 %783 }
 0x3e7   : > { %v5975_v9 = vcombine.low %v15679_v16, %v15682_v20  ;;  %v16090_v32 = vrot.slane %v12770_v29, %v14902_v18  ;;  %v4207_v11 = vcombine.low %v4151_v17, %v4167_v51  ;;  %v4208_v42 = vcombine.high %v4151_v17, %v4167_v51  ;;  %1223 = vrot.lane.b32.xlu0 %v20977_v3, %s14237_s19 }
 0x3e8   : > { %v16095_v39 = vrot.slane %v12772_v40, %v14902_v18  ;;  %v4223_v44 = vcombine.low %v4158_v52, %v4174_v54  ;;  %13423 = vmatprep.subr.msk.bf16.mxu0 %vm7887_vm1, %v7819_v6  ;;  %v7990_v57 = vsel %vm7887_vm1, %v7819_v6, 0  ;;  %v16100_v61 = vrot.slane %v6127_v19, %v14913_v35 }
 0x3e9   : > { %21010 = vst [vmem:[#allocation27_spill] sm:$0xff] %v16090_v32  ;;  %v16105_v29 = vrot.slane %v12774_v13, %v14902_v18  ;;  %v16108_v17 = vrot.slane %v12776_v58, %v14902_v18  ;;  %v16111_v51 = vrot.slane %v12778_v8, %v14902_v18  ;;  %v4224_v40 = vcombine.high %v4158_v52, %v4174_v54 }
 0x3ea   : > { %21011 = vst [vmem:[#allocation98_spill] sm:$0xff] %v16095_v39  ;;  %13160 = vmatpush3.bf16.xpose.msra.mxu0 %v7990_v57  ;;  %v16114_v1 = vrot.slane %v12780_v45, %v14902_v18  ;;  %v6011_v19 = vcombine.low %v16073_v38, %v16078_v10  ;;  %v6147_v6 = vcombine.low %v16081_v15, %v16100_v61  ;;  %v16130_v45 = vpop.permute.xlu1 %993 }
 0x3eb   : > { %21012 = vst [vmem:[#allocation99_spill] sm:$0xff] %v16105_v29  ;;  %21013 = vst [vmem:[#allocation100_spill] sm:$0xff] %v16108_v17  ;;  %v5671_v13 = vcombine.low %v16039_v41, %v16042_v56  ;;  %1173 = vrot.lane.b32.xlu1 %v21009_v2, %s14236_s17  ;;  %v6079_v8 = vcombine.low %v15731_v59, %v15734_v34  ;;  %v4215_v52 = vrot.slane %v4207_v11, %v14913_v35 }
 0x3ec   : > { %21014 = vst [vmem:[#allocation101_spill] sm:$0xff] %v16111_v51  ;;  %21015 = vst [vmem:[#allocation102_spill] sm:$0xff] %v16114_v1  ;;  %v4222_v54 = vrot.slane %v4208_v42, %v14913_v35  ;;  %v4363_v58 = vcombine.low %v15912_v46, %v15989_v4  ;;  %1083 = vrot.lane.b32.xlu0 %v14752_v24, %s14234_s30  ;;  %v16135_v57 = vrot.slane %v4223_v44, %v14913_v35 }
 0x3ed   : > { %v7820_v41 = vpack.c.bf16 %v6147_v6, %v6011_v19  ;;  %v4364_v56 = vcombine.high %v15912_v46, %v15989_v4  ;;  %v5703_v11 = vcombine.low %v16090_v32, %v16095_v39  ;;  %v16142_v42 = vrot.slane %v4224_v40, %v14913_v35  ;;  %v16161_v40 = vpop.permute.xlu0 %831 }
 0x3ee   : > { %v4347_v31 = vcombine.low %v15882_v48, %v15941_v12  ;;  %v4348_v27 = vcombine.high %v15882_v48, %v15941_v12  ;;  %v16149_v22 = vrot.slane %v5671_v13, %v14913_v35  ;;  %v5807_v46 = vcombine.low %v16105_v29, %v16108_v17  ;;  %v16185_v17 = vpop.permute.xlu1 %1041 }
 0x3ef   : > { %13424 = vmatprep.subr.msk.bf16.mxu0 %vm7887_vm1, %v7820_v41  ;;  %v16153_v44 = vrot.slane %v5703_v11, %v14913_v35  ;;  %v5839_v4 = vcombine.low %v16111_v51, %v16114_v1  ;;  %1221 = vrot.lane.b32.xlu1 %v21009_v2, %s14237_s19  ;;  %v16164_v48 = vrot.slane %v5975_v9, %v14913_v35  ;;  %v7993_v11 = vsel %vm7887_vm1, %v7820_v41, 0 }
 0x3f0   : > { %21016 = vst [vmem:[#allocation103_spill] sm:$0xff] %v16149_v22  ;;  %v16167_v12 = vrot.slane %v6079_v8, %v14913_v35  ;;  %v6111_v19 = vcombine.low %v15737_v62, %v15740_v47  ;;  %v4371_v6 = vrot.slane %v4363_v58, %v14902_v18  ;;  %1131 = vrot.lane.b32.xlu0 %v14752_v24, %s14235_s15 }
 0x3f1   : > { %21017 = vst [vmem:[#allocation104_spill] sm:$0xff] %v16153_v44  ;;  %v4378_v13 = vrot.slane %v4364_v56, %v14902_v18  ;;  %v16177_v51 = vrot.slane %v5807_v46, %v14913_v35  ;;  %v16180_v9 = vrot.slane %v5839_v4, %v14913_v35  ;;  %v12815_v8 = vcombine.low %v4215_v52, %v4222_v54  ;;  %v16206_v62 = vpop.permute.xlu0 %739 }
 0x3f2   : > { %v12817_v1 = vcombine.high %v4215_v52, %v4222_v54  ;;  %v12819_v29 = vcombine.low %v16135_v57, %v16142_v42  ;;  %v4355_v58 = vrot.slane %v4347_v31, %v14902_v18  ;;  %13162 = vmatpush3.bf16.xpose.msra.mxu0 %v7993_v11  ;;  %v4362_v56 = vrot.slane %v4348_v27, %v14902_v18 }
 0x3f3   : > { %21018 = vst [vmem:[#allocation105_spill] sm:$0xff] %v16177_v51  ;;  %21019 = vst [vmem:[#allocation106_spill] sm:$0xff] %v16180_v9  ;;  %v5735_v41 = vcombine.low %v16149_v22, %v16153_v44  ;;  %v5871_v46 = vcombine.low %v16177_v51, %v16180_v9  ;;  %v3751_v4 = vcombine.low %v15975_v7, %v16057_v0  ;;  %1081 = vrot.lane.b32.xlu1 %v20986_v28, %s14234_s30 }
 0x3f4   : > { %v4411_v52 = vcombine.low %v4355_v58, %v4371_v6  ;;  %v3735_v31 = vcombine.low %v15928_v63, %v16006_v50  ;;  %v3736_v54 = vcombine.high %v15928_v63, %v16006_v50  ;;  %v3752_v27 = vcombine.high %v15975_v7, %v16057_v0  ;;  %1179 = vrot.lane.b32.xlu0 %v14752_v24, %s14236_s17 }
 0x3f5   : > { %v4412_v11 = vcombine.high %v4355_v58, %v4371_v6  ;;  %v4427_v32 = vcombine.low %v4362_v56, %v4378_v13  ;;  %v7787_v39 = vpack.c.bf16 %v5871_v46, %v5735_v41  ;;  %v2087_v47 = vcombine.low %v21020_v55, %v16161_v40 }
 0x3f6   : > { %v16209_v34 = vrot.slane %v6111_v19, %v14913_v35  ;;  %v16212_v59 = vrot.slane %v12815_v8, %v14902_v18  ;;  %v12821_v63 = vcombine.high %v16135_v57, %v16142_v42  ;;  %v4428_v7 = vcombine.high %v4362_v56, %v4378_v13  ;;  %v16231_v42 = vpop.permute.xlu1 %785 }
 0x3f7   : > { %v16217_v50 = vrot.slane %v12817_v1, %v14902_v18  ;;  %v16220_v0 = vrot.slane %v12819_v29, %v14902_v18  ;;  %13167 = vmatprep.mubr.msk.bf16.mxu0 %vm7887_vm1, %v7787_v39  ;;  %v3759_v6 = vrot.slane %v3751_v4, %v14902_v18  ;;  %v2071_v19 = vcombine.low %v20971_v30, %v16102_v21 }
 0x3f8   : > { %21021 = vst [vmem:[#allocation52_spill] sm:$0xff] %v16212_v59  ;;  %v3743_v8 = vrot.slane %v3735_v31, %v14902_v18  ;;  %v3750_v58 = vrot.slane %v3736_v54, %v14902_v18  ;;  %v3766_v57 = vrot.slane %v3752_v27, %v14902_v18  ;;  %v2088_v1 = vcombine.high %v21020_v55, %v16161_v40 }
 0x3f9   : > { %21022 = vst [vmem:[#allocation107_spill] sm:$0xff] %v16217_v50  ;;  %21023 = vst [vmem:[#allocation108_spill] sm:$0xff] %v16220_v0  ;;  %1127 = vrot.lane.b32.xlu1 %v20977_v3, %s14235_s15  ;;  %v4419_v39 = vrot.slane %v4411_v52, %v14913_v35  ;;  %v4426_v29 = vrot.slane %v4412_v11, %v14913_v35  ;;  %v4435_v13 = vrot.slane %v4427_v32, %v14913_v35  ;;  %v16251_v52 = vpop.permute.xlu0 %787 }
 0x3fa   : > { %v2095_v56 = vrot.slane %v2087_v47, %v14902_v18  ;;  %1227 = vrot.lane.b32.xlu0 %v14752_v24, %s14237_s19  ;;  %v4442_v41 = vrot.slane %v4428_v7, %v14913_v35  ;;  %v2072_v55 = vcombine.high %v20971_v30, %v16102_v21  ;;  %v3939_v40 = vcombine.low %v16026_v14, %v16130_v45 }
 0x3fb   : > { %v3955_v3 = vcombine.low %v16075_v36, %v16185_v17  ;;  %v3799_v46 = vcombine.low %v3743_v8, %v3759_v6  ;;  %v3800_v4 = vcombine.high %v3743_v8, %v3759_v6  ;;  %v2079_v32 = vrot.slane %v2071_v19, %v14902_v18  ;;  %v834_v19 = vpop.permute.xlu1 %833 }
 0x3fc   : > { %v3956_v47 = vcombine.high %v16075_v36, %v16185_v17  ;;  %v16254_v24 = vrot.slane %v12821_v63, %v14902_v18  ;;  %v3815_v31 = vcombine.low %v3750_v58, %v3766_v57  ;;  %v3816_v30 = vcombine.high %v3750_v58, %v3766_v57 }
 0x3fd   : > { %v2102_v21 = vrot.slane %v2088_v1, %v14902_v18  ;;  %1129 = vrot.lane.b32.xlu1 %v20986_v28, %s14235_s15  ;;  %v12823_v54 = vcombine.low %v4419_v39, %v4426_v29  ;;  %v3940_v27 = vcombine.high %v16026_v14, %v16130_v45  ;;  %v2135_v11 = vcombine.low %v2079_v32, %v2095_v56 }
 0x3fe   : > { %21024 = vst [vmem:[#allocation109_spill] sm:$0xff] %v16254_v24  ;;  %v2136_v7 = vcombine.high %v2079_v32, %v2095_v56  ;;  %1087 = vrot.lane.b32.xlu0 %v14775_v53, %s14234_s30  ;;  %v12825_v36 = vcombine.high %v4419_v39, %v4426_v29  ;;  %v12827_v17 = vcombine.low %v4435_v13, %v4442_v41 }
 0x3ff   : > { %v2086_v63 = vrot.slane %v2072_v55, %v14902_v18  ;;  %v3963_v6 = vrot.slane %v3955_v3, %v14902_v18  ;;  %v3807_v8 = vrot.slane %v3799_v46, %v14913_v35  ;;  %v3814_v58 = vrot.slane %v3800_v4, %v14913_v35  ;;  %v16276_v4 = vpop.permute.xlu0 %835  ;;  %v16291_v20 = vpop.permute.xlu1 %741 }
 0x400   : > { %v3947_v57 = vrot.slane %v3939_v40, %v14902_v18  ;;  %v3970_v14 = vrot.slane %v3956_v47, %v14902_v18  ;;  %v3823_v45 = vrot.slane %v3815_v31, %v14913_v35  ;;  %v3830_v1 = vrot.slane %v3816_v30, %v14913_v35 }
 0x401   : > { %v2151_v56 = vcombine.low %v2086_v63, %v2102_v21  ;;  %v2152_v39 = vcombine.high %v2086_v63, %v2102_v21  ;;  %1177 = vrot.lane.b32.xlu1 %v20986_v28, %s14236_s17  ;;  %v12829_v29 = vcombine.high %v4435_v13, %v4442_v41  ;;  %v3954_v55 = vrot.slane %v3940_v27, %v14902_v18 }
 0x402   : > { %v2143_v3 = vrot.slane %v2135_v11, %v14913_v35  ;;  %v2150_v46 = vrot.slane %v2136_v7, %v14913_v35  ;;  %1183 = vrot.lane.b32.xlu0 %v14775_v53, %s14236_s17  ;;  %v16281_v40 = vrot.slane %v12823_v54, %v14902_v18  ;;  %v16284_v32 = vrot.slane %v12825_v36, %v14902_v18 }
 0x403   : > { %v4003_v47 = vcombine.low %v3947_v57, %v3963_v6  ;;  %v4004_v31 = vcombine.high %v3947_v57, %v3963_v6  ;;  %v12799_v13 = vcombine.low %v3807_v8, %v3814_v58  ;;  %v12801_v41 = vcombine.high %v3807_v8, %v3814_v58  ;;  %v21029_v57 = vld [vmem:[#allocation60_spill] sm:$0xff] }
 0x404   : > { %21025 = vst [vmem:[#allocation110_spill] sm:$0xff] %v16281_v40  ;;  %21026 = vst [vmem:[#allocation111_spill] sm:$0xff] %v16284_v32  ;;  %v4019_v30 = vcombine.low %v3954_v55, %v3970_v14  ;;  %v4020_v21 = vcombine.high %v3954_v55, %v3970_v14  ;;  %v16287_v27 = vrot.slane %v12827_v17, %v14902_v18 }
 0x405   : > { %v12803_v11 = vcombine.low %v3823_v45, %v3830_v1  ;;  %v2159_v7 = vrot.slane %v2151_v56, %v14913_v35  ;;  %v2166_v63 = vrot.slane %v2152_v39, %v14913_v35  ;;  %1225 = vrot.lane.b32.xlu1 %v20986_v28, %s14237_s19  ;;  %v16296_v54 = vrot.slane %v12829_v29, %v14902_v18  ;;  %v16312_v29 = vpop.permute.xlu0 %751 }
 0x406   : > { %21027 = vst [vmem:[#allocation112_spill] sm:$0xff] %v16287_v27  ;;  %v12805_v36 = vcombine.high %v3823_v45, %v3830_v1  ;;  %v12734_v6 = vcombine.low %v2143_v3, %v2150_v46  ;;  %v12736_v8 = vcombine.high %v2143_v3, %v2150_v46  ;;  %1231 = vrot.lane.b32.xlu0 %v14775_v53, %s14237_s19 }
 0x407   : > { %21028 = vst [vmem:[#allocation113_spill] sm:$0xff] %v16296_v54  ;;  %v4011_v17 = vrot.slane %v4003_v47, %v14913_v35  ;;  %v4018_v58 = vrot.slane %v4004_v31, %v14913_v35  ;;  %v2291_v14 = vcombine.low %v21029_v57, %v834_v19  ;;  %v2292_v56 = vcombine.high %v21029_v57, %v834_v19  ;;  %v21033_v47 = vld [vmem:[#allocation21_spill] sm:$0xff]  ;;  %v16340_v57 = vpop.permute.xlu1 %789 }
 0x408   : > { %v16305_v39 = vrot.slane %v12799_v13, %v14902_v18  ;;  %v16308_v28 = vrot.slane %v12801_v41, %v14902_v18  ;;  %v4027_v45 = vrot.slane %v4019_v30, %v14913_v35  ;;  %v4034_v1 = vrot.slane %v4020_v21, %v14913_v35  ;;  %v21035_v21 = vld [vmem:[#allocation23_spill] sm:$0xff] }
 0x409   : > { %v16315_v55 = vrot.slane %v12803_v11, %v14902_v18  ;;  %v12738_v3 = vcombine.low %v2159_v7, %v2166_v63  ;;  %v2275_v46 = vcombine.low %v14743_v43, %v16231_v42  ;;  %v2276_v19 = vcombine.high %v14743_v43, %v16231_v42  ;;  %1085 = vrot.lane.b32.xlu1 %v21033_v47, %s14234_s30 }
 0x40a   : > { %21030 = vst [vmem:[#allocation60_spill] sm:$0xff] %v16305_v39  ;;  %21031 = vst [vmem:[#allocation114_spill] sm:$0xff] %v16308_v28  ;;  %v16324_v31 = vrot.slane %v12805_v36, %v14902_v18  ;;  %v16327_v13 = vrot.slane %v12734_v6, %v14902_v18  ;;  %v2479_v41 = vcombine.low %v20981_v49, %v16251_v52  ;;  %1091 = vrot.lane.b32.xlu0 %v21035_v21, %s14234_s30 }
 0x40b   : > { %21032 = vst [vmem:[#allocation115_spill] sm:$0xff] %v16315_v55  ;;  %v2495_v30 = vcombine.low %v16206_v62, %v16276_v4  ;;  %v16336_v43 = vrot.slane %v12736_v8, %v14902_v18  ;;  %v12807_v42 = vcombine.low %v4011_v17, %v4018_v58  ;;  %v2299_v11 = vrot.slane %v2291_v14, %v14902_v18 }
 0x40c   : > { %21034 = vst [vmem:[#allocation21_spill] sm:$0xff] %v16324_v31  ;;  %v2306_v36 = vrot.slane %v2292_v56, %v14902_v18  ;;  %v12740_v6 = vcombine.high %v2159_v7, %v2166_v63  ;;  %v12809_v16 = vcombine.high %v4011_v17, %v4018_v58  ;;  %v12811_v22 = vcombine.low %v4027_v45, %v4034_v1  ;;  %v16361_v58 = vpop.permute.xlu0 %799 }
 0x40d   : > { %v12813_v44 = vcombine.high %v4027_v45, %v4034_v1  ;;  %v16343_v51 = vrot.slane %v12738_v3, %v14902_v18  ;;  %v2283_v9 = vrot.slane %v2275_v46, %v14902_v18  ;;  %v2290_v5 = vrot.slane %v2276_v19, %v14902_v18  ;;  %1133 = vrot.lane.b32.xlu1 %v21033_v47, %s14235_s15 }
 0x40e   : > { %v2480_v8 = vcombine.high %v20981_v49, %v16251_v52  ;;  %v16352_v14 = vrot.slane %v2479_v41, %v14902_v18  ;;  %v2496_v7 = vcombine.high %v16206_v62, %v16276_v4  ;;  %v16357_v63 = vrot.slane %v2495_v30, %v14902_v18  ;;  %1139 = vrot.lane.b32.xlu0 %v21035_v21, %s14235_s15 }
 0x40f   : > { %21036 = vst [vmem:[#allocation23_spill] sm:$0xff] %v16343_v51  ;;  %v2683_v17 = vcombine.low %v21009_v2, %v16340_v57  ;;  %v16366_v49 = vrot.slane %v12807_v42, %v14902_v18  ;;  %v2339_v52 = vcombine.low %v2283_v9, %v2299_v11  ;;  %v2340_v56 = vcombine.high %v2283_v9, %v2299_v11 }
 0x410   : > { %v2355_v45 = vcombine.low %v2290_v5, %v2306_v36  ;;  %v16369_v1 = vrot.slane %v12809_v16, %v14902_v18  ;;  %v16372_v62 = vrot.slane %v12811_v22, %v14902_v18  ;;  %v16375_v4 = vrot.slane %v12813_v44, %v14902_v18  ;;  %v838_v16 = vpop.permute.xlu1 %837 }
 0x411   : > { %21037 = vst [vmem:[#allocation116_spill] sm:$0xff] %v16366_v49  ;;  %v2356_v3 = vcombine.high %v2290_v5, %v2306_v36  ;;  %v16378_v46 = vrot.slane %v12740_v6, %v14902_v18  ;;  %v2494_v19 = vrot.slane %v2480_v8, %v14902_v18  ;;  %v2684_v41 = vcombine.high %v21009_v2, %v16340_v57 }
 0x412   : > { %21038 = vst [vmem:[#allocation117_spill] sm:$0xff] %v16369_v1  ;;  %21039 = vst [vmem:[#allocation118_spill] sm:$0xff] %v16372_v62  ;;  %1181 = vrot.lane.b32.xlu1 %v21033_v47, %s14236_s17  ;;  %v2510_v22 = vrot.slane %v2496_v7, %v14902_v18  ;;  %v2543_v5 = vcombine.low %v16352_v14, %v16357_v63  ;;  %v16391_v44 = vrot.slane %v2683_v17, %v14902_v18  ;;  %v16409_v17 = vpop.permute.xlu0 %847 }
 0x413   : > { %21040 = vst [vmem:[#allocation119_spill] sm:$0xff] %v16375_v4  ;;  %1187 = vrot.lane.b32.xlu0 %v21035_v21, %s14236_s17  ;;  %v2347_v2 = vrot.slane %v2339_v52, %v14913_v35  ;;  %v2354_v42 = vrot.slane %v2340_v56, %v14913_v35  ;;  %v2363_v11 = vrot.slane %v2355_v45, %v14913_v35 }
 0x414   : > { %v6231_v36 = vcombine.low %v16305_v39, %v16308_v28  ;;  %v2370_v57 = vrot.slane %v2356_v3, %v14913_v35  ;;  %v6263_v6 = vcombine.low %v16315_v55, %v16324_v31  ;;  %v6367_v8 = vcombine.low %v16366_v49, %v16369_v1 }
 0x415   : > { %v6399_v7 = vcombine.low %v16372_v62, %v16375_v4  ;;  %v2699_v52 = vcombine.low %v16291_v20, %v838_v16  ;;  %v2700_v56 = vcombine.high %v16291_v20, %v838_v16  ;;  %v6503_v3 = vcombine.low %v16212_v59, %v16217_v50 }
 0x416   : > { %v16414_v45 = vrot.slane %v6231_v36, %v14913_v35  ;;  %1229 = vrot.lane.b32.xlu1 %v21033_v47, %s14237_s19  ;;  %v16421_v30 = vrot.slane %v6263_v6, %v14913_v35  ;;  %v16424_v9 = vrot.slane %v6367_v8, %v14913_v35  ;;  %v6535_v20 = vcombine.low %v16220_v0, %v16254_v24  ;;  %v16435_v6 = vpop.permute.xlu1 %757 }
 0x417   : > { %v16427_v62 = vrot.slane %v6399_v7, %v14913_v35  ;;  %1235 = vrot.lane.b32.xlu0 %v21035_v21, %s14237_s19  ;;  %v12742_v16 = vcombine.low %v2347_v2, %v2354_v42  ;;  %v12744_v36 = vcombine.high %v2347_v2, %v2354_v42  ;;  %v2544_v47 = vcombine.high %v16352_v14, %v16357_v63 }
 0x418   : > { %v2559_v59 = vcombine.low %v2494_v19, %v2510_v22  ;;  %v2560_v50 = vcombine.high %v2494_v19, %v2510_v22  ;;  %v6283_v8 = vcombine.low %v16414_v45, %v16421_v30  ;;  %v6639_v0 = vcombine.low %v16281_v40, %v16284_v32  ;;  %v16458_v40 = vpop.permute.xlu0 %755 }
 0x419   : > { %v6419_v7 = vcombine.low %v16424_v9, %v16427_v62  ;;  %v12746_v24 = vcombine.low %v2363_v11, %v2370_v57  ;;  %v2707_v4 = vrot.slane %v2699_v52, %v14902_v18  ;;  %v2714_v2 = vrot.slane %v2700_v56, %v14902_v18 }
 0x41a   : > { %v16446_v14 = vrot.slane %v6503_v3, %v14913_v35  ;;  %1135 = vrot.lane.b32.xlu1 %v14775_v53, %s14235_s15  ;;  %v16451_v19 = vrot.slane %v6535_v20, %v14913_v35  ;;  %v16454_v22 = vrot.slane %v6639_v0, %v14913_v35  ;;  %v6671_v42 = vcombine.low %v16287_v27, %v16296_v54 }
 0x41b   : > { %v7821_v63 = vpack.c.bf16 %v6419_v7, %v6283_v8  ;;  %v16461_v52 = vrot.slane %v12742_v16, %v14902_v18  ;;  %v16464_v56 = vrot.slane %v12744_v36, %v14902_v18  ;;  %v12748_v3 = vcombine.high %v2363_v11, %v2370_v57 }
 0x41c   : > { %v2698_v8 = vrot.slane %v2684_v41, %v14902_v18  ;;  %v2551_v20 = vrot.slane %v2543_v5, %v14913_v35  ;;  %v2558_v7 = vrot.slane %v2544_v47, %v14913_v35  ;;  %v16472_v27 = vrot.slane %v6671_v42, %v14913_v35  ;;  %v16478_v41 = vpop.permute.xlu1 %805  ;;  %v16504_v1 = vpop.permute.xlu0 %803 }
 0x41d   : > { %21041 = vst [vmem:[#allocation120_spill] sm:$0xff] %v16461_v52  ;;  %21042 = vst [vmem:[#allocation121_spill] sm:$0xff] %v16464_v56  ;;  %13425 = vmatprep.subr.msk.bf16.mxu0 %vm7887_vm1, %v7821_v63  ;;  %v7996_v0 = vsel %vm7887_vm1, %v7821_v63, 0  ;;  %v2567_v16 = vrot.slane %v2559_v59, %v14913_v35  ;;  %v2574_v54 = vrot.slane %v2560_v50, %v14913_v35  ;;  %v21043_v59 = vld [vmem:[#allocation24_spill] sm:$0xff] }
 0x41e   : > { %v2747_v36 = vcombine.low %v16391_v44, %v2707_v4  ;;  %v2748_v11 = vcombine.high %v16391_v44, %v2707_v4  ;;  %13164 = vmatpush3.bf16.xpose.msra.mxu0 %v7996_v0  ;;  %v16481_v5 = vrot.slane %v12746_v24, %v14902_v18  ;;  %v2763_v57 = vcombine.low %v2698_v8, %v2714_v2 }
 0x41f   : > { %v6555_v47 = vcombine.low %v16446_v14, %v16451_v19  ;;  %v6691_v63 = vcombine.low %v16454_v22, %v16472_v27  ;;  %1093 = vrot.lane.b32.xlu1 %v21043_v59, %s14234_s30  ;;  %v16490_v50 = vrot.slane %v12748_v3, %v14902_v18  ;;  %v5127_v4 = vcombine.low %v16327_v13, %v16336_v43 }
 0x420   : > { %v5159_v24 = vcombine.low %v16343_v51, %v16378_v46  ;;  %v5263_v44 = vcombine.low %v16461_v52, %v16464_v56  ;;  %v21044_v42 = vcombine.low %v14775_v53, %v16361_v58  ;;  %v2764_v32 = vcombine.high %v2698_v8, %v2714_v2 }
 0x421   : > { %v7822_v49 = vpack.c.bf16 %v6691_v63, %v6555_v47  ;;  %v3719_v3 = vcombine.low %v16312_v29, %v16409_v17  ;;  %v12750_v55 = vcombine.low %v2551_v20, %v2558_v7  ;;  %v12752_v31 = vcombine.high %v2551_v20, %v2558_v7 }
 0x422   : > { %v3711_v0 = vrot.slane %v21044_v42, %v14902_v18  ;;  %v2755_v39 = vrot.slane %v2747_v36, %v14913_v35  ;;  %v2762_v28 = vrot.slane %v2748_v11, %v14913_v35  ;;  %v12754_v51 = vcombine.low %v2567_v16, %v2574_v54 }
 0x423   : > { %v12756_v52 = vcombine.high %v2567_v16, %v2574_v54  ;;  %v2771_v56 = vrot.slane %v2763_v57, %v14913_v35  ;;  %13426 = vmatprep.subr.msk.bf16.mxu0 %vm7887_vm1, %v7822_v49  ;;  %v3720_v2 = vcombine.high %v16312_v29, %v16409_v17  ;;  %v16513_v8 = vrot.slane %v5127_v4, %v14913_v35  ;;  %v16523_v54 = vpop.permute.xlu1 %753 }
 0x424   : > { %v16516_v47 = vrot.slane %v5159_v24, %v14913_v35  ;;  %v16519_v20 = vrot.slane %v5263_v44, %v14913_v35  ;;  %v5295_v7 = vcombine.low %v16481_v5, %v16490_v50  ;;  %1141 = vrot.lane.b32.xlu1 %v21043_v59, %s14235_s15  ;;  %v2778_v16 = vrot.slane %v2764_v32, %v14913_v35 }
 0x425   : > { %v3727_v29 = vrot.slane %v3719_v3, %v14902_v18  ;;  %v7999_v17 = vsel %vm7887_vm1, %v7822_v49, 0  ;;  %v5740_v36 = vcombine.high %v16029_v60, %v16032_v26  ;;  %v16533_v11 = vrot.slane %v12750_v55, %v14902_v18  ;;  %v852_v26 = vpop.permute.xlu0 %851 }
 0x426   : > { %v12758_v57 = vcombine.low %v2755_v39, %v2762_v28  ;;  %v16536_v63 = vrot.slane %v5295_v7, %v14913_v35  ;;  %13166 = vmatpush3.bf16.xpose.msra.mxu0 %v7999_v17  ;;  %v5876_v4 = vcombine.high %v16048_v25, %v16051_v33  ;;  %v16541_v32 = vrot.slane %v12752_v31, %v14902_v18 }
 0x427   : > { %v16544_v24 = vrot.slane %v12754_v51, %v14902_v18  ;;  %v12760_v49 = vcombine.high %v2755_v39, %v2762_v28  ;;  %v3734_v60 = vrot.slane %v3720_v2, %v14902_v18  ;;  %v16548_v55 = vrot.slane %v12756_v52, %v14902_v18  ;;  %v16565_v17 = vpop.permute.xlu1 %801 }
 0x428   : > { %v5191_v44 = vcombine.low %v16513_v8, %v16516_v47  ;;  %v5327_v42 = vcombine.low %v16519_v20, %v16536_v63  ;;  %v7827_v33 = vpack.c.bf16 %v5876_v4, %v5740_v36  ;;  %1189 = vrot.lane.b32.xlu1 %v21043_v59, %s14236_s17  ;;  %v21047_v25 = vcombine.high %v14775_v53, %v16361_v58 }
 0x429   : > { %21045 = vst [vmem:[#allocation24_spill] sm:$0xff] %v16544_v24  ;;  %21046 = vst [vmem:[#allocation122_spill] sm:$0xff] %v16548_v55  ;;  %v12762_v39 = vcombine.low %v2771_v56, %v2778_v16  ;;  %v3767_v28 = vcombine.low %v3711_v0, %v3727_v29  ;;  %v3768_v31 = vcombine.high %v3711_v0, %v3727_v29 }
 0x42a   : > { %v3718_v51 = vrot.slane %v21047_v25, %v14902_v18  ;;  %v16561_v52 = vrot.slane %v12758_v57, %v14902_v18  ;;  %v12764_v3 = vcombine.high %v2771_v56, %v2778_v16  ;;  %v7785_v2 = vpack.c.bf16 %v5327_v42, %v5191_v44  ;;  %13431 = vmatprep.subr.msk.bf16.mxu0 %vm7887_vm1, %v7827_v33  ;;  %v21050_v16 = vld [vmem:[#allocation26_spill] sm:$0xff] }
 0x42b   : > { %v4127_v7 = vcombine.low %v16458_v40, %v852_v26  ;;  %v16568_v36 = vrot.slane %v12760_v49, %v14902_v18  ;;  %v6143_v58 = vcombine.low %v16167_v12, %v16209_v34  ;;  %v4111_v56 = vcombine.low %v21035_v21, %v16504_v1 }
 0x42c   : > { %21048 = vst [vmem:[#allocation123_spill] sm:$0xff] %v16561_v52  ;;  %v3783_v4 = vcombine.low %v3718_v51, %v3734_v60  ;;  %v3784_v53 = vcombine.high %v3718_v51, %v3734_v60  ;;  %13155 = vmatprep.mubr.msk.bf16.mxu1 %vm7887_vm1, %v7785_v2  ;;  %v4128_v0 = vcombine.high %v16458_v40, %v852_v26 }
 0x42d   : > { %21049 = vst [vmem:[#allocation124_spill] sm:$0xff] %v16568_v36  ;;  %v6007_v29 = vcombine.low %v21050_v16, %v16164_v48  ;;  %v6148_v57 = vcombine.high %v16081_v15, %v16100_v61  ;;  %v3775_v49 = vrot.slane %v3767_v28, %v14913_v35  ;;  %v3782_v60 = vrot.slane %v3768_v31, %v14913_v35 }
 0x42e   : > { %v4315_v44 = vcombine.low %v21043_v59, %v16478_v41  ;;  %v4316_v42 = vcombine.high %v21043_v59, %v16478_v41  ;;  %1237 = vrot.lane.b32.xlu1 %v21043_v59, %s14237_s19  ;;  %v4112_v40 = vcombine.high %v21035_v21, %v16504_v1  ;;  %v4135_v26 = vrot.slane %v4127_v7, %v14902_v18 }
 0x42f   : > { %v7788_v25 = vpack.c.bf16 %v6143_v58, %v6007_v29  ;;  %v6012_v15 = vcombine.high %v16073_v38, %v16078_v10  ;;  %v16594_v61 = vrot.slane %v12762_v39, %v14902_v18  ;;  %v16597_v51 = vrot.slane %v12764_v3, %v14902_v18  ;;  %v850_v39 = vpop.permute.xlu1 %849 }
 0x430   : > { %v16600_v41 = vrot.slane %v3783_v4, %v14913_v35  ;;  %v16603_v59 = vrot.slane %v3784_v53, %v14913_v35  ;;  %v4119_v21 = vrot.slane %v4111_v56, %v14902_v18  ;;  %v4142_v1 = vrot.slane %v4128_v0, %v14902_v18 }
 0x431   : > { %21051 = vst [vmem:[#allocation26_spill] sm:$0xff] %v16594_v61  ;;  %21052 = vst [vmem:[#allocation125_spill] sm:$0xff] %v16597_v51  ;;  %13168 = vmatmul.mubr.msk.bf16.vlgmr.msra.gmra.mrb[16].mxu0 %vm7887_vm1, %v7788_v25  ;;  %v8168_v10 = vsel %vm7887_vm1, %v7827_v33, 0  ;;  %v7828_v38 = vpack.c.bf16 %v6148_v57, %v6012_v15  ;;  %v16610_v28 = vrot.slane %v4315_v44, %v14902_v18  ;;  %v21053_v57 = vld [vmem:[#allocation25_spill] sm:$0xff] }
 0x432   : > { %v16613_v31 = vrot.slane %v4316_v42, %v14902_v18  ;;  %13192 = vmatpush3.bf16.xpose.msra.mxu0 %v8168_v10  ;;  %v5399_v3 = vcombine.low %v16533_v11, %v16541_v32  ;;  %v5431_v2 = vcombine.low %v16544_v24, %v16548_v55  ;;  %v12798_v7 = vcombine.low %v3775_v49, %v3782_v60 }
 0x433   : > { %v4126_v4 = vrot.slane %v4112_v40, %v14902_v18  ;;  %v4175_v53 = vcombine.low %v4119_v21, %v4135_v26  ;;  %v4176_v33 = vcombine.high %v4119_v21, %v4135_v26  ;;  %13432 = vmatprep.subr.msk.bf16.mxu0 %vm7887_vm1, %v7828_v38  ;;  %v12800_v58 = vcombine.high %v3775_v49, %v3782_v60 }
 0x434   : > { %v12802_v56 = vcombine.low %v16600_v41, %v16603_v59  ;;  %v12804_v0 = vcombine.high %v16600_v41, %v16603_v59  ;;  %v3923_v29 = vcombine.low %v16523_v54, %v850_v39  ;;  %1089 = vrot.lane.b32.xlu1 %v21053_v57, %s14234_s30  ;;  %v3907_v40 = vcombine.low %v21053_v57, %v16565_v17 }
 0x435   : > { %v4191_v44 = vcombine.low %v4126_v4, %v4142_v1  ;;  %v4192_v42 = vcombine.high %v4126_v4, %v4142_v1  ;;  %v3924_v26 = vcombine.high %v16523_v54, %v850_v39  ;;  %v16632_v49 = vrot.slane %v5399_v3, %v14913_v35  ;;  %v21055_v3 = vld [vmem:[#allocation50_spill] sm:$0xff] }
 0x436   : > { %v16635_v60 = vrot.slane %v5431_v2, %v14913_v35  ;;  %v5535_v25 = vcombine.low %v16561_v52, %v16568_v36  ;;  %v5567_v15 = vcombine.low %v16594_v61, %v16597_v51  ;;  %v16642_v41 = vrot.slane %v12798_v7, %v14902_v18  ;;  %v21056_v2 = vld [vmem:[#allocation53_spill] sm:$0xff]  ;;  %v21058_v7 = vld [vmem:[#allocation58_spill] sm:$0xff]  ;;  %v21059_v61 = vld [vmem:[#allocation59_spill] sm:$0xff]  ;;  %v16670_v52 = vpop.permute.xlu0 %1063 }
 0x437   : > { %v4183_v59 = vrot.slane %v4175_v53, %v14913_v35  ;;  %v4190_v21 = vrot.slane %v4176_v33, %v14913_v35  ;;  %v3908_v54 = vcombine.high %v21053_v57, %v16565_v17  ;;  %v3931_v1 = vrot.slane %v3923_v29, %v14902_v18 }
 0x438   : > { %21054 = vst [vmem:[#allocation25_spill] sm:$0xff] %v16642_v41  ;;  %v16650_v10 = vrot.slane %v5535_v25, %v14913_v35  ;;  %v16653_v39 = vrot.slane %v5567_v15, %v14913_v35  ;;  %v21057_v4 = vcombine.high %v21055_v3, %v21056_v2  ;;  %v21060_v51 = vcombine.high %v21058_v7, %v21059_v61 }
 0x439   : > { %1137 = vrot.lane.b32.xlu1 %v21053_v57, %s14235_s15  ;;  %v16664_v17 = vrot.slane %v12800_v58, %v14902_v18  ;;  %v4199_v33 = vrot.slane %v4191_v44, %v14913_v35  ;;  %v3915_v29 = vrot.slane %v3907_v40, %v14902_v18  ;;  %v3938_v25 = vrot.slane %v3924_v26, %v14902_v18  ;;  %v854_v44 = vpop.permute.xlu1 %853  ;;  %s21593_s15 = sld [smem:[#allocation129_spill]] }
 0x43a   : > { %v7791_v53 = vpack.c.bf16 %v21060_v51, %v21057_v4  ;;  %v4206_v15 = vrot.slane %v4192_v42, %v14913_v35  ;;  %v5463_v61 = vcombine.low %v16632_v49, %v16635_v60  ;;  %v5599_v51 = vcombine.low %v16650_v10, %v16653_v39 }
 0x43b   : > { %21061 = vst [vmem:[#allocation50_spill] sm:$0xff] %v16664_v17  ;;  %v8171_v3 = vsel %vm7887_vm1, %v7828_v38, 0  ;;  %v12814_v58 = vcombine.low %v4183_v59, %v4190_v21  ;;  %v3922_v2 = vrot.slane %v3908_v54, %v14902_v18  ;;  %v6284_v40 = vcombine.high %v16414_v45, %v16421_v30 }
 0x43c   : > { %13194 = vmatpush3.bf16.xpose.msra.mxu0 %v8171_v3  ;;  %v6420_v42 = vcombine.high %v16424_v9, %v16427_v62  ;;  %v12816_v26 = vcombine.high %v4183_v59, %v4190_v21  ;;  %v3971_v4 = vcombine.low %v3915_v29, %v3931_v1  ;;  %v3972_v7 = vcombine.high %v3915_v29, %v3931_v1  ;;  %v21066_v59 = vld [vmem:[#allocation29_spill] sm:$0xff]  ;;  %v21067_v1 = vld [vmem:[#allocation32_spill] sm:$0xff]  ;;  %v21068_v29 = vld [vmem:[#allocation31_spill] sm:$0xff] }
 0x43d   : > { %v7786_v36 = vpack.c.bf16 %v5599_v51, %v5463_v61  ;;  %1185 = vrot.lane.b32.xlu1 %v21053_v57, %s14236_s17  ;;  %v16685_v38 = vrot.slane %v12802_v56, %v14902_v18  ;;  %v3987_v24 = vcombine.low %v3922_v2, %v3938_v25  ;;  %v3988_v54 = vcombine.high %v3922_v2, %v3938_v25  ;;  %v21065_v56 = vld [vmem:[#allocation30_spill] sm:$0xff] }
 0x43e   : > { %v7829_v55 = vpack.c.bf16 %v6420_v42, %v6284_v40  ;;  %v16688_v3 = vrot.slane %v12804_v0, %v14902_v18  ;;  %v12818_v30 = vcombine.low %v4199_v33, %v4206_v15  ;;  %v12820_v45 = vcombine.high %v4199_v33, %v4206_v15  ;;  %v16706_v15 = vpop.permute.xlu0 %1111  ;;  %v21070_v2 = vld [vmem:[#allocation34_spill] sm:$0xff]  ;;  %v21071_v40 = vld [vmem:[#allocation33_spill] sm:$0xff] }
 0x43f   : > { %21062 = vst [vmem:[#allocation53_spill] sm:$0xff] %v16685_v38  ;;  %13156 = vmatmul.mubr.msk.bf16.gmra.mrb[4].mxu1 %vm7887_vm1, %v7786_v36  ;;  %v4331_v62 = vcombine.low %v16435_v6, %v854_v44  ;;  %v16693_v9 = vrot.slane %v12814_v58, %v14902_v18  ;;  %v4872_v21 = vcombine.high %v21066_v59, %v21065_v56  ;;  %s20475_s17 = scalar_lea.hbm %s21593_s15, %s12972_s10 }
 0x440   : > { %21063 = vst [vmem:[#allocation58_spill] sm:$0xff] %v16688_v3  ;;  %13183 = vmatprep.mubr.msk.bf16.mxu1 %vm7887_vm1, %v7791_v53  ;;  %13433 = vmatprep.subr.msk.bf16.mxu0 %vm7887_vm1, %v7829_v55  ;;  %v4904_v0 = vcombine.high %v21068_v29, %v21067_v1  ;;  %v16702_v25 = vrot.slane %v12816_v26, %v14902_v18 }
 0x441   : > { %21064 = vst [vmem:[#allocation59_spill] sm:$0xff] %v16693_v9  ;;  %v3979_v36 = vrot.slane %v3971_v4, %v14913_v35  ;;  %v3986_v33 = vrot.slane %v3972_v7, %v14913_v35  ;;  %v4332_v61 = vcombine.high %v16435_v6, %v854_v44  ;;  %1233 = vrot.lane.b32.xlu1 %v21053_v57, %s14237_s19  ;;  %v8174_v57 = vsel %vm7887_vm1, %v7829_v55, 0  ;;  %v16724_v44 = vpop.permute.xlu1 %1065  ;;  %v21073_v7 = vld [vmem:[#allocation36_spill] sm:$0xff]  ;;  %s12540_s19 = scalar_lea.sflag [#allocation4], %s14515_s16 }
 0x442   : > { %21069 = vst [vmem:[#allocation30_spill] sm:$0xff] %v16702_v25  ;;  %v3995_v53 = vrot.slane %v3987_v24, %v14913_v35  ;;  %v4002_v51 = vrot.slane %v3988_v54, %v14913_v35  ;;  %v5328_v58 = vcombine.high %v16519_v20, %v16536_v63  ;;  %v5008_v42 = vcombine.high %v21071_v40, %v21070_v2  ;;  %v21074_v54 = vld [vmem:[#allocation35_spill] sm:$0xff] }
 0x443   : > { %v16718_v26 = vrot.slane %v12818_v30, %v14902_v18  ;;  %v4339_v4 = vrot.slane %v4331_v62, %v14902_v18  ;;  %v5192_v6 = vcombine.high %v16513_v8, %v16516_v47  ;;  %v16727_v24 = vrot.slane %v4872_v21, %v14913_v35  ;;  %v21076_v2 = vld [vmem:[#allocation87_spill] sm:$0xff] }
 0x444   : > { %v16730_v20 = vrot.slane %v4904_v0, %v14913_v35  ;;  %v16733_v63 = vrot.slane %v5008_v42, %v14913_v35  ;;  %v5040_v30 = vcombine.high %v21074_v54, %v21073_v7  ;;  %13196 = vmatpush3.bf16.xpose.msra.mxu0 %v8174_v57  ;;  %v16738_v62 = vrot.slane %v12820_v45, %v14902_v18  ;;  %v16745_v0 = vpop.permute.xlu0 %1159  ;;  %v21082_v57 = vld [vmem:[#allocation61_spill] sm:$0xff]  ;;  %v21083_v54 = vld [vmem:[#allocation64_spill] sm:$0xff] }
 0x445   : > { %21072 = vst [vmem:[#allocation29_spill] sm:$0xff] %v16718_v26  ;;  %v12806_v8 = vcombine.low %v3979_v36, %v3986_v33  ;;  %v12808_v47 = vcombine.high %v3979_v36, %v3986_v33  ;;  %v4346_v55 = vrot.slane %v4332_v61, %v14902_v18  ;;  %v12810_v56 = vcombine.low %v3995_v53, %v4002_v51  ;;  %v16777_v42 = vpop.permute.xlu1 %1113 }
 0x446   : > { %21075 = vst [vmem:[#allocation32_spill] sm:$0xff] %v16738_v62  ;;  %v12812_v59 = vcombine.high %v3995_v53, %v4002_v51  ;;  %v7793_v21 = vpack.c.bf16 %v5328_v58, %v5192_v6  ;;  %v16742_v1 = vrot.slane %v5040_v30, %v14913_v35  ;;  %v4379_v29 = vcombine.low %v16610_v28, %v4339_v4  ;;  %v21081_v6 = vld [vmem:[#allocation62_spill] sm:$0xff]  ;;  %v21084_v30 = vld [vmem:[#allocation63_spill] sm:$0xff] }
 0x447   : > { %13184 = vmatmul.mubr.msk.bf16.vlgmr.msra.gmra.mrb[8].mxu1 %vm7887_vm1, %v21076_v2  ;;  %v8257_v45 = vsel %vm7887_vm1, %v15992_v23, 0  ;;  %v6556_v36 = vcombine.high %v16446_v14, %v16451_v19  ;;  %v6692_v33 = vcombine.high %v16454_v22, %v16472_v27  ;;  %v4380_v61 = vcombine.high %v16610_v28, %v4339_v4 }
 0x448   : > { %13208 = vmatpush3.bf16.xpose.msra.mxu1 %v8257_v45  ;;  %13187 = vmatprep.mubr.msk.bf16.mxu1 %vm7887_vm1, %v7793_v21  ;;  %v4925_v53 = vcombine.low %v16727_v24, %v16730_v20  ;;  %v5061_v51 = vcombine.low %v16733_v63, %v16742_v1  ;;  %v16762_v58 = vrot.slane %v12806_v8, %v14902_v18  ;;  %v1208_v2 = vpop.permute.xlu0 %1207 }
 0x449   : > { %v4395_v23 = vcombine.low %v16613_v31, %v4346_v55  ;;  %v4396_v14 = vcombine.high %v16613_v31, %v4346_v55  ;;  %v16766_v19 = vpack.c.bf16 %v6692_v33, %v6556_v36  ;;  %v16769_v27 = vrot.slane %v12808_v47, %v14902_v18 }
 0x44a   : > { %21077 = vst [vmem:[#allocation31_spill] sm:$0xff] %v16762_v58  ;;  %v16772_v22 = vrot.slane %v12810_v56, %v14902_v18  ;;  %v16775_v28 = vrot.slane %v12812_v59, %v14902_v18  ;;  %v7832_v40 = vpack.c.bf16 %v5061_v51, %v4925_v53  ;;  %v5464_v31 = vcombine.high %v16632_v49, %v16635_v60  ;;  %v21085_v59 = vld [vmem:[#allocation67_spill] sm:$0xff]  ;;  %v21086_v49 = vld [vmem:[#allocation66_spill] sm:$0xff]  ;;  %v21089_v51 = vld [vmem:[#allocation69_spill] sm:$0xff] }
 0x44b   : > { %21078 = vst [vmem:[#allocation34_spill] sm:$0xff] %v16769_v27  ;;  %13434 = vmatprep.subr.msk.bf16.mxu0 %vm7887_vm1, %v16766_v19  ;;  %v5600_v4 = vcombine.high %v16650_v10, %v16653_v39  ;;  %v5144_v7 = vcombine.high %v21082_v57, %v21081_v6  ;;  %v5176_v8 = vcombine.high %v21084_v30, %v21083_v54  ;;  %v21088_v53 = vld [vmem:[#allocation70_spill] sm:$0xff]  ;;  %v21097_v54 = vld [vmem:[#allocation55_spill] sm:$0xff] }
 0x44c   : > { %21079 = vst [vmem:[#allocation33_spill] sm:$0xff] %v16772_v22  ;;  %21080 = vst [vmem:[#allocation36_spill] sm:$0xff] %v16775_v28  ;;  %v4387_v47 = vrot.slane %v4379_v29, %v14913_v35  ;;  %v4394_v55 = vrot.slane %v4380_v61, %v14913_v35  ;;  %v1391_v56 = vcombine.low %v16670_v52, %v16745_v0  ;;  %13436 = vmatprep.subr.msk.bf16.mxu1 %vm7887_vm1, %v7832_v40 }
 0x44d   : > { %v5280_v60 = vcombine.high %v21086_v49, %v21085_v59  ;;  %v4403_v10 = vrot.slane %v4395_v23, %v14913_v35  ;;  %v4410_v39 = vrot.slane %v4396_v14, %v14913_v35  ;;  %v1392_v21 = vcombine.high %v16670_v52, %v16745_v0  ;;  %v21090_v52 = vld [vmem:[#allocation45_spill] sm:$0xff]  ;;  %v21091_v0 = vld [vmem:[#allocation46_spill] sm:$0xff] }
 0x44e   : > { %v7794_v45 = vpack.c.bf16 %v5600_v4, %v5464_v31  ;;  %v8260_v29 = vsel %vm7887_vm1, %v7832_v40, 0  ;;  %v16802_v36 = vrot.slane %v5144_v7, %v14913_v35  ;;  %v16805_v33 = vrot.slane %v5176_v8, %v14913_v35  ;;  %v21093_v40 = vld [vmem:[#allocation47_spill] sm:$0xff]  ;;  %v21094_v4 = vld [vmem:[#allocation48_spill] sm:$0xff]  ;;  %v21096_v7 = vld [vmem:[#allocation54_spill] sm:$0xff] }
 0x44f   : > { %v16808_v61 = vrot.slane %v5280_v60, %v14913_v35  ;;  %v5312_v23 = vcombine.high %v21089_v51, %v21088_v53  ;;  %v21092_v14 = vcombine.high %v21090_v52, %v21091_v0  ;;  %v21095_v6 = vcombine.high %v21093_v40, %v21094_v4  ;;  %v21099_v53 = vld [vmem:[#allocation56_spill] sm:$0xff]  ;;  %v21100_v51 = vld [vmem:[#allocation57_spill] sm:$0xff] }
 0x450   : > { %13188 = vmatmul.mubr.msk.bf16.gmra.mrb[12].mxu1 %vm7887_vm1, %v7794_v45  ;;  %v21098_v30 = vcombine.high %v21096_v7, %v21097_v54  ;;  %v12822_v59 = vcombine.low %v4387_v47, %v4394_v55  ;;  %v16832_v49 = vrot.slane %v1391_v56, %v14902_v18  ;;  %v1407_v60 = vcombine.low %v16706_v15, %v1208_v2  ;;  %v16835_v45 = vpop.permute.xlu1 %1161 }
 0x451   : > { %21087 = vst [vmem:[#allocation35_spill] sm:$0xff] %v16808_v61  ;;  %v16817_v31 = vrot.slane %v21092_v14, %v14913_v35  ;;  %v16823_v57 = vrot.slane %v21095_v6, %v14913_v35  ;;  %13210 = vmatpush3.bf16.xpose.msra.mxu1 %v8260_v29  ;;  %v21101_v52 = vcombine.high %v21099_v53, %v21100_v51 }
 0x452   : > { %v16829_v8 = vrot.slane %v21098_v30, %v14913_v35  ;;  %v16844_v14 = vrot.slane %v5312_v23, %v14913_v35  ;;  %v6215_v56 = vcombine.low %v16642_v41, %v16664_v17  ;;  %v6247_v4 = vcombine.low %v16685_v38, %v16688_v3 }
 0x453   : > { %v16841_v0 = vrot.slane %v21101_v52, %v14913_v35  ;;  %v4649_v40 = vcombine.low %v16817_v31, %v16823_v57  ;;  %v12824_v6 = vcombine.high %v4387_v47, %v4394_v55  ;;  %v12826_v29 = vcombine.low %v4403_v10, %v4410_v39 }
 0x454   : > { %21102 = vst [vmem:[#allocation87_spill] sm:$0xff] %v16844_v14  ;;  %v6351_v54 = vcombine.low %v16762_v58, %v16769_v27  ;;  %v1408_v23 = vcombine.high %v16706_v15, %v1208_v2  ;;  %v5197_v30 = vcombine.low %v16802_v36, %v16805_v33  ;;  %v5333_v53 = vcombine.low %v16808_v61, %v16844_v14 }
 0x455   : > { %v4785_v7 = vcombine.low %v16829_v8, %v16841_v0  ;;  %v6383_v51 = vcombine.low %v16772_v22, %v16775_v28  ;;  %v12828_v52 = vcombine.high %v4403_v10, %v4410_v39  ;;  %v16864_v55 = vrot.slane %v6215_v56, %v14913_v35  ;;  %v21106_v56 = vld [vmem:[#allocation94_spill] sm:$0xff] }
 0x456   : > { %v16867_v38 = vrot.slane %v6247_v4, %v14913_v35  ;;  %v16870_v58 = vrot.slane %v1392_v21, %v14902_v18  ;;  %v16873_v15 = vrot.slane %v1407_v60, %v14902_v18  ;;  %v7833_v2 = vpack.c.bf16 %v5333_v53, %v5197_v30  ;;  %v16888_v21 = vpop.permute.xlu1 %1209  ;;  %v21110_v53 = vld [vmem:[#allocation41_spill] sm:$0xff] }
 0x457   : > { %v7799_v47 = vpack.c.bf16 %v4785_v7, %v4649_v40  ;;  %v16876_v27 = vrot.slane %v6351_v54, %v14913_v35  ;;  %v16879_v22 = vrot.slane %v12822_v59, %v14902_v18  ;;  %v16882_v10 = vrot.slane %v12824_v6, %v14902_v18  ;;  %v21107_v6 = vld [vmem:[#allocation96_spill] sm:$0xff] }
 0x458   : > { %v16885_v39 = vrot.slane %v12826_v29, %v14902_v18  ;;  %v16891_v60 = vrot.slane %v6383_v51, %v14913_v35  ;;  %v1422_v40 = vrot.slane %v1408_v23, %v14902_v18  ;;  %13437 = vmatprep.subr.msk.bf16.mxu1 %vm7887_vm1, %v7833_v2  ;;  %v8177_v59 = vsel %vm7887_vm1, %v16766_v19, 0  ;;  %v21108_v29 = vld [vmem:[#allocation95_spill] sm:$0xff]  ;;  %v21111_v51 = vld [vmem:[#allocation40_spill] sm:$0xff] }
 0x459   : > { %21103 = vst [vmem:[#allocation62_spill] sm:$0xff] %v16879_v22  ;;  %21104 = vst [vmem:[#allocation61_spill] sm:$0xff] %v16882_v10  ;;  %13215 = vmatprep.mubr.msk.bf16.mxu1 %vm7887_vm1, %v7799_v47  ;;  %v5688_v4 = vcombine.high %v21106_v56, %v15903_v37  ;;  %v5720_v7 = vcombine.high %v21108_v29, %v21107_v6  ;;  %v16902_v54 = vrot.slane %v12828_v52, %v14902_v18 }
 0x45a   : > { %21105 = vst [vmem:[#allocation64_spill] sm:$0xff] %v16885_v39  ;;  %v6279_v30 = vcombine.low %v16864_v55, %v16867_v38  ;;  %v6415_v23 = vcombine.low %v16876_v27, %v16891_v60  ;;  %13198 = vmatpush3.bf16.xpose.msra.mxu0 %v8177_v59  ;;  %v5824_v47 = vcombine.high %v21111_v51, %v21110_v53  ;;  %v21115_v53 = vld [vmem:[#allocation43_spill] sm:$0xff]  ;;  %v21116_v51 = vld [vmem:[#allocation42_spill] sm:$0xff] }
 0x45b   : > { %21109 = vst [vmem:[#allocation63_spill] sm:$0xff] %v16902_v54  ;;  %v1423_v19 = vcombine.low %v16832_v49, %v16873_v15  ;;  %v1595_v37 = vcombine.low %v16724_v44, %v16835_v45  ;;  %v1596_v52 = vcombine.high %v16724_v44, %v16835_v45  ;;  %v16917_v56 = vrot.slane %v5688_v4, %v14913_v35 }
 0x45c   : > { %v7789_v6 = vpack.c.bf16 %v6415_v23, %v6279_v30  ;;  %v16920_v29 = vrot.slane %v5720_v7, %v14913_v35  ;;  %v16923_v59 = vrot.slane %v5824_v47, %v14913_v35  ;;  %v5856_v28 = vcombine.high %v21116_v51, %v21115_v53  ;;  %v16935_v7 = vpop.permute.xlu0 %1067  ;;  %v16941_v23 = vpop.permute.xlu1 %1069 }
 0x45d   : > { %21112 = vst [vmem:[#allocation67_spill] sm:$0xff] %v16917_v56  ;;  %v1424_v3 = vcombine.high %v16832_v49, %v16873_v15  ;;  %v1439_v41 = vcombine.low %v16870_v58, %v1422_v40  ;;  %v6487_v44 = vcombine.low %v16693_v9, %v16702_v25  ;;  %v6519_v45 = vcombine.low %v16718_v26, %v16738_v62  ;;  %v21122_v62 = vld [vmem:[#allocation68_spill] sm:$0xff]  ;;  %v21123_v9 = vld [vmem:[#allocation65_spill] sm:$0xff] }
 0x45e   : > { %21113 = vst [vmem:[#allocation66_spill] sm:$0xff] %v16920_v29  ;;  %21114 = vst [vmem:[#allocation70_spill] sm:$0xff] %v16923_v59  ;;  %v1440_v4 = vcombine.high %v16870_v58, %v1422_v40  ;;  %13171 = vmatprep.mubr.msk.bf16.mxu0 %vm7887_vm1, %v7789_v6  ;;  %v16939_v30 = vrot.slane %v5856_v28, %v14913_v35  ;;  %v6623_v49 = vcombine.low %v16879_v22, %v16882_v10  ;;  %v21121_v10 = vld [vmem:[#allocation49_spill] sm:$0xff] }
 0x45f   : > { %v6655_v15 = vcombine.low %v16885_v39, %v16902_v54  ;;  %v1611_v47 = vcombine.low %v16777_v42, %v16888_v21  ;;  %v16950_v58 = vrot.slane %v6487_v44, %v14913_v35  ;;  %v16953_v40 = vrot.slane %v6519_v45, %v14913_v35  ;;  %v21118_v45 = vld [vmem:[#allocation106_spill] sm:$0xff]  ;;  %v21119_v54 = vld [vmem:[#allocation105_spill] sm:$0xff] }
 0x460   : > { %21117 = vst [vmem:[#allocation69_spill] sm:$0xff] %v16939_v30  ;;  %v8263_v28 = vsel %vm7887_vm1, %v7833_v2, 0  ;;  %v5741_v6 = vcombine.low %v16917_v56, %v16920_v29  ;;  %v5877_v53 = vcombine.low %v16923_v59, %v16939_v30  ;;  %v16961_v51 = vrot.slane %v6623_v49, %v14913_v35  ;;  %v21120_v2 = vld [vmem:[#allocation51_spill] sm:$0xff]  ;;  %v21124_v59 = vld [vmem:[#allocation72_spill] sm:$0xff]  ;;  %v21127_v56 = vld [vmem:[#allocation73_spill] sm:$0xff] }
 0x461   : > { %v16964_v39 = vrot.slane %v6655_v15, %v14913_v35  ;;  %13212 = vmatpush3.bf16.xpose.msra.mxu1 %v8263_v28  ;;  %v6551_v44 = vcombine.low %v16950_v58, %v16953_v40  ;;  %v5872_v22 = vcombine.high %v21119_v54, %v21118_v45  ;;  %v5416_v26 = vcombine.high %v21121_v10, %v21120_v2  ;;  %v21125_v15 = vld [vmem:[#allocation71_spill] sm:$0xff]  ;;  %v21126_v28 = vld [vmem:[#allocation74_spill] sm:$0xff]  ;;  %v21129_v54 = vld [vmem:[#allocation104_spill] sm:$0xff] }
 0x462   : > { %v5448_v25 = vcombine.high %v21123_v9, %v21122_v62  ;;  %v7835_v17 = vpack.c.bf16 %v5877_v53, %v5741_v6  ;;  %v5552_v30 = vcombine.high %v21125_v15, %v21124_v59  ;;  %v5584_v29 = vcombine.high %v21127_v56, %v21126_v28  ;;  %v21130_v45 = vld [vmem:[#allocation103_spill] sm:$0xff]  ;;  %v16991_v62 = vpop.permute.xlu0 %1115  ;;  %v17002_v53 = vpop.permute.xlu1 %1117  ;;  %v21139_v15 = vld [vmem:[#allocation82_spill] sm:$0xff] }
 0x463   : > { %v6687_v49 = vcombine.low %v16961_v51, %v16964_v39  ;;  %v16981_v61 = vrot.slane %v1423_v19, %v14913_v35  ;;  %v5736_v14 = vcombine.high %v21130_v45, %v21129_v54  ;;  %v16986_v10 = vrot.slane %v5416_v26, %v14913_v35  ;;  %v21142_v28 = vld [vmem:[#allocation83_spill] sm:$0xff]  ;;  %v21143_v54 = vld [vmem:[#allocation84_spill] sm:$0xff] }
 0x464   : > { %v16989_v9 = vrot.slane %v5448_v25, %v14913_v35  ;;  %v1612_v59 = vcombine.high %v16777_v42, %v16888_v21  ;;  %13439 = vmatprep.subr.msk.bf16.mxu0 %vm7887_vm1, %v7835_v17  ;;  %v16997_v19 = vrot.slane %v5552_v30, %v14913_v35  ;;  %v17000_v6 = vrot.slane %v5584_v29, %v14913_v35  ;;  %v21134_v21 = vld [vmem:[#allocation79_spill] sm:$0xff] }
 0x465   : > { %21128 = vst [vmem:[#allocation45_spill] sm:$0xff] %v16981_v61  ;;  %v7790_v56 = vpack.c.bf16 %v6687_v49, %v6551_v44  ;;  %v17005_v26 = vrot.slane %v1424_v3, %v14913_v35  ;;  %v17008_v25 = vrot.slane %v1439_v41, %v14913_v35  ;;  %v17011_v2 = vrot.slane %v1440_v4, %v14913_v35  ;;  %v21135_v44 = vld [vmem:[#allocation80_spill] sm:$0xff]  ;;  %v21138_v4 = vld [vmem:[#allocation81_spill] sm:$0xff] }
 0x466   : > { %v7795_v42 = vpack.c.bf16 %v5872_v22, %v5736_v14  ;;  %v21136_v30 = vcombine.high %v21134_v21, %v21135_v44  ;;  %v1619_v29 = vrot.slane %v1611_v47, %v14902_v18  ;;  %v5469_v3 = vcombine.low %v16986_v10, %v16989_v9  ;;  %v21146_v47 = vld [vmem:[#allocation85_spill] sm:$0xff] }
 0x467   : > { %21131 = vst [vmem:[#allocation46_spill] sm:$0xff] %v17005_v26  ;;  %21132 = vst [vmem:[#allocation47_spill] sm:$0xff] %v17008_v25  ;;  %13172 = vmatmul.mubr.msk.bf16.gmra.mrb[20].mxu0 %vm7887_vm1, %v7790_v56  ;;  %v5605_v41 = vcombine.low %v16997_v19, %v17000_v6  ;;  %v21140_v22 = vcombine.high %v21138_v4, %v21139_v15  ;;  %v21144_v45 = vcombine.high %v21142_v28, %v21143_v54  ;;  %v21147_v56 = vld [vmem:[#allocation86_spill] sm:$0xff]  ;;  %v21153_v54 = vld [vmem:[#allocation89_spill] sm:$0xff] }
 0x468   : > { %21133 = vst [vmem:[#allocation48_spill] sm:$0xff] %v17011_v2  ;;  %v17017_v49 = vrot.slane %v21136_v30, %v14913_v35  ;;  %v21148_v44 = vcombine.high %v21146_v47, %v21147_v56  ;;  %13199 = vmatprep.mubr.msk.bf16.mxu0 %vm7887_vm1, %v7795_v42  ;;  %v1610_v4 = vrot.slane %v1596_v52, %v14902_v18  ;;  %v1164_v52 = vpop.permute.xlu0 %1163 }
 0x469   : > { %v17029_v14 = vrot.slane %v21140_v22, %v14913_v35  ;;  %v17035_v21 = vrot.slane %v21144_v45, %v14913_v35  ;;  %v1626_v15 = vrot.slane %v1612_v59, %v14902_v18  ;;  %v7834_v22 = vpack.c.bf16 %v5605_v41, %v5469_v3  ;;  %v17058_v59 = vpop.permute.xlu1 %1165  ;;  %v21152_v45 = vld [vmem:[#allocation90_spill] sm:$0xff] }
 0x46a   : > { %21137 = vst [vmem:[#allocation54_spill] sm:$0xff] %v17017_v49  ;;  %v17041_v30 = vrot.slane %v21148_v44, %v14913_v35  ;;  %v1603_v49 = vrot.slane %v1595_v37, %v14902_v18  ;;  %v6144_v28 = vcombine.high %v16167_v12, %v16209_v34  ;;  %v6008_v34 = vcombine.high %v21050_v16, %v16164_v48  ;;  %v21150_v44 = vld [vmem:[#allocation88_spill] sm:$0xff]  ;;  %v21151_v37 = vld [vmem:[#allocation19_spill] sm:$0xff] }
 0x46b   : > { %21141 = vst [vmem:[#allocation55_spill] sm:$0xff] %v17029_v14  ;;  %21145 = vst [vmem:[#allocation56_spill] sm:$0xff] %v17035_v21  ;;  %13438 = vmatprep.subr.msk.bf16.mxu1 %vm7887_vm1, %v7834_v22  ;;  %v8266_v12 = vsel %vm7887_vm1, %v7834_v22, 0  ;;  %v6416_v3 = vcombine.high %v16876_v27, %v16891_v60  ;;  %v6280_v56 = vcombine.high %v16864_v55, %v16867_v38  ;;  %v21154_v48 = vld [vmem:[#allocation20_spill] sm:$0xff]  ;;  %v21155_v16 = vld [vmem:[#allocation91_spill] sm:$0xff] }
 0x46c   : > { %21149 = vst [vmem:[#allocation57_spill] sm:$0xff] %v17041_v30  ;;  %v1627_v42 = vcombine.low %v1603_v49, %v1619_v29  ;;  %v1628_v41 = vcombine.high %v1603_v49, %v1619_v29  ;;  %13214 = vmatpush3.bf16.xpose.msra.mxu1 %v8266_v12  ;;  %v5960_v47 = vcombine.high %v21151_v37, %v21150_v44  ;;  %v21156_v38 = vld [vmem:[#allocation93_spill] sm:$0xff]  ;;  %v21157_v55 = vld [vmem:[#allocation92_spill] sm:$0xff]  ;;  %v8346_v29 = vsel %vm7887_vm1, %v7835_v17, 0  ;;  %v21161_v37 = vld [vmem:[#allocation38_spill] sm:$0xff] }
 0x46d   : > { %v5992_v2 = vcombine.high %v21153_v54, %v21152_v45  ;;  %v1643_v25 = vcombine.low %v1610_v4, %v1626_v15  ;;  %v1644_v26 = vcombine.high %v1610_v4, %v1626_v15  ;;  %v7796_v61 = vpack.c.bf16 %v6144_v28, %v6008_v34  ;;  %v21158_v15 = vld [vmem:[#allocation37_spill] sm:$0xff]  ;;  %v21159_v28 = vld [vmem:[#allocation22_spill] sm:$0xff]  ;;  %v21160_v45 = vld [vmem:[#allocation39_spill] sm:$0xff]  ;;  %v17107_v44 = vpop.permute.xlu1 %1213 }
 0x46e   : > { %v6096_v22 = vcombine.high %v21155_v16, %v21154_v48  ;;  %v7797_v21 = vpack.c.bf16 %v6416_v3, %v6280_v56  ;;  %v17074_v27 = vrot.slane %v5960_v47, %v14913_v35  ;;  %v6128_v49 = vcombine.high %v21157_v55, %v21156_v38  ;;  %v1212_v56 = vpop.permute.xlu0 %1211  ;;  %v21162_v48 = vld [vmem:[#allocation76_spill] sm:$0xff]  ;;  %v21163_v16 = vld [vmem:[#allocation75_spill] sm:$0xff]  ;;  %v21165_v38 = vld [vmem:[#allocation77_spill] sm:$0xff] }
 0x46f   : > { %v17077_v60 = vrot.slane %v5992_v2, %v14913_v35  ;;  %13200 = vmatmul.mubr.msk.bf16.vlgmr.msra.gmra.mrb[24].mxu0 %vm7887_vm1, %v7796_v61  ;;  %v4654_v54 = vcombine.high %v21159_v28, %v21158_v15  ;;  %v4790_v47 = vcombine.high %v21161_v37, %v21160_v45  ;;  %v17091_v34 = vrot.slane %v1627_v42, %v14913_v35  ;;  %v21181_v28 = vld [vmem:[#allocation98_spill] sm:$0xff] }
 0x470   : > { %v17084_v4 = vrot.slane %v6096_v22, %v14913_v35  ;;  %v17094_v2 = vrot.slane %v1628_v41, %v14913_v35  ;;  %13224 = vmatpush3.bf16.xpose.msra.mxu0 %v8346_v29  ;;  %13203 = vmatprep.mubr.msk.bf16.mxu0 %vm7887_vm1, %v7797_v21  ;;  %v17098_v17 = vrot.slane %v6128_v49, %v14913_v35 }
 0x471   : > { %v17101_v61 = vrot.slane %v1643_v25, %v14913_v35  ;;  %v17104_v12 = vrot.slane %v1644_v26, %v14913_v35  ;;  %v1799_v3 = vcombine.low %v16935_v7, %v1164_v52  ;;  %v7839_v42 = vpack.c.bf16 %v4790_v47, %v4654_v54  ;;  %v21164_v25 = vld [vmem:[#allocation78_spill] sm:$0xff] }
 0x472   : > { %v6013_v41 = vcombine.low %v17074_v27, %v17077_v60  ;;  %v6149_v21 = vcombine.low %v17084_v4, %v17098_v17  ;;  %v4921_v22 = vcombine.low %v21163_v16, %v21162_v48  ;;  %v5057_v55 = vcombine.low %v21165_v38, %v21164_v25 }
 0x473   : > { %v1800_v26 = vcombine.high %v16935_v7, %v1164_v52  ;;  %13443 = vmatprep.subr.msk.bf16.mxu1 %vm7887_vm1, %v7839_v42  ;;  %v6552_v49 = vcombine.high %v16950_v58, %v16953_v40  ;;  %v6688_v29 = vcombine.high %v16961_v51, %v16964_v39  ;;  %v5128_v15 = vcombine.high %v16327_v13, %v16336_v43  ;;  %v21167_v43 = vld [vmem:[#allocation23_spill] sm:$0xff]  ;;  %v21179_v52 = vld [vmem:[#allocation97_spill] sm:$0xff] }
 0x474   : > { %v1815_v54 = vcombine.low %v16991_v62, %v1212_v56  ;;  %v7836_v45 = vpack.c.bf16 %v6149_v21, %v6013_v41  ;;  %v7800_v37 = vpack.c.bf16 %v5057_v55, %v4921_v22  ;;  %v17135_v40 = vrot.slane %v1799_v3, %v14902_v18  ;;  %v17147_v41 = vpop.permute.xlu0 %1071  ;;  %v17149_v21 = vpop.permute.xlu1 %1073  ;;  %v21168_v3 = vld [vmem:[#allocation121_spill] sm:$0xff]  ;;  %v21169_v22 = vld [vmem:[#allocation120_spill] sm:$0xff] }
 0x475   : > { %v7798_v39 = vpack.c.bf16 %v6688_v29, %v6552_v49  ;;  %v17140_v13 = vrot.slane %v5128_v15, %v14913_v35  ;;  %v5160_v51 = vcombine.high %v21167_v43, %v16378_v46  ;;  %v17145_v47 = vrot.slane %v1800_v26, %v14902_v18 }
 0x476   : > { %13440 = vmatprep.subr.msk.bf16.mxu0 %vm7887_vm1, %v7836_v45  ;;  %13216 = vmatmul.mubr.msk.bf16.vlgmr.msra.gmra.mrb[16].mxu1 %vm7887_vm1, %v7800_v37  ;;  %v5264_v55 = vcombine.high %v21169_v22, %v21168_v3  ;;  %v5296_v49 = vcombine.high %v16481_v5, %v16490_v50  ;;  %v8349_v29 = vsel %vm7887_vm1, %v7836_v45, 0  ;;  %v1816_v15 = vcombine.high %v16991_v62, %v1212_v56  ;;  %v21171_v56 = vld [vmem:[#allocation114_spill] sm:$0xff]  ;;  %v21175_v22 = vld [vmem:[#allocation117_spill] sm:$0xff] }
 0x477   : > { %21166 = vst [vmem:[#allocation94_spill] sm:$0xff] %v17140_v13  ;;  %13204 = vmatmul.mubr.msk.bf16.gmra.mrb[28].mxu0 %vm7887_vm1, %v7798_v39  ;;  %v17159_v46 = vrot.slane %v1815_v54, %v14902_v18  ;;  %v17162_v26 = vrot.slane %v5160_v51, %v14913_v35  ;;  %v8435_v37 = vsel %vm7887_vm1, %v7839_v42, 0  ;;  %v2003_v39 = vcombine.low %v16941_v23, %v17058_v59  ;;  %v21172_v54 = vld [vmem:[#allocation60_spill] sm:$0xff]  ;;  %v21173_v42 = vld [vmem:[#allocation21_spill] sm:$0xff]  ;;  %v21174_v51 = vld [vmem:[#allocation115_spill] sm:$0xff] }
 0x478   : > { %13226 = vmatpush3.bf16.xpose.msra.mxu0 %v8349_v29  ;;  %v2004_v43 = vcombine.high %v16941_v23, %v17058_v59  ;;  %v17170_v5 = vrot.slane %v5264_v55, %v14913_v35  ;;  %v17173_v50 = vrot.slane %v5296_v49, %v14913_v35  ;;  %13240 = vmatpush3.bf16.xpose.msra.mxu1 %v8435_v37  ;;  %v21176_v29 = vld [vmem:[#allocation116_spill] sm:$0xff]  ;;  %v21177_v59 = vld [vmem:[#allocation119_spill] sm:$0xff]  ;;  %v21178_v55 = vld [vmem:[#allocation118_spill] sm:$0xff] }
 0x479   : > { %21170 = vst [vmem:[#allocation96_spill] sm:$0xff] %v17162_v26  ;;  %v5193_v62 = vcombine.low %v17140_v13, %v17162_v26  ;;  %v6232_v45 = vcombine.high %v21172_v54, %v21171_v56  ;;  %v6264_v3 = vcombine.high %v21174_v51, %v21173_v42  ;;  %v6368_v58 = vcombine.high %v21176_v29, %v21175_v22  ;;  %v21180_v37 = vld [vmem:[#allocation44_spill] sm:$0xff]  ;;  %v21182_v13 = vld [vmem:[#allocation27_spill] sm:$0xff] }
 0x47a   : > { %v5329_v23 = vcombine.low %v17170_v5, %v17173_v50  ;;  %v6400_v49 = vcombine.high %v21178_v55, %v21177_v59  ;;  %v5672_v7 = vcombine.high %v21180_v37, %v21179_v52  ;;  %v5704_v26 = vcombine.high %v21182_v13, %v21181_v28  ;;  %v21186_v51 = vld [vmem:[#allocation100_spill] sm:$0xff]  ;;  %v21187_v22 = vld [vmem:[#allocation99_spill] sm:$0xff]  ;;  %v17207_v55 = vpop.permute.xlu0 %1167  ;;  %v21190_v37 = vld [vmem:[#allocation102_spill] sm:$0xff] }
 0x47b   : > { %v17192_v56 = vrot.slane %v6232_v45, %v14913_v35  ;;  %v17195_v54 = vrot.slane %v6264_v3, %v14913_v35  ;;  %v17198_v42 = vrot.slane %v6368_v58, %v14913_v35  ;;  %v5808_v29 = vcombine.high %v21187_v22, %v21186_v51  ;;  %v17212_v45 = vpop.permute.xlu1 %1119  ;;  %v21191_v51 = vld [vmem:[#allocation101_spill] sm:$0xff] }
 0x47c   : > { %v17203_v59 = vrot.slane %v1816_v15, %v14902_v18  ;;  %v1831_v52 = vcombine.low %v17135_v40, %v17159_v46  ;;  %v7801_v28 = vpack.c.bf16 %v5329_v23, %v5193_v62  ;;  %v17210_v13 = vrot.slane %v6400_v49, %v14913_v35 }
 0x47d   : > { %21183 = vst [vmem:[#allocation95_spill] sm:$0xff] %v17192_v56  ;;  %21184 = vst [vmem:[#allocation41_spill] sm:$0xff] %v17195_v54  ;;  %v17215_v58 = vrot.slane %v5672_v7, %v14913_v35  ;;  %v17218_v3 = vrot.slane %v5704_v26, %v14913_v35  ;;  %v17221_v15 = vrot.slane %v5808_v29, %v14913_v35 }
 0x47e   : > { %21185 = vst [vmem:[#allocation40_spill] sm:$0xff] %v17198_v42  ;;  %21188 = vst [vmem:[#allocation43_spill] sm:$0xff] %v17210_v13  ;;  %v5840_v22 = vcombine.high %v21191_v51, %v21190_v37  ;;  %13219 = vmatprep.mubr.msk.bf16.mxu1 %vm7887_vm1, %v7801_v28  ;;  %v6285_v62 = vcombine.low %v17192_v56, %v17195_v54  ;;  %v6421_v23 = vcombine.low %v17198_v42, %v17210_v13  ;;  %v21193_v37 = vld [vmem:[#allocation122_spill] sm:$0xff]  ;;  %v21194_v51 = vld [vmem:[#allocation24_spill] sm:$0xff] }
 0x47f   : > { %21189 = vst [vmem:[#allocation42_spill] sm:$0xff] %v17221_v15  ;;  %v4926_v7 = vcombine.high %v16727_v24, %v16730_v20  ;;  %v5062_v26 = vcombine.high %v16733_v63, %v16742_v1  ;;  %v1832_v49 = vcombine.high %v17135_v40, %v17159_v46  ;;  %v5400_v28 = vcombine.high %v16533_v11, %v16541_v32  ;;  %v21195_v20 = vld [vmem:[#allocation124_spill] sm:$0xff]  ;;  %v21196_v54 = vld [vmem:[#allocation123_spill] sm:$0xff] }
 0x480   : > { %v17237_v29 = vrot.slane %v5840_v22, %v14913_v35  ;;  %v5432_v56 = vcombine.high %v21194_v51, %v21193_v37  ;;  %v17244_v42 = vrot.slane %v2003_v39, %v14902_v18  ;;  %v7837_v13 = vpack.c.bf16 %v6421_v23, %v6285_v62  ;;  %v17265_v22 = vpop.permute.xlu1 %1121  ;;  %v21198_v51 = vld [vmem:[#allocation125_spill] sm:$0xff]  ;;  %v21204_v39 = vld [vmem:[#allocation111_spill] sm:$0xff] }
 0x481   : > { %v7840_v24 = vpack.c.bf16 %v5062_v26, %v4926_v7  ;;  %v5536_v63 = vcombine.high %v21196_v54, %v21195_v20  ;;  %v17249_v1 = vrot.slane %v2004_v43, %v14902_v18  ;;  %v2019_v40 = vcombine.low %v17002_v53, %v17107_v44  ;;  %v1216_v43 = vpop.permute.xlu0 %1215  ;;  %v21199_v20 = vld [vmem:[#allocation26_spill] sm:$0xff] }
 0x482   : > { %21192 = vst [vmem:[#allocation106_spill] sm:$0xff] %v17237_v29  ;;  %v5737_v11 = vcombine.low %v17215_v58, %v17218_v3  ;;  %v5873_v32 = vcombine.low %v17221_v15, %v17237_v29  ;;  %v1847_v46 = vcombine.low %v17145_v47, %v17203_v59  ;;  %v2020_v54 = vcombine.high %v17002_v53, %v17107_v44  ;;  %v21205_v15 = vld [vmem:[#allocation110_spill] sm:$0xff] }
 0x483   : > { %13441 = vmatprep.subr.msk.bf16.mxu0 %vm7887_vm1, %v7837_v13  ;;  %13444 = vmatprep.subr.msk.bf16.mxu1 %vm7887_vm1, %v7840_v24  ;;  %v8352_v62 = vsel %vm7887_vm1, %v7837_v13, 0  ;;  %v17269_v23 = vrot.slane %v1831_v52, %v14913_v35  ;;  %v17272_v26 = vrot.slane %v5400_v28, %v14913_v35  ;;  %v17275_v37 = vrot.slane %v5432_v56, %v14913_v35 }
 0x484   : > { %v7803_v7 = vpack.c.bf16 %v5873_v32, %v5737_v11  ;;  %13228 = vmatpush3.bf16.xpose.msra.mxu0 %v8352_v62  ;;  %v2207_v53 = vcombine.low %v17147_v41, %v17207_v55  ;;  %v17280_v44 = vrot.slane %v5536_v63, %v14913_v35  ;;  %v5568_v13 = vcombine.high %v21199_v20, %v21198_v51  ;;  %v21202_v20 = vld [vmem:[#allocation109_spill] sm:$0xff]  ;;  %v17313_v29 = vpop.permute.xlu1 %1169 }
 0x485   : > { %21197 = vst [vmem:[#allocation105_spill] sm:$0xff] %v17272_v26  ;;  %v8438_v52 = vsel %vm7887_vm1, %v7840_v24, 0  ;;  %v2208_v11 = vcombine.high %v17147_v41, %v17207_v55  ;;  %v2027_v28 = vrot.slane %v2019_v40, %v14902_v18  ;;  %v4650_v56 = vcombine.high %v16817_v31, %v16823_v57  ;;  %v21200_v40 = vld [vmem:[#allocation107_spill] sm:$0xff]  ;;  %v21203_v31 = vld [vmem:[#allocation108_spill] sm:$0xff] }
 0x486   : > { %13231 = vmatprep.mubr.msk.bf16.mxu0 %vm7887_vm1, %v7803_v7  ;;  %13242 = vmatpush3.bf16.xpose.msra.mxu1 %v8438_v52  ;;  %v2034_v32 = vrot.slane %v2020_v54, %v14902_v18  ;;  %v2223_v63 = vcombine.low %v17212_v45, %v1216_v43  ;;  %v17294_v62 = vrot.slane %v5568_v13, %v14913_v35  ;;  %v21201_v7 = vld [vmem:[#allocation52_spill] sm:$0xff]  ;;  %v17305_v54 = vpop.permute.xlu0 %1075 }
 0x487   : > { %v4786_v24 = vcombine.high %v16829_v8, %v16841_v0  ;;  %v2224_v41 = vcombine.high %v17212_v45, %v1216_v43  ;;  %v5465_v55 = vcombine.low %v17272_v26, %v17275_v37  ;;  %v6504_v51 = vcombine.high %v21201_v7, %v21200_v40  ;;  %v21206_v0 = vld [vmem:[#allocation113_spill] sm:$0xff]  ;;  %v21207_v45 = vld [vmem:[#allocation112_spill] sm:$0xff] }
 0x488   : > { %v6536_v57 = vcombine.high %v21203_v31, %v21202_v20  ;;  %v5601_v13 = vcombine.low %v17280_v44, %v17294_v62  ;;  %v6640_v8 = vcombine.high %v21205_v15, %v21204_v39  ;;  %v6672_v43 = vcombine.high %v21207_v45, %v21206_v0  ;;  %v21208_v20 = vld [vmem:[#allocation87_spill] sm:$0xff] }
 0x489   : > { %v7807_v52 = vpack.c.bf16 %v4786_v24, %v4650_v56  ;;  %v17316_v26 = vrot.slane %v6504_v51, %v14913_v35  ;;  %v5198_v7 = vcombine.high %v16802_v36, %v16805_v33  ;;  %v21209_v31 = vld [vmem:[#allocation35_spill] sm:$0xff]  ;;  %v2231_v24 = vrot.slane %v2223_v63, %v14902_v18 }
 0x48a   : > { %v17319_v40 = vrot.slane %v6536_v57, %v14913_v35  ;;  %v5334_v56 = vcombine.high %v21209_v31, %v21208_v20  ;;  %v7802_v15 = vpack.c.bf16 %v5601_v13, %v5465_v55  ;;  %v17327_v39 = vrot.slane %v6640_v8, %v14913_v35  ;;  %v1218_v31 = vpop.permute.xlu1 %1217 }
 0x48b   : > { %v17330_v0 = vrot.slane %v6672_v43, %v14913_v35  ;;  %v17333_v51 = vrot.slane %v1832_v49, %v14913_v35  ;;  %v2215_v57 = vrot.slane %v2207_v53, %v14902_v18  ;;  %v2238_v45 = vrot.slane %v2224_v41, %v14902_v18  ;;  %v17353_v43 = vpop.permute.xlu0 %1123 }
 0x48c   : > { %21210 = vst [vmem:[#allocation51_spill] sm:$0xff] %v17327_v39  ;;  %v7841_v36 = vpack.c.bf16 %v5334_v56, %v5198_v7  ;;  %v2035_v33 = vcombine.low %v17244_v42, %v2027_v28  ;;  %v2036_v20 = vcombine.high %v17244_v42, %v2027_v28  ;;  %13220 = vmatmul.mubr.msk.bf16.gmra.mrb[20].mxu1 %vm7887_vm1, %v7802_v15 }
 0x48d   : > { %v6557_v63 = vcombine.low %v17316_v26, %v17319_v40  ;;  %v6693_v55 = vcombine.low %v17327_v39, %v17330_v0  ;;  %v2222_v49 = vrot.slane %v2208_v11, %v14902_v18  ;;  %v2051_v13 = vcombine.low %v17249_v1, %v2034_v32  ;;  %13247 = vmatprep.mubr.msk.bf16.mxu1 %vm7887_vm1, %v7807_v52 }
 0x48e   : > { %v2052_v53 = vcombine.high %v17249_v1, %v2034_v32  ;;  %13445 = vmatprep.subr.msk.bf16.mxu1 %vm7887_vm1, %v7841_v36  ;;  %v8441_v42 = vsel %vm7887_vm1, %v7841_v36, 0  ;;  %v17351_v28 = vrot.slane %v1847_v46, %v14913_v35  ;;  %v2239_v41 = vcombine.low %v2215_v57, %v2231_v24 }
 0x48f   : > { %v2240_v8 = vcombine.high %v2215_v57, %v2231_v24  ;;  %v7838_v7 = vpack.c.bf16 %v6693_v55, %v6557_v63  ;;  %13244 = vmatpush3.bf16.xpose.msra.mxu1 %v8441_v42  ;;  %v2255_v11 = vcombine.low %v2222_v49, %v2238_v45  ;;  %v2256_v56 = vcombine.high %v2222_v49, %v2238_v45  ;;  %v21215_v42 = vld [vmem:[#allocation70_spill] sm:$0xff] }
 0x490   : > { %v5470_v1 = vcombine.high %v16986_v10, %v16989_v9  ;;  %v5606_v32 = vcombine.high %v16997_v19, %v17000_v6  ;;  %v21211_v46 = vcombine.high %v17145_v47, %v17203_v59  ;;  %v17366_v24 = vrot.slane %v2035_v33, %v14913_v35  ;;  %v21221_v47 = vld [vmem:[#allocation53_spill] sm:$0xff] }
 0x491   : > { %v17369_v15 = vrot.slane %v2036_v20, %v14913_v35  ;;  %13442 = vmatprep.subr.msk.bf16.mxu0 %vm7887_vm1, %v7838_v7  ;;  %v8355_v57 = vsel %vm7887_vm1, %v7838_v7, 0  ;;  %v17374_v10 = vrot.slane %v2051_v13, %v14913_v35  ;;  %v17377_v9 = vrot.slane %v2052_v53, %v14913_v35  ;;  %v17435_v53 = vpop.permute.xlu1 %1077  ;;  %v21219_v13 = vld [vmem:[#allocation25_spill] sm:$0xff] }
 0x492   : > { %v17363_v52 = vrot.slane %v21211_v46, %v14913_v35  ;;  %v2427_v19 = vcombine.low %v17265_v22, %v1218_v31  ;;  %13230 = vmatpush3.bf16.xpose.msra.mxu0 %v8355_v57  ;;  %v7842_v6 = vpack.c.bf16 %v5606_v32, %v5470_v1  ;;  %v17385_v45 = vrot.slane %v2239_v41, %v14913_v35  ;;  %v17409_v41 = vpop.permute.xlu0 %1171  ;;  %v21212_v1 = vld [vmem:[#allocation66_spill] sm:$0xff]  ;;  %v21213_v32 = vld [vmem:[#allocation67_spill] sm:$0xff]  ;;  %v21214_v57 = vld [vmem:[#allocation69_spill] sm:$0xff] }
 0x493   : > { %v17388_v36 = vrot.slane %v2240_v8, %v14913_v35  ;;  %v17391_v33 = vrot.slane %v2255_v11, %v14913_v35  ;;  %v17394_v20 = vrot.slane %v2256_v56, %v14913_v35  ;;  %v2411_v63 = vcombine.low %v17149_v21, %v17313_v29  ;;  %v21216_v56 = vld [vmem:[#allocation54_spill] sm:$0xff] }
 0x494   : > { %v2412_v55 = vcombine.high %v17149_v21, %v17313_v29  ;;  %13446 = vmatprep.subr.msk.bf16.mxu1 %vm7887_vm1, %v7842_v6  ;;  %v2428_v29 = vcombine.high %v17265_v22, %v1218_v31  ;;  %v17417_v7 = vrot.slane %v2427_v19, %v14902_v18  ;;  %v5742_v46 = vcombine.high %v21213_v32, %v21212_v1  ;;  %v21217_v32 = vld [vmem:[#allocation56_spill] sm:$0xff]  ;;  %v21222_v22 = vld [vmem:[#allocation34_spill] sm:$0xff] }
 0x495   : > { %v5878_v8 = vcombine.high %v21215_v42, %v21214_v57  ;;  %v2419_v31 = vrot.slane %v2411_v63, %v14902_v18  ;;  %v6009_v1 = vcombine.low %v21216_v56, %v17029_v14  ;;  %v6145_v42 = vcombine.low %v21217_v32, %v17041_v30  ;;  %v21218_v57 = vld [vmem:[#allocation50_spill] sm:$0xff]  ;;  %v21225_v32 = vld [vmem:[#allocation36_spill] sm:$0xff]  ;;  %v21226_v30 = vld [vmem:[#allocation33_spill] sm:$0xff] }
 0x496   : > { %v17433_v19 = vrot.slane %v2412_v55, %v14902_v18  ;;  %v6216_v21 = vcombine.high %v21219_v13, %v21218_v57  ;;  %v2442_v49 = vrot.slane %v2428_v29, %v14902_v18  ;;  %v21220_v63 = vld [vmem:[#allocation58_spill] sm:$0xff]  ;;  %v6384_v14 = vcombine.high %v21226_v30, %v21225_v32 }
 0x497   : > { %v7843_v11 = vpack.c.bf16 %v5878_v8, %v5742_v46  ;;  %v2443_v59 = vcombine.low %v2419_v31, %v17417_v7  ;;  %v6248_v55 = vcombine.high %v21221_v47, %v21220_v63  ;;  %v21223_v8 = vld [vmem:[#allocation31_spill] sm:$0xff]  ;;  %v7804_v39 = vpack.c.bf16 %v6145_v42, %v6009_v1  ;;  %v21231_v1 = vld [vmem:[#allocation46_spill] sm:$0xff] }
 0x498   : > { %v6352_v46 = vcombine.high %v21223_v8, %v21222_v22  ;;  %v17451_v56 = vrot.slane %v6216_v21, %v14913_v35  ;;  %v8444_v13 = vsel %vm7887_vm1, %v7842_v6, 0  ;;  %v6014_v22 = vcombine.high %v17074_v27, %v17077_v60  ;;  %v21230_v6 = vld [vmem:[#allocation45_spill] sm:$0xff]  ;;  %v17483_v27 = vpop.f32.mrb[0].mxu1  ;;  %v21235_v60 = vld [vmem:[#allocation47_spill] sm:$0xff] }
 0x499   : > { %13447 = vmatprep.subr.msk.bf16.mxu0 %vm7887_vm1, %v7843_v11  ;;  %v17457_v29 = vrot.slane %v6248_v55, %v14913_v35  ;;  %13246 = vmatpush3.bf16.xpose.msra.mxu1 %v8444_v13  ;;  %v8524_v47 = vsel %vm7887_vm1, %v7843_v11, 0  ;;  %v17467_v21 = vrot.slane %v6384_v14, %v14913_v35  ;;  %v6150_v30 = vcombine.high %v17084_v4, %v17098_v17  ;;  %v21236_v4 = vld [vmem:[#allocation48_spill] sm:$0xff] }
 0x49a   : > { %21224 = vst [vmem:[#allocation49_spill] sm:$0xff] %v17451_v56  ;;  %v17460_v57 = vrot.slane %v6352_v46, %v14913_v35  ;;  %13232 = vmatmul.mubr.msk.bf16.vlgmr.msra.gmra.mrb[32].mxu0 %vm7887_vm1, %v7804_v39  ;;  %v21232_v32 = vcombine.low %v21230_v6, %v21231_v1  ;;  %v21233_v11 = vcombine.high %v21230_v6, %v21231_v1  ;;  %21234 = vst [vmem:[#allocation71_spill] sm:$0xff] %v17483_v27  ;;  %v17505_v6 = vpop.f32.mrb[1].mxu1 }
 0x49b   : > { %21227 = vst [vmem:[#allocation68_spill] sm:$0xff] %v17457_v29  ;;  %21229 = vst [vmem:[#allocation72_spill] sm:$0xff] %v17467_v21  ;;  %v6281_v14 = vcombine.low %v17451_v56, %v17457_v29  ;;  %13256 = vmatpush3.bf16.xpose.msra.mxu0 %v8524_v47  ;;  %v21237_v17 = vcombine.low %v21235_v60, %v21236_v4  ;;  %v21239_v55 = vcombine.high %v21235_v60, %v21236_v4  ;;  %v17507_v47 = vpop.permute.xlu1 %1125  ;;  %v21253_v56 = vld [vmem:[#allocation32_spill] sm:$0xff]  ;;  %v21254_v29 = vld [vmem:[#allocation29_spill] sm:$0xff] }
 0x49c   : > { %21228 = vst [vmem:[#allocation65_spill] sm:$0xff] %v17460_v57  ;;  %v17475_v42 = vrot.slane %v21232_v32, %v14902_v18  ;;  %v17481_v63 = vrot.slane %v21233_v11, %v14902_v18  ;;  %v21240_v46 = vcombine.low %v17091_v34, %v17094_v2  ;;  %21242 = vst [vmem:[#allocation104_spill] sm:$0xff] %v17505_v6 }
 0x49d   : > { %v17491_v39 = vrot.slane %v21237_v17, %v14902_v18  ;;  %v17497_v8 = vrot.slane %v21239_v55, %v14902_v18  ;;  %v6417_v1 = vcombine.low %v17460_v57, %v17467_v21  ;;  %v7844_v32 = vpack.c.bf16 %v6150_v30, %v6014_v22  ;;  %v17519_v17 = vpop.f32.mrb[2].mxu1  ;;  %v1220_v55 = vpop.permute.xlu0 %1219 }
 0x49e   : > { %v17503_v13 = vrot.slane %v21240_v46, %v14902_v18  ;;  %v6727_v11 = vcombine.low %v17475_v42, %v17481_v63  ;;  %v21243_v60 = vcombine.high %v17091_v34, %v17094_v2  ;;  %21245 = vst [vmem:[#allocation79_spill] sm:$0xff] %v17519_v17  ;;  %v2444_v46 = vcombine.high %v2419_v31, %v17417_v7 }
 0x49f   : > { %21238 = vst [vmem:[#allocation74_spill] sm:$0xff] %v17491_v39  ;;  %v6743_v6 = vcombine.low %v17491_v39, %v17497_v8  ;;  %v21246_v22 = vcombine.low %v17101_v61, %v17104_v12  ;;  %v21248_v34 = vcombine.high %v17101_v61, %v17104_v12  ;;  %v2616_v7 = vcombine.high %v17305_v54, %v17409_v41  ;;  %v21270_v39 = vld [vmem:[#allocation43_spill] sm:$0xff] }
 0x4a0   : > { %21241 = vst [vmem:[#allocation73_spill] sm:$0xff] %v17503_v13  ;;  %v17517_v4 = vrot.slane %v21243_v60, %v14902_v18  ;;  %v17536_v60 = vpop.f32.mrb[3].mxu1  ;;  %v2459_v31 = vcombine.low %v17433_v19, %v2442_v49  ;;  %v7805_v17 = vpack.c.bf16 %v6417_v1, %v6281_v14  ;;  %13448 = vmatprep.subr.msk.bf16.mxu0 %vm7887_vm1, %v7844_v32 }
 0x4a1   : > { %v17528_v30 = vrot.slane %v21246_v22, %v14902_v18  ;;  %v17534_v2 = vrot.slane %v21248_v34, %v14902_v18  ;;  %21250 = vst [vmem:[#allocation82_spill] sm:$0xff] %v17536_v60  ;;  %v2460_v27 = vcombine.high %v17433_v19, %v2442_v49  ;;  %v17546_v57 = vrot.slane %v6727_v11, %v14913_v35  ;;  %v21251_v60 = vld [vmem:[#allocation30_spill] sm:$0xff]  ;;  %v21252_v49 = vld [vmem:[#allocation59_spill] sm:$0xff] }
 0x4a2   : > { %21244 = vst [vmem:[#allocation103_spill] sm:$0xff] %v17517_v4  ;;  %v6795_v22 = vcombine.low %v17503_v13, %v17517_v4  ;;  %v17549_v61 = vrot.slane %v6743_v6, %v14913_v35  ;;  %v2631_v34 = vcombine.low %v17353_v43, %v1220_v55  ;;  %v2632_v14 = vcombine.high %v17353_v43, %v1220_v55  ;;  %v17575_v55 = vpop.permute.xlu1 %1173 }
 0x4a3   : > { %21247 = vst [vmem:[#allocation80_spill] sm:$0xff] %v17528_v30  ;;  %21249 = vst [vmem:[#allocation81_spill] sm:$0xff] %v17534_v2  ;;  %v6811_v12 = vcombine.low %v17528_v30, %v17534_v2  ;;  %13235 = vmatprep.mubr.msk.bf16.mxu0 %vm7887_vm1, %v7805_v17  ;;  %v6488_v19 = vcombine.high %v21252_v49, %v21251_v60  ;;  %v17562_v11 = vrot.slane %v2443_v59, %v14913_v35  ;;  %v21256_v60 = vld [vmem:[#allocation61_spill] sm:$0xff]  ;;  %v21257_v59 = vld [vmem:[#allocation62_spill] sm:$0xff] }
 0x4a4   : > { %v17557_v1 = vrot.slane %v6795_v22, %v14913_v35  ;;  %v17565_v6 = vrot.slane %v2444_v46, %v14913_v35  ;;  %v6520_v43 = vcombine.high %v21254_v29, %v21253_v56  ;;  %v17573_v17 = vrot.slane %v2459_v31, %v14913_v35  ;;  %v21258_v30 = vld [vmem:[#allocation63_spill] sm:$0xff]  ;;  %v21259_v46 = vld [vmem:[#allocation64_spill] sm:$0xff] }
 0x4a5   : > { %v17568_v21 = vrot.slane %v6811_v12, %v14913_v35  ;;  %v17578_v22 = vrot.slane %v6488_v19, %v14913_v35  ;;  %v6624_v49 = vcombine.high %v21257_v59, %v21256_v60  ;;  %v6656_v2 = vcombine.high %v21259_v46, %v21258_v30 }
 0x4a6   : > { %v17585_v12 = vrot.slane %v2460_v27, %v14913_v35  ;;  %v6760_v56 = vcombine.high %v17546_v57, %v17549_v61  ;;  %v17592_v31 = vrot.slane %v6520_v43, %v14913_v35  ;;  %v12839_v19 = vcombine.high %v17391_v33, %v17394_v20 }
 0x4a7   : > { %21255 = vst [vmem:[#allocation83_spill] sm:$0xff] %v17578_v22  ;;  %v6828_v29 = vcombine.high %v17557_v1, %v17568_v21  ;;  %v21261_v60 = vcombine.low %v17305_v54, %v17409_v41  ;;  %v17603_v27 = vrot.slane %v6624_v49, %v14913_v35  ;;  %v17606_v59 = vrot.slane %v6656_v2, %v14913_v35 }
 0x4a8   : > { %21260 = vst [vmem:[#allocation84_spill] sm:$0xff] %v17592_v31  ;;  %v17609_v46 = vrot.slane %v2616_v7, %v14902_v18  ;;  %v17612_v43 = vrot.slane %v2631_v34, %v14902_v18  ;;  %v17615_v13 = vrot.slane %v2632_v14, %v14902_v18  ;;  %v7035_v54 = vcombine.low %v17562_v11, %v17565_v6 }
 0x4a9   : > { %v17600_v30 = vrot.slane %v21261_v60, %v14902_v18  ;;  %21262 = vst [vmem:[#allocation85_spill] sm:$0xff] %v17603_v27  ;;  %21263 = vst [vmem:[#allocation86_spill] sm:$0xff] %v17606_v59  ;;  %v7855_v4 = vpack.c.bf16 %v6828_v29, %v6760_v56  ;;  %v12840_v41 = vcombine.high %v17562_v11, %v17565_v6  ;;  %v17635_v6 = vpop.permute.xlu1 %1221  ;;  %v21264_v60 = vld [vmem:[#allocation96_spill] sm:$0xff] }
 0x4aa   : > { %v6553_v2 = vcombine.low %v17578_v22, %v17592_v31  ;;  %v6689_v7 = vcombine.low %v17603_v27, %v17606_v59  ;;  %v7051_v34 = vcombine.low %v17573_v17, %v17585_v12  ;;  %v12841_v14 = vcombine.high %v17573_v17, %v17585_v12  ;;  %v21265_v22 = vld [vmem:[#allocation94_spill] sm:$0xff]  ;;  %v21268_v59 = vld [vmem:[#allocation41_spill] sm:$0xff] }
 0x4ab   : > { %13303 = vmatprep.subr.bf16.mxu1 %v7855_v4  ;;  %v4922_v49 = vcombine.high %v21163_v16, %v21162_v48  ;;  %v5058_v56 = vcombine.high %v21165_v38, %v21164_v25  ;;  %v5194_v31 = vcombine.high %v21265_v22, %v21264_v60  ;;  %v5330_v27 = vcombine.high %v17170_v5, %v17173_v50  ;;  %v21266_v16 = vld [vmem:[#allocation106_spill] sm:$0xff]  ;;  %v21271_v22 = vld [vmem:[#allocation40_spill] sm:$0xff] }
 0x4ac   : > { %v7806_v29 = vpack.c.bf16 %v6689_v7, %v6553_v2  ;;  %v8527_v12 = vsel %vm7887_vm1, %v7844_v32, 0  ;;  %v5738_v48 = vcombine.high %v17215_v58, %v17218_v3  ;;  %v21267_v25 = vld [vmem:[#allocation42_spill] sm:$0xff]  ;;  %v21269_v2 = vld [vmem:[#allocation95_spill] sm:$0xff]  ;;  %v6422_v60 = vcombine.high %v21271_v22, %v21270_v39 }
 0x4ad   : > { %v7808_v17 = vpack.c.bf16 %v5058_v56, %v4922_v49  ;;  %v5874_v38 = vcombine.high %v21267_v25, %v21266_v16  ;;  %v7809_v11 = vpack.c.bf16 %v5330_v27, %v5194_v31  ;;  %v6286_v7 = vcombine.high %v21269_v2, %v21268_v59  ;;  %13258 = vmatpush3.bf16.xpose.msra.mxu0 %v8527_v12 }
 0x4ae   : > { %13236 = vmatmul.mubr.msk.bf16.gmra.mrb[36].mxu0 %vm7887_vm1, %v7806_v29  ;;  %v21272_v5 = vcombine.low %v17269_v23, %v17333_v51  ;;  %v21274_v3 = vcombine.high %v17269_v23, %v17333_v51  ;;  %v21276_v39 = vcombine.low %v17351_v28, %v17363_v52  ;;  %v21278_v59 = vcombine.high %v17351_v28, %v17363_v52 }
 0x4af   : > { %13248 = vmatmul.mubr.msk.bf16.vlgmr.msra.gmra.mrb[24].mxu1 %vm7887_vm1, %v7808_v17  ;;  %v7811_v58 = vpack.c.bf16 %v5874_v38, %v5738_v48  ;;  %v7845_v27 = vpack.c.bf16 %v6422_v60, %v6286_v7  ;;  %v21280_v23 = vcombine.low %v17366_v24, %v17369_v15  ;;  %v21284_v28 = vcombine.low %v17374_v10, %v17377_v9 }
 0x4b0   : > { %v17655_v50 = vrot.slane %v21272_v5, %v14902_v18  ;;  %v17662_v32 = vrot.slane %v21274_v3, %v14902_v18  ;;  %v17668_v31 = vrot.slane %v21276_v39, %v14902_v18  ;;  %13251 = vmatprep.mubr.msk.bf16.mxu1 %vm7887_vm1, %v7809_v11  ;;  %13304 = vmatpush3.bf16.msra.mxu1 %v7855_v4  ;;  %v17759_v3 = vpop.permute.xlu0 %1079 }
 0x4b1   : > { %v17675_v49 = vrot.slane %v21278_v59, %v14902_v18  ;;  %v17681_v51 = vrot.slane %v21280_v23, %v14902_v18  ;;  %13263 = vmatprep.mubr.msk.bf16.mxu0 %vm7887_vm1, %v7811_v58  ;;  %v21282_v4 = vcombine.high %v17366_v24, %v17369_v15  ;;  %v17696_v52 = vrot.slane %v21284_v28, %v14902_v18  ;;  %v17707_v24 = vpop.permute.xlu1 %1081 }
 0x4b2   : > { %21273 = vst [vmem:[#allocation88_spill] sm:$0xff] %v17655_v50  ;;  %21275 = vst [vmem:[#allocation19_spill] sm:$0xff] %v17662_v32  ;;  %v6863_v56 = vcombine.low %v17655_v50, %v17662_v32  ;;  %v21286_v29 = vcombine.high %v17374_v10, %v17377_v9  ;;  %13449 = vmatprep.subr.msk.bf16.mxu0 %vm7887_vm1, %v7845_v27  ;;  %v21288_v15 = vcombine.low %v17385_v45, %v17388_v36 }
 0x4b3   : > { %21277 = vst [vmem:[#allocation90_spill] sm:$0xff] %v17668_v31  ;;  %21279 = vst [vmem:[#allocation89_spill] sm:$0xff] %v17675_v49  ;;  %v17690_v11 = vrot.slane %v21282_v4, %v14902_v18  ;;  %v6879_v12 = vcombine.low %v17668_v31, %v17675_v49  ;;  %v21290_v16 = vcombine.high %v17385_v45, %v17388_v36 }
 0x4b4   : > { %21281 = vst [vmem:[#allocation20_spill] sm:$0xff] %v17681_v51  ;;  %21285 = vst [vmem:[#allocation93_spill] sm:$0xff] %v17696_v52  ;;  %v17702_v17 = vrot.slane %v21286_v29, %v14902_v18  ;;  %v17713_v48 = vrot.slane %v21288_v15, %v14902_v18  ;;  %v21292_v9 = vcombine.low %v17391_v33, %v17394_v20 }
 0x4b5   : > { %21283 = vst [vmem:[#allocation91_spill] sm:$0xff] %v17690_v11  ;;  %v17719_v10 = vrot.slane %v21290_v16, %v14902_v18  ;;  %v17728_v38 = vrot.slane %v6863_v56, %v14913_v35  ;;  %v6931_v2 = vcombine.low %v17681_v51, %v17690_v11  ;;  %v17735_v22 = vrot.slane %v12839_v19, %v14902_v18  ;;  %v17789_v29 = vpop.permute.xlu1 %1127 }
 0x4b6   : > { %21287 = vst [vmem:[#allocation92_spill] sm:$0xff] %v17702_v17  ;;  %21289 = vst [vmem:[#allocation37_spill] sm:$0xff] %v17713_v48  ;;  %v17725_v25 = vrot.slane %v21292_v9, %v14902_v18  ;;  %v6947_v7 = vcombine.low %v17696_v52, %v17702_v17  ;;  %v17738_v45 = vrot.slane %v6879_v12, %v14913_v35 }
 0x4b7   : > { %21291 = vst [vmem:[#allocation22_spill] sm:$0xff] %v17719_v10  ;;  %21294 = vst [vmem:[#allocation38_spill] sm:$0xff] %v17735_v22  ;;  %v6999_v36 = vcombine.low %v17713_v48, %v17719_v10  ;;  %v17743_v33 = vrot.slane %v7035_v54, %v14902_v18  ;;  %v17746_v20 = vrot.slane %v12840_v41, %v14902_v18 }
 0x4b8   : > { %21293 = vst [vmem:[#allocation39_spill] sm:$0xff] %v17725_v25  ;;  %v17749_v60 = vrot.slane %v6931_v2, %v14913_v35  ;;  %v17752_v5 = vrot.slane %v6947_v7, %v14913_v35  ;;  %v7015_v19 = vcombine.low %v17725_v25, %v17735_v22  ;;  %v17757_v58 = vrot.slane %v7051_v34, %v14902_v18 }
 0x4b9   : > { %21295 = vst [vmem:[#allocation76_spill] sm:$0xff] %v17743_v33  ;;  %21296 = vst [vmem:[#allocation75_spill] sm:$0xff] %v17746_v20  ;;  %v2835_v54 = vcombine.low %v17507_v47, %v17635_v6  ;;  %v2836_v41 = vcombine.high %v17507_v47, %v17635_v6  ;;  %v17766_v39 = vrot.slane %v12841_v14, %v14902_v18 }
 0x4ba   : > { %21297 = vst [vmem:[#allocation78_spill] sm:$0xff] %v17757_v58  ;;  %v7067_v59 = vcombine.low %v17743_v33, %v17746_v20  ;;  %v2647_v23 = vcombine.low %v17600_v30, %v17612_v43  ;;  %v2820_v34 = vcombine.high %v17435_v53, %v17575_v55  ;;  %v6896_v56 = vcombine.high %v17728_v38, %v17738_v45 }
 0x4bb   : > { %21298 = vst [vmem:[#allocation77_spill] sm:$0xff] %v17766_v39  ;;  %v6964_v4 = vcombine.high %v17749_v60, %v17752_v5  ;;  %v17779_v47 = vrot.slane %v6999_v36, %v14913_v35  ;;  %v17782_v14 = vrot.slane %v7015_v19, %v14913_v35  ;;  %v7083_v28 = vcombine.low %v17757_v58, %v17766_v39 }
 0x4bc   : > { %v17785_v6 = vrot.slane %v7067_v59, %v14913_v35  ;;  %v2648_v12 = vcombine.high %v17600_v30, %v17612_v43  ;;  %v2663_v15 = vcombine.low %v17609_v46, %v17615_v13  ;;  %v2664_v16 = vcombine.high %v17609_v46, %v17615_v13  ;;  %v21300_v30 = vld [vmem:[#allocation105_spill] sm:$0xff] }
 0x4bd   : > { %v7856_v9 = vpack.c.bf16 %v6964_v4, %v6896_v56  ;;  %v21299_v2 = vcombine.low %v17435_v53, %v17575_v55  ;;  %v2843_v36 = vrot.slane %v2835_v54, %v14902_v18  ;;  %v2850_v19 = vrot.slane %v2836_v41, %v14902_v18  ;;  %v21301_v53 = vld [vmem:[#allocation51_spill] sm:$0xff]  ;;  %v1176_v56 = vpop.permute.xlu0 %1175 }
 0x4be   : > { %v17804_v59 = vrot.slane %v7083_v28, %v14913_v35  ;;  %v5466_v43 = vcombine.high %v21300_v30, %v17275_v37  ;;  %v5602_v13 = vcombine.high %v17280_v44, %v17294_v62  ;;  %v6558_v46 = vcombine.high %v17316_v26, %v17319_v40 }
 0x4bf   : > { %v2827_v7 = vrot.slane %v21299_v2, %v14902_v18  ;;  %13305 = vmatprep.subr.bf16.mxu1 %v7856_v9  ;;  %v6694_v55 = vcombine.high %v21301_v53, %v17330_v0  ;;  %v2834_v54 = vrot.slane %v2820_v34, %v14902_v18  ;;  %v7032_v41 = vcombine.high %v17779_v47, %v17782_v14 }
 0x4c0   : > { %13306 = vmatpush3.bf16.msra.mxu1 %v7856_v9  ;;  %v7100_v4 = vcombine.high %v17785_v6, %v17804_v59  ;;  %v8530_v37 = vsel %vm7887_vm1, %v7845_v27, 0  ;;  %v2655_v44 = vrot.slane %v2647_v23, %v14913_v35  ;;  %v2662_v62 = vrot.slane %v2648_v12, %v14913_v35  ;;  %v17822_v9 = vpop.permute.xlu1 %1129 }
 0x4c1   : > { %v7810_v26 = vpack.c.bf16 %v5602_v13, %v5466_v43  ;;  %13260 = vmatpush3.bf16.xpose.msra.mxu0 %v8530_v37  ;;  %v7846_v40 = vpack.c.bf16 %v6694_v55, %v6558_v46  ;;  %v2851_v0 = vcombine.low %v2827_v7, %v2843_v36  ;;  %v2852_v28 = vcombine.high %v2827_v7, %v2843_v36  ;;  %v1224_v43 = vpop.permute.xlu0 %1223 }
 0x4c2   : > { %v2867_v2 = vcombine.low %v2834_v54, %v2850_v19  ;;  %v7857_v34 = vpack.c.bf16 %v7100_v4, %v7032_v41  ;;  %v2868_v30 = vcombine.high %v2834_v54, %v2850_v19  ;;  %v2671_v27 = vrot.slane %v2663_v15, %v14913_v35 }
 0x4c3   : > { %13252 = vmatmul.mubr.msk.bf16.gmra.mrb[28].mxu1 %vm7887_vm1, %v7810_v26  ;;  %13450 = vmatprep.subr.msk.bf16.mxu0 %vm7887_vm1, %v7846_v40  ;;  %v2678_v23 = vrot.slane %v2664_v16, %v14913_v35  ;;  %v7103_v12 = vcombine.low %v2655_v44, %v2662_v62  ;;  %v2859_v13 = vrot.slane %v2851_v0, %v14913_v35  ;;  %v8533_v4 = vsel %vm7887_vm1, %v7846_v40, 0 }
 0x4c4   : > { %13307 = vmatprep.subr.bf16.mxu1 %v7857_v34  ;;  %v2866_v7 = vrot.slane %v2852_v28, %v14913_v35  ;;  %v2875_v36 = vrot.slane %v2867_v2, %v14913_v35  ;;  %v2882_v19 = vrot.slane %v2868_v30, %v14913_v35  ;;  %v3039_v46 = vcombine.low %v17789_v29, %v1224_v43  ;;  %v17837_v41 = vpop.permute.xlu1 %1177 }
 0x4c5   : > { %13308 = vmatpush3.bf16.msra.mxu1 %v7857_v34  ;;  %v6759_v53 = vcombine.low %v17546_v57, %v17549_v61  ;;  %v6827_v15 = vcombine.low %v17557_v1, %v17568_v21  ;;  %v12842_v16 = vcombine.high %v2655_v44, %v2662_v62  ;;  %v7119_v55 = vcombine.low %v2671_v27, %v2678_v23 }
 0x4c6   : > { %v12843_v54 = vcombine.high %v2671_v27, %v2678_v23  ;;  %v3023_v37 = vcombine.low %v17759_v3, %v1176_v56  ;;  %v3024_v0 = vcombine.high %v17759_v3, %v1176_v56  ;;  %v7171_v28 = vcombine.low %v2859_v13, %v2866_v7 }
 0x4c7   : > { %v7847_v26 = vpack.c.bf16 %v6827_v15, %v6759_v53  ;;  %v12844_v2 = vcombine.high %v2859_v13, %v2866_v7  ;;  %v7187_v34 = vcombine.low %v2875_v36, %v2882_v19  ;;  %v12845_v57 = vcombine.high %v2875_v36, %v2882_v19 }
 0x4c8   : > { %v3040_v61 = vcombine.high %v17789_v29, %v1224_v43  ;;  %v17844_v21 = vrot.slane %v3039_v46, %v14902_v18  ;;  %v17847_v1 = vrot.slane %v7103_v12, %v14902_v18  ;;  %v17850_v44 = vrot.slane %v12842_v16, %v14902_v18  ;;  %v1226_v29 = vpop.permute.xlu1 %1225 }
 0x4c9   : > { %13262 = vmatpush3.bf16.xpose.msra.mxu0 %v8533_v4  ;;  %v17853_v62 = vrot.slane %v7119_v55, %v14902_v18  ;;  %v17856_v3 = vrot.slane %v12843_v54, %v14902_v18  ;;  %v17859_v56 = vrot.slane %v3023_v37, %v14902_v18  ;;  %v17866_v27 = vrot.slane %v7171_v28, %v14902_v18  ;;  %v21311_v28 = vld [vmem:[#allocation103_spill] sm:$0xff] }
 0x4ca   : > { %13271 = vmatprep.subr.bf16.mxu0 %v7847_v26  ;;  %21302 = vst [vmem:[#allocation23_spill] sm:$0xff] %v17847_v1  ;;  %21303 = vst [vmem:[#allocation121_spill] sm:$0xff] %v17850_v44  ;;  %v7135_v40 = vcombine.low %v17847_v1, %v17850_v44  ;;  %v17869_v23 = vrot.slane %v12844_v2, %v14902_v18  ;;  %v17872_v12 = vrot.slane %v3024_v0, %v14902_v18  ;;  %v21312_v2 = vld [vmem:[#allocation73_spill] sm:$0xff] }
 0x4cb   : > { %21304 = vst [vmem:[#allocation120_spill] sm:$0xff] %v17853_v62  ;;  %21305 = vst [vmem:[#allocation114_spill] sm:$0xff] %v17856_v3  ;;  %v7151_v30 = vcombine.low %v17853_v62, %v17856_v3  ;;  %v17875_v43 = vrot.slane %v3040_v61, %v14902_v18  ;;  %v3055_v13 = vcombine.low %v17859_v56, %v17844_v21  ;;  %v21314_v61 = vld [vmem:[#allocation80_spill] sm:$0xff] }
 0x4cc   : > { %21306 = vst [vmem:[#allocation60_spill] sm:$0xff] %v17866_v27  ;;  %21307 = vst [vmem:[#allocation21_spill] sm:$0xff] %v17869_v23  ;;  %v3056_v7 = vcombine.high %v17859_v56, %v17844_v21  ;;  %v3227_v36 = vcombine.low %v17707_v24, %v17837_v41  ;;  %v17884_v19 = vrot.slane %v7187_v34, %v14902_v18  ;;  %v21315_v56 = vld [vmem:[#allocation55_spill] sm:$0xff]  ;;  %v18121_v33 = vpop.permute.xlu1 %1085 }
 0x4cd   : > { %v17887_v46 = vrot.slane %v12845_v57, %v14902_v18  ;;  %v3228_v53 = vcombine.high %v17707_v24, %v17837_v41  ;;  %v3243_v15 = vcombine.low %v17822_v9, %v1226_v29  ;;  %v17893_v16 = vrot.slane %v7135_v40, %v14913_v35  ;;  %v21310_v24 = vld [vmem:[#allocation74_spill] sm:$0xff]  ;;  %v21313_v57 = vld [vmem:[#allocation81_spill] sm:$0xff] }
 0x4ce   : > { %21308 = vst [vmem:[#allocation115_spill] sm:$0xff] %v17884_v19  ;;  %v17896_v55 = vrot.slane %v7151_v30, %v14913_v35  ;;  %v3244_v54 = vcombine.high %v17822_v9, %v1226_v29  ;;  %v7203_v4 = vcombine.low %v17866_v27, %v17869_v23  ;;  %v6728_v0 = vcombine.high %v17475_v42, %v17481_v63  ;;  %v21316_v9 = vld [vmem:[#allocation54_spill] sm:$0xff]  ;;  %v21317_v42 = vld [vmem:[#allocation57_spill] sm:$0xff]  ;;  %v21318_v63 = vld [vmem:[#allocation56_spill] sm:$0xff] }
 0x4cf   : > { %21309 = vst [vmem:[#allocation117_spill] sm:$0xff] %v17887_v46  ;;  %v7219_v37 = vcombine.low %v17884_v19, %v17887_v46  ;;  %v6744_v41 = vcombine.high %v21310_v24, %v17497_v8  ;;  %v6796_v34 = vcombine.high %v21312_v2, %v21311_v28  ;;  %v6812_v21 = vcombine.high %v21314_v61, %v21313_v57  ;;  %v21319_v57 = vld [vmem:[#allocation68_spill] sm:$0xff] }
 0x4d0   : > { %v6010_v29 = vcombine.high %v21316_v9, %v21315_v56  ;;  %v7211_v40 = vrot.slane %v7203_v4, %v14913_v35  ;;  %v17916_v62 = vrot.slane %v6728_v0, %v14913_v35  ;;  %v6146_v3 = vcombine.high %v21318_v63, %v21317_v42  ;;  %v21320_v0 = vld [vmem:[#allocation49_spill] sm:$0xff]  ;;  %v21321_v56 = vld [vmem:[#allocation72_spill] sm:$0xff] }
 0x4d1   : > { %v7227_v30 = vrot.slane %v7219_v37, %v14913_v35  ;;  %v7168_v8 = vcombine.high %v17893_v16, %v17896_v55  ;;  %v17923_v24 = vrot.slane %v6744_v41, %v14913_v35  ;;  %v17926_v28 = vrot.slane %v6796_v34, %v14913_v35  ;;  %v21322_v9 = vld [vmem:[#allocation65_spill] sm:$0xff] }
 0x4d2   : > { %v17929_v2 = vrot.slane %v6812_v21, %v14913_v35  ;;  %v7812_v37 = vpack.c.bf16 %v6146_v3, %v6010_v29  ;;  %v6282_v61 = vcombine.high %v21320_v0, %v21319_v57  ;;  %v6418_v42 = vcombine.high %v21322_v9, %v21321_v56  ;;  %v21327_v56 = vld [vmem:[#allocation83_spill] sm:$0xff] }
 0x4d3   : > { %v7236_v4 = vcombine.high %v7211_v40, %v7227_v30  ;;  %v3251_v63 = vrot.slane %v3243_v15, %v14902_v18  ;;  %v6895_v34 = vcombine.low %v17728_v38, %v17738_v45  ;;  %v6963_v21 = vcombine.low %v17749_v60, %v17752_v5 }
 0x4d4   : > { %v6829_v41 = vcombine.low %v17926_v28, %v17929_v2  ;;  %v6761_v3 = vcombine.low %v17916_v62, %v17923_v24  ;;  %13264 = vmatmul.mubr.msk.bf16.vlgmr.msra.gmra.mrb[40].mxu0 %vm7887_vm1, %v7812_v37  ;;  %v7813_v29 = vpack.c.bf16 %v6418_v42, %v6282_v61  ;;  %v7099_v57 = vcombine.low %v17785_v6, %v17804_v59  ;;  %v21326_v61 = vld [vmem:[#allocation84_spill] sm:$0xff] }
 0x4d5   : > { %v7858_v1 = vpack.c.bf16 %v7236_v4, %v7168_v8  ;;  %v3071_v15 = vcombine.low %v17872_v12, %v17875_v43  ;;  %v3235_v0 = vrot.slane %v3227_v36, %v14902_v18  ;;  %v3258_v38 = vrot.slane %v3244_v54, %v14902_v18  ;;  %13272 = vmatpush3.bf16.msra.mxu0 %v7847_v26  ;;  %v21324_v8 = vld [vmem:[#allocation86_spill] sm:$0xff]  ;;  %v21325_v4 = vld [vmem:[#allocation85_spill] sm:$0xff] }
 0x4d6   : > { %v7848_v45 = vpack.c.bf16 %v6963_v21, %v6895_v34  ;;  %v17951_v60 = vpack.c.bf16 %v6829_v41, %v6761_v3  ;;  %13267 = vmatprep.mubr.msk.bf16.mxu0 %vm7887_vm1, %v7813_v29  ;;  %v7031_v5 = vcombine.low %v17779_v47, %v17782_v14  ;;  %v6690_v6 = vcombine.high %v21325_v4, %v21324_v8 }
 0x4d7   : > { %13309 = vmatprep.subr.bf16.mxu1 %v7858_v1  ;;  %v3072_v59 = vcombine.high %v17872_v12, %v17875_v43  ;;  %v3242_v36 = vrot.slane %v3228_v53, %v14902_v18  ;;  %v3259_v37 = vcombine.low %v3235_v0, %v3251_v63  ;;  %v3260_v26 = vcombine.high %v3235_v0, %v3251_v63 }
 0x4d8   : > { %21323 = vst [vmem:[#allocation116_spill] sm:$0xff] %v17951_v60  ;;  %13310 = vmatpush3.bf16.msra.mxu1 %v7858_v1  ;;  %13273 = vmatprep.subr.bf16.mxu0 %v7848_v45  ;;  %v7849_v54 = vpack.c.bf16 %v7099_v57, %v7031_v5  ;;  %v6554_v9 = vcombine.high %v21327_v56, %v21326_v61  ;;  %v18005_v61 = vld [vmem:[#allocation8 + $0x8] sm:$0xff] }
 0x4d9   : > { %13335 = vmatprep.subr.bf16.mxu1 %v17951_v60  ;;  %v7235_v42 = vcombine.low %v7211_v40, %v7227_v30  ;;  %v3063_v47 = vrot.slane %v3055_v13, %v14913_v35  ;;  %v3070_v14 = vrot.slane %v3056_v7, %v14913_v35  ;;  %13274 = vmatpush3.bf16.msra.mxu0 %v7848_v45  ;;  %v18082_v60 = vld [vmem:[#allocation8 + $0x38] sm:$0xff] }
 0x4da   : > { %v3275_v41 = vcombine.low %v3242_v36, %v3258_v38  ;;  %v3276_v12 = vcombine.high %v3242_v36, %v3258_v38  ;;  %13275 = vmatprep.subr.bf16.mxu0 %v7849_v54  ;;  %v7814_v43 = vpack.c.bf16 %v6690_v6, %v6554_v9  ;;  %v7167_v1 = vcombine.low %v17893_v16, %v17896_v55 }
 0x4db   : > { %v3079_v53 = vrot.slane %v3071_v15, %v14913_v35  ;;  %v3086_v63 = vrot.slane %v3072_v59, %v14913_v35  ;;  %v3267_v34 = vrot.slane %v3259_v37, %v14913_v35  ;;  %v3274_v40 = vrot.slane %v3260_v26, %v14913_v35 }
 0x4dc   : > { %13268 = vmatmul.mubr.msk.bf16.gmra.mrb[44].mxu0 %vm7887_vm1, %v7814_v43  ;;  %v7850_v13 = vpack.c.bf16 %v7235_v42, %v7167_v1  ;;  %v7239_v7 = vcombine.low %v3063_v47, %v3070_v14  ;;  %v3283_v30 = vrot.slane %v3275_v41, %v14913_v35  ;;  %v3290_v21 = vrot.slane %v3276_v12, %v14913_v35  ;;  %v21336_v41 = vld [vmem:[#allocation71_spill] sm:$0xff] }
 0x4dd   : > { %13276 = vmatpush3.bf16.msra.mxu0 %v7849_v54  ;;  %v12846_v3 = vcombine.high %v3063_v47, %v3070_v14  ;;  %v7255_v16 = vcombine.low %v3079_v53, %v3086_v63  ;;  %v12847_v55 = vcombine.high %v3079_v53, %v3086_v63  ;;  %v7307_v29 = vcombine.low %v3267_v34, %v3274_v40  ;;  %v18003_v54 = vld [vmem:[#allocation8 + $0x10] sm:$0xff]  ;;  %v18017_v14 = vld [vmem:[#allocation8] sm:$0xff]  ;;  %v21337_v53 = vld [vmem:[#allocation82_spill] sm:$0xff] }
 0x4de   : > { %13277 = vmatprep.subr.bf16.mxu0 %v7850_v13  ;;  %v12848_v57 = vcombine.high %v3267_v34, %v3274_v40  ;;  %v17976_v15 = vrot.slane %v7239_v7, %v14902_v18  ;;  %v7323_v0 = vcombine.low %v3283_v30, %v3290_v21  ;;  %v12849_v38 = vcombine.high %v3283_v30, %v3290_v21  ;;  %v21338_v34 = vld [vmem:[#allocation104_spill] sm:$0xff]  ;;  %v18043_v21 = vld [vmem:[#allocation8 + $0x18] sm:$0xff] }
 0x4df   : > { %v17979_v45 = vrot.slane %v12846_v3, %v14902_v18  ;;  %v17982_v5 = vrot.slane %v7255_v16, %v14902_v18  ;;  %v17985_v8 = vrot.slane %v12847_v55, %v14902_v18  ;;  %v17988_v4 = vrot.slane %v7307_v29, %v14902_v18  ;;  %v21340_v55 = vld [vmem:[#allocation79_spill] sm:$0xff] }
 0x4e0   : > { %21328 = vst [vmem:[#allocation119_spill] sm:$0xff] %v17976_v15  ;;  %v17995_v36 = vrot.slane %v12848_v57, %v14902_v18  ;;  %v17998_v37 = vrot.slane %v7323_v0, %v14902_v18  ;;  %v18001_v26 = vrot.slane %v12849_v38, %v14902_v18  ;;  %v18021_v12 = vadd.f32 %v21336_v41, %v18003_v54 }
 0x4e1   : > { %13278 = vmatpush3.bf16.msra.mxu0 %v7850_v13  ;;  %21329 = vst [vmem:[#allocation118_spill] sm:$0xff] %v17979_v45  ;;  %21330 = vst [vmem:[#allocation97_spill] sm:$0xff] %v17982_v5  ;;  %v7271_v6 = vcombine.low %v17976_v15, %v17979_v45  ;;  %v7287_v59 = vcombine.low %v17982_v5, %v17985_v8  ;;  %v18031_v63 = vadd.f32 %v21337_v53, %v18005_v61 }
 0x4e2   : > { %21331 = vst [vmem:[#allocation44_spill] sm:$0xff] %v17985_v8  ;;  %21332 = vst [vmem:[#allocation98_spill] sm:$0xff] %v17988_v4  ;;  %v7339_v42 = vcombine.low %v17988_v4, %v17995_v36  ;;  %v7355_v47 = vcombine.low %v17998_v37, %v18001_v26  ;;  %v18035_v40 = vadd.f32 %v21338_v34, %v18017_v14  ;;  %v8607_v13 = vsel %vm8600_vm2, %v18021_v12, -inf }
 0x4e3   : > { %21333 = vst [vmem:[#allocation27_spill] sm:$0xff] %v17995_v36  ;;  %21334 = vst [vmem:[#allocation100_spill] sm:$0xff] %v17998_v37  ;;  %v18008_v56 = vrot.slane %v7271_v6, %v14913_v35  ;;  %v18011_v9 = vrot.slane %v7287_v59, %v14913_v35  ;;  %8608 = vmax.xlane.f32.xlu0 %v8607_v13  ;;  %v8604_v3 = vsel %vm8600_vm2, %v18031_v63, -inf  ;;  %v18060_v6 = vpop.permute.xlu0 %1083 }
 0x4e4   : > { %21335 = vst [vmem:[#allocation99_spill] sm:$0xff] %v18001_v26  ;;  %v18024_v43 = vrot.slane %v7339_v42, %v14913_v35  ;;  %v18027_v1 = vrot.slane %v7355_v47, %v14913_v35  ;;  %8605 = vmax.xlane.f32.xlu1 %v8604_v3  ;;  %v18051_v29 = vadd.f32 %v21340_v55, %v18043_v21  ;;  %v8601_v57 = vsel %vm8600_vm2, %v18035_v40, -inf  ;;  %v18066_v3 = vld [vmem:[#allocation8 + $0x30] sm:$0xff] }
 0x4e5   : > { %v7303_v7 = vcombine.low %v18008_v56, %v18011_v9  ;;  %v6762_v38 = vcombine.high %v17916_v62, %v17923_v24  ;;  %v6830_v59 = vcombine.high %v17926_v28, %v17929_v2 }
 0x4e6   : > { %v7371_v30 = vcombine.low %v18024_v43, %v18027_v1  ;;  %v8610_v0 = vsel %vm8600_vm2, %v18051_v29, -inf }
 0x4e7   : > { %8602 = vmax.xlane.f32.xlu0 %v8601_v57  ;;  %v18064_v42 = vpack.c.bf16 %v6830_v59, %v6762_v38  ;;  %v1132_v47 = vpop.permute.xlu0 %1131  ;;  %v18068_v57 = vld [vmem:[#allocation8 + $0x20] sm:$0xff] }
 0x4e8   : > { %v18047_v16 = vpack.c.bf16 %v7371_v30, %v7303_v7 }
 0x4e9   : > { %21341 = vst [vmem:[#allocation101_spill] sm:$0xff] %v18064_v42 }
 0x4ea   : > { %21339 = vst [vmem:[#allocation102_spill] sm:$0xff] %v18047_v16  ;;  %13287 = vmatprep.subr.bf16.mxu0 %v18047_v16 }
 0x4eb   : > { %8611 = vmax.xlane.f32.xlu0 %v8610_v0  ;;  %v1180_v13 = vpop.permute.xlu0 %1179  ;;  %v18073_v0 = vld [vmem:[#allocation8 + $0x28] sm:$0xff] }
 0x4ef   : > { %v1228_v30 = vpop.permute.xlu0 %1227 }
 0x4f0   : > { %v3447_v25 = vcombine.low %v1132_v47, %v1228_v30  ;;  %v3448_v22 = vcombine.high %v1132_v47, %v1228_v30  ;;  %v1134_v47 = vpop.permute.xlu1 %1133 }
 0x4f3   : > { %v18075_v28 = vpop.permute.xlu0 %1087 }
 0x4f4   : > { %v1182_v52 = vpop.permute.xlu1 %1181 }
 0x4f7   : > { %v18097_v27 = vpop.permute.xlu0 %1183 }
 0x4f8   : > { %v1230_v8 = vpop.permute.xlu1 %1229 }
 0x504   : > { %v13169_v41 = vpop.f32.mrb[16].mxu0 }
 0x505   : > { %v8035_v53 = vpop.f32.mrb[17].mxu0 }
 0x506   : > { %v13170_v34 = vpop.f32.mrb[18].mxu0  ;;  %v18124_v20 = vadd.f32 %v8035_v53, %v18017_v14  ;;  %v3431_v53 = vcombine.low %v18060_v6, %v1180_v13 }
 0x507   : > { %v8038_v7 = vpop.f32.mrb[19].mxu0 }
 0x508   : > { %21349 = vst [vmem:[#allocation52_spill] sm:$0xff] %v18124_v20  ;;  %v3439_v30 = vrot.slane %v3431_v53, %v14902_v18 }
 0x512   : > { %v13157_v55 = vpop.f32.mrb[4].mxu1 }
 0x513   : > { %v18071_v62 = vadd.f32 %v13157_v55, %v18066_v3  ;;  %v7962_v24 = vpop.f32.mrb[5].mxu1  ;;  %v18088_v55 = vadd.f32 %v13170_v34, %v18043_v21 }
 0x514   : > { %v13158_v2 = vpop.f32.mrb[6].mxu1  ;;  %v18078_v38 = vadd.f32 %v7962_v24, %v18068_v57 }
 0x515   : > { %21342 = vst [vmem:[#allocation122_spill] sm:$0xff] %v18071_v62  ;;  %v7965_v59 = vpop.f32.mrb[7].mxu1  ;;  %v8619_v42 = vsel %vm8600_vm2, %v18071_v62, -inf  ;;  %21345 = vst [vmem:[#allocation123_spill] sm:$0xff] %v18088_v55  ;;  %v18093_v46 = vadd.f32 %v13158_v2, %v18082_v60  ;;  %v8634_v2 = vsel %vm8600_vm2, %v18088_v55, -inf }
 0x516   : > { %21343 = vst [vmem:[#allocation24_spill] sm:$0xff] %v18078_v38  ;;  %v18085_v44 = vadd.f32 %v7965_v59, %v18073_v0  ;;  %8620 = vmax.xlane.f32.xlu0 %v8619_v42  ;;  %v8613_v24 = vsel %vm8600_vm2, %v18078_v38, -inf  ;;  %v18104_v42 = vadd.f32 %v8038_v7, %v18005_v61 }
 0x517   : > { %21346 = vst [vmem:[#allocation125_spill] sm:$0xff] %v18093_v46  ;;  %v8622_v39 = vsel %vm8600_vm2, %v18093_v46, -inf }
 0x518   : > { %21344 = vst [vmem:[#allocation124_spill] sm:$0xff] %v18085_v44  ;;  %v8616_v19 = vsel %vm8600_vm2, %v18085_v44, -inf  ;;  %21347 = vst [vmem:[#allocation26_spill] sm:$0xff] %v18104_v42  ;;  %v8628_v7 = vsel %vm8600_vm2, %v18104_v42, -inf }
 0x519   : > { %8617 = vmax.xlane.f32.xlu1 %v8616_v19  ;;  %v18111_v19 = vadd.f32 %v13169_v41, %v18003_v54 }
 0x51a   : > { %v18099_v23 = vpop.f32.mrb[8].mxu1  ;;  %8614 = vmax.xlane.f32.xlu0 %v8613_v24  ;;  %v18117_v24 = vpop.permute.xlu0 %1231 }
 0x51b   : > { %v18101_v59 = vpop.f32.mrb[9].mxu1  ;;  %21348 = vst [vmem:[#allocation107_spill] sm:$0xff] %v18111_v19  ;;  %v8631_v41 = vsel %vm8600_vm2, %v18111_v19, -inf }
 0x51c   : > { %v18106_v34 = vpop.f32.mrb[10].mxu1 }
 0x51d   : > { %v18113_v58 = vpop.f32.mrb[11].mxu1  ;;  %8635 = vmax.xlane.f32.xlu1 %v8634_v2  ;;  %v7304_v2 = vcombine.high %v18008_v56, %v18011_v9  ;;  %v8625_v56 = vsel %vm8600_vm2, %v18124_v20, -inf  ;;  %v3455_v9 = vrot.slane %v3447_v25, %v14902_v18 }
 0x51e   : > { %8623 = vmax.xlane.f32.xlu0 %v8622_v39  ;;  %v7372_v39 = vcombine.high %v18024_v43, %v18027_v1  ;;  %v3462_v43 = vrot.slane %v3448_v22, %v14902_v18  ;;  %v18148_v1 = vpop.permute.xlu0 %1091 }
 0x520   : > { %v18136_v31 = vpack.c.bf16 %v7372_v39, %v7304_v2 }
 0x521   : > { %8629 = vmax.xlane.f32.xlu1 %v8628_v7  ;;  %v3432_v7 = vcombine.high %v18060_v6, %v1180_v13  ;;  %v3463_v6 = vcombine.low %v3439_v30, %v3455_v9  ;;  %v3464_v13 = vcombine.high %v3439_v30, %v3455_v9 }
 0x522   : > { %8632 = vmax.xlane.f32.xlu0 %v8631_v41  ;;  %21350 = vst [vmem:[#allocation109_spill] sm:$0xff] %v18136_v31  ;;  %v18152_v32 = vpop.permute.xlu0 %1139 }
 0x523   : > { %v18132_v48 = vpop.f32.mrb[12].mxu1  ;;  %v3446_v41 = vrot.slane %v3432_v7, %v14902_v18  ;;  %v3471_v17 = vrot.slane %v3463_v6, %v14913_v35  ;;  %v3478_v25 = vrot.slane %v3464_v13, %v14913_v35 }
 0x524   : > { %v18134_v10 = vpop.f32.mrb[13].mxu1 }
 0x525   : > { %v18140_v49 = vpop.f32.mrb[14].mxu1  ;;  %v3479_v2 = vcombine.low %v3446_v41, %v3462_v43  ;;  %v3480_v39 = vcombine.high %v3446_v41, %v3462_v43  ;;  %v7375_v51 = vcombine.low %v3471_v17, %v3478_v25  ;;  %v12850_v11 = vcombine.high %v3471_v17, %v3478_v25 }
 0x526   : > { %v18142_v50 = vpop.f32.mrb[15].mxu1  ;;  %8626 = vmax.xlane.f32.xlu0 %v8625_v56  ;;  %v1188_v7 = vpop.permute.xlu0 %1187  ;;  %v3839_v17 = vcombine.low %v18075_v28, %v18097_v27  ;;  %v3636_v25 = vcombine.high %v18121_v33, %v1182_v52 }
 0x527   : > { %v3487_v22 = vrot.slane %v3479_v2, %v14913_v35  ;;  %v3494_v56 = vrot.slane %v3480_v39, %v14913_v35  ;;  %v18159_v9 = vrot.slane %v7375_v51, %v14902_v18  ;;  %v18162_v43 = vrot.slane %v12850_v11, %v14902_v18 }
 0x528   : > { %v3840_v51 = vcombine.high %v18075_v28, %v18097_v27  ;;  %v3635_v11 = vcombine.low %v18121_v33, %v1182_v52  ;;  %v4247_v52 = vcombine.low %v18148_v1, %v1188_v7  ;;  %v3651_v33 = vcombine.low %v1134_v47, %v1230_v8 }
 0x529   : > { %v7391_v53 = vcombine.low %v3487_v22, %v3494_v56  ;;  %v12851_v5 = vcombine.high %v3487_v22, %v3494_v56  ;;  %v1136_v22 = vpop.permute.xlu1 %1135  ;;  %v7408_v45 = vcombine.high %v18159_v9, %v18162_v43  ;;  %v3652_v28 = vcombine.high %v1134_v47, %v1230_v8 }
 0x52a   : > { %v1236_v13 = vpop.permute.xlu0 %1235  ;;  %v4248_v4 = vcombine.high %v18148_v1, %v1188_v7  ;;  %v3855_v8 = vcombine.low %v1136_v22, %v18117_v24  ;;  %v3856_v47 = vcombine.high %v1136_v22, %v18117_v24  ;;  %v18220_v7 = vrot.slane %v3840_v51, %v14902_v18 }
 0x52b   : > { %v18165_v30 = vrot.slane %v7391_v53, %v14902_v18  ;;  %v18168_v41 = vrot.slane %v12851_v5, %v14902_v18  ;;  %v4264_v36 = vcombine.high %v18152_v32, %v1236_v13  ;;  %v3666_v24 = vrot.slane %v3652_v28, %v14902_v18 }
 0x52c   : > { %v3643_v22 = vrot.slane %v3635_v11, %v14902_v18  ;;  %v18232_v1 = vadd.f32 %v18106_v34, %v18043_v21  ;;  %v4255_v28 = vrot.slane %v4247_v52, %v14902_v18  ;;  %v3870_v34 = vrot.slane %v3856_v47, %v14902_v18 }
 0x52d   : > { %v7424_v27 = vcombine.high %v18165_v30, %v18168_v41 }
 0x52e   : > { %21356 = vst [vmem:[#allocation87_spill] sm:$0xff] %v18232_v1  ;;  %v8658_v47 = vsel %vm8600_vm2, %v18232_v1, -inf  ;;  %v18297_v1 = vadd.f32 %v18132_v48, %v18066_v3 }
 0x52f   : > { %v18202_v26 = vrot.slane %v7424_v27, %v14913_v35 }
 0x53a   : > { %v13173_v6 = vpop.f32.mrb[20].mxu0 }
 0x53b   : > { %v18173_v2 = vadd.f32 %v13173_v6, %v18066_v3  ;;  %v8051_v39 = vpop.f32.mrb[21].mxu0 }
 0x53c   : > { %v18180_v5 = vadd.f32 %v8051_v39, %v18068_v57  ;;  %v13174_v56 = vpop.f32.mrb[22].mxu0  ;;  %v4263_v39 = vcombine.low %v18152_v32, %v1236_v13  ;;  %v3847_v32 = vrot.slane %v3839_v17, %v14902_v18 }
 0x53d   : > { %21351 = vst [vmem:[#allocation108_spill] sm:$0xff] %v18173_v2  ;;  %v18183_v53 = vadd.f32 %v13174_v56, %v18082_v60  ;;  %v8054_v15 = vpop.f32.mrb[23].mxu0  ;;  %v8643_v6 = vsel %vm8600_vm2, %v18173_v2, -inf  ;;  %v18199_v2 = vrot.slane %v7408_v45, %v14913_v35 }
 0x53e   : > { %21352 = vst [vmem:[#allocation111_spill] sm:$0xff] %v18180_v5  ;;  %8644 = vmax.xlane.f32.xlu0 %v8643_v6  ;;  %v18194_v56 = vadd.f32 %v8054_v15, %v18073_v0  ;;  %v18210_v15 = vadd.f32 %v18099_v23, %v18003_v54  ;;  %v8637_v45 = vsel %vm8600_vm2, %v18180_v5, -inf  ;;  %v18224_v23 = vpop.permute.xlu1 %1093  ;;  %v4271_v27 = vrot.slane %v4263_v39, %v14902_v18 }
 0x53f   : > { %21353 = vst [vmem:[#allocation110_spill] sm:$0xff] %v18183_v53  ;;  %v8646_v37 = vsel %vm8600_vm2, %v18183_v53, -inf  ;;  %v4278_v6 = vrot.slane %v4264_v36, %v14902_v18  ;;  %v4262_v39 = vrot.slane %v4248_v4, %v14902_v18  ;;  %v18246_v5 = vadd.f32 %v18101_v59, %v18017_v14 }
 0x540   : > { %21354 = vst [vmem:[#allocation113_spill] sm:$0xff] %v18194_v56  ;;  %8647 = vmax.xlane.f32.xlu1 %v8646_v37  ;;  %21355 = vst [vmem:[#allocation112_spill] sm:$0xff] %v18210_v15  ;;  %v3659_v37 = vrot.slane %v3651_v33, %v14902_v18  ;;  %v8640_v51 = vsel %vm8600_vm2, %v18194_v56, -inf  ;;  %v3650_v33 = vrot.slane %v3636_v25, %v14902_v18  ;;  %v8655_v25 = vsel %vm8600_vm2, %v18210_v15, -inf }
 0x541   : > { %21357 = vst [vmem:[#allocation35_spill] sm:$0xff] %v18246_v5  ;;  %v4280_v55 = vcombine.high %v4255_v28, %v4271_v27  ;;  %v18252_v4 = vadd.f32 %v18140_v49, %v18082_v60  ;;  %v4295_v59 = vcombine.low %v4262_v39, %v4278_v6 }
 0x542   : > { %v18226_v13 = vpop.f32.mrb[24].mxu0  ;;  %8638 = vmax.xlane.f32.xlu0 %v8637_v45  ;;  %v3863_v45 = vrot.slane %v3855_v8, %v14902_v18  ;;  %v3667_v56 = vcombine.low %v3643_v22, %v3659_v37  ;;  %v3668_v52 = vcombine.high %v3643_v22, %v3659_v37  ;;  %v3683_v20 = vcombine.low %v3650_v33, %v3666_v24  ;;  %v18256_v46 = vpop.permute.xlu1 %1141 }
 0x543   : > { %v18234_v17 = vpop.f32.mrb[25].mxu0  ;;  %v3684_v36 = vcombine.high %v3650_v33, %v3666_v24  ;;  %v4279_v8 = vcombine.low %v4255_v28, %v4271_v27  ;;  %21358 = vst [vmem:[#allocation66_spill] sm:$0xff] %v18252_v4  ;;  %v3887_v37 = vcombine.low %v18220_v7, %v3870_v34  ;;  %v3888_v24 = vcombine.high %v18220_v7, %v3870_v34 }
 0x544   : > { %v13202_v11 = vpop.f32.mrb[26].mxu0  ;;  %8641 = vmax.xlane.f32.xlu1 %v8640_v51  ;;  %v4296_v51 = vcombine.high %v4262_v39, %v4278_v6  ;;  %v3871_v19 = vcombine.low %v3847_v32, %v3863_v45  ;;  %v3872_v42 = vcombine.high %v3847_v32, %v3863_v45  ;;  %v18262_v22 = vadd.f32 %v18113_v58, %v18005_v61 }
 0x545   : > { %v8216_v53 = vpop.f32.mrb[27].mxu0  ;;  %v8649_v27 = vsel %vm8600_vm2, %v18246_v5, -inf  ;;  %v3675_v6 = vrot.slane %v3667_v56, %v14913_v35  ;;  %v3682_v32 = vrot.slane %v3668_v52, %v14913_v35  ;;  %v3691_v33 = vrot.slane %v3683_v20, %v14913_v35 }
 0x546   : > { %8656 = vmax.xlane.f32.xlu0 %v8655_v25  ;;  %21359 = vst [vmem:[#allocation67_spill] sm:$0xff] %v18262_v22  ;;  %v3698_v28 = vrot.slane %v3684_v36, %v14913_v35  ;;  %v4287_v58 = vrot.slane %v4279_v8, %v14913_v35  ;;  %v4294_v39 = vrot.slane %v4280_v55, %v14913_v35  ;;  %v8670_v20 = vsel %vm8600_vm2, %v18252_v4, -inf  ;;  %v18301_v38 = vpop.permute.xlu1 %1189 }
 0x547   : > { %v18279_v34 = vadd.f32 %v13202_v11, %v18043_v21  ;;  %v4303_v52 = vrot.slane %v4295_v59, %v14913_v35  ;;  %v4310_v36 = vrot.slane %v4296_v51, %v14913_v35  ;;  %v3886_v8 = vrot.slane %v3872_v42, %v14913_v35 }
 0x548   : > { %8659 = vmax.xlane.f32.xlu1 %v8658_v47  ;;  %v3879_v47 = vrot.slane %v3871_v19, %v14913_v35  ;;  %v3895_v11 = vrot.slane %v3887_v37, %v14913_v35  ;;  %v3902_v5 = vrot.slane %v3888_v24, %v14913_v35  ;;  %v8652_v59 = vsel %vm8600_vm2, %v18262_v22, -inf }
 0x549   : > { %v18264_v49 = vpop.f32.mrb[16].mxu1  ;;  %v7443_v51 = vcombine.low %v3675_v6, %v3682_v32  ;;  %v12852_v19 = vcombine.high %v3675_v6, %v3682_v32  ;;  %v7459_v15 = vcombine.low %v3691_v33, %v3698_v28  ;;  %v12853_v42 = vcombine.high %v3691_v33, %v3698_v28 }
 0x54a   : > { %v18272_v45 = vpop.f32.mrb[28].mxu0  ;;  %v18274_v7 = vpop.f32.mrb[17].mxu1  ;;  %8650 = vmax.xlane.f32.xlu0 %v8649_v27  ;;  %v12858_v44 = vcombine.high %v4287_v58, %v4294_v39  ;;  %v18304_v37 = vadd.f32 %v8216_v53, %v18005_v61  ;;  %v8682_v48 = vsel %vm8600_vm2, %v18279_v34, -inf  ;;  %v7663_v24 = vcombine.low %v4303_v52, %v4310_v36 }
 0x54b   : > { %v18281_v25 = vpop.f32.mrb[29].mxu0  ;;  %v18283_v56 = vpop.f32.mrb[18].mxu1  ;;  %v12859_v62 = vcombine.high %v4303_v52, %v4310_v36  ;;  %v7511_v31 = vcombine.low %v3879_v47, %v3886_v8  ;;  %v12854_v16 = vcombine.high %v3879_v47, %v3886_v8  ;;  %v7527_v22 = vcombine.low %v3895_v11, %v3902_v5 }
 0x54c   : > { %v13206_v27 = vpop.f32.mrb[30].mxu0  ;;  %v18291_v55 = vpop.f32.mrb[19].mxu1  ;;  %8671 = vmax.xlane.f32.xlu1 %v8670_v20  ;;  %v7647_v20 = vcombine.low %v4287_v58, %v4294_v39  ;;  %21360 = vst [vmem:[#allocation69_spill] sm:$0xff] %v18304_v37  ;;  %v12855_v6 = vcombine.high %v3895_v11, %v3902_v5  ;;  %v18310_v32 = vadd.f32 %v18134_v10, %v18068_v57  ;;  %v8667_v33 = vsel %vm8600_vm2, %v18297_v1, -inf }
 0x54d   : > { %v8232_v4 = vpop.f32.mrb[31].mxu0  ;;  %v18315_v53 = vrot.slane %v7443_v51, %v14902_v18  ;;  %v18318_v28 = vrot.slane %v12852_v19, %v14902_v18  ;;  %v18321_v58 = vrot.slane %v7459_v15, %v14902_v18  ;;  %v18324_v39 = vrot.slane %v12853_v42, %v14902_v18  ;;  %v18331_v52 = vpop.permute.xlu1 %1237 }
 0x54e   : > { %8653 = vmax.xlane.f32.xlu0 %v8652_v59  ;;  %v18327_v5 = vadd.f32 %v13206_v27, %v18082_v60  ;;  %v8676_v10 = vsel %vm8600_vm2, %v18304_v37, -inf  ;;  %v18334_v36 = vrot.slane %v7511_v31, %v14902_v18  ;;  %v18337_v47 = vrot.slane %v12854_v16, %v14902_v18 }
 0x54f   : > { %v18340_v15 = vrot.slane %v7647_v20, %v14902_v18  ;;  %v18343_v8 = vrot.slane %v12858_v44, %v14902_v18  ;;  %v18347_v27 = vadd.f32 %v18142_v50, %v18073_v0  ;;  %v8661_v11 = vsel %vm8600_vm2, %v18310_v32, -inf }
 0x550   : > { %8683 = vmax.xlane.f32.xlu1 %v8682_v48  ;;  %21361 = vst [vmem:[#allocation70_spill] sm:$0xff] %v18327_v5  ;;  %v18352_v59 = vrot.slane %v7663_v24, %v14902_v18  ;;  %v18355_v31 = vrot.slane %v12859_v62, %v14902_v18  ;;  %v18358_v16 = vrot.slane %v7527_v22, %v14902_v18  ;;  %v8694_v62 = vsel %vm8600_vm2, %v18327_v5, -inf }
 0x551   : > { %21362 = vst [vmem:[#allocation50_spill] sm:$0xff] %v18347_v27  ;;  %v18361_v44 = vrot.slane %v12855_v6, %v14902_v18  ;;  %v7476_v50 = vcombine.high %v18315_v53, %v18318_v28  ;;  %v7492_v51 = vcombine.high %v18321_v58, %v18324_v39  ;;  %v18368_v19 = vadd.f32 %v8232_v4, %v18073_v0  ;;  %v18384_v6 = vpop.permute.xlu1 %1089 }
 0x552   : > { %8668 = vmax.xlane.f32.xlu0 %v8667_v33  ;;  %v18376_v20 = vadd.f32 %v18226_v13, %v18003_v54  ;;  %v8664_v48 = vsel %vm8600_vm2, %v18347_v27, -inf  ;;  %v7680_v24 = vcombine.high %v18340_v15, %v18343_v8  ;;  %v7696_v4 = vcombine.high %v18352_v59, %v18355_v31 }
 0x553   : > { %v7490_v42 = vrot.slane %v7476_v50, %v14913_v35  ;;  %v7506_v22 = vrot.slane %v7492_v51, %v14913_v35  ;;  %v18388_v33 = vadd.f32 %v18283_v56, %v18043_v21  ;;  %v7544_v13 = vcombine.high %v18334_v36, %v18337_v47 }
 0x554   : > { %8677 = vmax.xlane.f32.xlu1 %v8676_v10  ;;  %v8688_v50 = vsel %vm8600_vm2, %v18368_v19, -inf  ;;  %v18397_v51 = vrot.slane %v7680_v24, %v14913_v35  ;;  %v18404_v56 = vadd.f32 %v18234_v17, %v18017_v14  ;;  %v21370_v17 = vcombine.high %v18199_v2, %v18202_v26 }
 0x555   : > { %21363 = vst [vmem:[#allocation25_spill] sm:$0xff] %v18388_v33  ;;  %v7509_v10 = vcombine.low %v7490_v42, %v7506_v22  ;;  %v7510_v5 = vcombine.high %v7490_v42, %v7506_v22  ;;  %v18412_v27 = vrot.slane %v7544_v13, %v14913_v35 }
 0x556   : > { %8662 = vmax.xlane.f32.xlu0 %v8661_v11  ;;  %v7560_v11 = vcombine.high %v18358_v16, %v18361_v44  ;;  %21364 = vst [vmem:[#allocation58_spill] sm:$0xff] %v18397_v51 }
 0x557   : > { %21368 = vst [vmem:[#allocation31_spill] sm:$0xff] %v18412_v27  ;;  %v18424_v22 = vpack.c.bf16 %v7510_v5, %v21370_v17  ;;  %v18440_v5 = vadd.f32 %v18272_v45, %v18066_v3  ;;  %v8673_v17 = vsel %vm8600_vm2, %v18404_v56, -inf }
 0x558   : > { %8695 = vmax.xlane.f32.xlu1 %v8694_v62  ;;  %v18400_v62 = vrot.slane %v7696_v4, %v14913_v35  ;;  %v18415_v24 = vrot.slane %v7560_v11, %v14913_v35  ;;  %v8679_v4 = vsel %vm8600_vm2, %v18376_v20, -inf }
 0x559   : > { %21371 = vst [vmem:[#allocation33_spill] sm:$0xff] %v18424_v22  ;;  %v8691_v45 = vsel %vm8600_vm2, %v18440_v5, -inf }
 0x55a   : > { %8665 = vmax.xlane.f32.xlu0 %v8664_v48  ;;  %21365 = vst [vmem:[#allocation53_spill] sm:$0xff] %v18400_v62  ;;  %v21366_v48 = vcombine.low %v18199_v2, %v18202_v26  ;;  %21369 = vst [vmem:[#allocation36_spill] sm:$0xff] %v18415_v24  ;;  %v1138_v26 = vpop.permute.xlu1 %1137 }
 0x55c   : > { %8689 = vmax.xlane.f32.xlu1 %v8688_v50  ;;  %v18409_v37 = vpack.c.bf16 %v7509_v10, %v21366_v48  ;;  %v18434_v50 = vadd.f32 %v18291_v55, %v18005_v61  ;;  %v8706_v48 = vsel %vm8600_vm2, %v18388_v33, -inf }
 0x55e   : > { %21367 = vst [vmem:[#allocation34_spill] sm:$0xff] %v18409_v37  ;;  %8680 = vmax.xlane.f32.xlu0 %v8679_v4  ;;  %21372 = vst [vmem:[#allocation45_spill] sm:$0xff] %v18434_v50  ;;  %v8700_v42 = vsel %vm8600_vm2, %v18434_v50, -inf  ;;  %v1186_v13 = vpop.permute.xlu1 %1185 }
 0x55f   : > { %v13221_v2 = vpop.f32.mrb[20].mxu1  ;;  %v4044_v37 = vcombine.high %v18384_v6, %v1186_v13 }
 0x560   : > { %8707 = vmax.xlane.f32.xlu1 %v8706_v48  ;;  %v8318_v4 = vpop.f32.mrb[21].mxu1  ;;  %v18451_v48 = vadd.f32 %v18281_v25, %v18068_v57 }
 0x561   : > { %v13222_v10 = vpop.f32.mrb[22].mxu1 }
 0x562   : > { %8674 = vmax.xlane.f32.xlu0 %v8673_v17  ;;  %v18445_v11 = vadd.f32 %v13222_v10, %v18082_v60  ;;  %v8321_v55 = vpop.f32.mrb[23].mxu1  ;;  %21374 = vst [vmem:[#allocation47_spill] sm:$0xff] %v18451_v48  ;;  %v18462_v17 = vadd.f32 %v18264_v49, %v18003_v54  ;;  %v8685_v25 = vsel %vm8600_vm2, %v18451_v48, -inf  ;;  %v1234_v62 = vpop.permute.xlu1 %1233  ;;  %v4043_v49 = vcombine.low %v18384_v6, %v1186_v13 }
 0x563   : > { %v18456_v22 = vadd.f32 %v8321_v55, %v18073_v0  ;;  %v18470_v55 = vadd.f32 %v18274_v7, %v18017_v14  ;;  %v4060_v51 = vcombine.high %v1138_v26, %v1234_v62  ;;  %v4467_v7 = vcombine.low %v18256_v46, %v18331_v52 }
 0x564   : > { %21373 = vst [vmem:[#allocation46_spill] sm:$0xff] %v18445_v11  ;;  %8701 = vmax.xlane.f32.xlu1 %v8700_v42  ;;  %v8718_v10 = vsel %vm8600_vm2, %v18445_v11, -inf  ;;  %21376 = vst [vmem:[#allocation30_spill] sm:$0xff] %v18462_v17  ;;  %v18494_v6 = vadd.f32 %v8318_v4, %v18068_v57 }
 0x565   : > { %21375 = vst [vmem:[#allocation48_spill] sm:$0xff] %v18456_v22  ;;  %v8712_v42 = vsel %vm8600_vm2, %v18456_v22, -inf  ;;  %21377 = vst [vmem:[#allocation59_spill] sm:$0xff] %v18470_v55 }
 0x566   : > { %8692 = vmax.xlane.f32.xlu0 %v8691_v45  ;;  %v8703_v45 = vsel %vm8600_vm2, %v18462_v17, -inf  ;;  %v4074_v17 = vrot.slane %v4060_v51, %v14902_v18 }
 0x568   : > { %8719 = vmax.xlane.f32.xlu1 %v8718_v10  ;;  %v4059_v10 = vcombine.low %v1138_v26, %v1234_v62  ;;  %v4451_v26 = vcombine.low %v18224_v23, %v18301_v38 }
 0x56a   : > { %8686 = vmax.xlane.f32.xlu0 %v8685_v25  ;;  %v18476_v25 = vadd.f32 %v13221_v2, %v18066_v3  ;;  %v4468_v2 = vcombine.high %v18256_v46, %v18331_v52  ;;  %v4058_v46 = vrot.slane %v4044_v37, %v14902_v18  ;;  %v4452_v52 = vcombine.high %v18224_v23, %v18301_v38 }
 0x56c   : > { %8713 = vmax.xlane.f32.xlu1 %v8712_v42  ;;  %21378 = vst [vmem:[#allocation32_spill] sm:$0xff] %v18476_v25  ;;  %v8697_v42 = vsel %vm8600_vm2, %v18470_v55, -inf  ;;  %v4051_v55 = vrot.slane %v4043_v49, %v14902_v18  ;;  %v4459_v49 = vrot.slane %v4451_v26, %v14902_v18  ;;  %v4092_v50 = vcombine.high %v4058_v46, %v4074_v17 }
 0x56d   : > { %v13233_v24 = vpop.f32.mrb[32].mxu0 }
 0x56e   : > { %8704 = vmax.xlane.f32.xlu0 %v8703_v45  ;;  %v8391_v27 = vpop.f32.mrb[33].mxu0  ;;  %v4067_v45 = vrot.slane %v4059_v10, %v14902_v18  ;;  %v8715_v10 = vsel %vm8600_vm2, %v18476_v25, -inf  ;;  %v18510_v25 = vadd.f32 %v13233_v24, %v18003_v54 }
 0x56f   : > { %v13234_v22 = vpop.f32.mrb[34].mxu0 }
 0x570   : > { %v18485_v11 = vadd.f32 %v13234_v22, %v18043_v21  ;;  %v8394_v62 = vpop.f32.mrb[35].mxu0  ;;  %v4075_v51 = vcombine.low %v4051_v55, %v4067_v45  ;;  %v4076_v4 = vcombine.high %v4051_v55, %v4067_v45  ;;  %v8609_v48 = vpop.xlane.xlu0 %8608 }
 0x571   : > { %v18497_v13 = vadd.f32 %v8394_v62, %v18005_v61  ;;  %v4091_v62 = vcombine.low %v4058_v46, %v4074_v17  ;;  %v8606_v33 = vpop.xlane.xlu1 %8605  ;;  %v4466_v17 = vrot.slane %v4452_v52, %v14902_v18 }
 0x572   : > { %8698 = vmax.xlane.f32.xlu0 %v8697_v42  ;;  %21379 = vst [vmem:[#allocation29_spill] sm:$0xff] %v18485_v11  ;;  %v8730_v22 = vsel %vm8600_vm2, %v18485_v11, -inf  ;;  %v4475_v42 = vrot.slane %v4467_v7, %v14902_v18  ;;  %v4482_v11 = vrot.slane %v4468_v2, %v14902_v18  ;;  %v8709_v7 = vsel %vm8600_vm2, %v18494_v6, -inf }
 0x573   : > { %21380 = vst [vmem:[#allocation61_spill] sm:$0xff] %v18497_v13  ;;  %8731 = vmax.xlane.f32.xlu1 %v8730_v22  ;;  %v8724_v37 = vsel %vm8600_vm2, %v18497_v13, -inf  ;;  %v8794_v55 = vsub.f32 %v18031_v63, %v8606_v33  ;;  %v4083_v45 = vrot.slane %v4075_v51, %v14913_v35  ;;  %v4090_v26 = vrot.slane %v4076_v4, %v14913_v35 }
 0x574   : > { %v4483_v38 = vcombine.low %v4459_v49, %v4475_v42  ;;  %v4484_v23 = vcombine.high %v4459_v49, %v4475_v42  ;;  %v4099_v24 = vrot.slane %v4091_v62, %v14913_v35  ;;  %v4106_v2 = vrot.slane %v4092_v50, %v14913_v35  ;;  %v8603_v46 = vpop.xlane.xlu0 %8602 }
 0x575   : > { %v8795_v22 = vsub.f32 %v18021_v12, %v8609_v48  ;;  %v4499_v13 = vcombine.low %v4466_v17, %v4482_v11  ;;  %v8793_v42 = vsub.f32 %v18035_v40, %v8603_v46  ;;  %v18525_v63 = vadd.f32 %v8391_v27, %v18017_v14 }
 0x576   : > { %8716 = vmax.xlane.f32.xlu0 %v8715_v10  ;;  %v8859_v10 = vmul.f32 1.442695, %v8794_v55  ;;  %v8727_v33 = vsel %vm8600_vm2, %v18510_v25, -inf  ;;  %v4491_v52 = vrot.slane %v4483_v38, %v14913_v35  ;;  %v4498_v51 = vrot.slane %v4484_v23, %v14913_v35 }
 0x577   : > { %8725 = vmax.xlane.f32.xlu1 %v8724_v37  ;;  %v4500_v4 = vcombine.high %v4466_v17, %v4482_v11  ;;  %v7579_v50 = vcombine.low %v4083_v45, %v4090_v26  ;;  %v12856_v49 = vcombine.high %v4083_v45, %v4090_v26  ;;  %v8857_v12 = vmul.f32 1.442695, %v8793_v42 }
 0x578   : > { %13737 = vpow2.f32 %v8859_v10  ;;  %v7595_v48 = vcombine.low %v4099_v24, %v4106_v2  ;;  %v12857_v62 = vcombine.high %v4099_v24, %v4106_v2  ;;  %v8861_v37 = vmul.f32 1.442695, %v8795_v22  ;;  %v8612_v40 = vpop.xlane.xlu0 %8611 }
 0x579   : > { %v4507_v27 = vrot.slane %v4499_v13, %v14913_v35  ;;  %13739 = vpow2.f32 %v8857_v12  ;;  %v8796_v55 = vsub.f32 %v18051_v29, %v8612_v40  ;;  %v8721_v11 = vsel %vm8600_vm2, %v18525_v63, -inf }
 0x57a   : > { %8710 = vmax.xlane.f32.xlu0 %v8709_v7  ;;  %v4514_v23 = vrot.slane %v4500_v4, %v14913_v35  ;;  %v7715_v17 = vcombine.low %v4491_v52, %v4498_v51  ;;  %v7475_v2 = vcombine.low %v18315_v53, %v18318_v28  ;;  %v7491_v10 = vcombine.low %v18321_v58, %v18324_v39 }
 0x57b   : > { %v8863_v13 = vmul.f32 1.442695, %v8796_v55  ;;  %v18544_v42 = vrot.slane %v7579_v50, %v14902_v18  ;;  %13741 = vpow2.f32 %v8861_v37  ;;  %v18553_v53 = vrot.slane %v7595_v48, %v14902_v18 }
 0x57c   : > { %v18556_v28 = vrot.slane %v12857_v62, %v14902_v18  ;;  %v12860_v40 = vcombine.high %v4491_v52, %v4498_v51  ;;  %v7731_v50 = vcombine.low %v4507_v27, %v4514_v23  ;;  %v7407_v62 = vcombine.low %v18159_v9, %v18162_v43 }
 0x57d   : > { %13743 = vpow2.f32 %v8863_v13  ;;  %v7423_v52 = vcombine.low %v18165_v30, %v18168_v41  ;;  %v18576_v51 = vrot.slane %v7491_v10, %v14913_v35  ;;  %v18588_v43 = vrot.slane %v7715_v17, %v14902_v18 }
 0x57e   : > { %8728 = vmax.xlane.f32.xlu0 %v8727_v33  ;;  %v18547_v33 = vrot.slane %v12856_v49, %v14902_v18  ;;  %v12861_v49 = vcombine.high %v4507_v27, %v4514_v23  ;;  %v7627_v55 = vcombine.low %v18553_v53, %v18556_v28  ;;  %v18591_v30 = vrot.slane %v12860_v40, %v14902_v18 }
 0x57f   : > { %v18612_v13 = vrot.slane %v7423_v52, %v14913_v35  ;;  %v7559_v10 = vcombine.low %v18358_v16, %v18361_v44 }
 0x580   : > { %v7611_v27 = vcombine.low %v18544_v42, %v18547_v33  ;;  %v18602_v23 = vrot.slane %v12861_v49, %v14902_v18  ;;  %v7747_v16 = vcombine.low %v18588_v43, %v18591_v30 }
 0x581   : > { %v13237_v7 = vpop.f32.mrb[36].mxu0  ;;  %v18655_v52 = vrot.slane %v7559_v10, %v14913_v35 }
 0x582   : > { %v13249_v46 = vpop.f32.mrb[24].mxu1  ;;  %v8407_v38 = vpop.f32.mrb[37].mxu0  ;;  %8722 = vmax.xlane.f32.xlu0 %v8721_v11  ;;  %v18599_v11 = vrot.slane %v7731_v50, %v14902_v18  ;;  %v18626_v40 = vrot.slane %v7611_v27, %v14913_v35  ;;  %v7679_v27 = vcombine.low %v18340_v15, %v18343_v8  ;;  %v18667_v10 = vrot.slane %v7747_v16, %v14913_v35  ;;  %v21385_v8 = vld [vmem:[#allocation102_spill] sm:$0xff] }
 0x583   : > { %v18537_v45 = vadd.f32 %v8407_v38, %v18068_v57  ;;  %v8480_v26 = vpop.f32.mrb[25].mxu1  ;;  %v13238_v24 = vpop.f32.mrb[38].mxu0  ;;  %v18559_v58 = vadd.f32 %v13249_v46, %v18003_v54  ;;  %v18573_v54 = vrot.slane %v7475_v2, %v14913_v35  ;;  %v18609_v2 = vrot.slane %v7407_v62, %v14913_v35 }
 0x584   : > { %v13250_v22 = vpop.f32.mrb[26].mxu1  ;;  %v8410_v29 = vpop.f32.mrb[39].mxu0  ;;  %v18585_v9 = vadd.f32 %v8480_v26, %v18017_v14  ;;  %v18637_v50 = vadd.f32 %v13238_v24, %v18082_v60  ;;  %v7763_v44 = vcombine.low %v18599_v11, %v18602_v23 }
 0x585   : > { %v18550_v4 = vadd.f32 %v8410_v29, %v18073_v0  ;;  %v8483_v12 = vpop.f32.mrb[27].mxu1  ;;  %v8733_v39 = vsel %vm8600_vm2, %v18537_v45, -inf  ;;  %v18564_v37 = vadd.f32 %v13250_v22, %v18043_v21  ;;  %v18582_v46 = vpop.eup %13737  ;;  %v8751_v41 = vsel %vm8600_vm2, %v18559_v58, -inf }
 0x586   : > { %8734 = vmax.xlane.f32.xlu0 %v8733_v39  ;;  %21381 = vst [vmem:[#allocation62_spill] sm:$0xff] %v18585_v9  ;;  %v18596_v38 = vadd.f32 %v8483_v12, %v18005_v61  ;;  %v18606_v17 = vpop.eup %13739  ;;  %v7543_v61 = vcombine.low %v18334_v36, %v18337_v47  ;;  %v7507_v29 = vcombine.low %v18573_v54, %v18576_v51  ;;  %v8745_v36 = vsel %vm8600_vm2, %v18585_v9, -inf }
 0x587   : > { %v8736_v48 = vsel %vm8600_vm2, %v18550_v4, -inf  ;;  %v8754_v26 = vsel %vm8600_vm2, %v18564_v37, -inf  ;;  %v9177_v22 = vpack.c.bf16 %v18582_v46, %v18606_v17  ;;  %v18623_v12 = vadd.f32 %v13237_v7, %v18066_v3  ;;  %v18633_v47 = vpop.eup %13741  ;;  %21384 = vst [vmem:[#allocation96_spill] sm:$0xff] %v18637_v50 }
 0x588   : > { %8737 = vmax.xlane.f32.xlu1 %v8736_v48  ;;  %21382 = vst [vmem:[#allocation63_spill] sm:$0xff] %v18596_v38  ;;  %v18629_v39 = vrot.slane %v7627_v55, %v14913_v35  ;;  %v8748_v7 = vsel %vm8600_vm2, %v18596_v38, -inf  ;;  %v18645_v49 = vpop.eup %13743  ;;  %v7439_v48 = vcombine.low %v18609_v2, %v18612_v13  ;;  %v18650_v62 = vrot.slane %v7543_v61, %v14913_v35 }
 0x589   : > { %21383 = vst [vmem:[#allocation64_spill] sm:$0xff] %v18623_v12  ;;  %13279 = vmatprep.mubr.msk.bf16.mxu0 %vm8600_vm2, %v9177_v22  ;;  %v9178_v24 = vpack.c.bf16 %v18645_v49, %v18633_v47  ;;  %v7695_v55 = vcombine.low %v18352_v59, %v18355_v31  ;;  %v8739_v22 = vsel %vm8600_vm2, %v18623_v12, -inf  ;;  %v8742_v15 = vsel %vm8600_vm2, %v18637_v50, -inf }
 0x58a   : > { %8752 = vmax.xlane.f32.xlu0 %v8751_v41  ;;  %v7852_v41 = vpack.c.bf16 %v7507_v29, %v7439_v48  ;;  %v7575_v29 = vcombine.low %v18650_v62, %v18655_v52  ;;  %v18681_v48 = vrot.slane %v7679_v27, %v14913_v35 }
 0x58b   : > { %13280 = vmatmul.mubr.msk.bf16.vlgmr.msra.gmra.mrb[48].mxu0 %vm8600_vm2, %v9178_v24 }
 0x58c   : > { %8755 = vmax.xlane.f32.xlu1 %v8754_v26  ;;  %13288 = vmatpush3.bf16.msra.mxu0 %v21385_v8 }
 0x58d   : > { %13289 = vmatprep.subr.bf16.mxu0 %v7852_v41 }
 0x58e   : > { %8746 = vmax.xlane.f32.xlu0 %v8745_v36  ;;  %v7643_v36 = vcombine.low %v18626_v40, %v18629_v39 }
 0x590   : > { %8749 = vmax.xlane.f32.xlu1 %v8748_v7  ;;  %v18670_v7 = vrot.slane %v7763_v44, %v14913_v35  ;;  %v18684_v44 = vrot.slane %v7695_v55, %v14913_v35  ;;  %13290 = vmatpush3.bf16.msra.mxu0 %v7852_v41 }
 0x592   : > { %8740 = vmax.xlane.f32.xlu0 %v8739_v22  ;;  %v7779_v8 = vcombine.low %v18667_v10, %v18670_v7 }
 0x594   : > { %8743 = vmax.xlane.f32.xlu1 %v8742_v15  ;;  %v7853_v15 = vpack.c.bf16 %v7643_v36, %v7575_v29 }
 0x596   : > { %v13253_v26 = vpop.f32.mrb[28].mxu1  ;;  %13291 = vmatprep.subr.bf16.mxu0 %v7853_v15 }
 0x597   : > { %v8496_v61 = vpop.f32.mrb[29].mxu1  ;;  %v18687_v24 = vadd.f32 %v13253_v26, %v18066_v3  ;;  %v7711_v26 = vcombine.low %v18681_v48, %v18684_v44  ;;  %13292 = vmatpush3.bf16.msra.mxu0 %v7853_v15  ;;  %v13993_v15 = vld [vmem:[#allocation8 + $0x10] sm:$0xff] }
 0x598   : > { %v18676_v59 = vadd.f32 %v8496_v61, %v18068_v57  ;;  %v13254_v31 = vpop.f32.mrb[30].mxu1 }
 0x599   : > { %v8499_v16 = vpop.f32.mrb[31].mxu1  ;;  %21387 = vst [vmem:[#allocation106_spill] sm:$0xff] %v18687_v24  ;;  %v18697_v27 = vadd.f32 %v13254_v31, %v18082_v60  ;;  %v7854_v36 = vpack.c.bf16 %v7779_v8, %v7711_v26  ;;  %v21390_v31 = vld [vmem:[#allocation109_spill] sm:$0xff] }
 0x59a   : > { %21386 = vst [vmem:[#allocation94_spill] sm:$0xff] %v18676_v59  ;;  %v18690_v22 = vadd.f32 %v8499_v16, %v18073_v0  ;;  %v8757_v61 = vsel %vm8600_vm2, %v18676_v59, -inf  ;;  %v8763_v16 = vsel %vm8600_vm2, %v18687_v24, -inf  ;;  %v21392_v24 = vld [vmem:[#allocation122_spill] sm:$0xff] }
 0x59b   : > { %8758 = vmax.xlane.f32.xlu0 %v8757_v61  ;;  %21389 = vst [vmem:[#allocation41_spill] sm:$0xff] %v18697_v27  ;;  %v8766_v41 = vsel %vm8600_vm2, %v18697_v27, -inf  ;;  %13293 = vmatprep.subr.bf16.mxu0 %v7854_v36  ;;  %v13994_v27 = vld [vmem:[#allocation8 + $0x8] sm:$0xff] }
 0x59c   : > { %21388 = vst [vmem:[#allocation42_spill] sm:$0xff] %v18690_v22  ;;  %v8760_v55 = vsel %vm8600_vm2, %v18690_v22, -inf  ;;  %13294 = vmatpush3.bf16.msra.mxu0 %v7854_v36 }
 0x59d   : > { %8761 = vmax.xlane.f32.xlu1 %v8760_v55  ;;  %13319 = vmatprep.subr.bf16.mxu0 %v21390_v31 }
 0x59f   : > { %8764 = vmax.xlane.f32.xlu0 %v8763_v16 }
 0x5a1   : > { %8767 = vmax.xlane.f32.xlu1 %v8766_v41  ;;  %v21393_v41 = vld [vmem:[#allocation124_spill] sm:$0xff] }
 0x5a3   : > { %v8621_v61 = vpop.xlane.xlu0 %8620 }
 0x5a4   : > { %v8799_v8 = vsub.f32 %v21392_v24, %v8621_v61 }
 0x5a6   : > { %v8618_v26 = vpop.xlane.xlu1 %8617  ;;  %v8869_v61 = vmul.f32 1.442695, %v8799_v8 }
 0x5a7   : > { %v13265_v29 = vpop.f32.mrb[40].mxu0  ;;  %v8798_v12 = vsub.f32 %v21393_v41, %v8618_v26  ;;  %v8615_v38 = vpop.xlane.xlu0 %8614 }
 0x5a8   : > { %v8569_v18 = vpop.f32.mrb[41].mxu0  ;;  %v18712_v16 = vadd.f32 %v13993_v15, %v13265_v29 }
 0x5a9   : > { %v18709_v22 = vadd.f32 %v8569_v18, %v18017_v14  ;;  %v13266_v55 = vpop.f32.mrb[42].mxu0  ;;  %v21394_v18 = vld [vmem:[#allocation24_spill] sm:$0xff]  ;;  %v8867_v29 = vmul.f32 1.442695, %v8798_v12 }
 0x5aa   : > { %v8572_v59 = vpop.f32.mrb[43].mxu0  ;;  %v8797_v14 = vsub.f32 %v21394_v18, %v8615_v38  ;;  %v18721_v9 = vadd.f32 %v13266_v55, %v18043_v21  ;;  %v21395_v38 = vld [vmem:[#allocation125_spill] sm:$0xff] }
 0x5ab   : > { %21391 = vst [vmem:[#allocation95_spill] sm:$0xff] %v18709_v22  ;;  %v18714_v50 = vadd.f32 %v13994_v27, %v8572_v59  ;;  %v8769_v36 = vsel %vm8600_vm2, %v18709_v22, -inf  ;;  %v8636_v27 = vpop.xlane.xlu1 %8635  ;;  %v8775_v22 = vsel %vm8600_vm2, %v18712_v16, -inf  ;;  %13745 = vpow2.f32 %v8867_v29  ;;  %v8624_v26 = vpop.xlane.xlu0 %8623 }
 0x5ac   : > { %8770 = vmax.xlane.f32.xlu0 %v8769_v36  ;;  %v8865_v59 = vmul.f32 1.442695, %v8797_v14  ;;  %v8800_v21 = vsub.f32 %v21395_v38, %v8624_v26  ;;  %v8778_v12 = vsel %vm8600_vm2, %v18721_v9, -inf }
 0x5ad   : > { %v8772_v24 = vsel %vm8600_vm2, %v18714_v50, -inf }
 0x5ae   : > { %8773 = vmax.xlane.f32.xlu1 %v8772_v24  ;;  %13747 = vpow2.f32 %v8865_v59  ;;  %v8871_v18 = vmul.f32 1.442695, %v8800_v21 }
 0x5af   : > { %v13269_v15 = vpop.f32.mrb[44].mxu0  ;;  %13749 = vpow2.f32 %v8869_v61  ;;  %v8630_v14 = vpop.xlane.xlu1 %8629 }
 0x5b0   : > { %v8585_v36 = vpop.f32.mrb[45].mxu0  ;;  %8776 = vmax.xlane.f32.xlu0 %v8775_v22  ;;  %v18734_v24 = vadd.f32 %v13269_v15, %v18066_v3  ;;  %v8633_v26 = vpop.xlane.xlu0 %8632  ;;  %13751 = vpow2.f32 %v8871_v18  ;;  %v21402_v15 = vld [vmem:[#allocation123_spill] sm:$0xff] }
 0x5b1   : > { %v18729_v55 = vadd.f32 %v8585_v36, %v18068_v57  ;;  %v13270_v41 = vpop.f32.mrb[46].mxu0  ;;  %v21399_v57 = vld [vmem:[#allocation26_spill] sm:$0xff]  ;;  %v21400_v36 = vld [vmem:[#allocation107_spill] sm:$0xff]  ;;  %v8804_v21 = vsub.f32 %v21402_v15, %v8636_v27  ;;  %v8991_v27 = vsel %vm8600_vm2, %v18633_v47, 0.0  ;;  %v8988_v47 = vsel %vm8600_vm2, %v18582_v46, 0.0 }
 0x5b2   : > { %v8588_v8 = vpop.f32.mrb[47].mxu0  ;;  %8779 = vmax.xlane.f32.xlu1 %v8778_v12  ;;  %21397 = vst [vmem:[#allocation40_spill] sm:$0xff] %v18734_v24  ;;  %v8802_v59 = vsub.f32 %v21399_v57, %v8630_v14  ;;  %v8803_v38 = vsub.f32 %v21400_v36, %v8633_v26  ;;  %v18744_v61 = vadd.f32 %v13270_v41, %v18082_v60  ;;  %v8787_v12 = vsel %vm8600_vm2, %v18734_v24, -inf  ;;  %v21444_v24 = vld [vmem:[#allocation23_spill] sm:$0xff] }
 0x5b3   : > { %21396 = vst [vmem:[#allocation43_spill] sm:$0xff] %v18729_v55  ;;  %v18737_v22 = vadd.f32 %v8588_v8, %v18073_v0  ;;  %v8781_v29 = vsel %vm8600_vm2, %v18729_v55, -inf  ;;  %v8879_v41 = vmul.f32 1.442695, %v8804_v21  ;;  %v8985_v21 = vsel %vm8600_vm2, %v18606_v17, 0.0 }
 0x5b4   : > { %8782 = vmax.xlane.f32.xlu0 %v8781_v29  ;;  %21401 = vst [vmem:[#allocation51_spill] sm:$0xff] %v18744_v61  ;;  %v8875_v0 = vmul.f32 1.442695, %v8802_v59  ;;  %v8877_v8 = vmul.f32 1.442695, %v8803_v38  ;;  %v8627_v14 = vpop.xlane.xlu0 %8626  ;;  %v21403_v29 = vld [vmem:[#allocation52_spill] sm:$0xff]  ;;  %v7508_v17 = vcombine.high %v18573_v54, %v18576_v51  ;;  %v7644_v51 = vcombine.high %v18626_v40, %v18629_v39 }
 0x5b5   : > { %21398 = vst [vmem:[#allocation105_spill] sm:$0xff] %v18737_v22  ;;  %v8784_v3 = vsel %vm8600_vm2, %v18737_v22, -inf  ;;  %v8801_v18 = vsub.f32 %v21403_v29, %v8627_v14  ;;  %v13746_v57 = vpop.eup %13745  ;;  %v8790_v60 = vsel %vm8600_vm2, %v18744_v61, -inf  ;;  %v8994_v38 = vsel %vm8600_vm2, %v18645_v49, 0.0  ;;  %v21443_v61 = vld [vmem:[#allocation121_spill] sm:$0xff] }
 0x5b6   : > { %8785 = vmax.xlane.f32.xlu1 %v8784_v3  ;;  %13753 = vpow2.f32 %v8875_v0  ;;  %v7136_v22 = vcombine.high %v21444_v24, %v21443_v61 }
 0x5b7   : > { %v8873_v36 = vmul.f32 1.442695, %v8801_v18  ;;  %13755 = vpow2.f32 %v8877_v8 }
 0x5b8   : > { %8788 = vmax.xlane.f32.xlu0 %v8787_v12  ;;  %v13748_v26 = vpop.eup %13747 }
 0x5b9   : > { %v9179_v59 = vpack.c.bf16 %v13746_v57, %v13748_v26  ;;  %v13750_v3 = vpop.eup %13749  ;;  %13757 = vpow2.f32 %v8873_v36  ;;  %v8997_v29 = vsel %vm8600_vm2, %v13748_v26, 0.0  ;;  %v7440_v36 = vcombine.high %v18609_v2, %v18612_v13  ;;  %v21405_v26 = vld [vmem:[#allocation98_spill] sm:$0xff] }
 0x5ba   : > { %8791 = vmax.xlane.f32.xlu1 %v8790_v60  ;;  %13759 = vpow2.f32 %v8879_v41  ;;  %v13752_v15 = vpop.eup %13751  ;;  %v9003_v12 = vsel %vm8600_vm2, %v13750_v3, 0.0  ;;  %v7576_v13 = vcombine.high %v18650_v62, %v18655_v52 }
 0x5bb   : > { %13283 = vmatprep.mubr.msk.bf16.mxu0 %vm8600_vm2, %v9179_v59  ;;  %v9180_v0 = vpack.c.bf16 %v13752_v15, %v13750_v3  ;;  %v9006_v49 = vsel %vm8600_vm2, %v13752_v15, 0.0  ;;  %v21404_v3 = vld [vmem:[#allocation27_spill] sm:$0xff]  ;;  %v7860_v54 = vpack.c.bf16 %v7508_v17, %v7440_v36  ;;  %v21412_v17 = vld [vmem:[#allocation108_spill] sm:$0xff]  ;;  %v7780_v36 = vcombine.high %v18667_v10, %v18670_v7 }
 0x5bc   : > { %8992 = vadd.xlane.f32.xlu0 %v8991_v27  ;;  %v9000_v27 = vsel %vm8600_vm2, %v13746_v57, 0.0  ;;  %v21406_v15 = vld [vmem:[#allocation99_spill] sm:$0xff]  ;;  %v21408_v57 = vld [vmem:[#allocation118_spill] sm:$0xff] }
 0x5bd   : > { %13284 = vmatmul.mubr.msk.bf16.gmra.mrb[52].mxu0 %vm8600_vm2, %v9180_v0 }
 0x5be   : > { %8995 = vadd.xlane.f32.xlu1 %v8994_v38  ;;  %v7340_v38 = vcombine.high %v21405_v26, %v21404_v3 }
 0x5c0   : > { %8986 = vadd.xlane.f32.xlu0 %v8985_v21  ;;  %v13754_v8 = vpop.eup %13753  ;;  %v21407_v21 = vld [vmem:[#allocation100_spill] sm:$0xff]  ;;  %v18794_v62 = vrot.slane %v7340_v38, %v14913_v35  ;;  %v21414_v38 = vld [vmem:[#allocation111_spill] sm:$0xff] }
 0x5c1   : > { %v13756_v14 = vpop.eup %13755  ;;  %v7356_v0 = vcombine.high %v21407_v21, %v21406_v15  ;;  %v9012_v15 = vsel %vm8600_vm2, %v13754_v8, 0.0 }
 0x5c2   : > { %8989 = vadd.xlane.f32.xlu1 %v8988_v47  ;;  %v9015_v59 = vsel %vm8600_vm2, %v13756_v14, 0.0  ;;  %v21409_v47 = vld [vmem:[#allocation119_spill] sm:$0xff] }
 0x5c3   : > { %v13758_v18 = vpop.eup %13757  ;;  %v18797_v52 = vrot.slane %v7356_v0, %v14913_v35 }
 0x5c4   : > { %9004 = vadd.xlane.f32.xlu0 %v9003_v12  ;;  %v13760_v60 = vpop.eup %13759  ;;  %v9181_v41 = vpack.c.bf16 %v13754_v8, %v13758_v18  ;;  %v7272_v12 = vcombine.high %v21409_v47, %v21408_v57  ;;  %v9009_v39 = vsel %vm8600_vm2, %v13758_v18, 0.0  ;;  %v7712_v18 = vcombine.high %v18681_v48, %v18684_v44  ;;  %v21415_v44 = vld [vmem:[#allocation113_spill] sm:$0xff] }
 0x5c5   : > { %v9182_v46 = vpack.c.bf16 %v13760_v60, %v13756_v14  ;;  %v21411_v14 = vld [vmem:[#allocation97_spill] sm:$0xff]  ;;  %v9018_v40 = vsel %vm8600_vm2, %v13760_v60, 0.0  ;;  %v7373_v0 = vcombine.low %v18794_v62, %v18797_v52 }
 0x5c6   : > { %9007 = vadd.xlane.f32.xlu1 %v9006_v49  ;;  %13295 = vmatprep.mubr.msk.bf16.mxu0 %vm8600_vm2, %v9181_v41  ;;  %v21410_v49 = vld [vmem:[#allocation44_spill] sm:$0xff]  ;;  %v18803_v60 = vrot.slane %v7272_v12, %v14913_v35 }
 0x5c7   : > { %13296 = vmatmul.mubr.msk.bf16.vlgmr.msra.gmra.mrb[56].mxu0 %vm8600_vm2, %v9182_v46  ;;  %v21416_v12 = vld [vmem:[#allocation112_spill] sm:$0xff] }
 0x5c8   : > { %8998 = vadd.xlane.f32.xlu0 %v8997_v29  ;;  %13320 = vmatpush3.bf16.msra.mxu0 %v21390_v31  ;;  %v7288_v29 = vcombine.high %v21411_v14, %v21410_v49  ;;  %v7861_v31 = vpack.c.bf16 %v7644_v51, %v7576_v13 }
 0x5c9   : > { %13321 = vmatprep.subr.bf16.mxu0 %v7860_v54 }
 0x5ca   : > { %9001 = vadd.xlane.f32.xlu1 %v9000_v27  ;;  %v18806_v10 = vrot.slane %v7288_v29, %v14913_v35 }
 0x5cb   : > { %v8645_v2 = vpop.xlane.xlu0 %8644 }
 0x5cc   : > { %9016 = vadd.xlane.f32.xlu0 %v9015_v59  ;;  %v8807_v41 = vsub.f32 %v21412_v17, %v8645_v2  ;;  %v21413_v59 = vld [vmem:[#allocation110_spill] sm:$0xff]  ;;  %13322 = vmatpush3.bf16.msra.mxu0 %v7860_v54  ;;  %v7862_v54 = vpack.c.bf16 %v7780_v36, %v7712_v18  ;;  %v7305_v57 = vcombine.low %v18803_v60, %v18806_v10  ;;  %v21417_v17 = vld [vmem:[#allocation87_spill] sm:$0xff] }
 0x5cd   : > { %v8648_v46 = vpop.xlane.xlu1 %8647  ;;  %13323 = vmatprep.subr.bf16.mxu0 %v7861_v31 }
 0x5ce   : > { %9019 = vadd.xlane.f32.xlu1 %v9018_v40  ;;  %v8885_v27 = vmul.f32 1.442695, %v8807_v41  ;;  %v8808_v3 = vsub.f32 %v21413_v59, %v8648_v46  ;;  %v18816_v14 = vpack.c.bf16 %v7373_v0, %v7305_v57  ;;  %v21418_v46 = vld [vmem:[#allocation35_spill] sm:$0xff] }
 0x5cf   : > { %v8639_v26 = vpop.xlane.xlu0 %8638  ;;  %v21421_v57 = vld [vmem:[#allocation91_spill] sm:$0xff] }
 0x5d0   : > { %9010 = vadd.xlane.f32.xlu0 %v9009_v39  ;;  %13761 = vpow2.f32 %v8885_v27  ;;  %v8887_v7 = vmul.f32 1.442695, %v8808_v3  ;;  %v8805_v51 = vsub.f32 %v21414_v38, %v8639_v26  ;;  %13324 = vmatpush3.bf16.msra.mxu0 %v7861_v31  ;;  %v21419_v3 = vld [vmem:[#allocation66_spill] sm:$0xff] }
 0x5d1   : > { %v8642_v21 = vpop.xlane.xlu1 %8641  ;;  %13325 = vmatprep.subr.bf16.mxu0 %v7862_v54 }
 0x5d2   : > { %9013 = vadd.xlane.f32.xlu1 %v9012_v15  ;;  %13763 = vpow2.f32 %v8887_v7  ;;  %v8881_v48 = vmul.f32 1.442695, %v8805_v51  ;;  %v8806_v2 = vsub.f32 %v21415_v44, %v8642_v21  ;;  %v21420_v51 = vld [vmem:[#allocation67_spill] sm:$0xff] }
 0x5d3   : > { %v8657_v13 = vpop.xlane.xlu0 %8656 }
 0x5d4   : > { %13765 = vpow2.f32 %v8881_v48  ;;  %v8883_v47 = vmul.f32 1.442695, %v8806_v2  ;;  %v8811_v8 = vsub.f32 %v21416_v12, %v8657_v13  ;;  %13326 = vmatpush3.bf16.msra.mxu0 %v7862_v54 }
 0x5d5   : > { %v8660_v49 = vpop.xlane.xlu1 %8659  ;;  %13351 = vmatprep.subr.bf16.mxu0 %v18816_v14 }
 0x5d6   : > { %13767 = vpow2.f32 %v8883_v47  ;;  %v8893_v29 = vmul.f32 1.442695, %v8811_v8  ;;  %v8812_v41 = vsub.f32 %v21417_v17, %v8660_v49  ;;  %v21422_v47 = vld [vmem:[#allocation20_spill] sm:$0xff]  ;;  %v21424_v49 = vld [vmem:[#allocation93_spill] sm:$0xff] }
 0x5d7   : > { %v8651_v40 = vpop.xlane.xlu0 %8650  ;;  %v6932_v12 = vcombine.high %v21422_v47, %v21421_v57  ;;  %v21423_v8 = vld [vmem:[#allocation92_spill] sm:$0xff]  ;;  %v21431_v57 = vld [vmem:[#allocation38_spill] sm:$0xff]  ;;  %v21432_v47 = vld [vmem:[#allocation39_spill] sm:$0xff] }
 0x5d8   : > { %13769 = vpow2.f32 %v8893_v29  ;;  %v8895_v39 = vmul.f32 1.442695, %v8812_v41  ;;  %v8809_v31 = vsub.f32 %v21418_v46, %v8651_v40  ;;  %v6948_v29 = vcombine.high %v21424_v49, %v21423_v8 }
 0x5d9   : > { %v8672_v36 = vpop.xlane.xlu1 %8671  ;;  %v7016_v8 = vcombine.high %v21432_v47, %v21431_v57  ;;  %v21438_v57 = vld [vmem:[#allocation21_spill] sm:$0xff]  ;;  %v21439_v47 = vld [vmem:[#allocation60_spill] sm:$0xff] }
 0x5da   : > { %v13762_v27 = vpop.eup %13761  ;;  %13771 = vpow2.f32 %v8895_v39  ;;  %v8889_v59 = vmul.f32 1.442695, %v8809_v31  ;;  %v8816_v26 = vsub.f32 %v21419_v3, %v8672_v36  ;;  %v21425_v31 = vld [vmem:[#allocation19_spill] sm:$0xff]  ;;  %v21426_v36 = vld [vmem:[#allocation88_spill] sm:$0xff] }
 0x5db   : > { %v8654_v18 = vpop.xlane.xlu0 %8653  ;;  %v9027_v7 = vsel %vm8600_vm2, %v13762_v27, 0.0 }
 0x5dc   : > { %v13764_v38 = vpop.eup %13763  ;;  %13773 = vpow2.f32 %v8889_v59  ;;  %v8810_v15 = vsub.f32 %v21420_v51, %v8654_v18  ;;  %9028 = vadd.xlane.f32.xlu0 %v9027_v7  ;;  %v8903_v48 = vmul.f32 1.442695, %v8816_v26  ;;  %v6864_v59 = vcombine.high %v21426_v36, %v21425_v31  ;;  %v21427_v7 = vld [vmem:[#allocation89_spill] sm:$0xff]  ;;  %v21428_v51 = vld [vmem:[#allocation90_spill] sm:$0xff] }
 0x5dd   : > { %v8684_v21 = vpop.xlane.xlu1 %8683  ;;  %v9030_v54 = vsel %vm8600_vm2, %v13764_v38, 0.0  ;;  %v9184_v18 = vpack.c.bf16 %v13764_v38, %v13762_v27  ;;  %v21429_v27 = vld [vmem:[#allocation22_spill] sm:$0xff]  ;;  %v21430_v38 = vld [vmem:[#allocation37_spill] sm:$0xff] }
 0x5de   : > { %v13766_v0 = vpop.eup %13765  ;;  %v8891_v44 = vmul.f32 1.442695, %v8810_v15  ;;  %9031 = vadd.xlane.f32.xlu1 %v9030_v54  ;;  %v6880_v15 = vcombine.high %v21428_v51, %v21427_v7  ;;  %v8820_v36 = vsub.f32 %v18279_v34, %v8684_v21  ;;  %v18877_v21 = vrot.slane %v7016_v8, %v14913_v35 }
 0x5df   : > { %v8669_v2 = vpop.xlane.xlu0 %8668  ;;  %v9021_v13 = vsel %vm8600_vm2, %v13766_v0, 0.0 }
 0x5e0   : > { %v13768_v17 = vpop.eup %13767  ;;  %13775 = vpow2.f32 %v8891_v44  ;;  %v8815_v41 = vsub.f32 %v18297_v1, %v8669_v2  ;;  %9022 = vadd.xlane.f32.xlu0 %v9021_v13  ;;  %v18847_v44 = vrot.slane %v6948_v29, %v14913_v35  ;;  %v7000_v13 = vcombine.high %v21430_v38, %v21429_v27  ;;  %v21434_v29 = vld [vmem:[#allocation76_spill] sm:$0xff]  ;;  %v21437_v27 = vld [vmem:[#allocation50_spill] sm:$0xff] }
 0x5e1   : > { %v18831_v40 = vpop.xlane.xlu1 %8677  ;;  %v9024_v39 = vsel %vm8600_vm2, %v13768_v17, 0.0  ;;  %v9183_v46 = vpack.c.bf16 %v13768_v17, %v13766_v0  ;;  %13777 = vpow2.f32 %v8903_v48  ;;  %v18844_v0 = vrot.slane %v6932_v12, %v14913_v35  ;;  %v21433_v17 = vld [vmem:[#allocation75_spill] sm:$0xff] }
 0x5e2   : > { %v18836_v3 = vpop.eup %13769  ;;  %v8901_v26 = vmul.f32 1.442695, %v8815_v41  ;;  %9025 = vadd.xlane.f32.xlu1 %v9024_v39  ;;  %v7068_v41 = vcombine.high %v21434_v29, %v21433_v17  ;;  %v21435_v39 = vld [vmem:[#allocation77_spill] sm:$0xff]  ;;  %v18867_v7 = vrot.slane %v6880_v15, %v14913_v35  ;;  %v18874_v34 = vrot.slane %v7000_v13, %v14913_v35  ;;  %v21441_v29 = vld [vmem:[#allocation115_spill] sm:$0xff] }
 0x5e3   : > { %13299 = vmatprep.mubr.msk.bf16.mxu0 %vm8600_vm2, %v9183_v46  ;;  %v8663_v1 = vpop.xlane.xlu0 %8662  ;;  %v9039_v54 = vsel %vm8600_vm2, %v18836_v3, 0.0  ;;  %v21436_v46 = vld [vmem:[#allocation78_spill] sm:$0xff]  ;;  %v21440_v17 = vld [vmem:[#allocation117_spill] sm:$0xff]  ;;  %v8911_v13 = vmul.f32 1.442695, %v8820_v36 }
 0x5e4   : > { %v13772_v2 = vpop.eup %13771  ;;  %13779 = vpow2.f32 %v8901_v26  ;;  %v8813_v48 = vsub.f32 %v18310_v32, %v8663_v1  ;;  %13300 = vmatmul.mubr.msk.bf16.gmra.mrb[60].mxu0 %vm8600_vm2, %v9184_v18  ;;  %9040 = vadd.xlane.f32.xlu0 %v9039_v54  ;;  %v7084_v31 = vcombine.high %v21436_v46, %v21435_v39  ;;  %v18864_v18 = vrot.slane %v6864_v59, %v14913_v35 }
 0x5e5   : > { %v18855_v49 = vpop.xlane.xlu1 %8695  ;;  %v9042_v12 = vsel %vm8600_vm2, %v13772_v2, 0.0  ;;  %v6965_v54 = vcombine.low %v18844_v0, %v18847_v44  ;;  %v18882_v15 = vrot.slane %v7068_v41, %v14913_v35  ;;  %v7220_v39 = vcombine.high %v21441_v29, %v21440_v17 }
 0x5e6   : > { %v13774_v32 = vpop.eup %13773  ;;  %v8897_v26 = vmul.f32 1.442695, %v8813_v48  ;;  %9043 = vadd.xlane.f32.xlu1 %v9042_v12  ;;  %v18885_v48 = vrot.slane %v7084_v31, %v14913_v35  ;;  %v7204_v12 = vcombine.high %v21439_v47, %v21438_v57  ;;  %v21445_v57 = vld [vmem:[#allocation114_spill] sm:$0xff]  ;;  %v21446_v47 = vld [vmem:[#allocation120_spill] sm:$0xff]  ;;  %v9186_v36 = vpack.c.bf16 %v13772_v2, %v18836_v3 }
 0x5e7   : > { %v8666_v51 = vpop.xlane.xlu0 %8665  ;;  %v9033_v1 = vsel %vm8600_vm2, %v13774_v32, 0.0  ;;  %v7152_v55 = vcombine.high %v21446_v47, %v21445_v57  ;;  %v21447_v2 = vld [vmem:[#allocation70_spill] sm:$0xff] }
 0x5e8   : > { %13781 = vpow2.f32 %v8897_v26  ;;  %v8814_v38 = vsub.f32 %v21437_v27, %v8666_v51  ;;  %9034 = vadd.xlane.f32.xlu0 %v9033_v1  ;;  %v21442_v26 = vld [vmem:[#allocation69_spill] sm:$0xff]  ;;  %v6897_v1 = vcombine.low %v18864_v18, %v18867_v7  ;;  %v7101_v24 = vcombine.low %v18882_v15, %v18885_v48 }
 0x5e9   : > { %v18879_v59 = vpop.xlane.xlu1 %8689  ;;  %v8818_v8 = vsub.f32 %v21442_v26, %v18831_v40  ;;  %v18910_v61 = vrot.slane %v7204_v12, %v14913_v35 }
 0x5ea   : > { %v13776_v46 = vpop.eup %13775  ;;  %v8899_v51 = vmul.f32 1.442695, %v8814_v38  ;;  %v7864_v38 = vpack.c.bf16 %v6965_v54, %v6897_v1  ;;  %v8824_v54 = vsub.f32 %v21447_v2, %v18855_v49 }
 0x5eb   : > { %v8681_v41 = vpop.xlane.xlu0 %8680  ;;  %v9036_v27 = vsel %vm8600_vm2, %v13776_v46, 0.0  ;;  %v9185_v31 = vpack.c.bf16 %v13776_v46, %v13774_v32  ;;  %v18900_v17 = vpop.eup %13777  ;;  %v7033_v32 = vcombine.low %v18874_v34, %v18877_v21  ;;  %v18913_v46 = vrot.slane %v7220_v39, %v14913_v35 }
 0x5ec   : > { %13783 = vpow2.f32 %v8899_v51  ;;  %v8819_v40 = vsub.f32 %v18376_v20, %v8681_v41  ;;  %9037 = vadd.xlane.f32.xlu1 %v9036_v27  ;;  %v8907_v20 = vmul.f32 1.442695, %v8818_v8  ;;  %v21448_v51 = vld [vmem:[#allocation116_spill] sm:$0xff]  ;;  %v9054_v41 = vsel %vm8600_vm2, %v18900_v17, 0.0 }
 0x5ed   : > { %v8708_v29 = vpop.xlane.xlu1 %8707  ;;  %13311 = vmatprep.mubr.msk.bf16.mxu1 %vm8600_vm2, %v9185_v31  ;;  %13785 = vpow2.f32 %v8911_v13  ;;  %v18923_v39 = vrot.slane %v7136_v22, %v14913_v35  ;;  %v18926_v13 = vrot.slane %v7152_v55, %v14913_v35  ;;  %v7865_v27 = vpack.c.bf16 %v7101_v24, %v7033_v32 }
 0x5ee   : > { %v13780_v3 = vpop.eup %13779  ;;  %v8909_v26 = vmul.f32 1.442695, %v8819_v40  ;;  %13312 = vmatmul.mubr.msk.bf16.vlgmr.msra.gmra.mrb[32].mxu1 %vm8600_vm2, %v9186_v36  ;;  %v7237_v31 = vcombine.low %v18910_v61, %v18913_v46  ;;  %v8919_v47 = vmul.f32 1.442695, %v8824_v54  ;;  %v8822_v22 = vsub.f32 %v18368_v19, %v18879_v59  ;;  %v21449_v54 = vld [vmem:[#allocation25_spill] sm:$0xff] }
 0x5ef   : > { %13336 = vmatpush3.bf16.msra.mxu1 %v21448_v51  ;;  %v8675_v1 = vpop.xlane.xlu0 %8674  ;;  %v9051_v12 = vsel %vm8600_vm2, %v13780_v3, 0.0 }
 0x5f0   : > { %13787 = vpow2.f32 %v8909_v26  ;;  %13337 = vmatprep.subr.bf16.mxu1 %v7864_v38  ;;  %v8817_v49 = vsub.f32 %v18404_v56, %v8675_v1  ;;  %9055 = vadd.xlane.f32.xlu1 %v9054_v41  ;;  %v7169_v56 = vcombine.low %v18923_v39, %v18926_v13  ;;  %v8828_v26 = vsub.f32 %v21449_v54, %v8708_v29  ;;  %v21454_v54 = vld [vmem:[#allocation46_spill] sm:$0xff] }
 0x5f1   : > { %9052 = vadd.xlane.f32.xlu0 %v9051_v12  ;;  %v8702_v8 = vpop.xlane.xlu1 %8701  ;;  %13789 = vpow2.f32 %v8907_v20  ;;  %v8915_v20 = vmul.f32 1.442695, %v8822_v22  ;;  %v21450_v12 = vld [vmem:[#allocation47_spill] sm:$0xff]  ;;  %v7612_v29 = vcombine.high %v18544_v42, %v18547_v33  ;;  %v21452_v42 = vld [vmem:[#allocation101_spill] sm:$0xff]  ;;  %v21453_v33 = vld [vmem:[#allocation30_spill] sm:$0xff] }
 0x5f2   : > { %v13782_v57 = vpop.eup %13781  ;;  %v8905_v36 = vmul.f32 1.442695, %v8817_v49  ;;  %v7866_v24 = vpack.c.bf16 %v7237_v31, %v7169_v56 }
 0x5f3   : > { %13338 = vmatpush3.bf16.msra.mxu1 %v7864_v38  ;;  %v8693_v55 = vpop.xlane.xlu0 %8692  ;;  %v9045_v40 = vsel %vm8600_vm2, %v13782_v57, 0.0 }
 0x5f4   : > { %13791 = vpow2.f32 %v8905_v36  ;;  %13339 = vmatprep.subr.bf16.mxu1 %v7865_v27  ;;  %v8823_v32 = vsub.f32 %v18440_v5, %v8693_v55  ;;  %v9188_v5 = vpack.c.bf16 %v18900_v17, %v13780_v3 }
 0x5f5   : > { %9046 = vadd.xlane.f32.xlu0 %v9045_v40  ;;  %13793 = vpow2.f32 %v8919_v47  ;;  %v8720_v59 = vpop.xlane.xlu1 %8719  ;;  %v8927_v47 = vmul.f32 1.442695, %v8828_v26 }
 0x5f6   : > { %v13784_v2 = vpop.eup %13783  ;;  %v8917_v19 = vmul.f32 1.442695, %v8823_v32  ;;  %v7748_v32 = vcombine.high %v18588_v43, %v18591_v30  ;;  %v8832_v26 = vsub.f32 %v21454_v54, %v8720_v59  ;;  %v21462_v54 = vld [vmem:[#allocation29_spill] sm:$0xff] }
 0x5f7   : > { %13340 = vmatpush3.bf16.msra.mxu1 %v7865_v27  ;;  %v8687_v38 = vpop.xlane.xlu0 %8686  ;;  %v9048_v51 = vsel %vm8600_vm2, %v13784_v2, 0.0  ;;  %v9187_v1 = vpack.c.bf16 %v13784_v2, %v13782_v57  ;;  %v13786_v41 = vpop.eup %13785  ;;  %v7628_v27 = vcombine.high %v18553_v53, %v18556_v28  ;;  %v21451_v57 = vld [vmem:[#allocation45_spill] sm:$0xff] }
 0x5f8   : > { %13795 = vpow2.f32 %v8917_v19  ;;  %13341 = vmatprep.subr.bf16.mxu1 %v7866_v24  ;;  %v8821_v49 = vsub.f32 %v21450_v12, %v8687_v38  ;;  %9049 = vadd.xlane.f32.xlu1 %v9048_v51  ;;  %v8826_v22 = vsub.f32 %v21451_v57, %v8702_v8  ;;  %v9066_v17 = vsel %vm8600_vm2, %v13786_v41, 0.0 }
 0x5f9   : > { %13315 = vmatprep.mubr.msk.bf16.mxu1 %vm8600_vm2, %v9187_v1  ;;  %13797 = vpow2.f32 %v8915_v20  ;;  %v8714_v28 = vpop.xlane.xlu1 %8713  ;;  %v18953_v8 = vrot.slane %v7612_v29, %v14913_v35  ;;  %v18956_v56 = vrot.slane %v7628_v27, %v14913_v35  ;;  %v21455_v29 = vld [vmem:[#allocation59_spill] sm:$0xff]  ;;  %v8935_v27 = vmul.f32 1.442695, %v8832_v26 }
 0x5fa   : > { %v13788_v31 = vpop.eup %13787  ;;  %v8913_v36 = vmul.f32 1.442695, %v8821_v49  ;;  %13316 = vmatmul.mubr.msk.bf16.gmra.mrb[36].mxu1 %vm8600_vm2, %v9188_v5  ;;  %v8923_v20 = vmul.f32 1.442695, %v8826_v22 }
 0x5fb   : > { %13342 = vmatpush3.bf16.msra.mxu1 %v7866_v24  ;;  %v8705_v55 = vpop.xlane.xlu0 %8704  ;;  %v9063_v3 = vsel %vm8600_vm2, %v13788_v31, 0.0  ;;  %v13790_v40 = vpop.eup %13789  ;;  %v7764_v24 = vcombine.high %v18599_v11, %v18602_v23  ;;  %v9190_v5 = vpack.c.bf16 %v13786_v41, %v13788_v31  ;;  %v7645_v30 = vcombine.low %v18953_v8, %v18956_v56  ;;  %v21456_v41 = vld [vmem:[#allocation48_spill] sm:$0xff] }
 0x5fc   : > { %13799 = vpow2.f32 %v8913_v36  ;;  %13367 = vmatprep.subr.bf16.mxu1 %v21452_v42  ;;  %v8827_v53 = vsub.f32 %v21453_v33, %v8705_v55  ;;  %9067 = vadd.xlane.f32.xlu1 %v9066_v17  ;;  %v9060_v51 = vsel %vm8600_vm2, %v13790_v40, 0.0  ;;  %v18970_v11 = vrot.slane %v7748_v32, %v14913_v35 }
 0x5fd   : > { %9064 = vadd.xlane.f32.xlu0 %v9063_v3  ;;  %13801 = vpow2.f32 %v8927_v47  ;;  %v18973_v23 = vrot.slane %v7764_v24, %v14913_v35  ;;  %v8830_v31 = vsub.f32 %v21456_v41, %v8714_v28  ;;  %v21457_v3 = vld [vmem:[#allocation34_spill] sm:$0xff]  ;;  %v21460_v28 = vld [vmem:[#allocation36_spill] sm:$0xff]  ;;  %v21464_v41 = vld [vmem:[#allocation53_spill] sm:$0xff] }
 0x5fe   : > { %v13792_v2 = vpop.eup %13791  ;;  %v8925_v19 = vmul.f32 1.442695, %v8827_v53  ;;  %v21459_v53 = vld [vmem:[#allocation31_spill] sm:$0xff] }
 0x5ff   : > { %v8699_v38 = vpop.xlane.xlu0 %8698  ;;  %v9057_v1 = vsel %vm8600_vm2, %v13792_v2, 0.0  ;;  %v9189_v12 = vpack.c.bf16 %v13790_v40, %v13792_v2  ;;  %v13794_v49 = vpop.eup %13793  ;;  %v21458_v40 = vld [vmem:[#allocation32_spill] sm:$0xff]  ;;  %v21461_v32 = vcombine.low %v21459_v53, %v21460_v28 }
 0x600   : > { %13803 = vpow2.f32 %v8925_v19  ;;  %v8825_v43 = vsub.f32 %v21455_v29, %v8699_v38  ;;  %9061 = vadd.xlane.f32.xlu1 %v9060_v51  ;;  %v8732_v57 = vpop.xlane.xlu1 %8731  ;;  %v9078_v36 = vsel %vm8600_vm2, %v13794_v49, 0.0 }
 0x601   : > { %9058 = vadd.xlane.f32.xlu0 %v9057_v1  ;;  %13327 = vmatprep.mubr.msk.bf16.mxu0 %vm8600_vm2, %v9189_v12  ;;  %13805 = vpow2.f32 %v8923_v20  ;;  %v7869_v24 = vpack.c.bf16 %v7645_v30, %v21461_v32  ;;  %v8931_v20 = vmul.f32 1.442695, %v8830_v31  ;;  %v8836_v26 = vsub.f32 %v21462_v54, %v8732_v57 }
 0x602   : > { %v13796_v59 = vpop.eup %13795  ;;  %v8921_v47 = vmul.f32 1.442695, %v8825_v43  ;;  %13328 = vmatmul.mubr.msk.bf16.vlgmr.msra.gmra.mrb[64].mxu0 %vm8600_vm2, %v9190_v5  ;;  %v7374_v57 = vcombine.high %v18794_v62, %v18797_v52  ;;  %v7306_v62 = vcombine.high %v18803_v60, %v18806_v10  ;;  %v6966_v52 = vcombine.high %v18844_v0, %v18847_v44 }
 0x603   : > { %13352 = vmatpush3.bf16.msra.mxu0 %v18816_v14  ;;  %v8717_v22 = vpop.xlane.xlu0 %8716  ;;  %v9075_v55 = vsel %vm8600_vm2, %v13796_v59, 0.0  ;;  %v13798_v17 = vpop.eup %13797  ;;  %v7781_v14 = vcombine.low %v18970_v11, %v18973_v23  ;;  %v9192_v30 = vpack.c.bf16 %v13794_v49, %v13796_v59  ;;  %v6898_v0 = vcombine.high %v18864_v18, %v18867_v7 }
 0x604   : > { %13807 = vpow2.f32 %v8921_v47  ;;  %13353 = vmatprep.subr.bf16.mxu0 %v21457_v3  ;;  %v8831_v33 = vsub.f32 %v21458_v40, %v8717_v22  ;;  %9079 = vadd.xlane.f32.xlu1 %v9078_v36  ;;  %v8726_v38 = vpop.xlane.xlu1 %8725  ;;  %v9072_v1 = vsel %vm8600_vm2, %v13798_v17, 0.0  ;;  %v8943_v36 = vmul.f32 1.442695, %v8836_v26 }
 0x605   : > { %9076 = vadd.xlane.f32.xlu0 %v9075_v55  ;;  %13809 = vpow2.f32 %v8935_v27  ;;  %v21463_v27 = vld [vmem:[#allocation58_spill] sm:$0xff]  ;;  %v21466_v55 = vld [vmem:[#allocation61_spill] sm:$0xff] }
 0x606   : > { %v13800_v2 = vpop.eup %13799  ;;  %v8933_v19 = vmul.f32 1.442695, %v8831_v33  ;;  %v21465_v31 = vcombine.low %v21463_v27, %v21464_v41 }
 0x607   : > { %13354 = vmatpush3.bf16.msra.mxu0 %v21457_v3  ;;  %v8711_v51 = vpop.xlane.xlu0 %8710  ;;  %v9069_v12 = vsel %vm8600_vm2, %v13800_v2, 0.0  ;;  %v9191_v5 = vpack.c.bf16 %v13798_v17, %v13800_v2  ;;  %v13802_v29 = vpop.eup %13801  ;;  %v8834_v17 = vsub.f32 %v21466_v55, %v8726_v38  ;;  %v19007_v2 = vpack.c.bf16 %v7374_v57, %v7306_v62  ;;  %v21467_v62 = vld [vmem:[#allocation62_spill] sm:$0xff] }
 0x608   : > { %13355 = vmatprep.subr.bf16.mxu0 %v7869_v24  ;;  %v8829_v43 = vsub.f32 %v18494_v6, %v8711_v51  ;;  %9073 = vadd.xlane.f32.xlu1 %v9072_v1  ;;  %13811 = vpow2.f32 %v8933_v19  ;;  %v7870_v47 = vpack.c.bf16 %v7781_v14, %v21465_v31  ;;  %v9090_v49 = vsel %vm8600_vm2, %v13802_v29, 0.0 }
 0x609   : > { %9070 = vadd.xlane.f32.xlu0 %v9069_v12  ;;  %13331 = vmatprep.mubr.msk.bf16.mxu0 %vm8600_vm2, %v9191_v5  ;;  %13813 = vpow2.f32 %v8931_v20  ;;  %v7872_v38 = vpack.c.bf16 %v6966_v52, %v6898_v0  ;;  %v7102_v51 = vcombine.high %v18882_v15, %v18885_v48 }
 0x60a   : > { %v13804_v22 = vpop.eup %13803  ;;  %v8929_v3 = vmul.f32 1.442695, %v8829_v43  ;;  %13332 = vmatmul.mubr.msk.bf16.gmra.mrb[68].mxu0 %vm8600_vm2, %v9192_v30  ;;  %v7034_v43 = vcombine.high %v18874_v34, %v18877_v21 }
 0x60b   : > { %13356 = vmatpush3.bf16.msra.mxu0 %v7869_v24  ;;  %v8729_v6 = vpop.xlane.xlu0 %8728  ;;  %v9087_v59 = vsel %vm8600_vm2, %v13804_v22, 0.0  ;;  %v13806_v40 = vpop.eup %13805  ;;  %v8939_v24 = vmul.f32 1.442695, %v8834_v17  ;;  %v9194_v60 = vpack.c.bf16 %v13802_v29, %v13804_v22 }
 0x60c   : > { %13357 = vmatprep.subr.bf16.mxu0 %v7870_v47  ;;  %v8835_v33 = vsub.f32 %v18510_v25, %v8729_v6  ;;  %9091 = vadd.xlane.f32.xlu1 %v9090_v49  ;;  %13815 = vpow2.f32 %v8929_v3  ;;  %v9084_v54 = vsel %vm8600_vm2, %v13806_v40, 0.0  ;;  %v7170_v3 = vcombine.high %v18923_v39, %v18926_v13  ;;  %v21468_v39 = vld [vmem:[#allocation63_spill] sm:$0xff] }
 0x60d   : > { %9088 = vadd.xlane.f32.xlu0 %v9087_v59  ;;  %13817 = vpow2.f32 %v8943_v36 }
 0x60e   : > { %v13808_v32 = vpop.eup %13807  ;;  %v8941_v14 = vmul.f32 1.442695, %v8835_v33 }
 0x60f   : > { %13358 = vmatpush3.bf16.msra.mxu0 %v7870_v47  ;;  %v8723_v20 = vpop.xlane.xlu0 %8722  ;;  %v9081_v25 = vsel %vm8600_vm2, %v13808_v32, 0.0  ;;  %v9193_v26 = vpack.c.bf16 %v13806_v40, %v13808_v32  ;;  %v13810_v19 = vpop.eup %13809 }
 0x610   : > { %13819 = vpow2.f32 %v8941_v14  ;;  %13383 = vmatprep.subr.bf16.mxu0 %v19007_v2  ;;  %v8833_v10 = vsub.f32 %v18525_v63, %v8723_v20  ;;  %9085 = vadd.xlane.f32.xlu1 %v9084_v54  ;;  %v9102_v63 = vsel %vm8600_vm2, %v13810_v19, 0.0 }
 0x611   : > { %9082 = vadd.xlane.f32.xlu0 %v9081_v25  ;;  %13343 = vmatprep.mubr.msk.bf16.mxu1 %vm8600_vm2, %v9193_v26  ;;  %13821 = vpow2.f32 %v8939_v24 }
 0x612   : > { %v8937_v44 = vmul.f32 1.442695, %v8833_v10  ;;  %13344 = vmatmul.mubr.msk.bf16.vlgmr.msra.gmra.mrb[40].mxu1 %vm8600_vm2, %v9194_v60  ;;  %v13812_v1 = vpop.eup %13811  ;;  %v21469_v10 = vld [vmem:[#allocation64_spill] sm:$0xff] }
 0x613   : > { %13368 = vmatpush3.bf16.msra.mxu1 %v21452_v42  ;;  %v8735_v12 = vpop.xlane.xlu0 %8734  ;;  %v13814_v5 = vpop.eup %13813  ;;  %v9099_v7 = vsel %vm8600_vm2, %v13812_v1, 0.0  ;;  %v7873_v42 = vpack.c.bf16 %v7102_v51, %v7034_v43  ;;  %v9196_v17 = vpack.c.bf16 %v13810_v19, %v13812_v1  ;;  %v21472_v43 = vld [vmem:[#allocation94_spill] sm:$0xff] }
 0x614   : > { %13823 = vpow2.f32 %v8937_v44  ;;  %13369 = vmatprep.subr.bf16.mxu1 %v7872_v38  ;;  %v8837_v18 = vsub.f32 %v18537_v45, %v8735_v12  ;;  %9103 = vadd.xlane.f32.xlu1 %v9102_v63  ;;  %v9096_v57 = vsel %vm8600_vm2, %v13814_v5, 0.0  ;;  %v7238_v45 = vcombine.high %v18910_v61, %v18913_v46  ;;  %v21470_v44 = vld [vmem:[#allocation96_spill] sm:$0xff] }
 0x615   : > { %v8738_v29 = vpop.xlane.xlu1 %8737  ;;  %9100 = vadd.xlane.f32.xlu0 %v9099_v7  ;;  %v7646_v12 = vcombine.high %v18953_v8, %v18956_v56  ;;  %v21471_v7 = vld [vmem:[#allocation33_spill] sm:$0xff]  ;;  %v21473_v56 = vld [vmem:[#allocation42_spill] sm:$0xff] }
 0x616   : > { %v8838_v15 = vsub.f32 %v18550_v4, %v8738_v29  ;;  %v8945_v48 = vmul.f32 1.442695, %v8837_v18  ;;  %v13816_v30 = vpop.eup %13815 }
 0x617   : > { %13370 = vmatpush3.bf16.msra.mxu1 %v7872_v38  ;;  %v8753_v47 = vpop.xlane.xlu0 %8752  ;;  %v13818_v22 = vpop.eup %13817  ;;  %v9093_v4 = vsel %vm8600_vm2, %v13816_v30, 0.0  ;;  %v9195_v21 = vpack.c.bf16 %v13814_v5, %v13816_v30 }
 0x618   : > { %v8947_v31 = vmul.f32 1.442695, %v8838_v15  ;;  %13825 = vpow2.f32 %v8945_v48  ;;  %13371 = vmatprep.subr.bf16.mxu1 %v7873_v42  ;;  %v8843_v34 = vsub.f32 %v18559_v58, %v8753_v47  ;;  %9097 = vadd.xlane.f32.xlu1 %v9096_v57  ;;  %v7874_v58 = vpack.c.bf16 %v7238_v45, %v7170_v3 }
 0x619   : > { %v8756_v36 = vpop.xlane.xlu1 %8755  ;;  %9094 = vadd.xlane.f32.xlu0 %v9093_v4  ;;  %13347 = vmatprep.mubr.msk.bf16.mxu1 %vm8600_vm2, %v9195_v21  ;;  %v9114_v59 = vsel %vm8600_vm2, %v13818_v22, 0.0  ;;  %v7782_v45 = vcombine.high %v18970_v11, %v18973_v23  ;;  %v21475_v21 = vld [vmem:[#allocation106_spill] sm:$0xff]  ;;  %v21477_v23 = vcombine.high %v21463_v27, %v21464_v41 }
 0x61a   : > { %13827 = vpow2.f32 %v8947_v31  ;;  %v8844_v55 = vsub.f32 %v18564_v37, %v8756_v36  ;;  %v13820_v6 = vpop.eup %13819  ;;  %v8957_v61 = vmul.f32 1.442695, %v8843_v34  ;;  %13348 = vmatmul.mubr.msk.bf16.gmra.mrb[44].mxu1 %vm8600_vm2, %v9196_v17 }
 0x61b   : > { %v8747_v49 = vpop.xlane.xlu0 %8746  ;;  %v9111_v40 = vsel %vm8600_vm2, %v13820_v6, 0.0  ;;  %v13822_v33 = vpop.eup %13821  ;;  %13372 = vmatpush3.bf16.msra.mxu1 %v7873_v42  ;;  %v9198_v19 = vpack.c.bf16 %v13818_v22, %v13820_v6 }
 0x61c   : > { %v8959_v46 = vmul.f32 1.442695, %v8844_v55  ;;  %13829 = vpow2.f32 %v8957_v61  ;;  %v8841_v52 = vsub.f32 %v21467_v62, %v8747_v49  ;;  %9115 = vadd.xlane.f32.xlu1 %v9114_v59  ;;  %13373 = vmatprep.subr.bf16.mxu1 %v7874_v58  ;;  %v9108_v54 = vsel %vm8600_vm2, %v13822_v33, 0.0 }
 0x61d   : > { %v8750_v37 = vpop.xlane.xlu1 %8749  ;;  %9112 = vadd.xlane.f32.xlu0 %v9111_v40  ;;  %v7878_v61 = vpack.c.bf16 %v7782_v45, %v21477_v23 }
 0x61e   : > { %13831 = vpow2.f32 %v8959_v46  ;;  %v8842_v13 = vsub.f32 %v21468_v39, %v8750_v37  ;;  %v13824_v32 = vpop.eup %13823  ;;  %v8953_v24 = vmul.f32 1.442695, %v8841_v52 }
 0x61f   : > { %v8741_v20 = vpop.xlane.xlu0 %8740  ;;  %v9105_v25 = vsel %vm8600_vm2, %v13824_v32, 0.0  ;;  %v9197_v26 = vpack.c.bf16 %v13822_v33, %v13824_v32  ;;  %13374 = vmatpush3.bf16.msra.mxu1 %v7874_v58 }
 0x620   : > { %v8955_v14 = vmul.f32 1.442695, %v8842_v13  ;;  %13833 = vpow2.f32 %v8953_v24  ;;  %v8839_v0 = vsub.f32 %v21469_v10, %v8741_v20  ;;  %9109 = vadd.xlane.f32.xlu1 %v9108_v54  ;;  %v21478_v20 = vld [vmem:[#allocation95_spill] sm:$0xff] }
 0x621   : > { %v8744_v60 = vpop.xlane.xlu1 %8743  ;;  %9106 = vadd.xlane.f32.xlu0 %v9105_v25  ;;  %13359 = vmatprep.mubr.msk.bf16.mxu0 %vm8600_vm2, %v9197_v26 }
 0x622   : > { %13835 = vpow2.f32 %v8955_v14  ;;  %v8840_v38 = vsub.f32 %v21470_v44, %v8744_v60  ;;  %v13826_v51 = vpop.eup %13825  ;;  %v8949_v1 = vmul.f32 1.442695, %v8839_v0  ;;  %13360 = vmatmul.mubr.msk.bf16.vlgmr.msra.gmra.mrb[72].mxu0 %vm8600_vm2, %v9198_v19 }
 0x623   : > { %13384 = vmatpush3.bf16.msra.mxu0 %v19007_v2  ;;  %v9117_v18 = vsel %vm8600_vm2, %v13826_v51, 0.0  ;;  %v21474_v2 = vcombine.high %v21459_v53, %v21460_v28  ;;  %v21476_v28 = vld [vmem:[#allocation41_spill] sm:$0xff] }
 0x624   : > { %v13828_v63 = vpop.eup %13827  ;;  %v8951_v5 = vmul.f32 1.442695, %v8840_v38  ;;  %13837 = vpow2.f32 %v8949_v1  ;;  %13385 = vmatprep.subr.bf16.mxu0 %v21471_v7 }
 0x625   : > { %v9120_v48 = vsel %vm8600_vm2, %v13828_v63, 0.0  ;;  %v9199_v42 = vpack.c.bf16 %v13828_v63, %v13826_v51  ;;  %9118 = vadd.xlane.f32.xlu0 %v9117_v18  ;;  %v7877_v57 = vpack.c.bf16 %v7646_v12, %v21474_v2  ;;  %v21479_v18 = vld [vmem:[#allocation43_spill] sm:$0xff] }
 0x626   : > { %13839 = vpow2.f32 %v8951_v5  ;;  %9121 = vadd.xlane.f32.xlu1 %v9120_v48  ;;  %v13830_v8 = vpop.eup %13829 }
 0x627   : > { %13363 = vmatprep.mubr.msk.bf16.mxu0 %vm8600_vm2, %v9199_v42  ;;  %13386 = vmatpush3.bf16.msra.mxu0 %v21471_v7  ;;  %v9135_v34 = vsel %vm8600_vm2, %v13830_v8, 0.0 }
 0x628   : > { %v8759_v29 = vpop.xlane.xlu0 %8758  ;;  %v13832_v22 = vpop.eup %13831  ;;  %13387 = vmatprep.subr.bf16.mxu0 %v7877_v57 }
 0x629   : > { %v8845_v15 = vsub.f32 %v21472_v43, %v8759_v29  ;;  %v9138_v3 = vsel %vm8600_vm2, %v13832_v22, 0.0  ;;  %9136 = vadd.xlane.f32.xlu0 %v9135_v34  ;;  %v9202_v40 = vpack.c.bf16 %v13832_v22, %v13830_v8  ;;  %v21481_v8 = vld [vmem:[#allocation40_spill] sm:$0xff] }
 0x62a   : > { %v8762_v30 = vpop.xlane.xlu1 %8761  ;;  %v13834_v53 = vpop.eup %13833  ;;  %9139 = vadd.xlane.f32.xlu1 %v9138_v3 }
 0x62b   : > { %v8846_v31 = vsub.f32 %v21473_v56, %v8762_v30  ;;  %v8961_v47 = vmul.f32 1.442695, %v8845_v15  ;;  %13388 = vmatpush3.bf16.msra.mxu0 %v7877_v57  ;;  %v9129_v58 = vsel %vm8600_vm2, %v13834_v53, 0.0  ;;  %v21480_v15 = vld [vmem:[#allocation105_spill] sm:$0xff] }
 0x62c   : > { %v8765_v36 = vpop.xlane.xlu0 %8764  ;;  %v13836_v46 = vpop.eup %13835  ;;  %13389 = vmatprep.subr.bf16.mxu0 %v7878_v61 }
 0x62d   : > { %v8963_v4 = vmul.f32 1.442695, %v8846_v31  ;;  %13841 = vpow2.f32 %v8961_v47  ;;  %v8847_v55 = vsub.f32 %v21475_v21, %v8765_v36  ;;  %v9201_v59 = vpack.c.bf16 %v13836_v46, %v13834_v53  ;;  %9130 = vadd.xlane.f32.xlu0 %v9129_v58 }
 0x62e   : > { %v8768_v17 = vpop.xlane.xlu1 %8767  ;;  %v9132_v33 = vsel %vm8600_vm2, %v13836_v46, 0.0  ;;  %v19070_v37 = vpop.eup %13837 }
 0x62f   : > { %13843 = vpow2.f32 %v8963_v4  ;;  %v8848_v6 = vsub.f32 %v21476_v28, %v8768_v17  ;;  %v8965_v11 = vmul.f32 1.442695, %v8847_v55  ;;  %9133 = vadd.xlane.f32.xlu1 %v9132_v33  ;;  %13375 = vmatprep.mubr.msk.bf16.mxu1 %vm8600_vm2, %v9201_v59  ;;  %v9123_v59 = vsel %vm8600_vm2, %v19070_v37, 0.0 }
 0x630   : > { %v19073_v27 = vpop.eup %13839  ;;  %13376 = vmatmul.mubr.msk.bf16.vlgmr.msra.gmra.mrb[48].mxu1 %vm8600_vm2, %v9202_v40  ;;  %13390 = vmatpush3.bf16.msra.mxu0 %v7878_v61 }
 0x631   : > { %v8967_v49 = vmul.f32 1.442695, %v8848_v6  ;;  %13845 = vpow2.f32 %v8965_v11  ;;  %v9200_v41 = vpack.c.bf16 %v19073_v27, %v19070_v37 }
 0x633   : > { %13847 = vpow2.f32 %v8967_v49  ;;  %13364 = vmatmul.mubr.msk.bf16.gmra.mrb[76].mxu0 %vm8600_vm2, %v9200_v41  ;;  %v9126_v41 = vsel %vm8600_vm2, %v19073_v27, 0.0 }
 0x637   : > { %v13842_v62 = vpop.eup %13841 }
 0x638   : > { %v9141_v0 = vsel %vm8600_vm2, %v13842_v62, 0.0 }
 0x639   : > { %v13844_v52 = vpop.eup %13843  ;;  %v8771_v14 = vpop.xlane.xlu0 %8770 }
 0x63a   : > { %v9203_v39 = vpack.c.bf16 %v13844_v52, %v13842_v62  ;;  %v8849_v54 = vsub.f32 %v21478_v20, %v8771_v14  ;;  %v9144_v1 = vsel %vm8600_vm2, %v13844_v52, 0.0 }
 0x63b   : > { %v13846_v13 = vpop.eup %13845  ;;  %v8774_v19 = vpop.xlane.xlu1 %8773 }
 0x63c   : > { %13379 = vmatprep.mubr.msk.bf16.mxu1 %vm8600_vm2, %v9203_v39  ;;  %v9147_v32 = vsel %vm8600_vm2, %v13846_v13, 0.0  ;;  %v8850_v60 = vsub.f32 %v18714_v50, %v8774_v19  ;;  %v8969_v10 = vmul.f32 1.442695, %v8849_v54 }
 0x63d   : > { %v13848_v24 = vpop.eup %13847  ;;  %9148 = vadd.xlane.f32.xlu0 %v9147_v32  ;;  %v8777_v44 = vpop.xlane.xlu0 %8776 }
 0x63e   : > { %v9150_v25 = vsel %vm8600_vm2, %v13848_v24, 0.0  ;;  %v9204_v26 = vpack.c.bf16 %v13848_v24, %v13846_v13  ;;  %v8971_v38 = vmul.f32 1.442695, %v8850_v60  ;;  %13849 = vpow2.f32 %v8969_v10 }
 0x63f   : > { %9151 = vadd.xlane.f32.xlu1 %v9150_v25  ;;  %v8851_v51 = vsub.f32 %v18712_v16, %v8777_v44  ;;  %v8780_v12 = vpop.xlane.xlu1 %8779 }
 0x640   : > { %13380 = vmatmul.mubr.msk.bf16.gmra.mrb[52].mxu1 %vm8600_vm2, %v9204_v26  ;;  %13851 = vpow2.f32 %v8971_v38  ;;  %v8852_v63 = vsub.f32 %v18721_v9, %v8780_v12  ;;  %v21482_v9 = vld [vmem:[#allocation51_spill] sm:$0xff] }
 0x641   : > { %9142 = vadd.xlane.f32.xlu0 %v9141_v0  ;;  %v8973_v5 = vmul.f32 1.442695, %v8851_v51  ;;  %v8783_v50 = vpop.xlane.xlu0 %8782 }
 0x642   : > { %v8975_v29 = vmul.f32 1.442695, %v8852_v63  ;;  %v8853_v7 = vsub.f32 %v21479_v18, %v8783_v50 }
 0x643   : > { %9145 = vadd.xlane.f32.xlu1 %v9144_v1  ;;  %13853 = vpow2.f32 %v8973_v5  ;;  %v8786_v43 = vpop.xlane.xlu1 %8785 }
 0x644   : > { %13855 = vpow2.f32 %v8975_v29  ;;  %v8854_v48 = vsub.f32 %v21480_v15, %v8786_v43  ;;  %v8977_v42 = vmul.f32 1.442695, %v8853_v7 }
 0x645   : > { %v8789_v30 = vpop.xlane.xlu0 %8788 }
 0x646   : > { %v8979_v16 = vmul.f32 1.442695, %v8854_v48  ;;  %13857 = vpow2.f32 %v8977_v42  ;;  %v8855_v56 = vsub.f32 %v21481_v8, %v8789_v30 }
 0x647   : > { %v8792_v31 = vpop.xlane.xlu1 %8791 }
 0x648   : > { %v13850_v47 = vpop.eup %13849  ;;  %13859 = vpow2.f32 %v8979_v16  ;;  %v8856_v2 = vsub.f32 %v21482_v9, %v8792_v31  ;;  %v8981_v57 = vmul.f32 1.442695, %v8855_v56 }
 0x649   : > { %v8993_v21 = vpop.xlane.xlu0 %8992  ;;  %v9153_v6 = vsel %vm8600_vm2, %v13850_v47, 0.0 }
 0x64a   : > { %v13852_v45 = vpop.eup %13851  ;;  %v8983_v22 = vmul.f32 1.442695, %v8856_v2  ;;  %13861 = vpow2.f32 %v8981_v57 }
 0x64b   : > { %v9205_v36 = vpack.c.bf16 %v13852_v45, %v13850_v47  ;;  %v8996_v4 = vpop.xlane.xlu1 %8995  ;;  %v9156_v61 = vsel %vm8600_vm2, %v13852_v45, 0.0 }
 0x64c   : > { %13863 = vpow2.f32 %v8983_v22 }
 0x64d   : > { %v13854_v34 = vpop.eup %13853  ;;  %13391 = vmatprep.mubr.msk.bf16.mxu0 %vm8600_vm2, %v9205_v36  ;;  %v8987_v46 = vpop.xlane.xlu0 %8986  ;;  %13865 = vrcp.f32 %v8993_v21 }
 0x64e   : > { %v9159_v55 = vsel %vm8600_vm2, %v13854_v34, 0.0  ;;  %v13856_v17 = vpop.eup %13855  ;;  %13867 = vrcp.f32 %v8987_v46 }
 0x64f   : > { %9160 = vadd.xlane.f32.xlu0 %v9159_v55  ;;  %v9206_v3 = vpack.c.bf16 %v13856_v17, %v13854_v34  ;;  %v9162_v53 = vsel %vm8600_vm2, %v13856_v17, 0.0  ;;  %v8990_v23 = vpop.xlane.xlu1 %8989  ;;  %13869 = vrcp.f32 %v8996_v4 }
 0x650   : > { %v13858_v28 = vpop.eup %13857  ;;  %9163 = vadd.xlane.f32.xlu1 %v9162_v53  ;;  %13871 = vrcp.f32 %v8990_v23 }
 0x651   : > { %13392 = vmatmul.mubr.msk.bf16.vlgmr.msra.gmra.mrb[80].mxu0 %vm8600_vm2, %v9206_v3  ;;  %v9005_v52 = vpop.xlane.xlu0 %9004  ;;  %v9165_v39 = vsel %vm8600_vm2, %v13858_v28, 0.0 }
 0x652   : > { %v13860_v11 = vpop.eup %13859  ;;  %13873 = vrcp.f32 %v9005_v52 }
 0x653   : > { %9154 = vadd.xlane.f32.xlu0 %v9153_v6  ;;  %v9207_v58 = vpack.c.bf16 %v13860_v11, %v13858_v28  ;;  %v9008_v33 = vpop.xlane.xlu1 %9007  ;;  %v9168_v13 = vsel %vm8600_vm2, %v13860_v11, 0.0 }
 0x654   : > { %v13862_v49 = vpop.eup %13861  ;;  %9157 = vadd.xlane.f32.xlu1 %v9156_v61 }
 0x655   : > { %13395 = vmatprep.mubr.msk.bf16.mxu0 %vm8600_vm2, %v9207_v58  ;;  %v9171_v32 = vsel %vm8600_vm2, %v13862_v49, 0.0  ;;  %v8999_v24 = vpop.xlane.xlu0 %8998 }
 0x656   : > { %v13864_v40 = vpop.eup %13863  ;;  %13875 = vrcp.f32 %v8999_v24 }
 0x657   : > { %9124 = vadd.xlane.f32.xlu0 %v9123_v59  ;;  %v9208_v62 = vpack.c.bf16 %v13864_v40, %v13862_v49  ;;  %v9002_v37 = vpop.xlane.xlu1 %9001  ;;  %v9174_v27 = vsel %vm8600_vm2, %v13864_v40, 0.0  ;;  %v13866_v54 = vpop.eup %13865  ;;  %13877 = vrcp.f32 %v9008_v33 }
 0x658   : > { %9127 = vadd.xlane.f32.xlu1 %v9126_v41  ;;  %v13868_v25 = vpop.eup %13867  ;;  %13879 = vrcp.f32 %v9002_v37 }
 0x659   : > { %13396 = vmatmul.mubr.msk.bf16.gmra.mrb[84].mxu0 %vm8600_vm2, %v9208_v62  ;;  %v9017_v14 = vpop.xlane.xlu0 %9016  ;;  %v13870_v0 = vpop.eup %13869 }
 0x65a   : > { %v13872_v1 = vpop.eup %13871  ;;  %13881 = vrcp.f32 %v9017_v14 }
 0x65b   : > { %9166 = vadd.xlane.f32.xlu0 %v9165_v39  ;;  %v9020_v20 = vpop.xlane.xlu1 %9019 }
 0x65c   : > { %9169 = vadd.xlane.f32.xlu1 %v9168_v13  ;;  %v13874_v57 = vpop.eup %13873 }
 0x65d   : > { %v9011_v10 = vpop.xlane.xlu0 %9010 }
 0x65e   : > { %v13281_v26 = vpop.f32.mrb[48].mxu0  ;;  %13883 = vrcp.f32 %v9011_v10 }
 0x65f   : > { %9172 = vadd.xlane.f32.xlu0 %v9171_v32  ;;  %v19109_v19 = vmul.f32 %v13866_v54, %v13281_v26  ;;  %v9255_v60 = vpop.f32.mrb[49].mxu0  ;;  %v9014_v51 = vpop.xlane.xlu1 %9013  ;;  %13885 = vrcp.f32 %v9020_v20 }
 0x660   : > { %9175 = vadd.xlane.f32.xlu1 %v9174_v27  ;;  %v19111_v44 = vmul.f32 %v13868_v25, %v9255_v60  ;;  %v13282_v38 = vpop.f32.mrb[50].mxu0  ;;  %v13876_v22 = vpop.eup %13875  ;;  %13887 = vrcp.f32 %v9014_v51 }
 0x661   : > { %v19113_v12 = vmul.f32 %v13870_v0, %v13282_v38  ;;  %v9258_v63 = vpop.f32.mrb[51].mxu0  ;;  %v13878_v4 = vpop.eup %13877 }
 0x662   : > { %v19115_v5 = vmul.f32 %v13872_v1, %v9258_v63  ;;  %v13880_v17 = vpop.eup %13879 }
 0x664   : > { %v13882_v23 = vpop.eup %13881 }
 0x668   : > { %v13884_v58 = vpop.eup %13883 }
 0x669   : > { %v9029_v50 = vpop.xlane.xlu0 %9028  ;;  %v13886_v33 = vpop.eup %13885 }
 0x66a   : > { %v13888_v52 = vpop.eup %13887  ;;  %13889 = vrcp.f32 %v9029_v50 }
 0x66b   : > { %v9032_v29 = vpop.xlane.xlu1 %9031 }
 0x66d   : > { %v9023_v18 = vpop.xlane.xlu0 %9022 }
 0x66e   : > { %13891 = vrcp.f32 %v9023_v18 }
 0x66f   : > { %v9026_v7 = vpop.xlane.xlu1 %9025  ;;  %13893 = vrcp.f32 %v9032_v29 }
 0x670   : > { %13895 = vrcp.f32 %v9026_v7 }
 0x671   : > { %v19117_v43 = vpop.xlane.xlu0 %9040 }
 0x673   : > { %v19119_v15 = vpop.xlane.xlu1 %9043 }
 0x674   : > { %v13890_v60 = vpop.eup %13889 }
 0x675   : > { %v19123_v42 = vpop.xlane.xlu0 %9034 }
 0x678   : > { %v13892_v0 = vpop.eup %13891 }
 0x679   : > { %v19121_v48 = vpop.xlane.xlu1 %9037  ;;  %v13894_v1 = vpop.eup %13893 }
 0x67a   : > { %v13896_v18 = vpop.eup %13895 }
 0x67d   : > { %v19127_v16 = vpop.xlane.xlu1 %9055 }
 0x67e   : > { %v19125_v30 = vpop.xlane.xlu0 %9052 }
 0x67f   : > { %13897 = vrcp.f32 %v19125_v30 }
 0x682   : > { %v19131_v56 = vpop.xlane.xlu0 %9046 }
 0x683   : > { %13899 = vrcp.f32 %v19131_v56 }
 0x684   : > { %13901 = vrcp.f32 %v19127_v16 }
 0x685   : > { %v19129_v8 = vpop.xlane.xlu1 %9049 }
 0x686   : > { %13903 = vrcp.f32 %v19129_v8 }
 0x689   : > { %v19135_v47 = vpop.xlane.xlu1 %9067  ;;  %v13898_v30 = vpop.eup %13897 }
 0x68a   : > { %v19133_v31 = vpop.xlane.xlu0 %9064 }
 0x68b   : > { %13905 = vrcp.f32 %v19133_v31 }
 0x68d   : > { %v19139_v2 = vpop.xlane.xlu1 %9061 }
 0x68e   : > { %v19137_v9 = vpop.xlane.xlu0 %9058 }
 0x68f   : > { %13907 = vrcp.f32 %v19137_v9 }
 0x690   : > { %v13285_v45 = vpop.f32.mrb[52].mxu0  ;;  %13909 = vrcp.f32 %v19135_v47 }
 0x691   : > { %v19141_v36 = vmul.f32 %v13874_v57, %v13285_v45  ;;  %v9271_v34 = vpop.f32.mrb[53].mxu0  ;;  %v19149_v6 = vpop.xlane.xlu1 %9079  ;;  %13911 = vrcp.f32 %v19139_v2 }
 0x692   : > { %v19143_v21 = vmul.f32 %v13876_v22, %v9271_v34  ;;  %v13286_v55 = vpop.f32.mrb[54].mxu0  ;;  %v19145_v3 = vpop.xlane.xlu0 %9076 }
 0x693   : > { %v19147_v53 = vmul.f32 %v13878_v4, %v13286_v55  ;;  %v9274_v28 = vpop.f32.mrb[55].mxu0  ;;  %13913 = vrcp.f32 %v19145_v3 }
 0x694   : > { %v19151_v11 = vmul.f32 %v13880_v17, %v9274_v28 }
 0x695   : > { %v19155_v49 = vpop.xlane.xlu1 %9073 }
 0x696   : > { %v19153_v61 = vpop.xlane.xlu0 %9070 }
 0x697   : > { %13915 = vrcp.f32 %v19153_v61 }
 0x698   : > { %13917 = vrcp.f32 %v19149_v6 }
 0x699   : > { %v19167_v24 = vpop.xlane.xlu1 %9091  ;;  %13919 = vrcp.f32 %v19155_v49 }
 0x69a   : > { %v13297_v46 = vpop.f32.mrb[56].mxu0  ;;  %v19165_v32 = vpop.xlane.xlu0 %9088 }
 0x69b   : > { %v19157_v59 = vmul.f32 %v13882_v23, %v13297_v46  ;;  %v9332_v40 = vpop.f32.mrb[57].mxu0  ;;  %13921 = vrcp.f32 %v19165_v32 }
 0x69c   : > { %v19159_v41 = vmul.f32 %v13884_v58, %v9332_v40  ;;  %v13298_v62 = vpop.f32.mrb[58].mxu0 }
 0x69d   : > { %v19161_v39 = vmul.f32 %v13886_v33, %v13298_v62  ;;  %v9335_v13 = vpop.f32.mrb[59].mxu0  ;;  %v19171_v14 = vpop.xlane.xlu1 %9085 }
 0x69e   : > { %v19163_v37 = vmul.f32 %v13888_v52, %v9335_v13  ;;  %v19169_v27 = vpop.xlane.xlu0 %9082  ;;  %v13900_v62 = vpop.eup %13899 }
 0x69f   : > { %v13902_v52 = vpop.eup %13901  ;;  %13923 = vrcp.f32 %v19169_v27 }
 0x6a0   : > { %13925 = vrcp.f32 %v19167_v24 }
 0x6a1   : > { %v19175_v54 = vpop.xlane.xlu1 %9103  ;;  %13927 = vrcp.f32 %v19171_v14 }
 0x6a2   : > { %v19173_v20 = vpop.xlane.xlu0 %9100  ;;  %13929 = vrcp.f32 %v19117_v43 }
 0x6a3   : > { %13931 = vrcp.f32 %v19119_v15 }
 0x6a4   : > { %13933 = vrcp.f32 %v19123_v42 }
 0x6a5   : > { %v19179_v26 = vpop.xlane.xlu1 %9097 }
 0x6a6   : > { %v19177_v25 = vpop.xlane.xlu0 %9094 }
 0x6a9   : > { %v19189_v45 = vpop.xlane.xlu1 %9115 }
 0x6aa   : > { %v19185_v57 = vpop.xlane.xlu0 %9112 }
 0x6ad   : > { %v19195_v4 = vpop.xlane.xlu1 %9109 }
 0x6ae   : > { %v19193_v34 = vpop.xlane.xlu0 %9106 }
 0x6b2   : > { %v19209_v46 = vpop.xlane.xlu0 %9118 }
 0x6b3   : > { %v19211_v58 = vpop.xlane.xlu1 %9121 }
 0x6b6   : > { %v19215_v40 = vpop.xlane.xlu0 %9136 }
 0x6b7   : > { %v13301_v10 = vpop.f32.mrb[60].mxu0  ;;  %v19218_v56 = vpop.xlane.xlu1 %9139 }
 0x6b8   : > { %v19181_v38 = vmul.f32 %v13890_v60, %v13301_v10  ;;  %v9348_v51 = vpop.f32.mrb[61].mxu0  ;;  %v13904_v60 = vpop.eup %13903  ;;  %13935 = vrcp.f32 %v19121_v48 }
 0x6b9   : > { %v19183_v63 = vmul.f32 %v13892_v0, %v9348_v51  ;;  %v13302_v50 = vpop.f32.mrb[62].mxu0  ;;  %v13906_v2 = vpop.eup %13905  ;;  %13937 = vrcp.f32 %v19173_v20 }
 0x6ba   : > { %v19187_v29 = vmul.f32 %v13894_v1, %v13302_v50  ;;  %v9351_v7 = vpop.f32.mrb[63].mxu0  ;;  %v19232_v51 = vpop.xlane.xlu0 %9130 }
 0x6bb   : > { %v19191_v22 = vmul.f32 %v13896_v18, %v9351_v7  ;;  %v13908_v50 = vpop.eup %13907  ;;  %13939 = vrcp.f32 %v19177_v25 }
 0x6bc   : > { %v19230_v47 = vpop.xlane.xlu1 %9133 }
 0x6c1   : > { %v19197_v55 = vpop.f32.mrb[32].mxu1 }
 0x6c2   : > { %v19199_v17 = vpop.f32.mrb[33].mxu1 }
 0x6c3   : > { %v19202_v28 = vpop.f32.mrb[34].mxu1 }
 0x6c4   : > { %v19205_v23 = vpop.f32.mrb[35].mxu1 }
 0x6cd   : > { %v13317_v33 = vpop.f32.mrb[36].mxu1 }
 0x6ce   : > { %v19221_v16 = vmul.f32 %v13898_v30, %v13317_v33  ;;  %v9425_v8 = vpop.f32.mrb[37].mxu1  ;;  %v13910_v30 = vpop.eup %13909  ;;  %13941 = vrcp.f32 %v19175_v54 }
 0x6cf   : > { %v19223_v13 = vmul.f32 %v13900_v62, %v9425_v8  ;;  %v13318_v31 = vpop.f32.mrb[38].mxu1  ;;  %v19239_v33 = vpop.xlane.xlu0 %9148 }
 0x6d0   : > { %v19225_v9 = vmul.f32 %v13902_v52, %v13318_v31  ;;  %v9428_v10 = vpop.f32.mrb[39].mxu1  ;;  %v13912_v8 = vpop.eup %13911  ;;  %13943 = vrcp.f32 %v19179_v26 }
 0x6d1   : > { %v19227_v0 = vmul.f32 %v13904_v60, %v9428_v10  ;;  %v19245_v31 = vpop.xlane.xlu1 %9151  ;;  %v13914_v49 = vpop.eup %13913  ;;  %13945 = vrcp.f32 %v19189_v45 }
 0x6d3   : > { %v19252_v60 = vpop.xlane.xlu0 %9142 }
 0x6d5   : > { %v13329_v1 = vpop.f32.mrb[64].mxu0 }
 0x6d6   : > { %v19237_v18 = vmul.f32 %v13906_v2, %v13329_v1  ;;  %v9486_v7 = vpop.f32.mrb[65].mxu0  ;;  %v13916_v2 = vpop.eup %13915  ;;  %13947 = vrcp.f32 %v19185_v57 }
 0x6d7   : > { %v19241_v3 = vmul.f32 %v13908_v50, %v9486_v7  ;;  %v13330_v62 = vpop.f32.mrb[66].mxu0  ;;  %v13918_v7 = vpop.eup %13917  ;;  %13949 = vrcp.f32 %v19195_v4 }
 0x6d8   : > { %v19243_v52 = vmul.f32 %v13910_v30, %v13330_v62  ;;  %v9489_v61 = vpop.f32.mrb[67].mxu0  ;;  %v19257_v30 = vpop.xlane.xlu1 %9145 }
 0x6d9   : > { %21483 = vst [vmem:[#allocation74_spill] sm:$0xff] %v19241_v3  ;;  %v19247_v6 = vmul.f32 %v13912_v8, %v9489_v61  ;;  %v13920_v8 = vpop.eup %13919  ;;  %13951 = vrcp.f32 %v19193_v34 }
 0x6da   : > { %21484 = vst [vmem:[#allocation103_spill] sm:$0xff] %v19243_v52 }
 0x6db   : > { %21485 = vst [vmem:[#allocation73_spill] sm:$0xff] %v19247_v6 }
 0x6dc   : > { %v19269_v14 = vpop.xlane.xlu0 %9160 }
 0x6dd   : > { %v13333_v10 = vpop.f32.mrb[68].mxu0 }
 0x6de   : > { %v19255_v1 = vmul.f32 %v13914_v49, %v13333_v10  ;;  %v9502_v50 = vpop.f32.mrb[69].mxu0  ;;  %v13922_v49 = vpop.eup %13921  ;;  %13953 = vrcp.f32 %v19211_v58 }
 0x6df   : > { %v19259_v62 = vmul.f32 %v13916_v2, %v9502_v50  ;;  %v13334_v32 = vpop.f32.mrb[70].mxu0  ;;  %v19273_v10 = vpop.xlane.xlu1 %9163 }
 0x6e0   : > { %21486 = vst [vmem:[#allocation81_spill] sm:$0xff] %v19255_v1  ;;  %v19262_v27 = vmul.f32 %v13918_v7, %v13334_v32  ;;  %v9505_v24 = vpop.f32.mrb[71].mxu0  ;;  %v13924_v2 = vpop.eup %13923  ;;  %13955 = vrcp.f32 %v19209_v46 }
 0x6e1   : > { %21487 = vst [vmem:[#allocation80_spill] sm:$0xff] %v19259_v62  ;;  %v19265_v61 = vmul.f32 %v13920_v8, %v9505_v24  ;;  %v13926_v7 = vpop.eup %13925  ;;  %v9155_v24 = vpop.xlane.xlu0 %9154  ;;  %13957 = vrcp.f32 %v19215_v40 }
 0x6e2   : > { %21488 = vst [vmem:[#allocation55_spill] sm:$0xff] %v19262_v27  ;;  %v13928_v32 = vpop.eup %13927  ;;  %13959 = vrcp.f32 %v19218_v56 }
 0x6e3   : > { %21489 = vst [vmem:[#allocation54_spill] sm:$0xff] %v19265_v61  ;;  %v19295_v45 = vpop.eup %13929  ;;  %13961 = vrcp.f32 %v19232_v51 }
 0x6e4   : > { %v19302_v57 = vpop.eup %13931  ;;  %13963 = vrcp.f32 %v19230_v47 }
 0x6e5   : > { %v13345_v43 = vpop.f32.mrb[40].mxu1 }
 0x6e6   : > { %v19276_v15 = vmul.f32 %v13922_v49, %v13345_v43  ;;  %v9563_v50 = vpop.f32.mrb[41].mxu1  ;;  %v9125_v49 = vpop.xlane.xlu0 %9124 }
 0x6e7   : > { %v19279_v48 = vmul.f32 %v13924_v2, %v9563_v50  ;;  %v13346_v42 = vpop.f32.mrb[42].mxu1 }
 0x6e8   : > { %v19286_v8 = vmul.f32 %v13926_v7, %v13346_v42  ;;  %v9566_v54 = vpop.f32.mrb[43].mxu1  ;;  %v9158_v7 = vpop.xlane.xlu1 %9157 }
 0x6e9   : > { %v19293_v43 = vmul.f32 %v13928_v32, %v9566_v54  ;;  %v19307_v32 = vpop.eup %13933  ;;  %13965 = vrcp.f32 %v19239_v33 }
 0x6ea   : > { %v19312_v54 = vpop.eup %13935  ;;  %13967 = vrcp.f32 %v19245_v31 }
 0x6eb   : > { %v13938_v50 = vpop.eup %13937  ;;  %13969 = vrcp.f32 %v19252_v60 }
 0x6ec   : > { %v13940_v34 = vpop.eup %13939  ;;  %v9128_v46 = vpop.xlane.xlu1 %9127  ;;  %13971 = vrcp.f32 %v19257_v30 }
 0x6ed   : > { %v13349_v2 = vpop.f32.mrb[44].mxu1  ;;  %v13942_v25 = vpop.eup %13941  ;;  %13973 = vrcp.f32 %v19269_v14 }
 0x6ee   : > { %v19317_v42 = vmul.f32 %v13938_v50, %v13349_v2  ;;  %v9579_v26 = vpop.f32.mrb[45].mxu1  ;;  %v13944_v20 = vpop.eup %13943  ;;  %13975 = vrcp.f32 %v19273_v10 }
 0x6ef   : > { %v19320_v58 = vmul.f32 %v13940_v34, %v9579_v26  ;;  %v13350_v4 = vpop.f32.mrb[46].mxu1  ;;  %v13946_v50 = vpop.eup %13945  ;;  %13977 = vrcp.f32 %v9155_v24 }
 0x6f0   : > { %v19327_v61 = vmul.f32 %v13942_v25, %v13350_v4  ;;  %v9582_v2 = vpop.f32.mrb[47].mxu1  ;;  %v13948_v34 = vpop.eup %13947  ;;  %13979 = vrcp.f32 %v9158_v7 }
 0x6f1   : > { %v19334_v47 = vmul.f32 %v13944_v20, %v9582_v2  ;;  %v13950_v4 = vpop.eup %13949  ;;  %v9167_v2 = vpop.xlane.xlu0 %9166  ;;  %13981 = vrcp.f32 %v9125_v49  ;;  %v19375_v49 = vmul.f32 %v19307_v32, %v19199_v17  ;;  %v21492_v17 = vcombine.high %v19109_v19, %v19276_v15 }
 0x6f2   : > { %v13952_v20 = vpop.eup %13951  ;;  %v9170_v60 = vpop.xlane.xlu1 %9169  ;;  %13983 = vrcp.f32 %v9128_v46 }
 0x6f3   : > { %v19347_v51 = vpop.eup %13953  ;;  %13985 = vrcp.f32 %v9167_v2  ;;  %v21498_v2 = vcombine.high %v19115_v5, %v19293_v43 }
 0x6f4   : > { %v19352_v40 = vpop.eup %13955  ;;  %13987 = vrcp.f32 %v9170_v60 }
 0x6f5   : > { %v13361_v31 = vpop.f32.mrb[72].mxu0  ;;  %v13958_v26 = vpop.eup %13957 }
 0x6f6   : > { %v19350_v56 = vmul.f32 %v13948_v34, %v13361_v31  ;;  %v9640_v25 = vpop.f32.mrb[73].mxu0  ;;  %v19359_v34 = vpop.eup %13959 }
 0x6f7   : > { %v9929_v33 = vmul.f32 %v13952_v20, %v9640_v25  ;;  %v13362_v27 = vpop.f32.mrb[74].mxu0  ;;  %v13962_v25 = vpop.eup %13961 }
 0x6f8   : > { %v10633_v30 = vcombine.low %v19157_v59, %v19350_v56  ;;  %v10634_v62 = vcombine.high %v19157_v59, %v19350_v56  ;;  %v9932_v1 = vmul.f32 %v13946_v50, %v13362_v27  ;;  %v9643_v14 = vpop.f32.mrb[75].mxu0  ;;  %v13964_v52 = vpop.eup %13963  ;;  %v21496_v50 = vcombine.high %v19113_v12, %v19286_v8 }
 0x6f9   : > { %v10497_v31 = vcombine.low %v19159_v41, %v9929_v33  ;;  %v10498_v10 = vcombine.high %v19159_v41, %v9929_v33  ;;  %v9930_v6 = vmul.f32 %v13950_v4, %v9643_v14  ;;  %v9173_v3 = vpop.xlane.xlu0 %9172  ;;  %v19367_v56 = vpop.eup %13965  ;;  %v9907_v41 = vmul.f32 %v19295_v45, %v19197_v55 }
 0x6fa   : > { %v10701_v24 = vcombine.low %v19161_v39, %v9932_v1  ;;  %v10702_v20 = vcombine.high %v19161_v39, %v9932_v1  ;;  %v19369_v7 = vpop.eup %13967  ;;  %v19379_v39 = vmul.f32 %v19302_v57, %v19202_v28  ;;  %v9176_v1 = vpop.xlane.xlu1 %9175  ;;  %13989 = vrcp.f32 %v9173_v3 }
 0x6fb   : > { %v10565_v59 = vcombine.low %v19163_v37, %v9930_v6  ;;  %v10566_v27 = vcombine.high %v19163_v37, %v9930_v6  ;;  %v19381_v46 = vpop.eup %13969  ;;  %v19385_v37 = vmul.f32 %v19312_v54, %v19205_v23  ;;  %v21490_v6 = vld [vmem:[#allocation28_spill] sm:$0xff]  ;;  %v21491_v55 = vcombine.low %v19109_v19, %v19276_v15 }
 0x6fc   : > { %v19397_v28 = vrot.slane %v21492_v17, %v21490_v6  ;;  %v19399_v57 = vpop.eup %13971  ;;  %v21493_v23 = vcombine.low %v19111_v44, %v19279_v48  ;;  %v21494_v3 = vcombine.high %v19111_v44, %v19279_v48  ;;  %v21495_v19 = vcombine.low %v19113_v12, %v19286_v8 }
 0x6fd   : > { %v19391_v45 = vrot.slane %v21491_v55, %v21490_v6  ;;  %v19423_v4 = vrot.slane %v21496_v50, %v21490_v6  ;;  %v19425_v33 = vpop.eup %13973  ;;  %13991 = vrcp.f32 %v9176_v1  ;;  %v21497_v44 = vcombine.low %v19115_v5, %v19293_v43 }
 0x6fe   : > { %v19405_v32 = vrot.slane %v21493_v23, %v21490_v6  ;;  %v19411_v54 = vrot.slane %v21494_v3, %v21490_v6  ;;  %v19417_v15 = vrot.slane %v21495_v19, %v21490_v6  ;;  %v19437_v60 = vrot.slane %v21498_v2, %v21490_v6  ;;  %v19445_v14 = vpop.eup %13975 }
 0x6ff   : > { %v19431_v48 = vrot.slane %v21497_v44, %v21490_v6  ;;  %v21499_v12 = vcombine.low %v19141_v36, %v19317_v42  ;;  %21500 = vst [vmem:[#allocation57_spill] sm:$0xff] %v19445_v14  ;;  %v21501_v1 = vcombine.high %v19141_v36, %v19317_v42  ;;  %v21502_v5 = vcombine.low %v19143_v21, %v19320_v58  ;;  %v19471_v36 = vpop.eup %13977 }
 0x700   : > { %v21503_v17 = vcombine.high %v19143_v21, %v19320_v58  ;;  %v21504_v3 = vcombine.low %v19147_v53, %v19327_v61  ;;  %v21505_v42 = vcombine.high %v19147_v53, %v19327_v61  ;;  %v21506_v21 = vcombine.low %v19151_v11, %v19334_v47 }
 0x701   : > { %v19443_v8 = vrot.slane %v21499_v12, %v21490_v6  ;;  %v19451_v55 = vrot.slane %v21501_v1, %v21490_v6  ;;  %v19457_v43 = vrot.slane %v21502_v5, %v21490_v6  ;;  %v21507_v44 = vcombine.high %v19151_v11, %v19334_v47  ;;  %v19494_v5 = vpop.eup %13979 }
 0x702   : > { %v19463_v23 = vrot.slane %v21503_v17, %v21490_v6  ;;  %v19469_v19 = vrot.slane %v21504_v3, %v21490_v6  ;;  %v19477_v50 = vrot.slane %v21505_v42, %v21490_v6  ;;  %v19483_v58 = vrot.slane %v21506_v21, %v21490_v6  ;;  %21508 = vst [vmem:[#allocation56_spill] sm:$0xff] %v19494_v5  ;;  %v13982_v11 = vpop.eup %13981 }
 0x703   : > { %v19489_v2 = vrot.slane %v21507_v44, %v21490_v6  ;;  %v19492_v12 = vrot.slane %v10633_v30, %v21490_v6  ;;  %v13377_v1 = vpop.f32.mrb[48].mxu1  ;;  %v19497_v53 = vrot.slane %v10634_v62, %v21490_v6  ;;  %v19500_v61 = vrot.slane %v10497_v31, %v21490_v6  ;;  %v19514_v5 = vpop.eup %13983 }
 0x704   : > { %v19503_v17 = vrot.slane %v10498_v10, %v21490_v6  ;;  %v9939_v3 = vmul.f32 %v13958_v26, %v13377_v1  ;;  %v9717_v42 = vpop.f32.mrb[49].mxu1  ;;  %v19506_v47 = vrot.slane %v10701_v24, %v21490_v6  ;;  %v19509_v30 = vrot.slane %v10702_v20, %v21490_v6 }
 0x705   : > { %21509 = vst [vmem:[#allocation68_spill] sm:$0xff] %v19497_v53  ;;  %21510 = vst [vmem:[#allocation49_spill] sm:$0xff] %v19500_v61  ;;  %v19512_v21 = vrot.slane %v10565_v59, %v21490_v6  ;;  %v9937_v62 = vmul.f32 %v13962_v25, %v9717_v42  ;;  %v13378_v44 = vpop.f32.mrb[50].mxu1  ;;  %v19517_v31 = vrot.slane %v10566_v27, %v21490_v6 }
 0x706   : > { %21511 = vst [vmem:[#allocation72_spill] sm:$0xff] %v19503_v17  ;;  %21512 = vst [vmem:[#allocation65_spill] sm:$0xff] %v19506_v47  ;;  %v10105_v10 = vcombine.low %v9907_v41, %v9939_v3  ;;  %v10106_v26 = vcombine.high %v9907_v41, %v9939_v3  ;;  %v9940_v1 = vmul.f32 %v19359_v34, %v13378_v44  ;;  %v13365_v17 = vpop.f32.mrb[76].mxu0  ;;  %v9720_v24 = vpop.f32.mrb[51].mxu1 }
 0x707   : > { %21513 = vst [vmem:[#allocation86_spill] sm:$0xff] %v19509_v30  ;;  %21514 = vst [vmem:[#allocation85_spill] sm:$0xff] %v19512_v21  ;;  %v19520_v47 = vpop.eup %13985  ;;  %v9969_v20 = vcombine.low %v19375_v49, %v9937_v62  ;;  %v9970_v59 = vcombine.high %v19375_v49, %v9937_v62  ;;  %v9935_v21 = vmul.f32 %v13982_v11, %v13365_v17  ;;  %v9656_v42 = vpop.f32.mrb[77].mxu0 }
 0x708   : > { %21515 = vst [vmem:[#allocation84_spill] sm:$0xff] %v19517_v31  ;;  %21516 = vst [vmem:[#allocation83_spill] sm:$0xff] %v19520_v47  ;;  %v19524_v25 = vmul.f32 %v13964_v52, %v9720_v24  ;;  %v19526_v30 = vpop.eup %13987  ;;  %v10113_v27 = vrot.slane %v10105_v10, %v21490_v6  ;;  %v10120_v41 = vrot.slane %v10106_v26, %v21490_v6  ;;  %v13366_v44 = vpop.f32.mrb[78].mxu0 }
 0x709   : > { %21517 = vst [vmem:[#allocation71_spill] sm:$0xff] %v19526_v30  ;;  %v10173_v34 = vcombine.low %v19379_v39, %v9940_v1  ;;  %v10174_v3 = vcombine.high %v19379_v39, %v9940_v1  ;;  %v19532_v47 = vpop.eup %13989  ;;  %v9977_v31 = vrot.slane %v9969_v20, %v21490_v6  ;;  %v9984_v49 = vrot.slane %v9970_v59, %v21490_v6  ;;  %v19538_v11 = vpop.f32.mrb[79].mxu0 }
 0x70a   : > { %21518 = vst [vmem:[#allocation82_spill] sm:$0xff] %v19532_v47  ;;  %v10905_v52 = vcombine.low %v19181_v38, %v9935_v21  ;;  %v10906_v17 = vcombine.high %v19181_v38, %v9935_v21  ;;  %v10121_v62 = vcombine.low %v19391_v45, %v10113_v27  ;;  %v10122_v10 = vcombine.high %v19391_v45, %v10113_v27  ;;  %v19544_v1 = vpop.eup %13991 }
 0x70b   : > { %v10137_v26 = vcombine.low %v19397_v28, %v10120_v41  ;;  %v10138_v39 = vcombine.high %v19397_v28, %v10120_v41  ;;  %21519 = vst [vmem:[#allocation104_spill] sm:$0xff] %v19544_v1  ;;  %v9985_v24 = vcombine.low %v19405_v32, %v9977_v31  ;;  %v9986_v20 = vcombine.high %v19405_v32, %v9977_v31 }
 0x70c   : > { %v10001_v59 = vcombine.low %v19411_v54, %v9984_v49  ;;  %v10002_v38 = vcombine.high %v19411_v54, %v9984_v49  ;;  %v10129_v21 = vrot.slane %v10121_v62, %v14913_v35  ;;  %v10136_v30 = vrot.slane %v10122_v10, %v14913_v35 }
 0x70d   : > { %v10145_v45 = vrot.slane %v10137_v26, %v14913_v35  ;;  %v10152_v27 = vrot.slane %v10138_v39, %v14913_v35  ;;  %v9993_v28 = vrot.slane %v9985_v24, %v14913_v35  ;;  %v10000_v41 = vrot.slane %v9986_v20, %v14913_v35 }
 0x70e   : > { %v10009_v1 = vrot.slane %v10001_v59, %v14913_v35  ;;  %v10016_v32 = vrot.slane %v10002_v38, %v14913_v35  ;;  %v11177_v31 = vcombine.low %v10129_v21, %v10136_v30  ;;  %v12930_v47 = vcombine.high %v10129_v21, %v10136_v30 }
 0x70f   : > { %v11193_v61 = vcombine.low %v10145_v45, %v10152_v27  ;;  %v12931_v54 = vcombine.high %v10145_v45, %v10152_v27  ;;  %v11041_v49 = vcombine.low %v9993_v28, %v10000_v41  ;;  %v12926_v62 = vcombine.high %v9993_v28, %v10000_v41 }
 0x710   : > { %v11057_v14 = vcombine.low %v10009_v1, %v10016_v32  ;;  %v12927_v10 = vcombine.high %v10009_v1, %v10016_v32  ;;  %v19561_v26 = vrot.slane %v11177_v31, %v21490_v6  ;;  %v19564_v39 = vrot.slane %v12930_v47, %v21490_v6 }
 0x711   : > { %v19567_v24 = vrot.slane %v11193_v61, %v21490_v6  ;;  %v19570_v20 = vrot.slane %v12931_v54, %v21490_v6  ;;  %v19573_v59 = vrot.slane %v11041_v49, %v21490_v6  ;;  %v19576_v1 = vrot.slane %v12926_v62, %v21490_v6 }
 0x712   : > { %v19579_v38 = vrot.slane %v11057_v14, %v21490_v6  ;;  %v19582_v21 = vrot.slane %v12927_v10, %v21490_v6  ;;  %v10181_v61 = vrot.slane %v10173_v34, %v21490_v6  ;;  %v10188_v45 = vrot.slane %v10174_v3, %v21490_v6 }
 0x713   : > { %v19558_v53 = vpop.f32.mrb[52].mxu1  ;;  %v19587_v27 = vrot.slane %v10905_v52, %v21490_v6  ;;  %v19590_v28 = vrot.slane %v10906_v17, %v21490_v6  ;;  %v10037_v32 = vcombine.low %v19385_v37, %v19524_v25  ;;  %v10038_v14 = vcombine.high %v19385_v37, %v19524_v25 }
 0x714   : > { %v9733_v30 = vpop.f32.mrb[53].mxu1  ;;  %v9933_v31 = vmul.f32 %v19352_v40, %v9656_v42  ;;  %v9936_v54 = vmul.f32 %v19514_v5, %v13366_v44  ;;  %v10189_v34 = vcombine.low %v19417_v15, %v10181_v61  ;;  %v10190_v3 = vcombine.high %v19417_v15, %v10181_v61 }
 0x715   : > { %v13382_v47 = vpop.f32.mrb[54].mxu1  ;;  %v10205_v52 = vcombine.low %v19423_v4, %v10188_v45  ;;  %v10206_v17 = vcombine.high %v19423_v4, %v10188_v45  ;;  %v10045_v49 = vrot.slane %v10037_v32, %v21490_v6  ;;  %v10052_v62 = vrot.slane %v10038_v14, %v21490_v6 }
 0x716   : > { %v9736_v41 = vpop.f32.mrb[55].mxu1  ;;  %v10769_v10 = vcombine.low %v19183_v63, %v9933_v31  ;;  %v10770_v37 = vcombine.high %v19183_v63, %v9933_v31  ;;  %v10197_v40 = vrot.slane %v10189_v34, %v14913_v35  ;;  %v10204_v5 = vrot.slane %v10190_v3, %v14913_v35 }
 0x717   : > { %v10213_v25 = vrot.slane %v10205_v52, %v14913_v35  ;;  %v10220_v15 = vrot.slane %v10206_v17, %v14913_v35  ;;  %v10053_v42 = vcombine.low %v19431_v48, %v10045_v49  ;;  %v10054_v4 = vcombine.high %v19431_v48, %v10045_v49 }
 0x718   : > { %v10069_v44 = vcombine.low %v19437_v60, %v10052_v62  ;;  %v10070_v61 = vcombine.high %v19437_v60, %v10052_v62  ;;  %v11245_v45 = vcombine.low %v10197_v40, %v10204_v5  ;;  %v12932_v32 = vcombine.high %v10197_v40, %v10204_v5 }
 0x719   : > { %v11261_v14 = vcombine.low %v10213_v25, %v10220_v15  ;;  %v12933_v63 = vcombine.high %v10213_v25, %v10220_v15  ;;  %v10061_v31 = vrot.slane %v10053_v42, %v14913_v35  ;;  %v10068_v34 = vrot.slane %v10054_v4, %v14913_v35 }
 0x71a   : > { %v10077_v3 = vrot.slane %v10069_v44, %v14913_v35  ;;  %v10084_v52 = vrot.slane %v10070_v61, %v14913_v35  ;;  %v19619_v17 = vrot.slane %v11245_v45, %v21490_v6  ;;  %v19622_v48 = vrot.slane %v12932_v32, %v21490_v6 }
 0x71b   : > { %v19625_v60 = vrot.slane %v11261_v14, %v21490_v6  ;;  %v19628_v49 = vrot.slane %v12933_v63, %v21490_v6  ;;  %v11109_v62 = vcombine.low %v10061_v31, %v10068_v34  ;;  %v12928_v40 = vcombine.high %v10061_v31, %v10068_v34 }
 0x71c   : > { %v11125_v5 = vcombine.low %v10077_v3, %v10084_v52  ;;  %v12929_v25 = vcombine.high %v10077_v3, %v10084_v52  ;;  %v19631_v15 = vrot.slane %v10769_v10, %v21490_v6  ;;  %v19634_v42 = vrot.slane %v10770_v37, %v21490_v6 }
 0x71d   : > { %v10973_v4 = vcombine.low %v19187_v29, %v9936_v54  ;;  %v10974_v44 = vcombine.high %v19187_v29, %v9936_v54  ;;  %v19639_v61 = vrot.slane %v11109_v62, %v21490_v6  ;;  %v19642_v45 = vrot.slane %v12928_v40, %v21490_v6 }
 0x71e   : > { %v19645_v32 = vrot.slane %v11125_v5, %v21490_v6  ;;  %v19648_v14 = vrot.slane %v12929_v25, %v21490_v6  ;;  %v9934_v29 = vmul.f32 %v19347_v51, %v19538_v11  ;;  %v9943_v54 = vmul.f32 %v19367_v56, %v19558_v53 }
 0x71f   : > { %v19651_v10 = vrot.slane %v10973_v4, %v21490_v6  ;;  %v19654_v37 = vrot.slane %v10974_v44, %v21490_v6  ;;  %v9941_v63 = vmul.f32 %v19381_v46, %v9733_v30  ;;  %v9944_v31 = vmul.f32 %v19369_v7, %v13382_v47 }
 0x720   : > { %v19663_v34 = vmul.f32 %v19399_v57, %v9736_v41  ;;  %v10837_v52 = vcombine.low %v19191_v22, %v9934_v29  ;;  %v10838_v62 = vcombine.high %v19191_v22, %v9934_v29  ;;  %v10377_v40 = vcombine.low %v19221_v16, %v9943_v54 }
 0x721   : > { %v10378_v51 = vcombine.high %v19221_v16, %v9943_v54  ;;  %v10241_v56 = vcombine.low %v19223_v13, %v9941_v63  ;;  %v10242_v46 = vcombine.high %v19223_v13, %v9941_v63  ;;  %v10445_v7 = vcombine.low %v19225_v9, %v9944_v31 }
 0x722   : > { %v10446_v57 = vcombine.high %v19225_v9, %v9944_v31  ;;  %v19676_v53 = vrot.slane %v10837_v52, %v21490_v6  ;;  %v19679_v11 = vrot.slane %v10838_v62, %v21490_v6  ;;  %v10385_v22 = vrot.slane %v10377_v40, %v21490_v6 }
 0x723   : > { %v10392_v30 = vrot.slane %v10378_v51, %v21490_v6  ;;  %v10249_v16 = vrot.slane %v10241_v56, %v21490_v6  ;;  %v10256_v47 = vrot.slane %v10242_v46, %v21490_v6  ;;  %v10453_v13 = vrot.slane %v10445_v7, %v21490_v6 }
 0x724   : > { %v10460_v41 = vrot.slane %v10446_v57, %v21490_v6  ;;  %v10393_v9 = vcombine.low %v19443_v8, %v10385_v22  ;;  %v10394_v5 = vcombine.high %v19443_v8, %v10385_v22  ;;  %v13393_v44 = vpop.f32.mrb[80].mxu0 }
 0x725   : > { %v10409_v25 = vcombine.low %v19451_v55, %v10392_v30  ;;  %v10410_v4 = vcombine.high %v19451_v55, %v10392_v30  ;;  %v10257_v29 = vcombine.low %v19457_v43, %v10249_v16  ;;  %v10258_v54 = vcombine.high %v19457_v43, %v10249_v16  ;;  %v9794_v52 = vpop.f32.mrb[81].mxu0 }
 0x726   : > { %v10273_v63 = vcombine.low %v19463_v23, %v10256_v47  ;;  %v10274_v31 = vcombine.high %v19463_v23, %v10256_v47  ;;  %v10401_v62 = vrot.slane %v10393_v9, %v14913_v35  ;;  %v10408_v40 = vrot.slane %v10394_v5, %v14913_v35  ;;  %v19699_v56 = vpop.f32.mrb[82].mxu0 }
 0x727   : > { %v10417_v8 = vrot.slane %v10409_v25, %v14913_v35  ;;  %v10424_v51 = vrot.slane %v10410_v4, %v14913_v35  ;;  %v10265_v55 = vrot.slane %v10257_v29, %v14913_v35  ;;  %v10272_v46 = vrot.slane %v10258_v54, %v14913_v35  ;;  %v19705_v23 = vpop.f32.mrb[83].mxu0 }
 0x728   : > { %v10281_v43 = vrot.slane %v10273_v63, %v14913_v35  ;;  %v10288_v7 = vrot.slane %v10274_v31, %v14913_v35  ;;  %v11449_v57 = vcombine.low %v10401_v62, %v10408_v40  ;;  %v12938_v22 = vcombine.high %v10401_v62, %v10408_v40 }
 0x729   : > { %v11465_v30 = vcombine.low %v10417_v8, %v10424_v51  ;;  %v12939_v16 = vcombine.high %v10417_v8, %v10424_v51  ;;  %v11313_v47 = vcombine.low %v10265_v55, %v10272_v46  ;;  %v12934_v9 = vcombine.high %v10265_v55, %v10272_v46 }
 0x72a   : > { %v11329_v5 = vcombine.low %v10281_v43, %v10288_v7  ;;  %v12935_v25 = vcombine.high %v10281_v43, %v10288_v7  ;;  %v19708_v4 = vrot.slane %v11449_v57, %v21490_v6  ;;  %v19711_v29 = vrot.slane %v12938_v22, %v21490_v6 }
 0x72b   : > { %v19714_v54 = vrot.slane %v11465_v30, %v21490_v6  ;;  %v19717_v63 = vrot.slane %v12939_v16, %v21490_v6  ;;  %v19720_v31 = vrot.slane %v11313_v47, %v21490_v6  ;;  %v19723_v62 = vrot.slane %v12934_v9, %v21490_v6 }
 0x72c   : > { %v19726_v40 = vrot.slane %v11329_v5, %v21490_v6  ;;  %v19729_v8 = vrot.slane %v12935_v25, %v21490_v6  ;;  %v10461_v51 = vcombine.low %v19469_v19, %v10453_v13  ;;  %v10462_v55 = vcombine.high %v19469_v19, %v10453_v13  ;;  %v19735_v7 = vpop.f32.mrb[84].mxu0 }
 0x72d   : > { %21520 = vst [vmem:[#allocation79_spill] sm:$0xff] %v19714_v54  ;;  %v10477_v46 = vcombine.low %v19477_v50, %v10460_v41  ;;  %v10478_v43 = vcombine.high %v19477_v50, %v10460_v41  ;;  %v10309_v57 = vcombine.low %v19227_v0, %v19663_v34  ;;  %v10310_v22 = vcombine.high %v19227_v0, %v19663_v34  ;;  %v19743_v47 = vpop.f32.mrb[85].mxu0  ;;  %v21530_v54 = vld [vmem:[#allocation72_spill] sm:$0xff] }
 0x72e   : > { %v9947_v30 = vmul.f32 %v19425_v33, %v13393_v44  ;;  %v9945_v16 = vmul.f32 %v19471_v36, %v9794_v52  ;;  %v10469_v19 = vrot.slane %v10461_v51, %v14913_v35  ;;  %v10476_v13 = vrot.slane %v10462_v55, %v14913_v35  ;;  %v19749_v9 = vpop.f32.mrb[86].mxu0 }
 0x72f   : > { %v10485_v50 = vrot.slane %v10477_v46, %v14913_v35  ;;  %v10492_v41 = vrot.slane %v10478_v43, %v14913_v35  ;;  %v10317_v5 = vrot.slane %v10309_v57, %v21490_v6  ;;  %v10324_v0 = vrot.slane %v10310_v22, %v21490_v6  ;;  %v19755_v34 = vpop.f32.mrb[87].mxu0 }
 0x730   : > { %v10649_v33 = vcombine.low %v19237_v18, %v9947_v30  ;;  %v10650_v36 = vcombine.high %v19237_v18, %v9947_v30  ;;  %v11517_v44 = vcombine.low %v10469_v19, %v10476_v13  ;;  %v12940_v52 = vcombine.high %v10469_v19, %v10476_v13 }
 0x731   : > { %v11533_v25 = vcombine.low %v10485_v50, %v10492_v41  ;;  %v12941_v51 = vcombine.high %v10485_v50, %v10492_v41  ;;  %v10325_v55 = vcombine.low %v19483_v58, %v10317_v5  ;;  %v10326_v46 = vcombine.high %v19483_v58, %v10317_v5  ;;  %v21525_v5 = vld [vmem:[#allocation74_spill] sm:$0xff] }
 0x732   : > { %v10341_v43 = vcombine.low %v19489_v2, %v10324_v0  ;;  %v10342_v57 = vcombine.high %v19489_v2, %v10324_v0  ;;  %v19762_v22 = vrot.slane %v11517_v44, %v21490_v6  ;;  %v19765_v3 = vrot.slane %v12940_v52, %v21490_v6 }
 0x733   : > { %v19768_v18 = vrot.slane %v11533_v25, %v21490_v6  ;;  %v19771_v30 = vrot.slane %v12941_v51, %v21490_v6  ;;  %v10333_v19 = vrot.slane %v10325_v55, %v14913_v35  ;;  %v10340_v58 = vrot.slane %v10326_v46, %v14913_v35 }
 0x734   : > { %21521 = vst [vmem:[#allocation102_spill] sm:$0xff] %v19762_v22  ;;  %21522 = vst [vmem:[#allocation109_spill] sm:$0xff] %v19765_v3  ;;  %v10349_v13 = vrot.slane %v10341_v43, %v14913_v35  ;;  %v10356_v2 = vrot.slane %v10342_v57, %v14913_v35  ;;  %v10657_v50 = vrot.slane %v10649_v33, %v21490_v6  ;;  %v21529_v3 = vld [vmem:[#allocation49_spill] sm:$0xff] }
 0x735   : > { %21523 = vst [vmem:[#allocation122_spill] sm:$0xff] %v19768_v18  ;;  %21524 = vst [vmem:[#allocation124_spill] sm:$0xff] %v19771_v30  ;;  %v10664_v41 = vrot.slane %v10650_v36, %v21490_v6  ;;  %v10513_v0 = vcombine.low %v21525_v5, %v9945_v16  ;;  %v10514_v44 = vcombine.high %v21525_v5, %v9945_v16  ;;  %v21526_v30 = vld [vmem:[#allocation68_spill] sm:$0xff] }
 0x736   : > { %v11381_v52 = vcombine.low %v10333_v19, %v10340_v58  ;;  %v12936_v25 = vcombine.high %v10333_v19, %v10340_v58  ;;  %v11397_v51 = vcombine.low %v10349_v13, %v10356_v2  ;;  %v12937_v18 = vcombine.high %v10349_v13, %v10356_v2 }
 0x737   : > { %v10665_v55 = vcombine.low %v19492_v12, %v10657_v50  ;;  %v10666_v46 = vcombine.high %v19492_v12, %v10657_v50  ;;  %v10681_v43 = vcombine.low %v21526_v30, %v10664_v41  ;;  %v10682_v57 = vcombine.high %v21526_v30, %v10664_v41  ;;  %v21527_v41 = vld [vmem:[#allocation57_spill] sm:$0xff] }
 0x738   : > { %v19786_v33 = vrot.slane %v11381_v52, %v21490_v6  ;;  %v19789_v36 = vrot.slane %v12936_v25, %v21490_v6  ;;  %v19792_v16 = vrot.slane %v11397_v51, %v21490_v6  ;;  %v19795_v19 = vrot.slane %v12937_v18, %v21490_v6  ;;  %v21528_v52 = vld [vmem:[#allocation56_spill] sm:$0xff] }
 0x739   : > { %v10673_v58 = vrot.slane %v10665_v55, %v14913_v35  ;;  %v10680_v12 = vrot.slane %v10666_v46, %v14913_v35  ;;  %v10689_v13 = vrot.slane %v10681_v43, %v14913_v35  ;;  %v10696_v30 = vrot.slane %v10682_v57, %v14913_v35 }
 0x73a   : > { %v10521_v2 = vrot.slane %v10513_v0, %v21490_v6  ;;  %v10528_v50 = vrot.slane %v10514_v44, %v21490_v6  ;;  %v9948_v5 = vmul.f32 %v21527_v41, %v19699_v56  ;;  %v9946_v25 = vmul.f32 %v21528_v52, %v19705_v23  ;;  %v21536_v41 = vld [vmem:[#allocation73_spill] sm:$0xff] }
 0x73b   : > { %v11721_v18 = vcombine.low %v10673_v58, %v10680_v12  ;;  %v12946_v51 = vcombine.high %v10673_v58, %v10680_v12  ;;  %v11737_v22 = vcombine.low %v10689_v13, %v10696_v30  ;;  %v12947_v55 = vcombine.high %v10689_v13, %v10696_v30  ;;  %v21535_v30 = vld [vmem:[#allocation103_spill] sm:$0xff] }
 0x73c   : > { %v10529_v46 = vcombine.low %v21529_v3, %v10521_v2  ;;  %v10530_v43 = vcombine.high %v21529_v3, %v10521_v2  ;;  %v10545_v57 = vcombine.low %v21530_v54, %v10528_v50  ;;  %v10546_v0 = vcombine.high %v21530_v54, %v10528_v50 }
 0x73d   : > { %v19812_v44 = vrot.slane %v11721_v18, %v21490_v6  ;;  %v19815_v56 = vrot.slane %v12946_v51, %v21490_v6  ;;  %v19818_v23 = vrot.slane %v11737_v22, %v21490_v6  ;;  %v19821_v58 = vrot.slane %v12947_v55, %v21490_v6 }
 0x73e   : > { %v10537_v12 = vrot.slane %v10529_v46, %v14913_v35  ;;  %v10544_v3 = vrot.slane %v10530_v43, %v14913_v35  ;;  %v10553_v13 = vrot.slane %v10545_v57, %v14913_v35  ;;  %v10560_v54 = vrot.slane %v10546_v0, %v14913_v35 }
 0x73f   : > { %21531 = vst [vmem:[#allocation24_spill] sm:$0xff] %v19812_v44  ;;  %21532 = vst [vmem:[#allocation125_spill] sm:$0xff] %v19815_v56  ;;  %v10717_v2 = vcombine.low %v21535_v30, %v9948_v5  ;;  %v10718_v50 = vcombine.high %v21535_v30, %v9948_v5  ;;  %v10581_v52 = vcombine.low %v21536_v41, %v9946_v25  ;;  %v21541_v30 = vld [vmem:[#allocation86_spill] sm:$0xff] }
 0x740   : > { %21533 = vst [vmem:[#allocation26_spill] sm:$0xff] %v19818_v23  ;;  %21534 = vst [vmem:[#allocation107_spill] sm:$0xff] %v19821_v58  ;;  %v10582_v22 = vcombine.high %v21536_v41, %v9946_v25  ;;  %v11585_v18 = vcombine.low %v10537_v12, %v10544_v3  ;;  %v12942_v51 = vcombine.high %v10537_v12, %v10544_v3  ;;  %v21540_v3 = vld [vmem:[#allocation65_spill] sm:$0xff] }
 0x741   : > { %v11601_v55 = vcombine.low %v10553_v13, %v10560_v54  ;;  %v12943_v23 = vcombine.high %v10553_v13, %v10560_v54  ;;  %v10725_v46 = vrot.slane %v10717_v2, %v21490_v6  ;;  %v10732_v43 = vrot.slane %v10718_v50, %v21490_v6  ;;  %v21542_v41 = vld [vmem:[#allocation85_spill] sm:$0xff] }
 0x742   : > { %v10589_v57 = vrot.slane %v10581_v52, %v21490_v6  ;;  %v10596_v0 = vrot.slane %v10582_v22, %v21490_v6  ;;  %v19836_v58 = vrot.slane %v11585_v18, %v21490_v6  ;;  %v19839_v5 = vrot.slane %v12942_v51, %v21490_v6  ;;  %v21543_v18 = vld [vmem:[#allocation84_spill] sm:$0xff] }
 0x743   : > { %v19842_v25 = vrot.slane %v11601_v55, %v21490_v6  ;;  %v19845_v12 = vrot.slane %v12943_v23, %v21490_v6  ;;  %v10733_v13 = vcombine.low %v21540_v3, %v10725_v46  ;;  %v10734_v54 = vcombine.high %v21540_v3, %v10725_v46 }
 0x744   : > { %21537 = vst [vmem:[#allocation123_spill] sm:$0xff] %v19836_v58  ;;  %v10749_v2 = vcombine.low %v21541_v30, %v10732_v43  ;;  %v10750_v50 = vcombine.high %v21541_v30, %v10732_v43  ;;  %v10597_v52 = vcombine.low %v21542_v41, %v10589_v57  ;;  %v10598_v22 = vcombine.high %v21542_v41, %v10589_v57 }
 0x745   : > { %21538 = vst [vmem:[#allocation52_spill] sm:$0xff] %v19842_v25  ;;  %21539 = vst [vmem:[#allocation27_spill] sm:$0xff] %v19845_v12  ;;  %v10613_v51 = vcombine.low %v21543_v18, %v10596_v0  ;;  %v10614_v55 = vcombine.high %v21543_v18, %v10596_v0  ;;  %v10741_v44 = vrot.slane %v10733_v13, %v14913_v35 }
 0x746   : > { %v10748_v23 = vrot.slane %v10734_v54, %v14913_v35  ;;  %v10757_v56 = vrot.slane %v10749_v2, %v14913_v35  ;;  %v10764_v46 = vrot.slane %v10750_v50, %v14913_v35  ;;  %v10605_v3 = vrot.slane %v10597_v52, %v14913_v35 }
 0x747   : > { %v10612_v43 = vrot.slane %v10598_v22, %v14913_v35  ;;  %v10621_v30 = vrot.slane %v10613_v51, %v14913_v35  ;;  %v10628_v57 = vrot.slane %v10614_v55, %v14913_v35 }
 0x748   : > { %v11789_v41 = vcombine.low %v10741_v44, %v10748_v23  ;;  %v12948_v25 = vcombine.high %v10741_v44, %v10748_v23  ;;  %v11805_v12 = vcombine.low %v10757_v56, %v10764_v46  ;;  %v12949_v0 = vcombine.high %v10757_v56, %v10764_v46 }
 0x749   : > { %v11653_v18 = vcombine.low %v10605_v3, %v10612_v43  ;;  %v12944_v13 = vcombine.high %v10605_v3, %v10612_v43  ;;  %v11669_v58 = vcombine.low %v10621_v30, %v10628_v57  ;;  %v12945_v54 = vcombine.high %v10621_v30, %v10628_v57 }
 0x74a   : > { %v19864_v2 = vrot.slane %v11789_v41, %v21490_v6  ;;  %v19867_v50 = vrot.slane %v12948_v25, %v21490_v6  ;;  %v19870_v52 = vrot.slane %v11805_v12, %v21490_v6  ;;  %v19873_v22 = vrot.slane %v12949_v0, %v21490_v6 }
 0x74b   : > { %v19876_v44 = vrot.slane %v11653_v18, %v21490_v6  ;;  %v19879_v56 = vrot.slane %v12944_v13, %v21490_v6  ;;  %v19882_v51 = vrot.slane %v11669_v58, %v21490_v6  ;;  %v19885_v55 = vrot.slane %v12945_v54, %v21490_v6  ;;  %v21554_v13 = vld [vmem:[#allocation82_spill] sm:$0xff] }
 0x74c   : > { %21544 = vst [vmem:[#allocation98_spill] sm:$0xff] %v19864_v2  ;;  %21545 = vst [vmem:[#allocation99_spill] sm:$0xff] %v19867_v50  ;;  %v21549_v25 = vcombine.low %v19561_v26, %v19564_v39  ;;  %v11225_v23 = vcombine.low %v19567_v24, %v19570_v20  ;;  %v11277_v46 = vcombine.low %v19619_v17, %v19622_v48  ;;  %v21559_v2 = vld [vmem:[#allocation81_spill] sm:$0xff]  ;;  %v21561_v50 = vld [vmem:[#allocation104_spill] sm:$0xff] }
 0x74d   : > { %21546 = vst [vmem:[#allocation100_spill] sm:$0xff] %v19870_v52  ;;  %21547 = vst [vmem:[#allocation118_spill] sm:$0xff] %v19873_v22  ;;  %v11293_v3 = vcombine.low %v19625_v60, %v19628_v49  ;;  %v11073_v58 = vcombine.low %v19573_v59, %v19576_v1  ;;  %v11089_v43 = vcombine.low %v19579_v38, %v19582_v21 }
 0x74e   : > { %21548 = vst [vmem:[#allocation119_spill] sm:$0xff] %v19882_v51  ;;  %v19891_v12 = vrot.slane %v21549_v25, %v14913_v35  ;;  %v11141_v30 = vcombine.low %v19639_v61, %v19642_v45  ;;  %v11157_v57 = vcombine.low %v19645_v32, %v19648_v14  ;;  %v19908_v41 = vrot.slane %v11225_v23, %v14913_v35 }
 0x74f   : > { %v19911_v0 = vrot.slane %v11277_v46, %v14913_v35  ;;  %v19914_v18 = vrot.slane %v11293_v3, %v14913_v35  ;;  %v9951_v54 = vmul.f32 %v21554_v13, %v19735_v7  ;;  %v19919_v25 = vrot.slane %v11073_v58, %v14913_v35  ;;  %v21560_v13 = vld [vmem:[#allocation83_spill] sm:$0xff] }
 0x750   : > { %21550 = vst [vmem:[#allocation44_spill] sm:$0xff] %v19891_v12  ;;  %21551 = vst [vmem:[#allocation97_spill] sm:$0xff] %v19908_v41  ;;  %v19922_v52 = vrot.slane %v11089_v43, %v14913_v35  ;;  %v19925_v22 = vrot.slane %v11141_v30, %v14913_v35  ;;  %v19928_v23 = vrot.slane %v11157_v57, %v14913_v35 }
 0x751   : > { %21552 = vst [vmem:[#allocation108_spill] sm:$0xff] %v19911_v0  ;;  %21553 = vst [vmem:[#allocation110_spill] sm:$0xff] %v19914_v18  ;;  %v11242_v46 = vcombine.high %v19891_v12, %v19908_v41  ;;  %v11310_v3 = vcombine.high %v19911_v0, %v19914_v18  ;;  %v10921_v7 = vcombine.low %v21559_v2, %v9951_v54  ;;  %v21562_v18 = vld [vmem:[#allocation80_spill] sm:$0xff] }
 0x752   : > { %21555 = vst [vmem:[#allocation111_spill] sm:$0xff] %v19919_v25  ;;  %21556 = vst [vmem:[#allocation113_spill] sm:$0xff] %v19922_v52  ;;  %v10922_v58 = vcombine.high %v21559_v2, %v9951_v54  ;;  %v11106_v43 = vcombine.high %v19919_v25, %v19922_v52  ;;  %v11174_v30 = vcombine.high %v19925_v22, %v19928_v23 }
 0x753   : > { %21557 = vst [vmem:[#allocation112_spill] sm:$0xff] %v19925_v22  ;;  %21558 = vst [vmem:[#allocation87_spill] sm:$0xff] %v19928_v23  ;;  %v9949_v57 = vmul.f32 %v21560_v13, %v19743_v47  ;;  %v9952_v51 = vmul.f32 %v21561_v50, %v19749_v9  ;;  %v13581_v12 = vpack.i.bf16 %v11310_v3, %v11242_v46  ;;  %v21563_v22 = vld [vmem:[#allocation55_spill] sm:$0xff] }
 0x754   : > { %v10929_v41 = vrot.slane %v10921_v7, %v21490_v6  ;;  %v10936_v0 = vrot.slane %v10922_v58, %v21490_v6  ;;  %v11210_v2 = vcombine.high %v19561_v26, %v19564_v39  ;;  %v13596_v54 = vpack.i.bf16 %v11174_v30, %v11106_v43 }
 0x755   : > { %v10785_v25 = vcombine.low %v21562_v18, %v9949_v57  ;;  %v10786_v52 = vcombine.high %v21562_v18, %v9949_v57  ;;  %v10989_v23 = vcombine.low %v21563_v22, %v9952_v51  ;;  %13582 = vrot.lane.b32.xlu1 %v13581_v12, %s14238_s8  ;;  %v10990_v18 = vcombine.high %v21563_v22, %v9952_v51 }
 0x756   : > { %v10937_v47 = vcombine.low %v19587_v27, %v10929_v41  ;;  %v10938_v9 = vcombine.high %v19587_v27, %v10929_v41  ;;  %v10953_v50 = vcombine.low %v19590_v28, %v10936_v0  ;;  %v10954_v46 = vcombine.high %v19590_v28, %v10936_v0  ;;  %13597 = vrot.lane.b32.xlu0 %v13596_v54, %s14238_s8 }
 0x757   : > { %v10793_v26 = vrot.slane %v10785_v25, %v21490_v6  ;;  %v10800_v39 = vrot.slane %v10786_v52, %v21490_v6  ;;  %v10997_v3 = vrot.slane %v10989_v23, %v21490_v6 }
 0x758   : > { %v10945_v12 = vrot.slane %v10937_v47, %v14913_v35  ;;  %v10952_v7 = vrot.slane %v10938_v9, %v14913_v35  ;;  %v10961_v27 = vrot.slane %v10953_v50, %v14913_v35  ;;  %v10968_v41 = vrot.slane %v10954_v46, %v14913_v35 }
 0x759   : > { %v10801_v28 = vcombine.low %v19631_v15, %v10793_v26  ;;  %v10802_v0 = vcombine.high %v19631_v15, %v10793_v26  ;;  %v10817_v25 = vcombine.low %v19634_v42, %v10800_v39  ;;  %v10818_v52 = vcombine.high %v19634_v42, %v10800_v39 }
 0x75a   : > { %v11993_v58 = vcombine.low %v10945_v12, %v10952_v7  ;;  %v12954_v22 = vcombine.high %v10945_v12, %v10952_v7  ;;  %v12009_v51 = vcombine.low %v10961_v27, %v10968_v41  ;;  %v12955_v23 = vcombine.high %v10961_v27, %v10968_v41 }
 0x75b   : > { %v10809_v43 = vrot.slane %v10801_v28, %v14913_v35  ;;  %v10816_v30 = vrot.slane %v10802_v0, %v14913_v35  ;;  %v10825_v13 = vrot.slane %v10817_v25, %v14913_v35  ;;  %v10832_v57 = vrot.slane %v10818_v52, %v14913_v35 }
 0x75c   : > { %v19974_v54 = vrot.slane %v11993_v58, %v21490_v6  ;;  %v19977_v15 = vrot.slane %v12954_v22, %v21490_v6  ;;  %v19980_v42 = vrot.slane %v12009_v51, %v21490_v6  ;;  %v19983_v47 = vrot.slane %v12955_v23, %v21490_v6  ;;  %v21564_v51 = vld [vmem:[#allocation71_spill] sm:$0xff] }
 0x75d   : > { %v11857_v9 = vcombine.low %v10809_v43, %v10816_v30  ;;  %v12950_v50 = vcombine.high %v10809_v43, %v10816_v30  ;;  %v11873_v46 = vcombine.low %v10825_v13, %v10832_v57  ;;  %v12951_v26 = vcombine.high %v10825_v13, %v10832_v57 }
 0x75e   : > { %v11004_v39 = vrot.slane %v10990_v18, %v21490_v6  ;;  %v11005_v12 = vcombine.low %v19651_v10, %v10997_v3  ;;  %v11006_v7 = vcombine.high %v19651_v10, %v10997_v3  ;;  %v19989_v27 = vrot.slane %v11210_v2, %v14913_v35 }
 0x75f   : > { %v19992_v41 = vrot.slane %v11857_v9, %v21490_v6  ;;  %v19995_v28 = vrot.slane %v12950_v50, %v21490_v6  ;;  %v19998_v0 = vrot.slane %v11873_v46, %v21490_v6  ;;  %v20001_v25 = vrot.slane %v12951_v26, %v21490_v6 }
 0x760   : > { %v11013_v18 = vrot.slane %v11005_v12, %v14913_v35  ;;  %v11020_v52 = vrot.slane %v11006_v7, %v14913_v35  ;;  %v11021_v10 = vcombine.low %v19654_v37, %v11004_v39  ;;  %v11022_v2 = vcombine.high %v19654_v37, %v11004_v39 }
 0x761   : > { %v11226_v3 = vcombine.high %v19567_v24, %v19570_v20  ;;  %v11278_v58 = vcombine.high %v19619_v17, %v19622_v48  ;;  %v11294_v22 = vcombine.high %v19625_v60, %v19628_v49  ;;  %v9950_v23 = vmul.f32 %v21564_v51, %v19755_v34  ;;  %v21565_v20 = vld [vmem:[#allocation54_spill] sm:$0xff] }
 0x762   : > { %v11029_v43 = vrot.slane %v11021_v10, %v14913_v35  ;;  %v11036_v30 = vrot.slane %v11022_v2, %v14913_v35  ;;  %v12061_v13 = vcombine.low %v11013_v18, %v11020_v52  ;;  %v12956_v57 = vcombine.high %v11013_v18, %v11020_v52  ;;  %v13703_v10 = vld [vmem:[#allocation7] sm:$0xff]  }
 0x763   : > { %v11240_v37 = vrot.slane %v11226_v3, %v14913_v35  ;;  %v11292_v9 = vrot.slane %v11278_v58, %v14913_v35  ;;  %v11308_v24 = vrot.slane %v11294_v22, %v14913_v35  ;;  %v10853_v17 = vcombine.low %v21565_v20, %v9950_v23  ;;  %13399 = vmatprep.subr.bf16.mxu1 %v13703_v10 }
 0x764   : > { %v20022_v48 = vrot.slane %v12061_v13, %v21490_v6  ;;  %v20025_v60 = vrot.slane %v12956_v57, %v21490_v6  ;;  %v12077_v49 = vcombine.low %v11029_v43, %v11036_v30  ;;  %v12957_v34 = vcombine.high %v11029_v43, %v11036_v30  ;;  %13400 = vmatpush3.bf16.msra.mxu1 %v13703_v10 }
 0x765   : > { %v11243_v50 = vcombine.low %v19989_v27, %v11240_v37  ;;  %v11311_v46 = vcombine.low %v11292_v9, %v11308_v24  ;;  %v10854_v26 = vcombine.high %v21565_v20, %v9950_v23  ;;  %v10861_v39 = vrot.slane %v10853_v17, %v21490_v6 }
 0x766   : > { %v20031_v12 = vrot.slane %v12077_v49, %v21490_v6  ;;  %v20034_v7 = vrot.slane %v12957_v34, %v21490_v6  ;;  %v11074_v18 = vcombine.high %v19573_v59, %v19576_v1  ;;  %v11090_v52 = vcombine.high %v19579_v38, %v19582_v21 }
 0x767   : > { %v13586_v2 = vpack.i.bf16 %v11311_v46, %v11243_v50  ;;  %v10868_v3 = vrot.slane %v10854_v26, %v21490_v6  ;;  %v10869_v58 = vcombine.low %v19676_v53, %v10861_v39  ;;  %v10870_v22 = vcombine.high %v19676_v53, %v10861_v39 }
 0x768   : > { %v11088_v51 = vrot.slane %v11074_v18, %v14913_v35  ;;  %v11104_v23 = vrot.slane %v11090_v52, %v14913_v35  ;;  %v11142_v43 = vcombine.high %v19639_v61, %v19642_v45  ;;  %v11158_v59 = vcombine.high %v19645_v32, %v19648_v14 }
 0x769   : > { %13587 = vrot.lane.b32.xlu1 %v13586_v2, %s14239_s13  ;;  %v10877_v1 = vrot.slane %v10869_v58, %v14913_v35  ;;  %v10884_v38 = vrot.slane %v10870_v22, %v14913_v35  ;;  %v10885_v21 = vcombine.low %v19679_v11, %v10868_v3  ;;  %v10886_v53 = vcombine.high %v19679_v11, %v10868_v3 }
 0x76a   : > { %v11108_v30 = vcombine.high %v11088_v51, %v11104_v23  ;;  %v11156_v13 = vrot.slane %v11142_v43, %v14913_v35  ;;  %v11172_v61 = vrot.slane %v11158_v59, %v14913_v35  ;;  %v11244_v45 = vcombine.high %v19989_v27, %v11240_v37  ;;  %v13704_v27 = vld [vmem:[#allocation7 + $0x8] sm:$0xff]   ;;  %v21566_v43 = vld [vmem:[#allocation79_spill] sm:$0xff] }
 0x76b   : > { %v10893_v32 = vrot.slane %v10885_v21, %v14913_v35  ;;  %v10900_v14 = vrot.slane %v10886_v53, %v14913_v35  ;;  %v11925_v57 = vcombine.low %v10877_v1, %v10884_v38  ;;  %v12952_v20 = vcombine.high %v10877_v1, %v10884_v38  ;;  %13401 = vmatprep.subr.bf16.mxu1 %v13704_v27  ;;  %v21567_v1 = vld [vmem:[#allocation109_spill] sm:$0xff]  ;;  %v21568_v38 = vld [vmem:[#allocation102_spill] sm:$0xff] }
 0x76c   : > { %v11176_v17 = vcombine.high %v11156_v13, %v11172_v61  ;;  %v11312_v49 = vcombine.high %v11292_v9, %v11308_v24  ;;  %v11107_v34 = vcombine.low %v11088_v51, %v11104_v23  ;;  %v11175_v50 = vcombine.low %v11156_v13, %v11172_v61  ;;  %13402 = vmatpush3.bf16.msra.mxu1 %v13704_v27  ;;  %v21569_v13 = vld [vmem:[#allocation124_spill] sm:$0xff]  ;;  %v21570_v61 = vld [vmem:[#allocation122_spill] sm:$0xff] }
 0x76d   : > { %v20060_v11 = vrot.slane %v11925_v57, %v21490_v6  ;;  %v20063_v46 = vrot.slane %v12952_v20, %v21490_v6  ;;  %v11941_v26 = vcombine.low %v10893_v32, %v10900_v14  ;;  %v12953_v39 = vcombine.high %v10893_v32, %v10900_v14 }
 0x76e   : > { %v13606_v37 = vpack.i.bf16 %v11176_v17, %v11108_v30  ;;  %v13591_v18 = vpack.i.bf16 %v11312_v49, %v11244_v45  ;;  %v13601_v52 = vpack.i.bf16 %v11175_v50, %v11107_v34  ;;  %v11345_v10 = vcombine.low %v19720_v31, %v19723_v62 }
 0x76f   : > { %v20068_v2 = vrot.slane %v11941_v26, %v21490_v6  ;;  %v20071_v9 = vrot.slane %v12953_v39, %v21490_v6  ;;  %v11361_v24 = vcombine.low %v19726_v40, %v19729_v8  ;;  %v11413_v3 = vcombine.low %v19786_v33, %v19789_v36 }
 0x770   : > { %13607 = vrot.lane.b32.xlu0 %v13606_v37, %s14240_s3  ;;  %13592 = vrot.lane.b32.xlu1 %v13591_v18, %s14240_s3  ;;  %v20080_v58 = vrot.slane %v11345_v10, %v14913_v35  ;;  %v11429_v22 = vcombine.low %v19792_v16, %v19795_v19  ;;  %v11481_v6 = vcombine.low %v19708_v4, %v19711_v29 }
 0x771   : > { %v20087_v51 = vrot.slane %v11361_v24, %v14913_v35  ;;  %v20090_v23 = vrot.slane %v11413_v3, %v14913_v35  ;;  %v11497_v59 = vcombine.low %v21566_v43, %v19717_v63  ;;  %v11549_v21 = vcombine.low %v21568_v38, %v21567_v1 }
 0x772   : > { %v20097_v53 = vrot.slane %v11429_v22, %v14913_v35  ;;  %v20100_v30 = vrot.slane %v11481_v6, %v14913_v35  ;;  %v11565_v45 = vcombine.low %v21570_v61, %v21569_v13  ;;  %v11346_v32 = vcombine.high %v19720_v31, %v19723_v62  ;;  %v21571_v22 = vld [vmem:[#allocation123_spill] sm:$0xff] }
 0x773   : > { %v11378_v14 = vcombine.high %v20080_v58, %v20087_v51  ;;  %v20109_v57 = vrot.slane %v11497_v59, %v14913_v35  ;;  %v20112_v20 = vrot.slane %v11549_v21, %v14913_v35  ;;  %v11362_v17 = vcombine.high %v19726_v40, %v19729_v8  ;;  %v21573_v21 = vld [vmem:[#allocation52_spill] sm:$0xff] }
 0x774   : > { %13602 = vrot.lane.b32.xlu1 %v13601_v52, %s14239_s13  ;;  %v11446_v49 = vcombine.high %v20090_v23, %v20097_v53  ;;  %v20120_v34 = vrot.slane %v11565_v45, %v14913_v35  ;;  %v11360_v31 = vrot.slane %v11346_v32, %v14913_v35  ;;  %v11414_v62 = vcombine.high %v19786_v33, %v19789_v36 }
 0x775   : > { %v11514_v50 = vcombine.high %v20100_v30, %v20109_v57  ;;  %v11376_v26 = vrot.slane %v11362_v17, %v14913_v35  ;;  %v11430_v40 = vcombine.high %v19792_v16, %v19795_v19  ;;  %v11482_v8 = vcombine.high %v19708_v4, %v19711_v29 }
 0x776   : > { %v13626_v39 = vpack.i.bf16 %v11446_v49, %v11378_v14  ;;  %v11582_v27 = vcombine.high %v20112_v20, %v20120_v34  ;;  %v11428_v37 = vrot.slane %v11414_v62, %v14913_v35  ;;  %v11498_v33 = vcombine.high %v21566_v43, %v19717_v63  ;;  %v21574_v62 = vld [vmem:[#allocation119_spill] sm:$0xff] }
 0x777   : > { %v11379_v36 = vcombine.low %v11360_v31, %v11376_v26  ;;  %v11444_v18 = vrot.slane %v11430_v40, %v14913_v35  ;;  %v11496_v52 = vrot.slane %v11482_v8, %v14913_v35  ;;  %v11550_v16 = vcombine.high %v21568_v38, %v21567_v1  ;;  %v21572_v38 = vld [vmem:[#allocation27_spill] sm:$0xff]  ;;  %v21575_v40 = vld [vmem:[#allocation125_spill] sm:$0xff]  ;;  %v21576_v8 = vld [vmem:[#allocation24_spill] sm:$0xff] }
 0x778   : > { %13627 = vrot.lane.b32.xlu0 %v13626_v39, %s14238_s8  ;;  %v13611_v4 = vpack.i.bf16 %v11582_v27, %v11514_v50  ;;  %v11512_v29 = vrot.slane %v11498_v33, %v14913_v35  ;;  %v11566_v19 = vcombine.high %v21570_v61, %v21569_v13  ;;  %v11380_v10 = vcombine.high %v11360_v31, %v11376_v26  ;;  %v21577_v27 = vld [vmem:[#allocation107_spill] sm:$0xff] }
 0x779   : > { %v11447_v24 = vcombine.low %v11428_v37, %v11444_v18  ;;  %v11564_v63 = vrot.slane %v11550_v16, %v14913_v35  ;;  %v11448_v3 = vcombine.high %v11428_v37, %v11444_v18  ;;  %v11617_v6 = vcombine.low %v21571_v22, %v19839_v5  ;;  %v21578_v37 = vld [vmem:[#allocation26_spill] sm:$0xff] }
 0x77a   : > { %13612 = vrot.lane.b32.xlu1 %v13611_v4, %s14238_s8  ;;  %v11515_v43 = vcombine.low %v11496_v52, %v11512_v29  ;;  %v11580_v59 = vrot.slane %v11566_v19, %v14913_v35  ;;  %v11516_v1 = vcombine.high %v11496_v52, %v11512_v29  ;;  %v11633_v45 = vcombine.low %v21573_v21, %v21572_v38  ;;  %v21580_v18 = vld [vmem:[#allocation98_spill] sm:$0xff] }
 0x77b   : > { %v13631_v32 = vpack.i.bf16 %v11447_v24, %v11379_v36  ;;  %v13636_v14 = vpack.i.bf16 %v11448_v3, %v11380_v10  ;;  %v20153_v13 = vrot.slane %v11617_v6, %v14913_v35  ;;  %v11685_v61 = vcombine.low %v19876_v44, %v19879_v56  ;;  %v21579_v36 = vld [vmem:[#allocation99_spill] sm:$0xff]  ;;  %v21581_v3 = vld [vmem:[#allocation118_spill] sm:$0xff]  ;;  %v21582_v6 = vld [vmem:[#allocation100_spill] sm:$0xff] }
 0x77c   : > { %v11583_v17 = vcombine.low %v11564_v63, %v11580_v59  ;;  %v11584_v49 = vcombine.high %v11564_v63, %v11580_v59  ;;  %v20158_v31 = vrot.slane %v11633_v45, %v14913_v35  ;;  %v11701_v50 = vcombine.low %v21574_v62, %v19885_v55 }
 0x77d   : > { %13632 = vrot.lane.b32.xlu0 %v13631_v32, %s14239_s13  ;;  %v20164_v26 = vrot.slane %v11685_v61, %v14913_v35  ;;  %v11753_v39 = vcombine.low %v21576_v8, %v21575_v40  ;;  %v11769_v33 = vcombine.low %v21578_v37, %v21577_v27  ;;  %v11821_v52 = vcombine.low %v21580_v18, %v21579_v36 }
 0x77e   : > { %v13616_v16 = vpack.i.bf16 %v11583_v17, %v11515_v43  ;;  %v13621_v4 = vpack.i.bf16 %v11584_v49, %v11516_v1  ;;  %v11650_v29 = vcombine.high %v20153_v13, %v20158_v31  ;;  %v20175_v19 = vrot.slane %v11701_v50, %v14913_v35 }
 0x77f   : > { %v20178_v10 = vrot.slane %v11753_v39, %v14913_v35  ;;  %v20181_v24 = vrot.slane %v11769_v33, %v14913_v35  ;;  %v20184_v63 = vrot.slane %v11821_v52, %v14913_v35  ;;  %v11837_v59 = vcombine.low %v21582_v6, %v21581_v3 }
 0x780   : > { %13617 = vrot.lane.b32.xlu1 %v13616_v16, %s14239_s13  ;;  %v11718_v43 = vcombine.high %v20164_v26, %v20175_v19  ;;  %v11618_v1 = vcombine.high %v21571_v22, %v19839_v5  ;;  %v11634_v45 = vcombine.high %v21573_v21, %v21572_v38  ;;  %v11686_v32 = vcombine.high %v19876_v44, %v19879_v56 }
 0x781   : > { %13637 = vrot.lane.b32.xlu0 %v13636_v14, %s14240_s3  ;;  %v11786_v61 = vcombine.high %v20178_v10, %v20181_v24  ;;  %v20201_v17 = vrot.slane %v11837_v59, %v14913_v35  ;;  %v11702_v49 = vcombine.high %v21574_v62, %v19885_v55  ;;  %v11754_v5 = vcombine.high %v21576_v8, %v21575_v40 }
 0x782   : > { %v13656_v22 = vpack.i.bf16 %v11718_v43, %v11650_v29  ;;  %v11632_v38 = vrot.slane %v11618_v1, %v14913_v35  ;;  %v11648_v21 = vrot.slane %v11634_v45, %v14913_v35  ;;  %v11700_v44 = vrot.slane %v11686_v32, %v14913_v35 }
 0x783   : > { %v11854_v56 = vcombine.high %v20184_v63, %v20201_v17  ;;  %v11716_v14 = vrot.slane %v11702_v49, %v14913_v35  ;;  %v11768_v50 = vrot.slane %v11754_v5, %v14913_v35  ;;  %v11770_v55 = vcombine.high %v21578_v37, %v21577_v27 }
 0x784   : > { %13622 = vrot.lane.b32.xlu1 %v13621_v4, %s14240_s3  ;;  %v11651_v62 = vcombine.low %v11632_v38, %v11648_v21  ;;  %v11822_v40 = vcombine.high %v21580_v18, %v21579_v36  ;;  %v11838_v8 = vcombine.high %v21582_v6, %v21581_v3  ;;  %v11652_v39 = vcombine.high %v11632_v38, %v11648_v21 }
 0x785   : > { %13657 = vrot.lane.b32.xlu0 %v13656_v22, %s14238_s8  ;;  %v13641_v33 = vpack.i.bf16 %v11854_v56, %v11786_v61  ;;  %v11719_v52 = vcombine.low %v11700_v44, %v11716_v14  ;;  %v11784_v16 = vrot.slane %v11770_v55, %v14913_v35  ;;  %v11720_v29 = vcombine.high %v11700_v44, %v11716_v14 }
 0x786   : > { %v11836_v59 = vrot.slane %v11822_v40, %v14913_v35  ;;  %v11852_v27 = vrot.slane %v11838_v8, %v14913_v35  ;;  %v11889_v37 = vcombine.low %v19992_v41, %v19995_v28  ;;  %v11905_v36 = vcombine.low %v19998_v0, %v20001_v25 }
 0x787   : > { %v13661_v18 = vpack.i.bf16 %v11719_v52, %v11651_v62  ;;  %v11787_v4 = vcombine.low %v11768_v50, %v11784_v16  ;;  %v13666_v3 = vpack.i.bf16 %v11720_v29, %v11652_v39  ;;  %v11788_v6 = vcombine.high %v11768_v50, %v11784_v16 }
 0x788   : > { %13642 = vrot.lane.b32.xlu1 %v13641_v33, %s14238_s8  ;;  %v11855_v43 = vcombine.low %v11836_v59, %v11852_v27  ;;  %v11856_v1 = vcombine.high %v11836_v59, %v11852_v27  ;;  %v20231_v45 = vrot.slane %v11889_v37, %v14913_v35  ;;  %v20234_v32 = vrot.slane %v11905_v36, %v14913_v35 }
 0x789   : > { %13662 = vrot.lane.b32.xlu0 %v13661_v18, %s14239_s13  ;;  %v11957_v61 = vcombine.low %v20060_v11, %v20063_v46  ;;  %v11973_v49 = vcombine.low %v20068_v2, %v20071_v9  ;;  %v11890_v5 = vcombine.high %v19992_v41, %v19995_v28  ;;  %v11906_v22 = vcombine.high %v19998_v0, %v20001_v25 }
 0x78a   : > { %v13646_v38 = vpack.i.bf16 %v11855_v43, %v11787_v4  ;;  %v13651_v21 = vpack.i.bf16 %v11856_v1, %v11788_v6  ;;  %v11922_v44 = vcombine.high %v20231_v45, %v20234_v32  ;;  %v11958_v56 = vcombine.high %v20060_v11, %v20063_v46 }
 0x78b   : > { %v20250_v14 = vrot.slane %v11957_v61, %v14913_v35  ;;  %v20253_v50 = vrot.slane %v11973_v49, %v14913_v35  ;;  %v11904_v55 = vrot.slane %v11890_v5, %v14913_v35  ;;  %v11920_v41 = vrot.slane %v11906_v22, %v14913_v35  ;;  %v21583_v61 = vld [vmem:[#allocation110_spill] sm:$0xff]  ;;  %v21584_v49 = vld [vmem:[#allocation108_spill] sm:$0xff] }
 0x78c   : > { %13647 = vrot.lane.b32.xlu1 %v13646_v38, %s14239_s13  ;;  %v11972_v28 = vrot.slane %v11958_v56, %v14913_v35  ;;  %v11974_v0 = vcombine.high %v20068_v2, %v20071_v9  ;;  %v12025_v25 = vcombine.low %v19974_v54, %v19977_v15  ;;  %v12041_v11 = vcombine.low %v19980_v42, %v19983_v47 }
 0x78d   : > { %13667 = vrot.lane.b32.xlu0 %v13666_v3, %s14240_s3  ;;  %v11990_v46 = vcombine.high %v20250_v14, %v20253_v50  ;;  %v11923_v62 = vcombine.low %v11904_v55, %v11920_v41  ;;  %v12093_v40 = vcombine.low %v20022_v48, %v20025_v60  ;;  %v12109_v8 = vcombine.low %v20031_v12, %v20034_v7 }
 0x78e   : > { %v11988_v2 = vrot.slane %v11974_v0, %v14913_v35  ;;  %v20274_v9 = vrot.slane %v12025_v25, %v14913_v35  ;;  %v20277_v39 = vrot.slane %v12041_v11, %v14913_v35  ;;  %v11924_v33 = vcombine.high %v11904_v55, %v11920_v41 }
 0x78f   : > { %v13681_v52 = vpack.i.bf16 %v11990_v46, %v11922_v44  ;;  %v20280_v16 = vrot.slane %v12093_v40, %v14913_v35  ;;  %v20283_v29 = vrot.slane %v12109_v8, %v14913_v35  ;;  %v12026_v59 = vcombine.high %v19974_v54, %v19977_v15 }
 0x790   : > { %13652 = vrot.lane.b32.xlu1 %v13651_v21, %s14240_s3  ;;  %v11991_v27 = vcombine.low %v11972_v28, %v11988_v2  ;;  %v12058_v37 = vcombine.high %v20274_v9, %v20277_v39  ;;  %v11992_v36 = vcombine.high %v11972_v28, %v11988_v2  ;;  %v12042_v18 = vcombine.high %v19980_v42, %v19983_v47 }
 0x791   : > { %13682 = vrot.lane.b32.xlu0 %v13681_v52, %s14238_s8  ;;  %v12126_v4 = vcombine.high %v20280_v16, %v20283_v29  ;;  %v12040_v3 = vrot.slane %v12026_v59, %v14913_v35  ;;  %v12094_v54 = vcombine.high %v20022_v48, %v20025_v60  ;;  %v12110_v15 = vcombine.high %v20031_v12, %v20034_v7 }
 0x792   : > { %v13686_v6 = vpack.i.bf16 %v11991_v27, %v11923_v62  ;;  %v13691_v43 = vpack.i.bf16 %v11992_v36, %v11924_v33  ;;  %v12056_v1 = vrot.slane %v12042_v18, %v14913_v35  ;;  %v11309_v42 = vcombine.low %v21584_v49, %v21583_v61  ;;  %v21585_v18 = vld [vmem:[#allocation97_spill] sm:$0xff]  ;;  %v21589_v61 = vld [vmem:[#allocation87_spill] sm:$0xff]  ;;  %v21590_v49 = vld [vmem:[#allocation112_spill] sm:$0xff] }
 0x793   : > { %v13671_v47 = vpack.i.bf16 %v12126_v4, %v12058_v37  ;;  %v12108_v5 = vrot.slane %v12094_v54, %v14913_v35  ;;  %v12124_v22 = vrot.slane %v12110_v15, %v14913_v35  ;;  %v11377_v12 = vcombine.low %v20080_v58, %v20087_v51  ;;  %v21586_v4 = vld [vmem:[#allocation44_spill] sm:$0xff] }
 0x794   : > { %v12059_v38 = vcombine.low %v12040_v3, %v12056_v1  ;;  %v12060_v21 = vcombine.high %v12040_v3, %v12056_v1  ;;  %v11445_v7 = vcombine.low %v20090_v23, %v20097_v53  ;;  %v11581_v44 = vcombine.low %v20112_v20, %v20120_v34 }
 0x795   : > { %13687 = vrot.lane.b32.xlu0 %v13686_v6, %s14239_s13  ;;  %13672 = vrot.lane.b32.xlu1 %v13671_v47, %s14238_s8  ;;  %v12127_v48 = vcombine.low %v12108_v5, %v12124_v22  ;;  %v12128_v60 = vcombine.high %v12108_v5, %v12124_v22  ;;  %v11513_v35 = vcombine.low %v20100_v30, %v20109_v57  ;;  %v21587_v6 = vld [vmem:[#allocation113_spill] sm:$0xff] }
 0x796   : > { %v11649_v56 = vcombine.low %v20153_v13, %v20158_v31  ;;  %v11717_v28 = vcombine.low %v20164_v26, %v20175_v19  ;;  %v11853_v0 = vcombine.low %v20184_v63, %v20201_v17  ;;  %v11785_v25 = vcombine.low %v20178_v10, %v20181_v24 }
 0x797   : > { %v13676_v55 = vpack.i.bf16 %v12127_v48, %v12059_v38  ;;  %v13696_v41 = vpack.i.bf16 %v12128_v60, %v12060_v21  ;;  %v11921_v11 = vcombine.low %v20231_v45, %v20234_v32  ;;  %v11989_v46 = vcombine.low %v20250_v14, %v20253_v50 }
 0x798   : > { %v12125_v62 = vcombine.low %v20280_v16, %v20283_v29  ;;  %v12057_v40 = vcombine.low %v20274_v9, %v20277_v39  ;;  %v11241_v3 = vcombine.low %v21586_v4, %v21585_v18  ;;  %v11173_v47 = vcombine.low %v21590_v49, %v21589_v61  ;;  %v12958_v9 = vld [vmem:[%s20538_s4] ss:$0 sm:$0xff] }
 0x799   : > { %13692 = vrot.lane.b32.xlu0 %v13691_v43, %s14240_s3  ;;  %13677 = vrot.lane.b32.xlu1 %v13676_v55, %s14239_s13  ;;  %v21588_v43 = vld [vmem:[#allocation111_spill] sm:$0xff]  ;;  %s14109_s13 = scalar_lea.vmem %s20468_s5, 2048 }
 0x79a   : > { %v11105_v1 = vcombine.low %v21588_v43, %v21587_v6  ;;  %p14110_p6 = scmp.ne.s32.totalorder %s20468_s5, %s14109_s13 }
 0x79c   : > { %p14111_p0 = pnand %p14110_p6, %p14447_p3 }
 0x79d   : > { %13697 = vrot.lane.b32.xlu1 %v13696_v41, %s14240_s3  ;;  %s14241_s3 = smov [#allocation10]  }
 0x79e   : > { %p14112_p10 = pneg %p14111_p0  ;;  %s14113_s1 = sshll.u32 %s14241_s3, 4  ;;  %s14114_s1 = int_to_ptr.vmem [resolvable:$false] %s14113_s1 }
 0x79f   : > { %s14115_s7 = scalar_lea.vmem %s14114_s1, 4096  ;;  %p14116_p5 = scmp.lt.s32.totalorder %s20468_s5, %s14114_s1 }
 0x7a0   : > { %p14117_p7 = scmp.lt.s32.totalorder %s14115_s7, %s14109_s13 }
 0x7a2   : > { %p14118_p11 = por %p14117_p7, %p14116_p5 }
 0x7a4   : > { %p14119_p1 = pnand %p14118_p11, %p14112_p10 }
 0x7c7   : > { %v13583_v8 = vpop.permute.xlu1 %13582 }
 0x7c8   : > { %v13598_v33 = vpop.permute.xlu0 %13597  ;;  %v13585_v52 = vunpack.i.h.bf16 %v13583_v8  ;;  %v13584_v59 = vunpack.i.l.bf16 %v13583_v8 }
 0x7c9   : > { %v13600_v37 = vunpack.i.h.bf16 %v13598_v33  ;;  %v13599_v36 = vunpack.i.l.bf16 %v13598_v33 }
 0x7ca   : > { %v12324_v21 = vsel %vm7887_vm1, %v11309_v42, %v13585_v52  ;;  %v12323_v48 = vsel %vm7887_vm1, %v11241_v3, %v13584_v59 }
 0x7cb   : > { %v12322_v55 = vsel %vm7887_vm1, %v11173_v47, %v13600_v37  ;;  %v12321_v41 = vsel %vm7887_vm1, %v11105_v1, %v13599_v36 }
 0x7db   : > { %v13588_v2 = vpop.permute.xlu1 %13587 }
 0x7dc   : > { %v13590_v54 = vunpack.i.h.bf16 %v13588_v2  ;;  %v13589_v15 = vunpack.i.l.bf16 %v13588_v2 }
 0x7de   : > { %v12340_v33 = vsel %vm12337_vm3, %v12323_v48, %v13589_v15  ;;  %v12341_v18 = vsel %vm12337_vm3, %v12324_v21, %v13590_v54 }
 0x7e2   : > { %v13593_v27 = vpop.permute.xlu1 %13592  ;;  %v13608_v5 = vpop.permute.xlu0 %13607 }
 0x7e3   : > { %v13595_v22 = vunpack.i.h.bf16 %v13593_v27  ;;  %v13594_v38 = vunpack.i.l.bf16 %v13593_v27  ;;  %v13610_v4 = vunpack.i.h.bf16 %v13608_v5  ;;  %v13609_v6 = vunpack.i.l.bf16 %v13608_v5 }
 0x7e5   : > { %v12357_v27 = vsel %vm12354_vm4, %v12340_v33, %v13594_v38  ;;  %v12358_v42 = vsel %vm12354_vm4, %v12341_v18, %v13595_v22 }
 0x7e6   : > { %v13603_v60 = vpop.permute.xlu1 %13602  ;;  %v12372_v1 = vpack.c.bf16 %v12358_v42, %v12357_v27 }
 0x7e7   : > { %v13605_v8 = vunpack.i.h.bf16 %v13603_v60  ;;  %v13604_v2 = vunpack.i.l.bf16 %v13603_v60 }
 0x7e9   : > { %v12338_v52 = vsel %vm12337_vm3, %v12321_v41, %v13604_v2  ;;  %v12339_v59 = vsel %vm12337_vm3, %v12322_v55, %v13605_v8 }
 0x7ea   : > { %v13628_v3 = vpop.permute.xlu0 %13627  ;;  %v12355_v37 = vsel %vm12354_vm4, %v12338_v52, %v13609_v6  ;;  %v12356_v36 = vsel %vm12354_vm4, %v12339_v59, %v13610_v4 }
 0x7eb   : > { %v12371_v43 = vpack.c.bf16 %v12356_v36, %v12355_v37  ;;  %v13630_v54 = vunpack.i.h.bf16 %v13628_v3  ;;  %v13629_v61 = vunpack.i.l.bf16 %v13628_v3 }
 0x7ec   : > { %v13613_v15 = vpop.permute.xlu1 %13612 }
 0x7ed   : > { %13403 = vmatprep.mubr.msk.bf16.mxu1 %vm349_vm0, %v12371_v43  ;;  %v13615_v22 = vunpack.i.h.bf16 %v13613_v15  ;;  %v12326_v21 = vsel %vm7887_vm1, %v11445_v7, %v13630_v54  ;;  %v12325_v48 = vsel %vm7887_vm1, %v11377_v12, %v13629_v61  ;;  %v13614_v60 = vunpack.i.l.bf16 %v13613_v15 }
 0x7ee   : > { %13404 = vmatmul.mubr.msk.bf16.vlgmr.msra.gmra.mrb[56].mxu1 %vm349_vm0, %v12372_v1 }
 0x7ef   : > { %v13633_v49 = vpop.permute.xlu0 %13632  ;;  %v12328_v23 = vsel %vm7887_vm1, %v11581_v44, %v13615_v22  ;;  %v12327_v12 = vsel %vm7887_vm1, %v11513_v35, %v13614_v60 }
 0x7f0   : > { %v13635_v47 = vunpack.i.h.bf16 %v13633_v49  ;;  %v13634_v5 = vunpack.i.l.bf16 %v13633_v49 }
 0x7f2   : > { %v13618_v38 = vpop.permute.xlu1 %13617  ;;  %v12342_v18 = vsel %vm12337_vm3, %v12325_v48, %v13634_v5  ;;  %v12343_v4 = vsel %vm12337_vm3, %v12326_v21, %v13635_v47 }
 0x7f3   : > { %v13638_v55 = vpop.permute.xlu0 %13637  ;;  %v13620_v41 = vunpack.i.h.bf16 %v13618_v38  ;;  %v13619_v8 = vunpack.i.l.bf16 %v13618_v38 }
 0x7f4   : > { %v13640_v2 = vunpack.i.h.bf16 %v13638_v55  ;;  %v13639_v33 = vunpack.i.l.bf16 %v13638_v55 }
 0x7f5   : > { %v12344_v52 = vsel %vm12337_vm3, %v12327_v12, %v13619_v8  ;;  %v12345_v20 = vsel %vm12337_vm3, %v12328_v23, %v13620_v41 }
 0x7f6   : > { %v12359_v53 = vsel %vm12354_vm4, %v12342_v18, %v13639_v33  ;;  %v12360_v58 = vsel %vm12354_vm4, %v12343_v4, %v13640_v2  ;;  %v13623_v51 = vpop.permute.xlu1 %13622 }
 0x7f7   : > { %v12373_v7 = vpack.c.bf16 %v12360_v58, %v12359_v53  ;;  %v13625_v6 = vunpack.i.h.bf16 %v13623_v51  ;;  %v13624_v27 = vunpack.i.l.bf16 %v13623_v51  ;;  %v13658_v42 = vpop.permute.xlu0 %13657 }
 0x7f8   : > { %v13660_v37 = vunpack.i.h.bf16 %v13658_v42  ;;  %v13659_v30 = vunpack.i.l.bf16 %v13658_v42 }
 0x7f9   : > { %v12361_v34 = vsel %vm12354_vm4, %v12344_v52, %v13624_v27  ;;  %v12362_v44 = vsel %vm12354_vm4, %v12345_v20, %v13625_v6  ;;  %13407 = vmatprep.mubr.msk.bf16.mxu1 %vm349_vm0, %v12373_v7 }
 0x7fa   : > { %v12374_v59 = vpack.c.bf16 %v12362_v44, %v12361_v34  ;;  %v13643_v3 = vpop.permute.xlu1 %13642  ;;  %v12330_v15 = vsel %vm7887_vm1, %v11717_v28, %v13660_v37  ;;  %v12329_v54 = vsel %vm7887_vm1, %v11649_v56, %v13659_v30 }
 0x7fb   : > { %v13663_v57 = vpop.permute.xlu0 %13662  ;;  %v13645_v43 = vunpack.i.h.bf16 %v13643_v3  ;;  %v13644_v61 = vunpack.i.l.bf16 %v13643_v3 }
 0x7fc   : > { %13408 = vmatmul.mubr.msk.bf16.gmra.mrb[60].mxu1 %vm349_vm0, %v12374_v59  ;;  %v13665_v35 = vunpack.i.h.bf16 %v13663_v57  ;;  %v13664_v36 = vunpack.i.l.bf16 %v13663_v57 }
 0x7fd   : > { %v12332_v26 = vsel %vm7887_vm1, %v11853_v0, %v13645_v43  ;;  %v12331_v56 = vsel %vm7887_vm1, %v11785_v25, %v13644_v61 }
 0x7fe   : > { %v13648_v1 = vpop.permute.xlu1 %13647  ;;  %v12346_v21 = vsel %vm12337_vm3, %v12329_v54, %v13664_v36  ;;  %v12347_v48 = vsel %vm12337_vm3, %v12330_v15, %v13665_v35 }
 0x7ff   : > { %v13668_v49 = vpop.permute.xlu0 %13667  ;;  %v13650_v47 = vunpack.i.h.bf16 %v13648_v1  ;;  %v13649_v5 = vunpack.i.l.bf16 %v13648_v1 }
 0x800   : > { %v13670_v22 = vunpack.i.h.bf16 %v13668_v49  ;;  %v13669_v38 = vunpack.i.l.bf16 %v13668_v49 }
 0x801   : > { %v12348_v8 = vsel %vm12337_vm3, %v12331_v56, %v13649_v5  ;;  %v12349_v63 = vsel %vm12337_vm3, %v12332_v26, %v13650_v47 }
 0x802   : > { %v12363_v19 = vsel %vm12354_vm4, %v12346_v21, %v13669_v38  ;;  %v12364_v13 = vsel %vm12354_vm4, %v12347_v48, %v13670_v22  ;;  %v13653_v31 = vpop.permute.xlu1 %13652 }
 0x803   : > { %v12375_v28 = vpack.c.bf16 %v12364_v13, %v12363_v19  ;;  %v13655_v60 = vunpack.i.h.bf16 %v13653_v31  ;;  %v13654_v55 = vunpack.i.l.bf16 %v13653_v31  ;;  %v13683_v41 = vpop.permute.xlu0 %13682 }
 0x804   : > { %v13685_v33 = vunpack.i.h.bf16 %v13683_v41  ;;  %v13684_v18 = vunpack.i.l.bf16 %v13683_v41 }
 0x805   : > { %v12365_v17 = vsel %vm12354_vm4, %v12348_v8, %v13654_v55  ;;  %v12366_v0 = vsel %vm12354_vm4, %v12349_v63, %v13655_v60  ;;  %13411 = vmatprep.mubr.msk.bf16.mxu1 %vm349_vm0, %v12375_v28 }
 0x806   : > { %v12376_v2 = vpack.c.bf16 %v12366_v0, %v12365_v17  ;;  %v12334_v23 = vsel %vm7887_vm1, %v11989_v46, %v13685_v33  ;;  %v12333_v53 = vsel %vm7887_vm1, %v11921_v11, %v13684_v18 }
 0x807   : > { %v13673_v10 = vpop.permute.xlu1 %13672  ;;  %v13688_v24 = vpop.permute.xlu0 %13687 }
 0x808   : > { %13412 = vmatmul.mubr.msk.bf16.gmra.mrb[64].mxu1 %vm349_vm0, %v12376_v2  ;;  %v13690_v25 = vunpack.i.h.bf16 %v13688_v24  ;;  %v13689_v4 = vunpack.i.l.bf16 %v13688_v24  ;;  %v13675_v12 = vunpack.i.h.bf16 %v13673_v10  ;;  %v13674_v7 = vunpack.i.l.bf16 %v13673_v10 }
 0x80a   : > { %v12350_v42 = vsel %vm12337_vm3, %v12333_v53, %v13689_v4  ;;  %v12351_v52 = vsel %vm12337_vm3, %v12334_v23, %v13690_v25  ;;  %v12336_v32 = vsel %vm7887_vm1, %v12125_v62, %v13675_v12  ;;  %v12335_v11 = vsel %vm7887_vm1, %v12057_v40, %v13674_v7 }
 0x80b   : > { %v13678_v58 = vpop.permute.xlu1 %13677  ;;  %v13693_v51 = vpop.permute.xlu0 %13692 }
 0x80c   : > { %v13695_v6 = vunpack.i.h.bf16 %v13693_v51  ;;  %v13694_v27 = vunpack.i.l.bf16 %v13693_v51  ;;  %v13680_v20 = vunpack.i.h.bf16 %v13678_v58  ;;  %v13679_v34 = vunpack.i.l.bf16 %v13678_v58 }
 0x80e   : > { %v12367_v14 = vsel %vm12354_vm4, %v12350_v42, %v13694_v27  ;;  %v12368_v50 = vsel %vm12354_vm4, %v12351_v52, %v13695_v6  ;;  %v12352_v3 = vsel %vm12337_vm3, %v12335_v11, %v13679_v34  ;;  %v12353_v37 = vsel %vm12337_vm3, %v12336_v32, %v13680_v20 }
 0x80f   : > { %v12377_v46 = vpack.c.bf16 %v12368_v50, %v12367_v14  ;;  %v13698_v45 = vpop.permute.xlu1 %13697 }
 0x810   : > { %v13700_v44 = vunpack.i.h.bf16 %v13698_v45  ;;  %v13699_v59 = vunpack.i.l.bf16 %v13698_v45 }
 0x811   : > { %13415 = vmatprep.mubr.msk.bf16.mxu1 %vm349_vm0, %v12377_v46 }
 0x812   : > { %v12369_v30 = vsel %vm12354_vm4, %v12352_v3, %v13699_v59  ;;  %v12370_v16 = vsel %vm12354_vm4, %v12353_v37, %v13700_v44 }
 0x813   : > { %v12378_v29 = vpack.c.bf16 %v12370_v16, %v12369_v30 }
 0x815   : > { %13416 = vmatmul.mubr.msk.bf16.gmra.mrb[68].mxu1 %vm349_vm0, %v12378_v29 }
 0x8c1   : > { %v13405_v39 = vpop.f32.mrb[56].mxu1 }
 0x8c2   : > { %v12469_v62 = vadd.f32 %v13405_v39, %v12958_v9  ;;  %v12460_v40 = vpop.f32.mrb[57].mxu1 }
 0x8c3   : > { %v12461_v57 = vadd.f32 %v12958_v9, %v12460_v40  ;;  %v13406_v35 = vpop.f32.mrb[58].mxu1 }
 0x8c4   : > { %12527 = vst.msk [vmem:[%s20437_s9 + $0x20] sm:$0xff] %vm349_vm0, %v12469_v62  ;;  %v12472_v36 = vadd.f32 %v13406_v35, %v12958_v9  ;;  %v12463_v43 = vpop.f32.mrb[59].mxu1 }
 0x8c5   : > { %12523 = vst.msk [vmem:[%s20437_s9] sm:$0xff] %vm349_vm0, %v12461_v57  ;;  %v12464_v1 = vadd.f32 %v12958_v9, %v12463_v43 }
 0x8c6   : > { %12529 = vst.msk [vmem:[%s20437_s9 + $0x30] sm:$0xff] %vm349_vm0, %v12472_v36 }
 0x8c7   : > { %12525 = vst.msk [vmem:[%s20437_s9 + $0x10] sm:$0xff] %vm349_vm0, %v12464_v1 }
 0x8cf   : > { %v13409_v15 = vpop.f32.mrb[60].mxu1 }
 0x8d0   : > { %v12485_v54 = vadd.f32 %v13409_v15, %v12958_v9  ;;  %v12476_v61 = vpop.f32.mrb[61].mxu1 }
 0x8d1   : > { %v12477_v49 = vadd.f32 %v12958_v9, %v12476_v61  ;;  %v13410_v47 = vpop.f32.mrb[62].mxu1 }
 0x8d2   : > { %12535 = vst.msk [vmem:[%s20437_s9 + $0x60] sm:$0xff] %vm349_vm0, %v12485_v54  ;;  %v12488_v5 = vadd.f32 %v13410_v47, %v12958_v9  ;;  %v12479_v22 = vpop.f32.mrb[63].mxu1 }
 0x8d3   : > { %12531 = vst.msk [vmem:[%s20437_s9 + $0x40] sm:$0xff] %vm349_vm0, %v12477_v49  ;;  %v12480_v38 = vadd.f32 %v12958_v9, %v12479_v22 }
 0x8d4   : > { %12537 = vst.msk [vmem:[%s20437_s9 + $0x70] sm:$0xff] %vm349_vm0, %v12488_v5 }
 0x8d5   : > { %12533 = vst.msk [vmem:[%s20437_s9 + $0x50] sm:$0xff] %vm349_vm0, %v12480_v38 }
 0x8db   : > { %v13413_v21 = vpop.f32.mrb[64].mxu1 }
 0x8dc   : > { %v12501_v48 = vadd.f32 %v13413_v21, %v12958_v9  ;;  %v12492_v26 = vpop.f32.mrb[65].mxu1 }
 0x8dd   : > { %v12493_v19 = vadd.f32 %v12958_v9, %v12492_v26  ;;  %v13414_v13 = vpop.f32.mrb[66].mxu1 }
 0x8de   : > { %12528 = vst.msk [vmem:[%s20437_s9 + $0x28] sm:$0xff] %vm349_vm0, %v12501_v48  ;;  %v12504_v31 = vadd.f32 %v13414_v13, %v12958_v9  ;;  %v12495_v56 = vpop.f32.mrb[67].mxu1 }
 0x8df   : > { %12524 = vst.msk [vmem:[%s20437_s9 + $0x8] sm:$0xff] %vm349_vm0, %v12493_v19  ;;  %v12496_v28 = vadd.f32 %v12958_v9, %v12495_v56 }
 0x8e0   : > { %12530 = vst.msk [vmem:[%s20437_s9 + $0x38] sm:$0xff] %vm349_vm0, %v12504_v31 }
 0x8e1   : > { %12526 = vst.msk [vmem:[%s20437_s9 + $0x18] sm:$0xff] %vm349_vm0, %v12496_v28 }
 0x8e8   : > { %v13417_v60 = vpop.f32.mrb[68].mxu1 }
 0x8e9   : > { %v12517_v55 = vadd.f32 %v13417_v60, %v12958_v9  ;;  %v12508_v41 = vpop.f32.mrb[69].mxu1 }
 0x8ea   : > { %v12509_v8 = vadd.f32 %v12958_v9, %v12508_v41  ;;  %v13418_v63 = vpop.f32.mrb[70].mxu1 }
 0x8eb   : > { %12536 = vst.msk [vmem:[%s20437_s9 + $0x68] sm:$0xff] %vm349_vm0, %v12517_v55  ;;  %v12520_v17 = vadd.f32 %v13418_v63, %v12958_v9  ;;  %v12511_v0 = vpop.f32.mrb[71].mxu1 }
 0x8ec   : > { %12532 = vst.msk [vmem:[%s20437_s9 + $0x48] sm:$0xff] %vm349_vm0, %v12509_v8  ;;  %v12512_v2 = vadd.f32 %v12958_v9, %v12511_v0 }
 0x8ed   : > { %12538 = vst.msk [vmem:[%s20437_s9 + $0x78] sm:$0xff] %vm349_vm0, %v12520_v17 }
 0x8ee   : > { %12534 = vst.msk [vmem:[%s20437_s9 + $0x58] sm:$0xff] %vm349_vm0, %v12512_v2 }
 0x8ef   : > { %14122 = shalt.err (!%p14119_p1)
}
 0x8f0   : > { %s14123_s9 = scalar_lea.hbm %s20475_s17, 2048  ;;  %s14127_s20 = scalar_lea.hbm %s21593_s15, 8192 }
 0x8f1   : > { %p14124_p2 = scmp.ne.s32.totalorder %s20475_s17, %s14123_s9  ;;  %p14128_p13 = scmp.lt.u32.totalorder %s20475_s17, %s21593_s15 }
 0x8f2   : > { %p14129_p4 = scmp.lt.u32.totalorder %s14127_s20, %s14123_s9  ;;  %p14131_p6 = scmp.lt.u32.totalorder %s14123_s9, %s20475_s17 }
 0x8f3   : > { %p14125_p8 = pnand %p14124_p2, %p14447_p3 }
 0x8f4   : > { %p14130_p9 = por %p14129_p4, %p14128_p13 }
 0x8f5   : > { %p14126_p12 = pneg %p14125_p8 }
 0x8f6   : > { %p14132_p0 = por %p14131_p6, %p14130_p9 }
 0x8f8   : > { %p14133_p10 = pnand %p14132_p0, %p14126_p12 }
 0x8fa   : > { %14136 = shalt.err (!%p14133_p10)
}
 0x8fb   : > { %s14242_s10 = smov 128  }
 0x8fc   : > { %13465 = dma.vmem_to_hbm [thread:$0]  (%p14447_p3), %s20468_s5, 2048, %s20475_s17, %s12540_s19, %s14242_s10, %s14242_s10, %s14238_s8  }
 0x8fd PF: > { %s21594_s12 = sld [smem:[#allocation15_spill]]  ;;  %s21595_s30 = sld [smem:[#allocation18_spill]] }
 0x8fe   : > { %p13492_p5 = scmp.ge.s32.totalorder %s14215_s28, 2 }
 0x903   : > { %s12570_s13 = sand.u32 1, %s21594_s12   ;;  %p21596_p7 = scmp.ne.s32.totalorder %s21595_s30, 0 }
 0x904   : > { %s12571_s3 = scalar_lea.sflag [#allocation4], %s12570_s13 }
 0x905   : > { %p13482_p11 = pnand %p13492_p5, %p21596_p7 }
 0x907   : > { %14182 = dma.done.wait (!%p13482_p11), %s12571_s3, 2048  }
 0x908   : > { %14184 = vsyncadd (!%p13482_p11), %s12571_s3, 4294965248  ;;  %s24_s28 = sadd.s32 1, %s14215_s28   ;;  %s21597_s16 = smov %s21610_s21 }
 0x909   : > { %p21_p1 = scmp.ge.s32.totalorder %s24_s28, 6   ;;  %s21598_s21 = smov %s14191_s22 }
 0x90a   : > { %s21599_s22 = smov %s14195_s23  ;;  %s21600_s23 = smov %s14464_s29 }
 0x90b   : > { %s21601_s24 = smov %s14207_s26  ;;  %s21602_s25 = smov %s14211_s27 }
 0x90c   : > { %s21603_s26 = smov %s21606_s6  ;;  %s21604_s27 = smov %s21597_s16 }
 0x90d   :  { %23 = sbr.rel (!%p21_p1) target bundleno = 14 (0xe), region = 101 }
 0x914   :  { %12576 = vsyncpa [#allocation3], 1 }
 0x915   :  { %12578 = vsyncpa [#allocation3 + $0x1], 1 }
 0x916   :  { %12579 = vsyncpa [#allocation6], 1 }
 0x917   :  { %12580 = vsyncpa [#allocation9], 1 }
 0x918   :  { %12581 = vsyncpa [#allocation4], 1 }
 0x919   :  { %12583 = vsyncpa [#allocation4 + $0x1], 1 }

</bundles_post_ra>
